<compile_context>
chip_gen: v7x
topology: tpu7x:2x2x1
jax: 0.10.0
libtpu: 0.0.40
codegen_flags: <defaults>
</compile_context>

<pallas_src>
import jax
import jax.numpy as jnp
from jax import lax
from jax.experimental import pallas as pl
from jax.experimental.pallas import tpu as pltpu

# ----- model hyper-params (mirror PyTorch CNN.__init__) -----
F1 = 8
D = 2
F2 = F1 * D            # 16
F3 = F2                # 16
SAMPLE_RATE = 32
K3 = SAMPLE_RATE // 4  # 8
N_ELECTRODES = 22      # conv2 kernel height (input H must be 22)
BN_EPS = 1e-5
MAX_BATCH_TILE = 128   # per-step VMEM footprint is ~20 KiB/sample -> 128 is safe
                       # on v5e/v6e/v7x and keeps grid >= 2 (2 TCs) for B > 128


def _elu(v):
    return jnp.where(v > 0, v, jnp.exp(jnp.minimum(v, 0.0)) - 1.0)


# --------------------------------------------------------------------------
# Kernel: three lane-dense matmuls, two ELUs, three bias adds.  No reshapes,
# slices (beyond static bias-row slicing), concats or strided gathers.
# --------------------------------------------------------------------------
def cnn_kernel(x_ref, w1_ref, w2_ref, wfc_ref, bias_ref, out_ref):
    n1 = w1_ref.shape[1]          # w1len * F2
    n2 = w2_ref.shape[1]          # w3len * F3
    nout = out_ref.shape[1]

    # conv1 + BN1 + conv2 + BN2 (window structure baked into w1_ref)
    h2 = jnp.dot(x_ref[...], w1_ref[...], preferred_element_type=jnp.float32)
    h2 = _elu(h2 + bias_ref[0:1, :n1])                        # (bt, n1) f32

    # AvgPool(1,2) + conv3(1x8) + conv3(1x1) + BN3 (all baked into w2_ref)
    h3 = jnp.dot(h2.astype(w2_ref.dtype), w2_ref[...],
                 preferred_element_type=jnp.float32)
    h3 = _elu(h3 + bias_ref[1:2, :n2])                        # (bt, n2) f32

    # AvgPool(1,4) + flatten order + fc (baked into wfc_ref), kept in f32
    out = jnp.dot(h3, wfc_ref[...], preferred_element_type=jnp.float32)
    out_ref[...] = out + bias_ref[2:3, :nout]


# --------------------------------------------------------------------------
# Glue: fold BN + pools + window structure into three dense weights.
# --------------------------------------------------------------------------
def fold_bn(gamma, beta, mean, var, eps=BN_EPS):
    scale = gamma / jnp.sqrt(var + eps)
    return scale.astype(jnp.float32), (beta - mean * scale).astype(jnp.float32)


def build_fused_weights(params, T, output_size):
    (w1, g1, be1, m1, v1,
     w2, g2, be2, m2, v2,
     w3a, w3b, g3, be3, m3, v3,
     wfc, bfc) = params

    H = N_ELECTRODES
    K1 = SAMPLE_RATE
    w1len = T - K1 + 1
    w2len = w1len // 2
    w3len = w2len - K3 + 1
    w4len = w3len // 4

    hp = lax.Precision.HIGHEST
    s1, c1 = fold_bn(g1, be1, m1, v1)
    s2, c2 = fold_bn(g2, be2, m2, v2)
    s3, c3 = fold_bn(g3, be3, m3, v3)

    # conv1 + BN1 + conv2 + BN2 -> W12[(k,e), f2], b12[f2]
    w12 = jnp.einsum('oih,ik->ohk', w2, w1 * s1[:, None], precision=hp)  # (F2,22,32)
    w12 = w12 * s2[:, None, None]
    w12_2d = jnp.transpose(w12, (2, 1, 0)).reshape(K1 * H, F2)           # row = k*22+e
    b12 = s2 * jnp.einsum('oi,i->o', w2.sum(axis=2), c1, precision=hp) + c2

    # AvgPool(1,2) + conv3(1x8) + conv3(1x1) + BN3 -> stride-2, length-16 taps
    w3f = jnp.einsum('fg,gck->fck', w3b, w3a, precision=hp) * s3[:, None, None]  # (F3,F2,8)
    w3s = 0.5 * jnp.repeat(w3f, 2, axis=2)                               # (F3,F2,16), j = 2k+r
    w3s_2d = jnp.transpose(w3s, (2, 1, 0)).reshape(2 * K3 * F2, F3)      # row = j*16+c

    # ---- stage-1 banded weight: (T*22, w1len*F2) ----
    t_idx = jnp.arange(w1len)
    r1 = jnp.arange(K1 * H)
    blk1 = jnp.zeros((w1len, T * H, F2), jnp.float32)
    blk1 = blk1.at[t_idx[:, None], t_idx[:, None] * H + r1[None, :], :].set(w12_2d[None])
    w1big = blk1.transpose(1, 0, 2).reshape(T * H, w1len * F2)

    # ---- stage-2 banded weight: (w1len*F2, w3len*F3), stride-2 band (pool2 folded) ----
    u_idx = jnp.arange(w3len)
    r2 = jnp.arange(2 * K3 * F2)
    blk2 = jnp.zeros((w3len, w1len * F2, F3), jnp.float32)
    blk2 = blk2.at[u_idx[:, None], u_idx[:, None] * (2 * F2) + r2[None, :], :].set(w3s_2d[None])
    w2big = blk2.transpose(1, 0, 2).reshape(w1len * F2, w3len * F3)

    # ---- fc weight with AvgPool(1,4) + flatten order folded: (w3len*F3, nout) ----
    wfc_vfo = jnp.transpose(wfc.reshape(output_size, F3, w4len), (2, 1, 0))  # (v,f,o)
    wfc_rep = 0.25 * jnp.repeat(wfc_vfo, 4, axis=0)                          # (4*w4len,f,o)
    wfcbig = jnp.zeros((w3len, F3, output_size), jnp.float32)
    wfcbig = wfcbig.at[:4 * w4len].set(wfc_rep)
    wfcbig = wfcbig.reshape(w3len * F3, output_size)

    # ---- three bias rows packed into one small array ----
    n1 = w1len * F2
    n2 = w3len * F3
    pw = max(n1, n2, output_size)
    bias_pack = jnp.zeros((3, pw), jnp.float32)
    bias_pack = bias_pack.at[0, :n1].set(jnp.tile(b12, w1len))
    bias_pack = bias_pack.at[1, :n2].set(jnp.tile(c3, w3len))
    bias_pack = bias_pack.at[2, :output_size].set(bfc.astype(jnp.float32))

    return (w1big.astype(jnp.bfloat16), w2big.astype(jnp.bfloat16),
            wfcbig, bias_pack)


def cnn_forward_pallas(x, params, output_size):
    """x: (B, 22, T) float32 — the PyTorch (B, 1, 22, T) input with unit dim squeezed."""
    B, H, T = x.shape
    assert H == N_ELECTRODES

    w1big, w2big, wfcbig, bias_pack = build_fused_weights(params, T, output_size)
    n1, n2 = w1big.shape[1], w2big.shape[1]

    # ---- batch tiling: bt = min(B, cap), cdiv grid, zero-padded tail ----
    bt = min(B, MAX_BATCH_TILE)
    n_steps = pl.cdiv(B, bt)
    B_pad = n_steps * bt

    xa = jnp.transpose(x, (0, 2, 1)).reshape(B, T * H).astype(jnp.bfloat16)
    if B_pad != B:
        xa = jnp.concatenate([xa, jnp.zeros((B_pad - B, T * H), xa.dtype)], axis=0)

    # scoped-VMEM budget: double-buffered operands + live intermediates + headroom
    operand_bytes = (w1big.size * 2 + w2big.size * 2 + wfcbig.size * 4
                     + bias_pack.size * 4 + bt * T * H * 2 + bt * 128 * 4)
    inter_bytes = bt * (n1 + n2) * 4
    vmem_limit = int(max(2 * operand_bytes + 3 * inter_bytes + (4 << 20), 32 << 20))

    grid_spec = pltpu.PrefetchScalarGridSpec(
        num_scalar_prefetch=0,
        grid=(n_steps,),
        in_specs=[
            pl.BlockSpec((bt, T * H), lambda i: (i, 0)),        # per-step batch tile
            pl.BlockSpec(w1big.shape, lambda i: (0, 0)),        # constants (fetched once)
            pl.BlockSpec(w2big.shape, lambda i: (0, 0)),
            pl.BlockSpec(wfcbig.shape, lambda i: (0, 0)),
            pl.BlockSpec(bias_pack.shape, lambda i: (0, 0)),
        ],
        out_specs=pl.BlockSpec((bt, output_size), lambda i: (i, 0)),
    )
    out = pl.pallas_call(
        cnn_kernel,
        out_shape=jax.ShapeDtypeStruct((B_pad, output_size), jnp.float32),
        grid_spec=grid_spec,
        compiler_params=pltpu.CompilerParams(
            dimension_semantics=("parallel",),
            vmem_limit_bytes=vmem_limit),
    )(xa, w1big, w2big, wfcbig, bias_pack)
    return out[:B]


# --------------------------------------------------------------------------
# Pure-JAX reference (eval-mode semantics of the PyTorch module).
# --------------------------------------------------------------------------
def cnn_forward_ref(x, params, output_size):
    (w1, g1, be1, m1, v1,
     w2, g2, be2, m2, v2,
     w3a, w3b, g3, be3, m3, v3,
     wfc, bfc) = params
    hp = lax.Precision.HIGHEST
    dn = ('NCHW', 'OIHW', 'NCHW')
    B = x.shape[0]

    def bn(y, g, be, m, v):
        shp = (1, -1, 1, 1)
        return ((y - m.reshape(shp)) / jnp.sqrt(v.reshape(shp) + BN_EPS)
                * g.reshape(shp) + be.reshape(shp))

    y = x[:, None, :, :].astype(jnp.float32)                       # (B,1,22,T)
    y = lax.conv_general_dilated(y, w1[:, None, None, :], (1, 1), 'VALID',
                                 dimension_numbers=dn, precision=hp)
    y = bn(y, g1, be1, m1, v1)
    y = lax.conv_general_dilated(y, w2[:, :, :, None], (1, 1), 'VALID',
                                 dimension_numbers=dn, precision=hp)
    y = bn(y, g2, be2, m2, v2)
    y = _elu(y)
    w1len = y.shape[-1]
    w2len = w1len // 2
    y = y[..., :2 * w2len].reshape(B, F2, 1, w2len, 2).mean(-1)
    y = lax.conv_general_dilated(y, w3a[:, :, None, :], (1, 1), 'VALID',
                                 dimension_numbers=dn, precision=hp)
    y = lax.conv_general_dilated(y, w3b[:, :, None, None], (1, 1), 'VALID',
                                 dimension_numbers=dn, precision=hp)
    y = bn(y, g3, be3, m3, v3)
    y = _elu(y)
    w3len = y.shape[-1]
    w4len = w3len // 4
    y = y[..., :4 * w4len].reshape(B, F3, 1, w4len, 4).mean(-1)
    y = y.reshape(B, -1)
    return jnp.dot(y, wfc.T, precision=hp) + bfc


def make_params(key, T, output_size):
    w1len = T - SAMPLE_RATE + 1
    w3len = w1len // 2 - K3 + 1
    w4len = w3len // 4

    ks = jax.random.split(key, 6)
    w1 = jax.random.normal(ks[0], (F1, SAMPLE_RATE), jnp.float32) * 0.1
    w2 = jax.random.normal(ks[1], (F2, F1, N_ELECTRODES), jnp.float32) * 0.1
    w3a = jax.random.normal(ks[2], (F3, F2, K3), jnp.float32) * 0.1
    w3b = jax.random.normal(ks[3], (F3, F3), jnp.float32) * 0.1
    wfc = jax.random.normal(ks[4], (output_size, F3 * w4len), jnp.float32) * 0.1
    bfc = jax.random.normal(ks[5], (output_size,), jnp.float32) * 0.1

    # BatchNorm in eval mode with deterministic, non-trivial affine & running stats.
    def bn_params(n, a, b, c, d):
        idx = jnp.arange(n, dtype=jnp.float32)
        return 1.0 + a * idx, b * idx, c * idx, 0.5 + d * idx

    g1, be1, m1, v1 = bn_params(F1, 0.01, 0.02, 0.005, 0.03)
    g2, be2, m2, v2 = bn_params(F2, 0.01, -0.01, -0.004, 0.02)
    g3, be3, m3, v3 = bn_params(F3, -0.005, 0.015, 0.006, 0.025)

    return (w1, g1, be1, m1, v1,
            w2, g2, be2, m2, v2,
            w3a, w3b, g3, be3, m3, v3,
            wfc, bfc)


if __name__ == "__main__":
    B = 2
    T = 95               # input_size = (22, 95) -> w1=64, w2=32, w3=25, w4=6
    output_size = 4

    key = jax.random.PRNGKey(0)
    k_x, k_p = jax.random.split(key)
    x = jax.random.normal(k_x, (B, N_ELECTRODES, T), jnp.float32)
    params = make_params(k_p, T, output_size)

    out = cnn_forward_pallas(x, params, output_size)
    out = jax.block_until_ready(out)

    ref = cnn_forward_ref(x, params, output_size)
    assert out.shape == (B, output_size)
    # bf16 MXU inputs (per perf review) -> tolerance loosened vs the f32 reference.
    assert jnp.allclose(out, ref, atol=1e-2, rtol=1e-2), (out, ref)
    print("KERNEL_OK")
</pallas_src>

<mosaic_0001>
module attributes {stable_mosaic.version = 11 : i64} {
  func.func @cnn_kernel(%arg0: i32, %arg1: memref<2x2090xbf16, #tpu.memory_space<vmem>>, %arg2: memref<2090x1024xbf16, #tpu.memory_space<vmem>>, %arg3: memref<1024x400xbf16, #tpu.memory_space<vmem>>, %arg4: memref<400x4xf32, #tpu.memory_space<vmem>>, %arg5: memref<3x1024xf32, #tpu.memory_space<vmem>>, %arg6: memref<2x4xf32, #tpu.memory_space<vmem>>) attributes {dimension_semantics = [#tpu.dimension_semantics<parallel>], iteration_bounds = array<i64: 1>, scalar_prefetch = 0 : i64, scratch_operands = 0 : i64, tpu.core_type = #tpu.core_type<tc>, window_params = [{transform_indices = @transform_0, window_bounds = array<i64: 2, 2090>}, {pipeline_mode = #tpu.pipeline_mode<synchronous>, transform_indices = @transform_1, window_bounds = array<i64: 2090, 1024>}, {pipeline_mode = #tpu.pipeline_mode<synchronous>, transform_indices = @transform_2, window_bounds = array<i64: 1024, 400>}, {pipeline_mode = #tpu.pipeline_mode<synchronous>, transform_indices = @transform_3, window_bounds = array<i64: 400, 4>}, {pipeline_mode = #tpu.pipeline_mode<synchronous>, transform_indices = @transform_4, window_bounds = array<i64: 3, 1024>}, {transform_indices = @transform_5, window_bounds = array<i64: 2, 4>}]} {
    %c0 = arith.constant 0 : index
    %c0_0 = arith.constant 0 : index
    %0 = vector.load %arg1[%c0, %c0_0] : memref<2x2090xbf16, #tpu.memory_space<vmem>>, vector<2x2090xbf16>
    %c0_1 = arith.constant 0 : index
    %c0_2 = arith.constant 0 : index
    %1 = vector.load %arg2[%c0_1, %c0_2] : memref<2090x1024xbf16, #tpu.memory_space<vmem>>, vector<2090x1024xbf16>
    %cst = arith.constant dense<0.000000e+00> : vector<2x1024xf32>
    %2 = tpu.matmul %0, %1, %cst {dimension_numbers = #tpu.dot_dimension_numbers<[1], [0], [0], [1], [0, 0, 1, 1], [], []>} : vector<2x2090xbf16>, vector<2090x1024xbf16>, vector<2x1024xf32> -> vector<2x1024xf32>
    %c0_3 = arith.constant 0 : index
    %c0_4 = arith.constant 0 : index
    %3 = vector.load %arg5[%c0_3, %c0_4] : memref<3x1024xf32, #tpu.memory_space<vmem>>, vector<1x1024xf32>
    %4 = vector.broadcast %3 : vector<1x1024xf32> to vector<2x1024xf32>
    %5 = arith.addf %2, %4 : vector<2x1024xf32>
    %cst_5 = arith.constant 0.000000e+00 : f32
    %6 = vector.broadcast %cst_5 : f32 to vector<2x1024xf32>
    %7 = arith.cmpf ogt, %5, %6 : vector<2x1024xf32>
    %cst_6 = arith.constant 0.000000e+00 : f32
    %8 = vector.broadcast %cst_6 : f32 to vector<2x1024xf32>
    %9 = arith.minimumf %5, %8 : vector<2x1024xf32>
    %10 = math.exp %9 : vector<2x1024xf32>
    %cst_7 = arith.constant 1.000000e+00 : f32
    %11 = vector.broadcast %cst_7 : f32 to vector<2x1024xf32>
    %12 = arith.subf %10, %11 : vector<2x1024xf32>
    %13 = arith.select %7, %5, %12 : vector<2x1024xi1>, vector<2x1024xf32>
    %14 = arith.truncf %13 : vector<2x1024xf32> to vector<2x1024xbf16>
    %c0_8 = arith.constant 0 : index
    %c0_9 = arith.constant 0 : index
    %15 = vector.load %arg3[%c0_8, %c0_9] : memref<1024x400xbf16, #tpu.memory_space<vmem>>, vector<1024x400xbf16>
    %cst_10 = arith.constant dense<0.000000e+00> : vector<2x400xf32>
    %16 = tpu.matmul %14, %15, %cst_10 {dimension_numbers = #tpu.dot_dimension_numbers<[1], [0], [0], [1], [0, 0, 1, 1], [], []>} : vector<2x1024xbf16>, vector<1024x400xbf16>, vector<2x400xf32> -> vector<2x400xf32>
    %c1 = arith.constant 1 : index
    %c0_11 = arith.constant 0 : index
    %17 = vector.load %arg5[%c1, %c0_11] : memref<3x1024xf32, #tpu.memory_space<vmem>>, vector<1x400xf32>
    %18 = vector.broadcast %17 : vector<1x400xf32> to vector<2x400xf32>
    %19 = arith.addf %16, %18 : vector<2x400xf32>
    %cst_12 = arith.constant 0.000000e+00 : f32
    %20 = vector.broadcast %cst_12 : f32 to vector<2x400xf32>
    %21 = arith.cmpf ogt, %19, %20 : vector<2x400xf32>
    %cst_13 = arith.constant 0.000000e+00 : f32
    %22 = vector.broadcast %cst_13 : f32 to vector<2x400xf32>
    %23 = arith.minimumf %19, %22 : vector<2x400xf32>
    %24 = math.exp %23 : vector<2x400xf32>
    %cst_14 = arith.constant 1.000000e+00 : f32
    %25 = vector.broadcast %cst_14 : f32 to vector<2x400xf32>
    %26 = arith.subf %24, %25 : vector<2x400xf32>
    %27 = arith.select %21, %19, %26 : vector<2x400xi1>, vector<2x400xf32>
    %c0_15 = arith.constant 0 : index
    %c0_16 = arith.constant 0 : index
    %28 = vector.load %arg4[%c0_15, %c0_16] : memref<400x4xf32, #tpu.memory_space<vmem>>, vector<400x4xf32>
    %cst_17 = arith.constant dense<0.000000e+00> : vector<2x4xf32>
    %29 = tpu.matmul %27, %28, %cst_17 {dimension_numbers = #tpu.dot_dimension_numbers<[1], [0], [0], [1], [0, 0, 1, 1], [], []>} : vector<2x400xf32>, vector<400x4xf32>, vector<2x4xf32> -> vector<2x4xf32>
    %c2 = arith.constant 2 : index
    %c0_18 = arith.constant 0 : index
    %30 = vector.load %arg5[%c2, %c0_18] : memref<3x1024xf32, #tpu.memory_space<vmem>>, vector<1x4xf32>
    %31 = vector.broadcast %30 : vector<1x4xf32> to vector<2x4xf32>
    %32 = arith.addf %29, %31 : vector<2x4xf32>
    %c0_19 = arith.constant 0 : index
    %c0_20 = arith.constant 0 : index
    %33 = vector.load %arg6[%c0_19, %c0_20] : memref<2x4xf32, #tpu.memory_space<vmem>>, vector<2x4xf32>
    tpu.vector_store %arg6[%c0_19, %c0_20], %32 {strides = array<i32>} : memref<2x4xf32, #tpu.memory_space<vmem>>, vector<2x4xf32>,
    return
  }
  func.func @transform_0(%arg0: i32) -> (i32, i32) {
    %c0_i32 = arith.constant 0 : i32
    %c0_i32_0 = arith.constant 0 : i32
    return %arg0, %c0_i32 : i32, i32
  }
  func.func @transform_1(%arg0: i32) -> (i32, i32) {
    %c0_i32 = arith.constant 0 : i32
    %c0_i32_0 = arith.constant 0 : i32
    %c0_i32_1 = arith.constant 0 : i32
    return %c0_i32, %c0_i32_0 : i32, i32
  }
  func.func @transform_2(%arg0: i32) -> (i32, i32) {
    %c0_i32 = arith.constant 0 : i32
    %c0_i32_0 = arith.constant 0 : i32
    %c0_i32_1 = arith.constant 0 : i32
    return %c0_i32, %c0_i32_0 : i32, i32
  }
  func.func @transform_3(%arg0: i32) -> (i32, i32) {
    %c0_i32 = arith.constant 0 : i32
    %c0_i32_0 = arith.constant 0 : i32
    %c0_i32_1 = arith.constant 0 : i32
    return %c0_i32, %c0_i32_0 : i32, i32
  }
  func.func @transform_4(%arg0: i32) -> (i32, i32) {
    %c0_i32 = arith.constant 0 : i32
    %c0_i32_0 = arith.constant 0 : i32
    %c0_i32_1 = arith.constant 0 : i32
    return %c0_i32, %c0_i32_0 : i32, i32
  }
  func.func @transform_5(%arg0: i32) -> (i32, i32) {
    %c0_i32 = arith.constant 0 : i32
    %c0_i32_0 = arith.constant 0 : i32
    return %arg0, %c0_i32 : i32, i32
  }
}

</mosaic_0001>

<bundles_post_ra>
// kernel: tpu_custom_call.1
= control target key start
LH: loop header
LB: loop body
LE: loop exit
PB: predicated region body
PF: predicated region fallthrough
CT: control target
= control target key end

     0   :  { %10 = vsyncpa [#allocation3], 0  ;;  %s13575_s0 = inlined_call_operand.hbm [shape: bf16[2,2090], index: 0, kind: input, shape index: {}]   ;;  %s13576_s1 = inlined_call_operand.hbm [shape: bf16[2090,1024], index: 1, kind: input, shape index: {}]   ;;  %s13577_s2 = inlined_call_operand.vmem [shape: bf16[1024,400], index: 2, kind: input, shape index: {}]   ;;  %s13578_s3 = inlined_call_operand.vmem [shape: f32[400,4], index: 3, kind: input, shape index: {}]   ;;  %s13579_s4 = inlined_call_operand.hbm [shape: f32[3,1024], index: 4, kind: input, shape index: {}]   ;;  %s13580_s5 = inlined_call_operand.hbm [shape: f32[2,4], index: 5, kind: output, shape index: {}]  }
   0x1   :  { %11 = vsyncpa [#allocation6], 0 }
   0x2   :  { %12 = vsyncpa [#allocation4], 0  ;;  %s12303_s18 = smov [#allocation5]   ;;  %s12209_s22 = scalar_lea.hbm %s13576_s1, 134144 }
   0x3   :  { %s28_s19 = sshll.u32 %s12303_s18, 4  ;;  %p12210_p0 = scmp.ne.s32.totalorder %s13576_s1, %s12209_s22  ;;  %s29_s19 = int_to_ptr.vmem [resolvable:$true] %s28_s19 }
   0x4   :  { %p12213_p1 = scmp.lt.u32.totalorder %s12209_s22, %s13576_s1 }
   0x6   :  { %p12215_p2 = pnand %p12213_p1, %p12210_p0 }
   0x8   :  { %12218 = shalt.err (!%p12215_p2)
}
   0x9   :  { %s12219_s27 = scalar_lea.vmem %s29_s19, 134144  ;;  %p12224_p4 = scmp.lt.s32.totalorder %s29_s19, %s29_s19 }
   0xa   :  { %p12220_p3 = scmp.ne.s32.totalorder %s29_s19, %s12219_s27  ;;  %p12225_p5 = scmp.lt.s32.totalorder %s12219_s27, %s12219_s27 }
   0xc   :  { %p12226_p6 = por %p12225_p5, %p12224_p4 }
   0xe   :  { %p12227_p7 = pnand %p12226_p6, %p12220_p3 }
  0x10   :  { %12230 = shalt.err (!%p12227_p7)
}
  0x11   :  { %s12304_s28 = smov 512   ;;  %s12305_s29 = smov 32  }
  0x12   :  { %34 = dma.hbm_to_vmem [thread:$0]  %s13576_s1, 134144, %s29_s19, [#allocation6], %s12304_s28, %s12304_s28, %s12305_s29  }
  0x13   :  { %s12306_s7 = smov [#allocation2]   ;;  %s12307_s9 = smov [#allocation7]  }
  0x14   :  { %s19_s8 = sshll.u32 %s12306_s7, 4  ;;  %s45_s10 = sshll.u32 %s12307_s9, 4  ;;  %s20_s8 = int_to_ptr.vmem [resolvable:$true] %s19_s8  ;;  %s46_s10 = int_to_ptr.vmem [resolvable:$true] %s45_s10 }
  0x15   :  { %s12231_s13 = scalar_lea.hbm %s13575_s0, 272 }
  0x16   :  { %p12232_p8 = scmp.ne.s32.totalorder %s13575_s0, %s12231_s13  ;;  %p12235_p9 = scmp.lt.u32.totalorder %s12231_s13, %s13575_s0 }
  0x18   :  { %p12237_p10 = pnand %p12235_p9, %p12232_p8 }
  0x1a   :  { %12240 = shalt.err (!%p12237_p10)
}
  0x1b   :  { %s12241_s1 = scalar_lea.vmem %s20_s8, 272  ;;  %s12245_s18 = scalar_lea.vmem %s20_s8, 288 }
  0x1c   :  { %p12242_p11 = scmp.ne.s32.totalorder %s20_s8, %s12241_s1  ;;  %p12246_p12 = scmp.lt.s32.totalorder %s20_s8, %s20_s8 }
  0x1d   :  { %p12247_p13 = scmp.lt.s32.totalorder %s12245_s18, %s12241_s1 }
  0x1f   :  { %p12248_p0 = por %p12247_p13, %p12246_p12 }
  0x21   :  { %p12249_p1 = pnand %p12248_p0, %p12242_p11 }
  0x23   :  { %12252 = shalt.err (!%p12249_p1)
}
  0x24   :  { %22 = dma.hbm_to_vmem [thread:$0]  %s13575_s0, 272, %s20_s8, [#allocation3]  }
  0x25   :  { %s12253_s23 = scalar_lea.hbm %s13579_s4, 512 }
  0x26   :  { %p12254_p2 = scmp.ne.s32.totalorder %s13579_s4, %s12253_s23  ;;  %p12257_p3 = scmp.lt.u32.totalorder %s12253_s23, %s13579_s4 }
  0x28   :  { %p12259_p4 = pnand %p12257_p3, %p12254_p2 }
  0x2a   :  { %12262 = shalt.err (!%p12259_p4)
}
  0x2b   :  { %s12263_s28 = scalar_lea.vmem %s46_s10, 512  ;;  %p12268_p6 = scmp.lt.s32.totalorder %s46_s10, %s46_s10 }
  0x2c   :  { %p12264_p5 = scmp.ne.s32.totalorder %s46_s10, %s12263_s28  ;;  %p12269_p7 = scmp.lt.s32.totalorder %s12263_s28, %s12263_s28 }
  0x2e   :  { %p12270_p8 = por %p12269_p7, %p12268_p6 }
  0x30   :  { %p12271_p9 = pnand %p12270_p8, %p12264_p5 }
  0x32   :  { %12274 = shalt.err (!%p12271_p9)
}
  0x33   :  { %48 = dma.hbm_to_vmem [thread:$0]  %s13579_s4, 512, %s46_s10, [#allocation6]  }
  0x34   :  { %12297 = dma.done.wait [#allocation3], 272  }
  0x35   :  { %12298 = vsyncadd [#allocation3], 4294967024 }
  0x36   :  { %12299 = dma.done.wait [#allocation6], 134656  }
  0x37   :  { %12300 = vsyncadd [#allocation6], 4294832640  ;;  %v62_v0 = vld [vmem:[#allocation5] sm:$0xff]  ;;  %v63_v2 = vld [vmem:[#allocation5 + $0x8] sm:$0xff]  ;;  %v1112_v32 = vlaneseq  ;;  %v12308_v33 = vmov 1966171168  }
  0x38   :  { %v66_v1 = vld [vmem:[#allocation5 + $0x20] sm:$0xff]  ;;  %v67_v4 = vld [vmem:[#allocation5 + $0x28] sm:$0xff]  ;;  %v1157_v34 = vunpack.c.l.s4 %v12308_v33  ;;  %vm6519_vm0 = vcmask 1044480   ;;  %vm6515_vm1 = vcmask 343040   ;;  %vm10042_vm11 = vcmask 130048  }
  0x39   :  { %v10206_v3 = vcombine.high %v62_v0, %v66_v1  ;;  %v10205_v5 = vcombine.low %v62_v0, %v66_v1  ;;  %v70_v6 = vld [vmem:[#allocation5 + $0x40] sm:$0xff]  ;;  %v10208_v8 = vcombine.high %v63_v2, %v67_v4  ;;  %v10207_v9 = vcombine.low %v63_v2, %v67_v4  ;;  %v71_v11 = vld [vmem:[#allocation5 + $0x48] sm:$0xff] }
  0x3a   :  { %v74_v7 = vld [vmem:[#allocation5 + $0x60] sm:$0xff]  ;;  %v75_v12 = vld [vmem:[#allocation5 + $0x68] sm:$0xff]  ;;  %v12378_v43 = vshrl.u32 %v1112_v32, 7  ;;  %v1158_v44 = vunpack.c.0.s8 %v1157_v34  ;;  %vm10186_vm15 = vcmask 25600  }
  0x3b   :  { %v10214_v10 = vcombine.high %v70_v6, %v74_v7  ;;  %v78_v13 = vld [vmem:[#allocation5 + $0x80] sm:$0xff]  ;;  %6544 = vmatprep.subr.bf16.mxu0 %v10206_v3  ;;  %v10216_v14 = vcombine.high %v71_v11, %v75_v12  ;;  %v79_v16 = vld [vmem:[#allocation5 + $0x88] sm:$0xff]  ;;  %6913 = vmatprep.subr.bf16.mxu1 %v10208_v8  ;;  %v10213_v18 = vcombine.low %v70_v6, %v74_v7 }
  0x3c   :  { %v82_v15 = vld [vmem:[#allocation5 + $0xa0] sm:$0xff]  ;;  %v83_v17 = vld [vmem:[#allocation5 + $0xa8] sm:$0xff]  ;;  %6545 = vmatpush1.bf16.msra.mxu0 %v10205_v5  ;;  %6914 = vmatpush1.bf16.msra.mxu1 %v10207_v9  ;;  %v10215_v19 = vcombine.low %v71_v11, %v75_v12  ;;  %v12381_v53 = vsub.s32 %v1158_v44, %v12378_v43 }
  0x3d   :  { %6546 = vmatprep.subr.bf16.mxu0 %v10214_v10  ;;  %v10222_v20 = vcombine.high %v78_v13, %v82_v15  ;;  %6915 = vmatprep.subr.bf16.mxu1 %v10216_v14  ;;  %v10224_v21 = vcombine.high %v79_v16, %v83_v17  ;;  %v86_v22 = vld [vmem:[#allocation5 + $0xc0] sm:$0xff]  ;;  %v87_v24 = vld [vmem:[#allocation5 + $0xc8] sm:$0xff]  ;;  %v10221_v26 = vcombine.low %v78_v13, %v82_v15 }
  0x3e   :  { %v90_v23 = vld [vmem:[#allocation5 + $0xe0] sm:$0xff]  ;;  %v91_v25 = vld [vmem:[#allocation5 + $0xe8] sm:$0xff]  ;;  %v10223_v27 = vcombine.low %v79_v16, %v83_v17 }
  0x3f   :  { %v10230_v28 = vcombine.high %v86_v22, %v90_v23  ;;  %v10232_v29 = vcombine.high %v87_v24, %v91_v25  ;;  %v94_v30 = vld [vmem:[#allocation5 + $0x100] sm:$0xff]  ;;  %v95_v35 = vld [vmem:[#allocation5 + $0x108] sm:$0xff]  ;;  %v10229_v37 = vcombine.low %v86_v22, %v90_v23  ;;  %v10231_v38 = vcombine.low %v87_v24, %v91_v25 }
  0x40   :  { %6547 = vmatpush1.bf16.msra.mxu0 %v10213_v18  ;;  %6916 = vmatpush1.bf16.msra.mxu1 %v10215_v19  ;;  %v98_v31 = vld [vmem:[#allocation5 + $0x120] sm:$0xff]  ;;  %v99_v36 = vld [vmem:[#allocation5 + $0x128] sm:$0xff] }
  0x41   :  { %6548 = vmatprep.subr.bf16.mxu0 %v10222_v20  ;;  %6917 = vmatprep.subr.bf16.mxu1 %v10224_v21  ;;  %v10238_v39 = vcombine.high %v94_v30, %v98_v31  ;;  %v10240_v40 = vcombine.high %v95_v35, %v99_v36  ;;  %v102_v41 = vld [vmem:[#allocation5 + $0x140] sm:$0xff]  ;;  %v103_v45 = vld [vmem:[#allocation5 + $0x148] sm:$0xff]  ;;  %v10237_v47 = vcombine.low %v94_v30, %v98_v31 }
  0x42   :  { %v106_v42 = vld [vmem:[#allocation5 + $0x160] sm:$0xff]  ;;  %v107_v46 = vld [vmem:[#allocation5 + $0x168] sm:$0xff]  ;;  %v10239_v48 = vcombine.low %v95_v35, %v99_v36 }
  0x43   :  { %v10246_v49 = vcombine.high %v102_v41, %v106_v42  ;;  %v10248_v50 = vcombine.high %v103_v45, %v107_v46  ;;  %v110_v51 = vld [vmem:[#allocation5 + $0x180] sm:$0xff]  ;;  %v111_v54 = vld [vmem:[#allocation5 + $0x188] sm:$0xff]  ;;  %v10245_v56 = vcombine.low %v102_v41, %v106_v42  ;;  %v10247_v57 = vcombine.low %v103_v45, %v107_v46 }
  0x44   :  { %6549 = vmatpush1.bf16.msra.mxu0 %v10221_v26  ;;  %6918 = vmatpush1.bf16.msra.mxu1 %v10223_v27  ;;  %v114_v52 = vld [vmem:[#allocation5 + $0x1a0] sm:$0xff]  ;;  %v115_v55 = vld [vmem:[#allocation5 + $0x1a8] sm:$0xff] }
  0x45   :  { %6550 = vmatprep.subr.bf16.mxu0 %v10230_v28  ;;  %6919 = vmatprep.subr.bf16.mxu1 %v10232_v29  ;;  %v10254_v58 = vcombine.high %v110_v51, %v114_v52  ;;  %v12383_v59 = vld [vmem:[#allocation2] sm:$0xff]  ;;  %v10256_v60 = vcombine.high %v111_v54, %v115_v55  ;;  %v118_v61 = vld [vmem:[#allocation5 + $0x1c0] sm:$0xff]  ;;  %v10253_v2 = vcombine.low %v110_v51, %v114_v52 }
  0x46   :  { %v122_v62 = vld [vmem:[#allocation5 + $0x1e0] sm:$0xff]  ;;  %v12387_v63 = vrot.slane %v12383_v59, %v12381_v53  ;;  %v119_v0 = vld [vmem:[#allocation5 + $0x1c8] sm:$0xff]  ;;  %v10255_v4 = vcombine.low %v111_v54, %v115_v55 }
  0x47   :  { %v123_v1 = vld [vmem:[#allocation5 + $0x1e8] sm:$0xff]  ;;  %v10262_v5 = vcombine.high %v118_v61, %v122_v62  ;;  %v126_v7 = vld [vmem:[#allocation5 + $0x200] sm:$0xff]  ;;  %v10261_v12 = vcombine.low %v118_v61, %v122_v62 }
  0x48   :  { %6551 = vmatpush1.bf16.msra.mxu0 %v10229_v37  ;;  %6920 = vmatpush1.bf16.msra.mxu1 %v10231_v38  ;;  %v1170_v3 = vcombine.high %v12387_v63, %v12387_v63  ;;  %v10264_v6 = vcombine.high %v119_v0, %v123_v1  ;;  %v130_v8 = vld [vmem:[#allocation5 + $0x220] sm:$0xff]  ;;  %v127_v10 = vld [vmem:[#allocation5 + $0x208] sm:$0xff]  ;;  %v10263_v13 = vcombine.low %v119_v0, %v123_v1 }
  0x49   :  { %6552 = vmatprep.subr.bf16.mxu0 %v10238_v39  ;;  %6921 = vmatprep.subr.bf16.mxu1 %v10240_v40  ;;  %v131_v11 = vld [vmem:[#allocation5 + $0x228] sm:$0xff]  ;;  %v10270_v14 = vcombine.high %v126_v7, %v130_v8  ;;  %v134_v16 = vld [vmem:[#allocation5 + $0x240] sm:$0xff]  ;;  %v10269_v20 = vcombine.low %v126_v7, %v130_v8 }
  0x4a   :  { %v12392_v9 = vrot.slane %v1170_v3, %v12381_v53  ;;  %v10272_v15 = vcombine.high %v127_v10, %v131_v11  ;;  %v138_v17 = vld [vmem:[#allocation5 + $0x260] sm:$0xff]  ;;  %v135_v18 = vld [vmem:[#allocation5 + $0x248] sm:$0xff]  ;;  %v10271_v21 = vcombine.low %v127_v10, %v131_v11 }
  0x4b   :  { %v139_v19 = vld [vmem:[#allocation5 + $0x268] sm:$0xff]  ;;  %v10278_v22 = vcombine.high %v134_v16, %v138_v17  ;;  %v142_v24 = vld [vmem:[#allocation5 + $0x280] sm:$0xff]  ;;  %v10277_v28 = vcombine.low %v134_v16, %v138_v17 }
  0x4c   :  { %6553 = vmatpush1.bf16.msra.mxu0 %v10237_v47  ;;  %6922 = vmatpush1.bf16.msra.mxu1 %v10239_v48  ;;  %v10280_v23 = vcombine.high %v135_v18, %v139_v19  ;;  %v146_v25 = vld [vmem:[#allocation5 + $0x2a0] sm:$0xff]  ;;  %v143_v26 = vld [vmem:[#allocation5 + $0x288] sm:$0xff]  ;;  %v10279_v29 = vcombine.low %v135_v18, %v139_v19 }
  0x4d   :  { %6554 = vmatprep.subr.bf16.mxu0 %v10246_v49  ;;  %6923 = vmatprep.subr.bf16.mxu1 %v10248_v50  ;;  %v147_v27 = vld [vmem:[#allocation5 + $0x2a8] sm:$0xff]  ;;  %v10286_v30 = vcombine.high %v142_v24, %v146_v25  ;;  %v150_v32 = vld [vmem:[#allocation5 + $0x2c0] sm:$0xff]  ;;  %v10285_v36 = vcombine.low %v142_v24, %v146_v25 }
  0x4e   :  { %6576 = vmatprep.mubr.bf16.mxu0 %v12392_v9  ;;  %6945 = vmatprep.mubr.bf16.mxu1 %v12392_v9  ;;  %v10288_v31 = vcombine.high %v143_v26, %v147_v27  ;;  %v154_v33 = vld [vmem:[#allocation5 + $0x2e0] sm:$0xff]  ;;  %v151_v34 = vld [vmem:[#allocation5 + $0x2c8] sm:$0xff]  ;;  %v10287_v37 = vcombine.low %v143_v26, %v147_v27 }
  0x4f   :  { %v155_v35 = vld [vmem:[#allocation5 + $0x2e8] sm:$0xff]  ;;  %v10294_v38 = vcombine.high %v150_v32, %v154_v33  ;;  %v158_v40 = vld [vmem:[#allocation5 + $0x300] sm:$0xff]  ;;  %v10293_v45 = vcombine.low %v150_v32, %v154_v33 }
  0x50   :  { %6555 = vmatpush1.bf16.msra.mxu0 %v10245_v56  ;;  %6924 = vmatpush1.bf16.msra.mxu1 %v10247_v57  ;;  %v10296_v39 = vcombine.high %v151_v34, %v155_v35  ;;  %v162_v41 = vld [vmem:[#allocation5 + $0x320] sm:$0xff]  ;;  %v159_v42 = vld [vmem:[#allocation5 + $0x308] sm:$0xff]  ;;  %v10295_v46 = vcombine.low %v151_v34, %v155_v35  ;;  %v12402_v34 = vcombine.high %v12392_v9, %v12392_v9 }
  0x51   :  { %6556 = vmatprep.subr.bf16.mxu0 %v10254_v58  ;;  %6925 = vmatprep.subr.bf16.mxu1 %v10256_v60  ;;  %v163_v44 = vld [vmem:[#allocation5 + $0x328] sm:$0xff]  ;;  %v10302_v47 = vcombine.high %v158_v40, %v162_v41  ;;  %v166_v49 = vld [vmem:[#allocation5 + $0x340] sm:$0xff]  ;;  %v10301_v54 = vcombine.low %v158_v40, %v162_v41 }
  0x52   :  { %v10304_v48 = vcombine.high %v159_v42, %v163_v44  ;;  %v170_v50 = vld [vmem:[#allocation5 + $0x360] sm:$0xff]  ;;  %v167_v51 = vld [vmem:[#allocation5 + $0x348] sm:$0xff]  ;;  %v10303_v55 = vcombine.low %v159_v42, %v163_v44 }
  0x53   :  { %v171_v52 = vld [vmem:[#allocation5 + $0x368] sm:$0xff]  ;;  %v10310_v56 = vcombine.high %v166_v49, %v170_v50  ;;  %v174_v58 = vld [vmem:[#allocation5 + $0x380] sm:$0xff]  ;;  %v10309_v0 = vcombine.low %v166_v49, %v170_v50 }
  0x54   :  { %6557 = vmatpush1.bf16.msra.mxu0 %v10253_v2  ;;  %6926 = vmatpush1.bf16.msra.mxu1 %v10255_v4  ;;  %v10312_v57 = vcombine.high %v167_v51, %v171_v52  ;;  %v178_v60 = vld [vmem:[#allocation5 + $0x3a0] sm:$0xff]  ;;  %v175_v61 = vld [vmem:[#allocation5 + $0x388] sm:$0xff]  ;;  %v10311_v1 = vcombine.low %v167_v51, %v171_v52 }
  0x55   :  { %6558 = vmatprep.subr.bf16.mxu0 %v10262_v5  ;;  %6927 = vmatprep.subr.bf16.mxu1 %v10264_v6  ;;  %v179_v62 = vld [vmem:[#allocation5 + $0x3a8] sm:$0xff]  ;;  %v10318_v2 = vcombine.high %v174_v58, %v178_v60  ;;  %v182_v4 = vld [vmem:[#allocation5 + $0x3c0] sm:$0xff]  ;;  %v10317_v8 = vcombine.low %v174_v58, %v178_v60 }
  0x56   :  { %v10320_v3 = vcombine.high %v175_v61, %v179_v62  ;;  %v186_v5 = vld [vmem:[#allocation5 + $0x3e0] sm:$0xff]  ;;  %v183_v6 = vld [vmem:[#allocation5 + $0x3c8] sm:$0xff]  ;;  %v10319_v10 = vcombine.low %v175_v61, %v179_v62 }
  0x57   :  { %v187_v7 = vld [vmem:[#allocation5 + $0x3e8] sm:$0xff]  ;;  %v10326_v11 = vcombine.high %v182_v4, %v186_v5  ;;  %v10325_v17 = vcombine.low %v182_v4, %v186_v5 }
  0x58   :  { %6559 = vmatpush1.bf16.msra.mxu0 %v10261_v12  ;;  %6928 = vmatpush1.bf16.msra.mxu1 %v10263_v13  ;;  %v10328_v12 = vcombine.high %v183_v6, %v187_v7  ;;  %v190_v13 = vld [vmem:[#allocation5 + $0x400] sm:$0xff]  ;;  %v195_v16 = vld [vmem:[#allocation5 + $0x428] sm:$0xff]  ;;  %v10327_v18 = vcombine.low %v183_v6, %v187_v7 }
  0x59   :  { %6560 = vmatprep.subr.bf16.mxu0 %v10270_v14  ;;  %6929 = vmatprep.subr.bf16.mxu1 %v10272_v15  ;;  %v194_v14 = vld [vmem:[#allocation5 + $0x420] sm:$0xff]  ;;  %v191_v15 = vld [vmem:[#allocation5 + $0x408] sm:$0xff] }
  0x5a   :  { %v10334_v19 = vcombine.high %v190_v13, %v194_v14  ;;  %v199_v24 = vld [vmem:[#allocation5 + $0x448] sm:$0xff]  ;;  %v10333_v26 = vcombine.low %v190_v13, %v194_v14  ;;  %v10335_v27 = vcombine.low %v191_v15, %v195_v16 }
  0x5b   :  { %v203_v25 = vld [vmem:[#allocation5 + $0x468] sm:$0xff] }
  0x5c   :  { %6561 = vmatpush1.bf16.msra.mxu0 %v10269_v20  ;;  %6930 = vmatpush1.bf16.msra.mxu1 %v10271_v21  ;;  %v10336_v20 = vcombine.high %v191_v15, %v195_v16  ;;  %v198_v21 = vld [vmem:[#allocation5 + $0x440] sm:$0xff]  ;;  %v10344_v32 = vcombine.high %v199_v24, %v203_v25  ;;  %v211_v33 = vld [vmem:[#allocation5 + $0x4a8] sm:$0xff]  ;;  %v10343_v35 = vcombine.low %v199_v24, %v203_v25 }
  0x5d   :  { %6562 = vmatprep.subr.bf16.mxu0 %v10278_v22  ;;  %6931 = vmatprep.subr.bf16.mxu1 %v10280_v23  ;;  %v202_v22 = vld [vmem:[#allocation5 + $0x460] sm:$0xff]  ;;  %v12398_v23 = vrot.slane %v12387_v63, %v12381_v53  ;;  %v219_v41 = vld [vmem:[#allocation5 + $0x4e8] sm:$0xff] }
  0x5e   :  { %v10341_v63 = vcombine.low %v198_v21, %v202_v22  ;;  %v227_v50 = vld [vmem:[#allocation5 + $0x528] sm:$0xff] }
  0x5f   :  { %v235_v60 = vld [vmem:[#allocation5 + $0x568] sm:$0xff] }
  0x60   :  { %6563 = vmatpush1.bf16.msra.mxu0 %v10277_v28  ;;  %6932 = vmatpush1.bf16.msra.mxu1 %v10279_v29  ;;  %v10342_v28 = vcombine.high %v198_v21, %v202_v22  ;;  %v206_v29 = vld [vmem:[#allocation5 + $0x480] sm:$0xff]  ;;  %v243_v5 = vld [vmem:[#allocation5 + $0x5a8] sm:$0xff] }
  0x61   :  { %6564 = vmatprep.subr.bf16.mxu0 %v10286_v30  ;;  %6933 = vmatprep.subr.bf16.mxu1 %v10288_v31  ;;  %v210_v30 = vld [vmem:[#allocation5 + $0x4a0] sm:$0xff]  ;;  %v207_v31 = vld [vmem:[#allocation5 + $0x488] sm:$0xff] }
  0x62   :  { %v10352_v40 = vcombine.high %v207_v31, %v211_v33  ;;  %v10349_v42 = vcombine.low %v206_v29, %v210_v30  ;;  %v10351_v44 = vcombine.low %v207_v31, %v211_v33  ;;  %v251_v14 = vld [vmem:[#allocation5 + $0x5e8] sm:$0xff] }
  0x63   :  { %v259_v22 = vld [vmem:[#allocation5 + $0x628] sm:$0xff] }
  0x64   :  { %6565 = vmatpush1.bf16.msra.mxu0 %v10285_v36  ;;  %6934 = vmatpush1.bf16.msra.mxu1 %v10287_v37  ;;  %v10350_v36 = vcombine.high %v206_v29, %v210_v30  ;;  %v214_v37 = vld [vmem:[#allocation5 + $0x4c0] sm:$0xff]  ;;  %v263_v29 = vld [vmem:[#allocation5 + $0x648] sm:$0xff] }
  0x65   :  { %6566 = vmatprep.subr.bf16.mxu0 %v10294_v38  ;;  %6935 = vmatprep.subr.bf16.mxu1 %v10296_v39  ;;  %v218_v38 = vld [vmem:[#allocation5 + $0x4e0] sm:$0xff]  ;;  %v215_v39 = vld [vmem:[#allocation5 + $0x4c8] sm:$0xff] }
  0x66   :  { %v10360_v49 = vcombine.high %v215_v39, %v219_v41  ;;  %v10357_v51 = vcombine.low %v214_v37, %v218_v38  ;;  %v10359_v52 = vcombine.low %v215_v39, %v219_v41  ;;  %v267_v31 = vld [vmem:[#allocation5 + $0x668] sm:$0xff] }
  0x67   :  { %v275_v39 = vld [vmem:[#allocation5 + $0x6a8] sm:$0xff]  ;;  %v10407_v41 = vcombine.low %v263_v29, %v267_v31 }
  0x68   :  { %6567 = vmatpush1.bf16.msra.mxu0 %v10293_v45  ;;  %6936 = vmatpush1.bf16.msra.mxu1 %v10295_v46  ;;  %v10358_v45 = vcombine.high %v214_v37, %v218_v38  ;;  %v222_v46 = vld [vmem:[#allocation5 + $0x500] sm:$0xff]  ;;  %v271_v37 = vld [vmem:[#allocation5 + $0x688] sm:$0xff]  ;;  %v10408_v38 = vcombine.high %v263_v29, %v267_v31 }
  0x69   :  { %6568 = vmatprep.subr.bf16.mxu0 %v10302_v47  ;;  %6937 = vmatprep.subr.bf16.mxu1 %v10304_v48  ;;  %v226_v47 = vld [vmem:[#allocation5 + $0x520] sm:$0xff]  ;;  %v223_v48 = vld [vmem:[#allocation5 + $0x508] sm:$0xff] }
  0x6a   :  { %v10368_v58 = vcombine.high %v223_v48, %v227_v50  ;;  %v10365_v61 = vcombine.low %v222_v46, %v226_v47  ;;  %v10367_v62 = vcombine.low %v223_v48, %v227_v50  ;;  %v283_v48 = vld [vmem:[#allocation5 + $0x6e8] sm:$0xff]  ;;  %v10415_v50 = vcombine.low %v271_v37, %v275_v39 }
  0x6c   :  { %6569 = vmatpush1.bf16.msra.mxu0 %v10301_v54  ;;  %6938 = vmatpush1.bf16.msra.mxu1 %v10303_v55  ;;  %v10366_v54 = vcombine.high %v222_v46, %v226_v47  ;;  %v230_v55 = vld [vmem:[#allocation5 + $0x540] sm:$0xff]  ;;  %v279_v46 = vld [vmem:[#allocation5 + $0x6c8] sm:$0xff]  ;;  %v10416_v47 = vcombine.high %v271_v37, %v275_v39 }
  0x6d   :  { %6570 = vmatprep.subr.bf16.mxu0 %v10310_v56  ;;  %6939 = vmatprep.subr.bf16.mxu1 %v10312_v57  ;;  %v234_v56 = vld [vmem:[#allocation5 + $0x560] sm:$0xff]  ;;  %v231_v57 = vld [vmem:[#allocation5 + $0x548] sm:$0xff] }
  0x6e   :  { %v10376_v4 = vcombine.high %v231_v57, %v235_v60  ;;  %v10373_v6 = vcombine.low %v230_v55, %v234_v56  ;;  %v10375_v7 = vcombine.low %v231_v57, %v235_v60  ;;  %v291_v57 = vld [vmem:[#allocation5 + $0x728] sm:$0xff]  ;;  %v10423_v60 = vcombine.low %v279_v46, %v283_v48 }
  0x70   :  { %6571 = vmatpush1.bf16.msra.mxu0 %v10309_v0  ;;  %6940 = vmatpush1.bf16.msra.mxu1 %v10311_v1  ;;  %v10374_v0 = vcombine.high %v230_v55, %v234_v56  ;;  %v238_v1 = vld [vmem:[#allocation5 + $0x580] sm:$0xff]  ;;  %v287_v55 = vld [vmem:[#allocation5 + $0x708] sm:$0xff]  ;;  %v10424_v56 = vcombine.high %v279_v46, %v283_v48 }
  0x71   :  { %6572 = vmatprep.subr.bf16.mxu0 %v10318_v2  ;;  %6941 = vmatprep.subr.bf16.mxu1 %v10320_v3  ;;  %v242_v2 = vld [vmem:[#allocation5 + $0x5a0] sm:$0xff]  ;;  %v239_v3 = vld [vmem:[#allocation5 + $0x588] sm:$0xff] }
  0x72   :  { %v10384_v13 = vcombine.high %v239_v3, %v243_v5  ;;  %v10381_v15 = vcombine.low %v238_v1, %v242_v2  ;;  %v10383_v16 = vcombine.low %v239_v3, %v243_v5  ;;  %v299_v3 = vld [vmem:[#allocation5 + $0x768] sm:$0xff]  ;;  %v10431_v5 = vcombine.low %v287_v55, %v291_v57  ;;  %v338_v46 = vld [vmem:[#allocation5 + $0x8a0] sm:$0xff] }
  0x74   :  { %6573 = vmatpush1.bf16.msra.mxu0 %v10317_v8  ;;  %6942 = vmatpush1.bf16.msra.mxu1 %v10319_v10  ;;  %v10382_v8 = vcombine.high %v238_v1, %v242_v2  ;;  %v246_v10 = vld [vmem:[#allocation5 + $0x5c0] sm:$0xff]  ;;  %v295_v1 = vld [vmem:[#allocation5 + $0x748] sm:$0xff]  ;;  %v10432_v2 = vcombine.high %v287_v55, %v291_v57 }
  0x75   :  { %6574 = vmatprep.subr.bf16.mxu0 %v10326_v11  ;;  %6943 = vmatprep.subr.bf16.mxu1 %v10328_v12  ;;  %v250_v11 = vld [vmem:[#allocation5 + $0x5e0] sm:$0xff]  ;;  %v247_v12 = vld [vmem:[#allocation5 + $0x5c8] sm:$0xff] }
  0x76   :  { %v10392_v21 = vcombine.high %v247_v12, %v251_v14  ;;  %v10389_v24 = vcombine.low %v246_v10, %v250_v11  ;;  %v10391_v25 = vcombine.low %v247_v12, %v251_v14  ;;  %v307_v12 = vld [vmem:[#allocation5 + $0x7a8] sm:$0xff]  ;;  %v10439_v14 = vcombine.low %v295_v1, %v299_v3  ;;  %v342_v55 = vld [vmem:[#allocation5 + $0x8c0] sm:$0xff] }
  0x77   :  { %v343_v57 = vld [vmem:[#allocation5 + $0x8c8] sm:$0xff] }
  0x78   :  { %6575 = vmatpush1.bf16.msra.mxu0 %v10325_v17  ;;  %6944 = vmatpush1.bf16.msra.mxu1 %v10327_v18  ;;  %v10390_v17 = vcombine.high %v246_v10, %v250_v11  ;;  %v254_v18 = vld [vmem:[#allocation5 + $0x600] sm:$0xff]  ;;  %v303_v10 = vld [vmem:[#allocation5 + $0x788] sm:$0xff]  ;;  %v10440_v11 = vcombine.high %v295_v1, %v299_v3 }
  0x79   :  { %6585 = vmatprep.subr.bf16.mxu0 %v10334_v19  ;;  %6954 = vmatprep.subr.bf16.mxu1 %v10336_v20  ;;  %v258_v19 = vld [vmem:[#allocation5 + $0x620] sm:$0xff]  ;;  %v255_v20 = vld [vmem:[#allocation5 + $0x608] sm:$0xff] }
  0x7a   :  { %v10400_v30 = vcombine.high %v255_v20, %v259_v22  ;;  %v10399_v33 = vcombine.low %v255_v20, %v259_v22  ;;  %v315_v20 = vld [vmem:[#allocation5 + $0x7e8] sm:$0xff]  ;;  %v350_v1 = vld [vmem:[#allocation5 + $0x900] sm:$0xff] }
  0x7b   :  { %6577 = vmatmul.mubr.bf16.vlgmr.msra.gmra.mrb[0].mxu0 %v12398_v23  ;;  %6946 = vmatmul.mubr.bf16.vlgmr.msra.gmra.mrb[0].mxu1 %v12398_v23  ;;  %v351_v3 = vld [vmem:[#allocation5 + $0x908] sm:$0xff] }
  0x7c   :  { %6586 = vmatpush1.bf16.msra.mxu0 %v10333_v26  ;;  %6955 = vmatpush1.bf16.msra.mxu1 %v10335_v27  ;;  %v10398_v26 = vcombine.high %v254_v18, %v258_v19  ;;  %v262_v27 = vld [vmem:[#allocation5 + $0x640] sm:$0xff] }
  0x7d   :  { %6587 = vmatprep.subr.bf16.mxu0 %v10342_v28  ;;  %6956 = vmatprep.subr.bf16.mxu1 %v10344_v32  ;;  %v266_v28 = vld [vmem:[#allocation5 + $0x660] sm:$0xff]  ;;  %v10397_v32 = vcombine.low %v254_v18, %v258_v19  ;;  %v311_v18 = vld [vmem:[#allocation5 + $0x7c8] sm:$0xff]  ;;  %v10448_v19 = vcombine.high %v303_v10, %v307_v12 }
  0x7e   :  { %6617 = vmatprep.mubr.bf16.mxu0 %v12402_v34  ;;  %6986 = vmatprep.mubr.bf16.mxu1 %v12402_v34  ;;  %v10456_v29 = vcombine.high %v311_v18, %v315_v20 }
  0x80   :  { %6588 = vmatpush1.bf16.msra.mxu0 %v10341_v63  ;;  %6957 = vmatpush1.bf16.msra.mxu1 %v10343_v35  ;;  %v10406_v63 = vcombine.high %v262_v27, %v266_v28  ;;  %v270_v35 = vld [vmem:[#allocation5 + $0x680] sm:$0xff] }
  0x81   :  { %6589 = vmatprep.subr.bf16.mxu0 %v10350_v36  ;;  %6958 = vmatprep.subr.bf16.mxu1 %v10352_v40  ;;  %v274_v36 = vld [vmem:[#allocation5 + $0x6a0] sm:$0xff]  ;;  %v10405_v40 = vcombine.low %v262_v27, %v266_v28  ;;  %v319_v28 = vld [vmem:[#allocation5 + $0x808] sm:$0xff] }
  0x82   :  { %v322_v27 = vld [vmem:[#allocation5 + $0x820] sm:$0xff] }
  0x84   :  { %6590 = vmatpush1.bf16.msra.mxu0 %v10349_v42  ;;  %6959 = vmatpush1.bf16.msra.mxu1 %v10351_v44  ;;  %v10414_v42 = vcombine.high %v270_v35, %v274_v36  ;;  %v278_v44 = vld [vmem:[#allocation5 + $0x6c0] sm:$0xff] }
  0x85   :  { %6591 = vmatprep.subr.bf16.mxu0 %v10358_v45  ;;  %6960 = vmatprep.subr.bf16.mxu1 %v10360_v49  ;;  %v282_v45 = vld [vmem:[#allocation5 + $0x6e0] sm:$0xff]  ;;  %v10413_v49 = vcombine.low %v270_v35, %v274_v36  ;;  %v327_v36 = vld [vmem:[#allocation5 + $0x848] sm:$0xff] }
  0x86   :  { %v330_v35 = vld [vmem:[#allocation5 + $0x860] sm:$0xff] }
  0x88   :  { %6592 = vmatpush1.bf16.msra.mxu0 %v10357_v51  ;;  %6961 = vmatpush1.bf16.msra.mxu1 %v10359_v52  ;;  %v10422_v51 = vcombine.high %v278_v44, %v282_v45  ;;  %v286_v52 = vld [vmem:[#allocation5 + $0x700] sm:$0xff] }
  0x89   :  { %6593 = vmatprep.subr.bf16.mxu0 %v10366_v54  ;;  %6962 = vmatprep.subr.bf16.mxu1 %v10368_v58  ;;  %v290_v54 = vld [vmem:[#allocation5 + $0x720] sm:$0xff]  ;;  %v10421_v58 = vcombine.low %v278_v44, %v282_v45 }
  0x8a   :  { %v334_v45 = vld [vmem:[#allocation5 + $0x880] sm:$0xff] }
  0x8c   :  { %6594 = vmatpush1.bf16.msra.mxu0 %v10365_v61  ;;  %6963 = vmatpush1.bf16.msra.mxu1 %v10367_v62  ;;  %v10430_v61 = vcombine.high %v286_v52, %v290_v54  ;;  %v294_v62 = vld [vmem:[#allocation5 + $0x740] sm:$0xff] }
  0x8d   :  { %6595 = vmatprep.subr.bf16.mxu0 %v10374_v0  ;;  %6964 = vmatprep.subr.bf16.mxu1 %v10376_v4  ;;  %v298_v0 = vld [vmem:[#allocation5 + $0x760] sm:$0xff]  ;;  %v10429_v4 = vcombine.low %v286_v52, %v290_v54  ;;  %v10478_v54 = vcombine.high %v334_v45, %v338_v46 }
  0x90   :  { %6596 = vmatpush1.bf16.msra.mxu0 %v10373_v6  ;;  %6965 = vmatpush1.bf16.msra.mxu1 %v10375_v7  ;;  %v10438_v6 = vcombine.high %v294_v62, %v298_v0  ;;  %v302_v7 = vld [vmem:[#allocation5 + $0x780] sm:$0xff] }
  0x91   :  { %6597 = vmatprep.subr.bf16.mxu0 %v10382_v8  ;;  %6966 = vmatprep.subr.bf16.mxu1 %v10384_v13  ;;  %v306_v8 = vld [vmem:[#allocation5 + $0x7a0] sm:$0xff]  ;;  %v10437_v13 = vcombine.low %v294_v62, %v298_v0 }
  0x92   :  { %v10445_v22 = vcombine.low %v302_v7, %v306_v8 }
  0x94   :  { %6598 = vmatpush1.bf16.msra.mxu0 %v10381_v15  ;;  %6967 = vmatpush1.bf16.msra.mxu1 %v10383_v16  ;;  %v10446_v15 = vcombine.high %v302_v7, %v306_v8  ;;  %v310_v16 = vld [vmem:[#allocation5 + $0x7c0] sm:$0xff] }
  0x95   :  { %6599 = vmatprep.subr.bf16.mxu0 %v10390_v17  ;;  %6968 = vmatprep.subr.bf16.mxu1 %v10392_v21  ;;  %v314_v17 = vld [vmem:[#allocation5 + $0x7e0] sm:$0xff]  ;;  %v1155_v21 = vcombine.high %v12383_v59, %v12383_v59  ;;  %v10455_v59 = vcombine.low %v311_v18, %v315_v20  ;;  %v367_v20 = vld [vmem:[#allocation5 + $0x988] sm:$0xff] }
  0x96   :  { %v366_v18 = vld [vmem:[#allocation5 + $0x980] sm:$0xff] }
  0x97   :  { %v12411_v31 = vrot.slane %v1155_v21, %v12381_v53 }
  0x98   :  { %6600 = vmatpush1.bf16.msra.mxu0 %v10389_v24  ;;  %6969 = vmatpush1.bf16.msra.mxu1 %v10391_v25  ;;  %v10447_v24 = vcombine.low %v303_v10, %v307_v12  ;;  %v10454_v25 = vcombine.high %v310_v16, %v314_v17  ;;  %v358_v10 = vld [vmem:[#allocation5 + $0x940] sm:$0xff]  ;;  %v359_v12 = vld [vmem:[#allocation5 + $0x948] sm:$0xff] }
  0x99   :  { %6601 = vmatprep.subr.bf16.mxu0 %v10398_v26  ;;  %6970 = vmatprep.subr.bf16.mxu1 %v10400_v30  ;;  %v318_v26 = vld [vmem:[#allocation5 + $0x800] sm:$0xff]  ;;  %v323_v30 = vld [vmem:[#allocation5 + $0x828] sm:$0xff]  ;;  %v1171_v39 = vcombine.high %v12411_v31, %v12411_v31 }
  0x9a   :  { %v10464_v37 = vcombine.high %v319_v28, %v323_v30 }
  0x9c   :  { %6602 = vmatpush1.bf16.msra.mxu0 %v10397_v32  ;;  %6971 = vmatpush1.bf16.msra.mxu1 %v10399_v33  ;;  %v10453_v32 = vcombine.low %v310_v16, %v314_v17  ;;  %v10462_v33 = vcombine.high %v318_v26, %v322_v27 }
  0x9d   :  { %6603 = vmatprep.subr.bf16.mxu0 %v10406_v63  ;;  %6972 = vmatprep.subr.bf16.mxu1 %v10408_v38  ;;  %v326_v63 = vld [vmem:[#allocation5 + $0x840] sm:$0xff]  ;;  %v331_v38 = vld [vmem:[#allocation5 + $0x868] sm:$0xff] }
  0x9e   :  { %v10470_v44 = vcombine.high %v326_v63, %v330_v35  ;;  %v10472_v48 = vcombine.high %v327_v36, %v331_v38  ;;  %v10471_v52 = vcombine.low %v327_v36, %v331_v38  ;;  %v386_v36 = vld [vmem:[#allocation5 + $0xa20] sm:$0xff] }
  0xa0   :  { %6604 = vmatpush1.bf16.msra.mxu0 %v10405_v40  ;;  %6973 = vmatpush1.bf16.msra.mxu1 %v10407_v41  ;;  %v12417_v40 = vcombine.high %v12398_v23, %v12398_v23  ;;  %v10461_v41 = vcombine.low %v318_v26, %v322_v27  ;;  %v374_v27 = vld [vmem:[#allocation5 + $0x9c0] sm:$0xff] }
  0xa1   :  { %6605 = vmatprep.subr.bf16.mxu0 %v10414_v42  ;;  %6974 = vmatprep.subr.bf16.mxu1 %v10416_v47  ;;  %v10463_v42 = vcombine.low %v319_v28, %v323_v30  ;;  %v335_v47 = vld [vmem:[#allocation5 + $0x888] sm:$0xff]  ;;  %v378_v28 = vld [vmem:[#allocation5 + $0x9e0] sm:$0xff] }
  0xa4   :  { %6606 = vmatpush1.bf16.msra.mxu0 %v10413_v49  ;;  %6975 = vmatpush1.bf16.msra.mxu1 %v10415_v50  ;;  %v339_v49 = vld [vmem:[#allocation5 + $0x8a8] sm:$0xff]  ;;  %v12420_v50 = vrot.slane %v1171_v39, %v12381_v53 }
  0xa5   :  { %6607 = vmatprep.subr.bf16.mxu0 %v10422_v51  ;;  %6976 = vmatprep.subr.bf16.mxu1 %v10424_v56  ;;  %v10469_v51 = vcombine.low %v326_v63, %v330_v35  ;;  %v346_v56 = vld [vmem:[#allocation5 + $0x8e0] sm:$0xff]  ;;  %v10479_v62 = vcombine.low %v335_v47, %v339_v49  ;;  %v10518_v63 = vcombine.high %v374_v27, %v378_v28  ;;  %v387_v39 = vld [vmem:[#allocation5 + $0xa28] sm:$0xff] }
  0xa6   :  { %v10486_v0 = vcombine.high %v342_v55, %v346_v56  ;;  %v382_v35 = vld [vmem:[#allocation5 + $0xa00] sm:$0xff] }
  0xa8   :  { %6608 = vmatpush1.bf16.msra.mxu0 %v10421_v58  ;;  %6977 = vmatpush1.bf16.msra.mxu1 %v10423_v60  ;;  %v10480_v58 = vcombine.high %v335_v47, %v339_v49  ;;  %v347_v60 = vld [vmem:[#allocation5 + $0x8e8] sm:$0xff] }
  0xa9   :  { %6609 = vmatprep.subr.bf16.mxu0 %v10430_v61  ;;  %6978 = vmatprep.subr.bf16.mxu1 %v10432_v2  ;;  %v10477_v61 = vcombine.low %v334_v45, %v338_v46  ;;  %v354_v2 = vld [vmem:[#allocation5 + $0x920] sm:$0xff]  ;;  %v10487_v7 = vcombine.low %v343_v57, %v347_v60  ;;  %v391_v47 = vld [vmem:[#allocation5 + $0xa48] sm:$0xff] }
  0xaa   :  { %v10494_v8 = vcombine.high %v350_v1, %v354_v2  ;;  %v390_v45 = vld [vmem:[#allocation5 + $0xa40] sm:$0xff]  ;;  %v395_v49 = vld [vmem:[#allocation5 + $0xa68] sm:$0xff] }
  0xab   :  { %v394_v46 = vld [vmem:[#allocation5 + $0xa60] sm:$0xff] }
  0xac   :  { %6610 = vmatpush1.bf16.msra.mxu0 %v10429_v4  ;;  %6979 = vmatpush1.bf16.msra.mxu1 %v10431_v5  ;;  %v10488_v4 = vcombine.high %v343_v57, %v347_v60  ;;  %v355_v5 = vld [vmem:[#allocation5 + $0x928] sm:$0xff] }
  0xad   :  { %6611 = vmatprep.subr.bf16.mxu0 %v10438_v6  ;;  %6980 = vmatprep.subr.bf16.mxu1 %v10440_v11  ;;  %v10485_v6 = vcombine.low %v342_v55, %v346_v56  ;;  %v362_v11 = vld [vmem:[#allocation5 + $0x960] sm:$0xff]  ;;  %v10495_v16 = vcombine.low %v351_v3, %v355_v5  ;;  %v399_v57 = vld [vmem:[#allocation5 + $0xa88] sm:$0xff] }
  0xae   :  { %v10502_v17 = vcombine.high %v358_v10, %v362_v11  ;;  %v398_v55 = vld [vmem:[#allocation5 + $0xa80] sm:$0xff]  ;;  %v403_v60 = vld [vmem:[#allocation5 + $0xaa8] sm:$0xff] }
  0xaf   :  { %v402_v56 = vld [vmem:[#allocation5 + $0xaa0] sm:$0xff] }
  0xb0   :  { %6612 = vmatpush1.bf16.msra.mxu0 %v10437_v13  ;;  %6981 = vmatpush1.bf16.msra.mxu1 %v10439_v14  ;;  %v10496_v13 = vcombine.high %v351_v3, %v355_v5  ;;  %v363_v14 = vld [vmem:[#allocation5 + $0x968] sm:$0xff] }
  0xb1   :  { %6613 = vmatprep.subr.bf16.mxu0 %v10446_v15  ;;  %6982 = vmatprep.subr.bf16.mxu1 %v10448_v19  ;;  %v10493_v15 = vcombine.low %v350_v1, %v354_v2  ;;  %v370_v19 = vld [vmem:[#allocation5 + $0x9a0] sm:$0xff]  ;;  %v10504_v21 = vcombine.high %v359_v12, %v363_v14  ;;  %v407_v3 = vld [vmem:[#allocation5 + $0xac8] sm:$0xff] }
  0xb2   :  { %v10510_v26 = vcombine.high %v366_v18, %v370_v19  ;;  %v406_v1 = vld [vmem:[#allocation5 + $0xac0] sm:$0xff]  ;;  %v411_v5 = vld [vmem:[#allocation5 + $0xae8] sm:$0xff] }
  0xb3   :  { %v410_v2 = vld [vmem:[#allocation5 + $0xae0] sm:$0xff] }
  0xb4   :  { %6614 = vmatpush1.bf16.msra.mxu0 %v10445_v22  ;;  %6983 = vmatpush1.bf16.msra.mxu1 %v10447_v24  ;;  %v371_v22 = vld [vmem:[#allocation5 + $0x9a8] sm:$0xff]  ;;  %v10501_v24 = vcombine.low %v358_v10, %v362_v11  ;;  %v414_v10 = vld [vmem:[#allocation5 + $0xb00] sm:$0xff] }
  0xb5   :  { %6615 = vmatprep.subr.bf16.mxu0 %v10454_v25  ;;  %6984 = vmatprep.subr.bf16.mxu1 %v10456_v29  ;;  %v10503_v25 = vcombine.low %v359_v12, %v363_v14  ;;  %v375_v29 = vld [vmem:[#allocation5 + $0x9c8] sm:$0xff]  ;;  %v10512_v30 = vcombine.high %v367_v20, %v371_v22  ;;  %v418_v11 = vld [vmem:[#allocation5 + $0xb20] sm:$0xff] }
  0xb6   :  { %v415_v12 = vld [vmem:[#allocation5 + $0xb08] sm:$0xff] }
  0xb7   :  { %v419_v14 = vld [vmem:[#allocation5 + $0xb28] sm:$0xff] }
  0xb8   :  { %6616 = vmatpush1.bf16.msra.mxu0 %v10453_v32  ;;  %6985 = vmatpush1.bf16.msra.mxu1 %v10455_v59  ;;  %v379_v32 = vld [vmem:[#allocation5 + $0x9e8] sm:$0xff]  ;;  %v10509_v59 = vcombine.low %v366_v18, %v370_v19  ;;  %v422_v18 = vld [vmem:[#allocation5 + $0xb40] sm:$0xff] }
  0xb9   :  { %6626 = vmatprep.subr.bf16.mxu0 %v10462_v33  ;;  %6995 = vmatprep.subr.bf16.mxu1 %v10464_v37  ;;  %v10511_v33 = vcombine.low %v367_v20, %v371_v22  ;;  %v383_v37 = vld [vmem:[#allocation5 + $0xa08] sm:$0xff]  ;;  %v10520_v38 = vcombine.high %v375_v29, %v379_v32  ;;  %v426_v19 = vld [vmem:[#allocation5 + $0xb60] sm:$0xff] }
  0xba   :  { %v423_v20 = vld [vmem:[#allocation5 + $0xb48] sm:$0xff] }
  0xbb   :  { %6618 = vmatmul.mubr.bf16.vlgmr.msra.gmra.mrb[0].mxu0 %v12417_v40  ;;  %6987 = vmatmul.mubr.bf16.vlgmr.msra.gmra.mrb[0].mxu1 %v12417_v40  ;;  %v427_v22 = vld [vmem:[#allocation5 + $0xb68] sm:$0xff] }
  0xbc   :  { %6627 = vmatpush1.bf16.msra.mxu0 %v10461_v41  ;;  %6996 = vmatpush1.bf16.msra.mxu1 %v10463_v42  ;;  %v10517_v41 = vcombine.low %v374_v27, %v378_v28  ;;  %v10519_v42 = vcombine.low %v375_v29, %v379_v32  ;;  %v430_v27 = vld [vmem:[#allocation5 + $0xb80] sm:$0xff]  ;;  %v431_v29 = vld [vmem:[#allocation5 + $0xb88] sm:$0xff] }
  0xbd   :  { %6628 = vmatprep.subr.bf16.mxu0 %v10470_v44  ;;  %6997 = vmatprep.subr.bf16.mxu1 %v10472_v48  ;;  %v10526_v44 = vcombine.high %v382_v35, %v386_v36  ;;  %v10528_v48 = vcombine.high %v383_v37, %v387_v39  ;;  %v434_v28 = vld [vmem:[#allocation5 + $0xba0] sm:$0xff]  ;;  %v435_v32 = vld [vmem:[#allocation5 + $0xba8] sm:$0xff] }
  0xbe   :  { %6658 = vmatprep.mubr.bf16.mxu0 %v12420_v50  ;;  %7027 = vmatprep.mubr.bf16.mxu1 %v12420_v50 }
  0xc0   :  { %6629 = vmatpush1.bf16.msra.mxu0 %v10469_v51  ;;  %6998 = vmatpush1.bf16.msra.mxu1 %v10471_v52  ;;  %v10525_v51 = vcombine.low %v382_v35, %v386_v36  ;;  %v10527_v52 = vcombine.low %v383_v37, %v387_v39  ;;  %v438_v35 = vld [vmem:[#allocation5 + $0xbc0] sm:$0xff]  ;;  %v439_v37 = vld [vmem:[#allocation5 + $0xbc8] sm:$0xff] }
  0xc1   :  { %6630 = vmatprep.subr.bf16.mxu0 %v10478_v54  ;;  %6999 = vmatprep.subr.bf16.mxu1 %v10480_v58  ;;  %v10534_v54 = vcombine.high %v390_v45, %v394_v46  ;;  %v10536_v58 = vcombine.high %v391_v47, %v395_v49  ;;  %v442_v36 = vld [vmem:[#allocation5 + $0xbe0] sm:$0xff]  ;;  %v443_v39 = vld [vmem:[#allocation5 + $0xbe8] sm:$0xff] }
  0xc4   :  { %6631 = vmatpush1.bf16.msra.mxu0 %v10477_v61  ;;  %7000 = vmatpush1.bf16.msra.mxu1 %v10479_v62  ;;  %v10533_v61 = vcombine.low %v390_v45, %v394_v46  ;;  %v10535_v62 = vcombine.low %v391_v47, %v395_v49  ;;  %v446_v45 = vld [vmem:[#allocation5 + $0xc00] sm:$0xff]  ;;  %v447_v47 = vld [vmem:[#allocation5 + $0xc08] sm:$0xff] }
  0xc5   :  { %6632 = vmatprep.subr.bf16.mxu0 %v10486_v0  ;;  %7001 = vmatprep.subr.bf16.mxu1 %v10488_v4  ;;  %v10542_v0 = vcombine.high %v398_v55, %v402_v56  ;;  %v10544_v4 = vcombine.high %v399_v57, %v403_v60  ;;  %v450_v46 = vld [vmem:[#allocation5 + $0xc20] sm:$0xff]  ;;  %v451_v49 = vld [vmem:[#allocation5 + $0xc28] sm:$0xff] }
  0xc8   :  { %6633 = vmatpush1.bf16.msra.mxu0 %v10485_v6  ;;  %7002 = vmatpush1.bf16.msra.mxu1 %v10487_v7  ;;  %v10541_v6 = vcombine.low %v398_v55, %v402_v56  ;;  %v10543_v7 = vcombine.low %v399_v57, %v403_v60  ;;  %v454_v55 = vld [vmem:[#allocation5 + $0xc40] sm:$0xff]  ;;  %v10592_v57 = vcombine.high %v447_v47, %v451_v49  ;;  %v459_v60 = vld [vmem:[#allocation5 + $0xc68] sm:$0xff] }
  0xc9   :  { %6634 = vmatprep.subr.bf16.mxu0 %v10494_v8  ;;  %7003 = vmatprep.subr.bf16.mxu1 %v10496_v13  ;;  %v10550_v8 = vcombine.high %v406_v1, %v410_v2  ;;  %v10552_v13 = vcombine.high %v407_v3, %v411_v5  ;;  %v458_v56 = vld [vmem:[#allocation5 + $0xc60] sm:$0xff] }
  0xcc   :  { %6635 = vmatpush1.bf16.msra.mxu0 %v10493_v15  ;;  %7004 = vmatpush1.bf16.msra.mxu1 %v10495_v16  ;;  %v10549_v15 = vcombine.low %v406_v1, %v410_v2  ;;  %v10551_v16 = vcombine.low %v407_v3, %v411_v5  ;;  %v10598_v1 = vcombine.high %v454_v55, %v458_v56  ;;  %v462_v3 = vld [vmem:[#allocation5 + $0xc80] sm:$0xff] }
  0xcd   :  { %6636 = vmatprep.subr.bf16.mxu0 %v10502_v17  ;;  %7005 = vmatprep.subr.bf16.mxu1 %v10504_v21  ;;  %v10558_v17 = vcombine.high %v414_v10, %v418_v11  ;;  %v10560_v21 = vcombine.high %v415_v12, %v419_v14  ;;  %v12432_v5 = vcombine.high %v12420_v50, %v12420_v50 }
  0xd0   :  { %6637 = vmatpush1.bf16.msra.mxu0 %v10501_v24  ;;  %7006 = vmatpush1.bf16.msra.mxu1 %v10503_v25  ;;  %v10557_v24 = vcombine.low %v414_v10, %v418_v11  ;;  %v10559_v25 = vcombine.low %v415_v12, %v419_v14  ;;  %v470_v12 = vld [vmem:[#allocation5 + $0xcc0] sm:$0xff]  ;;  %v471_v14 = vld [vmem:[#allocation5 + $0xcc8] sm:$0xff] }
  0xd1   :  { %6638 = vmatprep.subr.bf16.mxu0 %v10510_v26  ;;  %7007 = vmatprep.subr.bf16.mxu1 %v10512_v30  ;;  %v10566_v26 = vcombine.high %v422_v18, %v426_v19  ;;  %v10568_v30 = vcombine.high %v423_v20, %v427_v22 }
  0xd4   :  { %6639 = vmatpush1.bf16.msra.mxu0 %v10509_v59  ;;  %7008 = vmatpush1.bf16.msra.mxu1 %v10511_v33  ;;  %v10565_v59 = vcombine.low %v422_v18, %v426_v19  ;;  %v10567_v33 = vcombine.low %v423_v20, %v427_v22  ;;  %v478_v20 = vld [vmem:[#allocation5 + $0xd00] sm:$0xff]  ;;  %v479_v22 = vld [vmem:[#allocation5 + $0xd08] sm:$0xff] }
  0xd5   :  { %6640 = vmatprep.subr.bf16.mxu0 %v10518_v63  ;;  %7009 = vmatprep.subr.bf16.mxu1 %v10520_v38  ;;  %v10574_v63 = vcombine.high %v430_v27, %v434_v28  ;;  %v10576_v38 = vcombine.high %v431_v29, %v435_v32 }
  0xd8   :  { %6641 = vmatpush1.bf16.msra.mxu0 %v10517_v41  ;;  %7010 = vmatpush1.bf16.msra.mxu1 %v10519_v42  ;;  %v10573_v41 = vcombine.low %v430_v27, %v434_v28  ;;  %v10575_v42 = vcombine.low %v431_v29, %v435_v32  ;;  %v486_v29 = vld [vmem:[#allocation5 + $0xd40] sm:$0xff]  ;;  %v487_v32 = vld [vmem:[#allocation5 + $0xd48] sm:$0xff] }
  0xd9   :  { %6642 = vmatprep.subr.bf16.mxu0 %v10526_v44  ;;  %7011 = vmatprep.subr.bf16.mxu1 %v10528_v48  ;;  %v10582_v44 = vcombine.high %v438_v35, %v442_v36  ;;  %v10584_v48 = vcombine.high %v439_v37, %v443_v39 }
  0xdc   :  { %6643 = vmatpush1.bf16.msra.mxu0 %v10525_v51  ;;  %7012 = vmatpush1.bf16.msra.mxu1 %v10527_v52  ;;  %v10581_v51 = vcombine.low %v438_v35, %v442_v36  ;;  %v10583_v52 = vcombine.low %v439_v37, %v443_v39  ;;  %v494_v37 = vld [vmem:[#allocation5 + $0xd80] sm:$0xff]  ;;  %v495_v39 = vld [vmem:[#allocation5 + $0xd88] sm:$0xff] }
  0xdd   :  { %6644 = vmatprep.subr.bf16.mxu0 %v10534_v54  ;;  %7013 = vmatprep.subr.bf16.mxu1 %v10536_v58  ;;  %v10590_v54 = vcombine.high %v446_v45, %v450_v46  ;;  %v455_v58 = vld [vmem:[#allocation5 + $0xc48] sm:$0xff] }
  0xde   :  { %v10600_v2 = vcombine.high %v455_v58, %v459_v60 }
  0xe0   :  { %6645 = vmatpush1.bf16.msra.mxu0 %v10533_v61  ;;  %7014 = vmatpush1.bf16.msra.mxu1 %v10535_v62  ;;  %v12428_v61 = vrot.slane %v12411_v31, %v12381_v53  ;;  %v10589_v62 = vcombine.low %v446_v45, %v450_v46  ;;  %v10597_v31 = vcombine.low %v454_v55, %v458_v56 }
  0xe1   :  { %6646 = vmatprep.subr.bf16.mxu0 %v10542_v0  ;;  %7015 = vmatprep.subr.bf16.mxu1 %v10544_v4  ;;  %v10591_v0 = vcombine.low %v447_v47, %v451_v49  ;;  %v466_v4 = vld [vmem:[#allocation5 + $0xca0] sm:$0xff]  ;;  %v503_v49 = vld [vmem:[#allocation5 + $0xdc8] sm:$0xff] }
  0xe2   :  { %v10606_v10 = vcombine.high %v462_v3, %v466_v4  ;;  %v502_v47 = vld [vmem:[#allocation5 + $0xdc0] sm:$0xff] }
  0xe4   :  { %6647 = vmatpush1.bf16.msra.mxu0 %v10541_v6  ;;  %7016 = vmatpush1.bf16.msra.mxu1 %v10543_v7  ;;  %v463_v6 = vld [vmem:[#allocation5 + $0xc88] sm:$0xff] }
  0xe5   :  { %6648 = vmatprep.subr.bf16.mxu0 %v10550_v8  ;;  %7017 = vmatprep.subr.bf16.mxu1 %v10552_v13  ;;  %v467_v7 = vld [vmem:[#allocation5 + $0xca8] sm:$0xff]  ;;  %v10599_v8 = vcombine.low %v455_v58, %v459_v60  ;;  %v474_v13 = vld [vmem:[#allocation5 + $0xce0] sm:$0xff] }
  0xe6   :  { %v10608_v11 = vcombine.high %v463_v6, %v467_v7  ;;  %v10614_v18 = vcombine.high %v470_v12, %v474_v13  ;;  %v514_v58 = vld [vmem:[#allocation5 + $0xe20] sm:$0xff]  ;;  %v511_v60 = vld [vmem:[#allocation5 + $0xe08] sm:$0xff] }
  0xe8   :  { %6649 = vmatpush1.bf16.msra.mxu0 %v10549_v15  ;;  %7018 = vmatpush1.bf16.msra.mxu1 %v10551_v16  ;;  %v475_v15 = vld [vmem:[#allocation5 + $0xce8] sm:$0xff]  ;;  %v10605_v16 = vcombine.low %v462_v3, %v466_v4  ;;  %v518_v4 = vld [vmem:[#allocation5 + $0xe40] sm:$0xff] }
  0xe9   :  { %6650 = vmatprep.subr.bf16.mxu0 %v10558_v17  ;;  %7019 = vmatprep.subr.bf16.mxu1 %v10560_v21  ;;  %v10607_v17 = vcombine.low %v463_v6, %v467_v7  ;;  %v10616_v19 = vcombine.high %v471_v14, %v475_v15  ;;  %v482_v21 = vld [vmem:[#allocation5 + $0xd20] sm:$0xff]  ;;  %v519_v7 = vld [vmem:[#allocation5 + $0xe48] sm:$0xff] }
  0xea   :  { %v10622_v27 = vcombine.high %v478_v20, %v482_v21  ;;  %v522_v6 = vld [vmem:[#allocation5 + $0xe60] sm:$0xff] }
  0xec   :  { %6651 = vmatpush1.bf16.msra.mxu0 %v10557_v24  ;;  %7020 = vmatpush1.bf16.msra.mxu1 %v10559_v25  ;;  %v483_v24 = vld [vmem:[#allocation5 + $0xd28] sm:$0xff]  ;;  %v10613_v25 = vcombine.low %v470_v12, %v474_v13  ;;  %v526_v13 = vld [vmem:[#allocation5 + $0xe80] sm:$0xff] }
  0xed   :  { %6652 = vmatprep.subr.bf16.mxu0 %v10566_v26  ;;  %7021 = vmatprep.subr.bf16.mxu1 %v10568_v30  ;;  %v10615_v26 = vcombine.low %v471_v14, %v475_v15  ;;  %v10624_v28 = vcombine.high %v479_v22, %v483_v24  ;;  %v490_v30 = vld [vmem:[#allocation5 + $0xd60] sm:$0xff]  ;;  %v527_v15 = vld [vmem:[#allocation5 + $0xe88] sm:$0xff] }
  0xee   :  { %v10630_v35 = vcombine.high %v486_v29, %v490_v30  ;;  %v530_v14 = vld [vmem:[#allocation5 + $0xea0] sm:$0xff] }
  0xf0   :  { %6653 = vmatpush1.bf16.msra.mxu0 %v10565_v59  ;;  %7022 = vmatpush1.bf16.msra.mxu1 %v10567_v33  ;;  %v491_v59 = vld [vmem:[#allocation5 + $0xd68] sm:$0xff]  ;;  %v10621_v33 = vcombine.low %v478_v20, %v482_v21  ;;  %v534_v21 = vld [vmem:[#allocation5 + $0xec0] sm:$0xff] }
  0xf1   :  { %6654 = vmatprep.subr.bf16.mxu0 %v10574_v63  ;;  %7023 = vmatprep.subr.bf16.mxu1 %v10576_v38  ;;  %v10623_v63 = vcombine.low %v479_v22, %v483_v24  ;;  %v10632_v36 = vcombine.high %v487_v32, %v491_v59  ;;  %v498_v38 = vld [vmem:[#allocation5 + $0xda0] sm:$0xff]  ;;  %v535_v24 = vld [vmem:[#allocation5 + $0xec8] sm:$0xff] }
  0xf2   :  { %v10638_v45 = vcombine.high %v494_v37, %v498_v38  ;;  %v538_v22 = vld [vmem:[#allocation5 + $0xee0] sm:$0xff] }
  0xf4   :  { %6655 = vmatpush1.bf16.msra.mxu0 %v10573_v41  ;;  %7024 = vmatpush1.bf16.msra.mxu1 %v10575_v42  ;;  %v499_v41 = vld [vmem:[#allocation5 + $0xda8] sm:$0xff]  ;;  %v10629_v42 = vcombine.low %v486_v29, %v490_v30  ;;  %v542_v30 = vld [vmem:[#allocation5 + $0xf00] sm:$0xff] }
  0xf5   :  { %6656 = vmatprep.subr.bf16.mxu0 %v10582_v44  ;;  %7025 = vmatprep.subr.bf16.mxu1 %v10584_v48  ;;  %v10631_v44 = vcombine.low %v487_v32, %v491_v59  ;;  %v10640_v46 = vcombine.high %v495_v39, %v499_v41  ;;  %v506_v48 = vld [vmem:[#allocation5 + $0xde0] sm:$0xff]  ;;  %v543_v59 = vld [vmem:[#allocation5 + $0xf08] sm:$0xff] }
  0xf6   :  { %v10646_v55 = vcombine.high %v502_v47, %v506_v48  ;;  %v546_v32 = vld [vmem:[#allocation5 + $0xf20] sm:$0xff] }
  0xf8   :  { %6657 = vmatpush1.bf16.msra.mxu0 %v10581_v51  ;;  %7026 = vmatpush1.bf16.msra.mxu1 %v10583_v52  ;;  %v507_v51 = vld [vmem:[#allocation5 + $0xde8] sm:$0xff]  ;;  %v10637_v52 = vcombine.low %v494_v37, %v498_v38  ;;  %v550_v38 = vld [vmem:[#allocation5 + $0xf40] sm:$0xff] }
  0xf9   :  { %6667 = vmatprep.subr.bf16.mxu0 %v10590_v54  ;;  %7036 = vmatprep.subr.bf16.mxu1 %v10592_v57  ;;  %v10639_v54 = vcombine.low %v495_v39, %v499_v41  ;;  %v10648_v56 = vcombine.high %v503_v49, %v507_v51  ;;  %v510_v57 = vld [vmem:[#allocation5 + $0xe00] sm:$0xff]  ;;  %v551_v41 = vld [vmem:[#allocation5 + $0xf48] sm:$0xff] }
  0xfa   :  { %v554_v39 = vld [vmem:[#allocation5 + $0xf60] sm:$0xff] }
  0xfb   :  { %6659 = vmatmul.mubr.bf16.vlgmr.msra.gmra.mrb[0].mxu0 %v12428_v61  ;;  %7028 = vmatmul.mubr.bf16.vlgmr.msra.gmra.mrb[0].mxu1 %v12428_v61 }
  0xfc   :  { %6668 = vmatpush1.bf16.msra.mxu0 %v10589_v62  ;;  %7037 = vmatpush1.bf16.msra.mxu1 %v10591_v0  ;;  %v515_v62 = vld [vmem:[#allocation5 + $0xe28] sm:$0xff]  ;;  %v10645_v0 = vcombine.low %v502_v47, %v506_v48  ;;  %v558_v48 = vld [vmem:[#allocation5 + $0xf80] sm:$0xff] }
  0xfd   :  { %6669 = vmatprep.subr.bf16.mxu0 %v10598_v1  ;;  %7038 = vmatprep.subr.bf16.mxu1 %v10600_v2  ;;  %v10647_v1 = vcombine.low %v503_v49, %v507_v51  ;;  %v10654_v2 = vcombine.high %v510_v57, %v514_v58  ;;  %v10656_v3 = vcombine.high %v511_v60, %v515_v62  ;;  %v562_v49 = vld [vmem:[#allocation5 + $0xfa0] sm:$0xff]  ;;  %v559_v51 = vld [vmem:[#allocation5 + $0xf88] sm:$0xff] }
  0xfe   :  { %6699 = vmatprep.mubr.bf16.mxu0 %v12432_v5  ;;  %7068 = vmatprep.mubr.bf16.mxu1 %v12432_v5 }
 0x100   :  { %6670 = vmatpush1.bf16.msra.mxu0 %v10597_v31  ;;  %7039 = vmatpush1.bf16.msra.mxu1 %v10599_v8  ;;  %v523_v31 = vld [vmem:[#allocation5 + $0xe68] sm:$0xff]  ;;  %v10653_v8 = vcombine.low %v510_v57, %v514_v58  ;;  %v566_v58 = vld [vmem:[#allocation5 + $0xfc0] sm:$0xff] }
 0x101   :  { %6671 = vmatprep.subr.bf16.mxu0 %v10606_v10  ;;  %7040 = vmatprep.subr.bf16.mxu1 %v10608_v11  ;;  %v10655_v10 = vcombine.low %v511_v60, %v515_v62  ;;  %v10662_v11 = vcombine.high %v518_v4, %v522_v6  ;;  %v10664_v12 = vcombine.high %v519_v7, %v523_v31  ;;  %v570_v60 = vld [vmem:[#allocation5 + $0xfe0] sm:$0xff]  ;;  %v567_v62 = vld [vmem:[#allocation5 + $0xfc8] sm:$0xff] }
 0x104   :  { %6672 = vmatpush1.bf16.msra.mxu0 %v10605_v16  ;;  %7041 = vmatpush1.bf16.msra.mxu1 %v10607_v17  ;;  %v531_v16 = vld [vmem:[#allocation5 + $0xea8] sm:$0xff]  ;;  %v10661_v17 = vcombine.low %v518_v4, %v522_v6  ;;  %v10710_v4 = vcombine.high %v566_v58, %v570_v60 }
 0x105   :  { %6673 = vmatprep.subr.bf16.mxu0 %v10614_v18  ;;  %7042 = vmatprep.subr.bf16.mxu1 %v10616_v19  ;;  %v10663_v18 = vcombine.low %v519_v7, %v523_v31  ;;  %v10670_v19 = vcombine.high %v526_v13, %v530_v14  ;;  %v10672_v20 = vcombine.high %v527_v15, %v531_v16  ;;  %v574_v7 = vld [vmem:[#allocation5 + $0x1000] sm:$0xff] }
 0x106   :  { %v578_v31 = vld [vmem:[#allocation5 + $0x1020] sm:$0xff] }
 0x108   :  { %6674 = vmatpush1.bf16.msra.mxu0 %v10613_v25  ;;  %7043 = vmatpush1.bf16.msra.mxu1 %v10615_v26  ;;  %v539_v25 = vld [vmem:[#allocation5 + $0xee8] sm:$0xff]  ;;  %v10669_v26 = vcombine.low %v526_v13, %v530_v14  ;;  %v10718_v14 = vcombine.high %v574_v7, %v578_v31 }
 0x109   :  { %6675 = vmatprep.subr.bf16.mxu0 %v10622_v27  ;;  %7044 = vmatprep.subr.bf16.mxu1 %v10624_v28  ;;  %v10671_v27 = vcombine.low %v527_v15, %v531_v16  ;;  %v10678_v28 = vcombine.high %v534_v21, %v538_v22  ;;  %v10680_v29 = vcombine.high %v535_v24, %v539_v25  ;;  %v582_v16 = vld [vmem:[#allocation5 + $0x1040] sm:$0xff] }
 0x10c   :  { %6676 = vmatpush1.bf16.msra.mxu0 %v10621_v33  ;;  %7045 = vmatpush1.bf16.msra.mxu1 %v10623_v63  ;;  %v547_v33 = vld [vmem:[#allocation5 + $0xf28] sm:$0xff]  ;;  %v10677_v63 = vcombine.low %v534_v21, %v538_v22  ;;  %v10717_v22 = vcombine.low %v574_v7, %v578_v31 }
 0x10d   :  { %6677 = vmatprep.subr.bf16.mxu0 %v10630_v35  ;;  %7046 = vmatprep.subr.bf16.mxu1 %v10632_v36  ;;  %v10679_v35 = vcombine.low %v535_v24, %v539_v25  ;;  %v10686_v36 = vcombine.high %v542_v30, %v546_v32  ;;  %v10688_v37 = vcombine.high %v543_v59, %v547_v33  ;;  %v587_v21 = vld [vmem:[#allocation5 + $0x1068] sm:$0xff] }
 0x10e   :  { %v623_v7 = vld [vmem:[#allocation5 + $0x1188] sm:$0xff] }
 0x10f   :  { %v627_v31 = vld [vmem:[#allocation5 + $0x11a8] sm:$0xff] }
 0x110   :  { %6678 = vmatpush1.bf16.msra.mxu0 %v10629_v42  ;;  %7047 = vmatpush1.bf16.msra.mxu1 %v10631_v44  ;;  %v555_v42 = vld [vmem:[#allocation5 + $0xf68] sm:$0xff]  ;;  %v10685_v44 = vcombine.low %v542_v30, %v546_v32 }
 0x111   :  { %6679 = vmatprep.subr.bf16.mxu0 %v10638_v45  ;;  %7048 = vmatprep.subr.bf16.mxu1 %v10640_v46  ;;  %v10687_v45 = vcombine.low %v543_v59, %v547_v33  ;;  %v10694_v46 = vcombine.high %v550_v38, %v554_v39  ;;  %v10696_v47 = vcombine.high %v551_v41, %v555_v42  ;;  %v591_v30 = vld [vmem:[#allocation5 + $0x1088] sm:$0xff] }
 0x112   :  { %v595_v32 = vld [vmem:[#allocation5 + $0x10a8] sm:$0xff] }
 0x114   :  { %6680 = vmatpush1.bf16.msra.mxu0 %v10637_v52  ;;  %7049 = vmatpush1.bf16.msra.mxu1 %v10639_v54  ;;  %v563_v52 = vld [vmem:[#allocation5 + $0xfa8] sm:$0xff]  ;;  %v10693_v54 = vcombine.low %v550_v38, %v554_v39 }
 0x115   :  { %6681 = vmatprep.subr.bf16.mxu0 %v10646_v55  ;;  %7050 = vmatprep.subr.bf16.mxu1 %v10648_v56  ;;  %v10695_v55 = vcombine.low %v551_v41, %v555_v42  ;;  %v10702_v56 = vcombine.high %v558_v48, %v562_v49  ;;  %v10704_v57 = vcombine.high %v559_v51, %v563_v52  ;;  %v599_v38 = vld [vmem:[#allocation5 + $0x10c8] sm:$0xff] }
 0x116   :  { %v603_v39 = vld [vmem:[#allocation5 + $0x10e8] sm:$0xff]  ;;  %v10735_v42 = vcombine.low %v591_v30, %v595_v32 }
 0x118   :  { %6682 = vmatpush1.bf16.msra.mxu0 %v10645_v0  ;;  %7051 = vmatpush1.bf16.msra.mxu1 %v10647_v1  ;;  %v571_v0 = vld [vmem:[#allocation5 + $0xfe8] sm:$0xff]  ;;  %v12438_v1 = vld [vmem:[#allocation2 + $0x8] sm:$0xff] }
 0x119   :  { %6683 = vmatprep.subr.bf16.mxu0 %v10654_v2  ;;  %7052 = vmatprep.subr.bf16.mxu1 %v10656_v3  ;;  %v10701_v2 = vcombine.low %v558_v48, %v562_v49  ;;  %v10703_v3 = vcombine.low %v559_v51, %v563_v52  ;;  %v10712_v6 = vcombine.high %v567_v62, %v571_v0  ;;  %v607_v48 = vld [vmem:[#allocation5 + $0x1108] sm:$0xff] }
 0x11a   :  { %v10711_v13 = vcombine.low %v567_v62, %v571_v0  ;;  %v611_v49 = vld [vmem:[#allocation5 + $0x1128] sm:$0xff]  ;;  %v10743_v52 = vcombine.low %v599_v38, %v603_v39 }
 0x11b   :  { %v10751_v0 = vcombine.low %v607_v48, %v611_v49 }
 0x11c   :  { %6684 = vmatpush1.bf16.msra.mxu0 %v10653_v8  ;;  %7053 = vmatpush1.bf16.msra.mxu1 %v10655_v10  ;;  %v12442_v8 = vrot.slane %v12438_v1, %v12381_v53  ;;  %v575_v10 = vld [vmem:[#allocation5 + $0x1008] sm:$0xff] }
 0x11d   :  { %6685 = vmatprep.subr.bf16.mxu0 %v10662_v11  ;;  %7054 = vmatprep.subr.bf16.mxu1 %v10664_v12  ;;  %v579_v11 = vld [vmem:[#allocation5 + $0x1028] sm:$0xff]  ;;  %v10709_v12 = vcombine.low %v566_v58, %v570_v60 }
 0x11e   :  { %v10720_v15 = vcombine.high %v575_v10, %v579_v11  ;;  %v10719_v24 = vcombine.low %v575_v10, %v579_v11  ;;  %v615_v58 = vld [vmem:[#allocation5 + $0x1148] sm:$0xff] }
 0x11f   :  { %v619_v60 = vld [vmem:[#allocation5 + $0x1168] sm:$0xff] }
 0x120   :  { %6686 = vmatpush1.bf16.msra.mxu0 %v10661_v17  ;;  %7055 = vmatpush1.bf16.msra.mxu1 %v10663_v18  ;;  %v586_v17 = vld [vmem:[#allocation5 + $0x1060] sm:$0xff]  ;;  %v1219_v18 = vcombine.high %v12442_v8, %v12442_v8  ;;  %v10759_v11 = vcombine.low %v615_v58, %v619_v60 }
 0x121   :  { %6687 = vmatprep.subr.bf16.mxu0 %v10670_v19  ;;  %7056 = vmatprep.subr.bf16.mxu1 %v10672_v20  ;;  %v12448_v19 = vcombine.high %v12428_v61, %v12428_v61  ;;  %v583_v20 = vld [vmem:[#allocation5 + $0x1048] sm:$0xff]  ;;  %v10726_v25 = vcombine.high %v582_v16, %v586_v17  ;;  %v10725_v59 = vcombine.low %v582_v16, %v586_v17 }
 0x122   :  { %v10727_v33 = vcombine.low %v583_v20, %v587_v21  ;;  %v631_v16 = vld [vmem:[#allocation5 + $0x11c8] sm:$0xff] }
 0x123   :  { %v635_v17 = vld [vmem:[#allocation5 + $0x11e8] sm:$0xff] }
 0x124   :  { %6688 = vmatpush1.bf16.msra.mxu0 %v10669_v26  ;;  %7057 = vmatpush1.bf16.msra.mxu1 %v10671_v27  ;;  %v10728_v26 = vcombine.high %v583_v20, %v587_v21  ;;  %v590_v27 = vld [vmem:[#allocation5 + $0x1080] sm:$0xff]  ;;  %v10767_v20 = vcombine.low %v623_v7, %v627_v31 }
 0x125   :  { %6689 = vmatprep.subr.bf16.mxu0 %v10678_v28  ;;  %7058 = vmatprep.subr.bf16.mxu1 %v10680_v29  ;;  %v594_v28 = vld [vmem:[#allocation5 + $0x10a0] sm:$0xff]  ;;  %v12451_v29 = vrot.slane %v1219_v18, %v12381_v53 }
 0x126   :  { %v10733_v41 = vcombine.low %v590_v27, %v594_v28 }
 0x128   :  { %6690 = vmatpush1.bf16.msra.mxu0 %v10677_v63  ;;  %7059 = vmatpush1.bf16.msra.mxu1 %v10679_v35  ;;  %v10734_v63 = vcombine.high %v590_v27, %v594_v28  ;;  %v10736_v35 = vcombine.high %v591_v30, %v595_v32  ;;  %v643_v27 = vld [vmem:[#allocation5 + $0x1228] sm:$0xff]  ;;  %v10775_v30 = vcombine.low %v631_v16, %v635_v17 }
 0x129   :  { %6691 = vmatprep.subr.bf16.mxu0 %v10686_v36  ;;  %7060 = vmatprep.subr.bf16.mxu1 %v10688_v37  ;;  %v598_v36 = vld [vmem:[#allocation5 + $0x10c0] sm:$0xff] }
 0x12a   :  { %v602_v37 = vld [vmem:[#allocation5 + $0x10e0] sm:$0xff] }
 0x12b   :  { %v10741_v51 = vcombine.low %v598_v36, %v602_v37 }
 0x12c   :  { %6692 = vmatpush1.bf16.msra.mxu0 %v10685_v44  ;;  %7061 = vmatpush1.bf16.msra.mxu1 %v10687_v45  ;;  %v10742_v44 = vcombine.high %v598_v36, %v602_v37  ;;  %v10744_v45 = vcombine.high %v599_v38, %v603_v39  ;;  %v651_v36 = vld [vmem:[#allocation5 + $0x1268] sm:$0xff] }
 0x12d   :  { %6693 = vmatprep.subr.bf16.mxu0 %v10694_v46  ;;  %7062 = vmatprep.subr.bf16.mxu1 %v10696_v47  ;;  %v606_v46 = vld [vmem:[#allocation5 + $0x1100] sm:$0xff] }
 0x12e   :  { %v610_v47 = vld [vmem:[#allocation5 + $0x1120] sm:$0xff] }
 0x12f   :  { %v10749_v62 = vcombine.low %v606_v46, %v610_v47 }
 0x130   :  { %6694 = vmatpush1.bf16.msra.mxu0 %v10693_v54  ;;  %7063 = vmatpush1.bf16.msra.mxu1 %v10695_v55  ;;  %v10750_v54 = vcombine.high %v606_v46, %v610_v47  ;;  %v10752_v55 = vcombine.high %v607_v48, %v611_v49  ;;  %v659_v46 = vld [vmem:[#allocation5 + $0x12a8] sm:$0xff] }
 0x131   :  { %6695 = vmatprep.subr.bf16.mxu0 %v10702_v56  ;;  %7064 = vmatprep.subr.bf16.mxu1 %v10704_v57  ;;  %v614_v56 = vld [vmem:[#allocation5 + $0x1140] sm:$0xff] }
 0x132   :  { %v618_v57 = vld [vmem:[#allocation5 + $0x1160] sm:$0xff] }
 0x133   :  { %v10757_v10 = vcombine.low %v614_v56, %v618_v57 }
 0x134   :  { %6696 = vmatpush1.bf16.msra.mxu0 %v10701_v2  ;;  %7065 = vmatpush1.bf16.msra.mxu1 %v10703_v3  ;;  %v10758_v2 = vcombine.high %v614_v56, %v618_v57  ;;  %v10760_v3 = vcombine.high %v615_v58, %v619_v60  ;;  %v667_v56 = vld [vmem:[#allocation5 + $0x12e8] sm:$0xff] }
 0x135   :  { %6697 = vmatprep.subr.bf16.mxu0 %v10710_v4  ;;  %7066 = vmatprep.subr.bf16.mxu1 %v10712_v6  ;;  %v622_v4 = vld [vmem:[#allocation5 + $0x1180] sm:$0xff] }
 0x136   :  { %v626_v6 = vld [vmem:[#allocation5 + $0x11a0] sm:$0xff] }
 0x137   :  { %v10765_v18 = vcombine.low %v622_v4, %v626_v6 }
 0x138   :  { %6698 = vmatpush1.bf16.msra.mxu0 %v10709_v12  ;;  %7067 = vmatpush1.bf16.msra.mxu1 %v10711_v13  ;;  %v10766_v12 = vcombine.high %v622_v4, %v626_v6  ;;  %v10768_v13 = vcombine.high %v623_v7, %v627_v31  ;;  %v675_v4 = vld [vmem:[#allocation5 + $0x1328] sm:$0xff] }
 0x139   :  { %6708 = vmatprep.subr.bf16.mxu0 %v10718_v14  ;;  %7077 = vmatprep.subr.bf16.mxu1 %v10720_v15  ;;  %v630_v14 = vld [vmem:[#allocation5 + $0x11c0] sm:$0xff] }
 0x13a   :  { %v634_v15 = vld [vmem:[#allocation5 + $0x11e0] sm:$0xff] }
 0x13b   :  { %6700 = vmatmul.mubr.bf16.vlgmr.msra.gmra.mrb[0].mxu0 %v12448_v19  ;;  %7069 = vmatmul.mubr.bf16.vlgmr.msra.gmra.mrb[0].mxu1 %v12448_v19  ;;  %v10774_v21 = vcombine.high %v630_v14, %v634_v15  ;;  %v10773_v28 = vcombine.low %v630_v14, %v634_v15  ;;  %v683_v14 = vld [vmem:[#allocation5 + $0x1368] sm:$0xff] }
 0x13c   :  { %6709 = vmatpush1.bf16.msra.mxu0 %v10717_v22  ;;  %7078 = vmatpush1.bf16.msra.mxu1 %v10719_v24  ;;  %v10776_v22 = vcombine.high %v631_v16, %v635_v17  ;;  %v638_v24 = vld [vmem:[#allocation5 + $0x1200] sm:$0xff] }
 0x13d   :  { %6710 = vmatprep.subr.bf16.mxu0 %v10726_v25  ;;  %7079 = vmatprep.subr.bf16.mxu1 %v10728_v26  ;;  %v642_v25 = vld [vmem:[#allocation5 + $0x1220] sm:$0xff]  ;;  %v639_v26 = vld [vmem:[#allocation5 + $0x1208] sm:$0xff] }
 0x13e   :  { %6740 = vmatprep.mubr.bf16.mxu0 %v12451_v29  ;;  %7109 = vmatprep.mubr.bf16.mxu1 %v12451_v29  ;;  %v10782_v32 = vcombine.high %v638_v24, %v642_v25  ;;  %v10781_v37 = vcombine.low %v638_v24, %v642_v25  ;;  %v10783_v38 = vcombine.low %v639_v26, %v643_v27  ;;  %v691_v24 = vld [vmem:[#allocation5 + $0x13a8] sm:$0xff] }
 0x140   :  { %6711 = vmatpush1.bf16.msra.mxu0 %v10725_v59  ;;  %7080 = vmatpush1.bf16.msra.mxu1 %v10727_v33  ;;  %v10784_v59 = vcombine.high %v639_v26, %v643_v27  ;;  %v646_v33 = vld [vmem:[#allocation5 + $0x1240] sm:$0xff] }
 0x141   :  { %6712 = vmatprep.subr.bf16.mxu0 %v10734_v63  ;;  %7081 = vmatprep.subr.bf16.mxu1 %v10736_v35  ;;  %v650_v63 = vld [vmem:[#allocation5 + $0x1260] sm:$0xff]  ;;  %v647_v35 = vld [vmem:[#allocation5 + $0x1248] sm:$0xff] }
 0x142   :  { %v10790_v39 = vcombine.high %v646_v33, %v650_v63  ;;  %v10789_v47 = vcombine.low %v646_v33, %v650_v63  ;;  %v10791_v48 = vcombine.low %v647_v35, %v651_v36  ;;  %v699_v33 = vld [vmem:[#allocation5 + $0x13e8] sm:$0xff] }
 0x144   :  { %6713 = vmatpush1.bf16.msra.mxu0 %v10733_v41  ;;  %7082 = vmatpush1.bf16.msra.mxu1 %v10735_v42  ;;  %v10792_v41 = vcombine.high %v647_v35, %v651_v36  ;;  %v654_v42 = vld [vmem:[#allocation5 + $0x1280] sm:$0xff] }
 0x145   :  { %6714 = vmatprep.subr.bf16.mxu0 %v10742_v44  ;;  %7083 = vmatprep.subr.bf16.mxu1 %v10744_v45  ;;  %v658_v44 = vld [vmem:[#allocation5 + $0x12a0] sm:$0xff]  ;;  %v655_v45 = vld [vmem:[#allocation5 + $0x1288] sm:$0xff] }
 0x146   :  { %v10798_v49 = vcombine.high %v654_v42, %v658_v44  ;;  %v10797_v57 = vcombine.low %v654_v42, %v658_v44  ;;  %v10799_v58 = vcombine.low %v655_v45, %v659_v46  ;;  %v707_v42 = vld [vmem:[#allocation5 + $0x1428] sm:$0xff] }
 0x148   :  { %6715 = vmatpush1.bf16.msra.mxu0 %v10741_v51  ;;  %7084 = vmatpush1.bf16.msra.mxu1 %v10743_v52  ;;  %v10800_v51 = vcombine.high %v655_v45, %v659_v46  ;;  %v662_v52 = vld [vmem:[#allocation5 + $0x12c0] sm:$0xff] }
 0x149   :  { %6716 = vmatprep.subr.bf16.mxu0 %v10750_v54  ;;  %7085 = vmatprep.subr.bf16.mxu1 %v10752_v55  ;;  %v666_v54 = vld [vmem:[#allocation5 + $0x12e0] sm:$0xff]  ;;  %v663_v55 = vld [vmem:[#allocation5 + $0x12c8] sm:$0xff] }
 0x14a   :  { %v10806_v60 = vcombine.high %v662_v52, %v666_v54  ;;  %v10805_v6 = vcombine.low %v662_v52, %v666_v54  ;;  %v10807_v7 = vcombine.low %v663_v55, %v667_v56  ;;  %v711_v52 = vld [vmem:[#allocation5 + $0x1448] sm:$0xff] }
 0x14b   :  { %v715_v54 = vld [vmem:[#allocation5 + $0x1468] sm:$0xff] }
 0x14c   :  { %6717 = vmatpush1.bf16.msra.mxu0 %v10749_v62  ;;  %7086 = vmatpush1.bf16.msra.mxu1 %v10751_v0  ;;  %v10808_v62 = vcombine.high %v663_v55, %v667_v56  ;;  %v670_v0 = vld [vmem:[#allocation5 + $0x1300] sm:$0xff] }
 0x14d   :  { %6718 = vmatprep.subr.bf16.mxu0 %v10758_v2  ;;  %7087 = vmatprep.subr.bf16.mxu1 %v10760_v3  ;;  %v674_v2 = vld [vmem:[#allocation5 + $0x1320] sm:$0xff]  ;;  %v671_v3 = vld [vmem:[#allocation5 + $0x1308] sm:$0xff] }
 0x14e   :  { %v10814_v31 = vcombine.high %v670_v0, %v674_v2  ;;  %v10813_v15 = vcombine.low %v670_v0, %v674_v2  ;;  %v10815_v16 = vcombine.low %v671_v3, %v675_v4  ;;  %v12463_v0 = vcombine.high %v12451_v29, %v12451_v29  ;;  %v723_v2 = vld [vmem:[#allocation5 + $0x14a8] sm:$0xff] }
 0x150   :  { %6719 = vmatpush1.bf16.msra.mxu0 %v10757_v10  ;;  %7088 = vmatpush1.bf16.msra.mxu1 %v10759_v11  ;;  %v10816_v10 = vcombine.high %v671_v3, %v675_v4  ;;  %v678_v11 = vld [vmem:[#allocation5 + $0x1340] sm:$0xff]  ;;  %v10855_v4 = vcombine.low %v711_v52, %v715_v54 }
 0x151   :  { %6720 = vmatprep.subr.bf16.mxu0 %v10766_v12  ;;  %7089 = vmatprep.subr.bf16.mxu1 %v10768_v13  ;;  %v682_v12 = vld [vmem:[#allocation5 + $0x1360] sm:$0xff]  ;;  %v679_v13 = vld [vmem:[#allocation5 + $0x1348] sm:$0xff] }
 0x152   :  { %v10822_v17 = vcombine.high %v678_v11, %v682_v12  ;;  %v10821_v25 = vcombine.low %v678_v11, %v682_v12  ;;  %v10823_v26 = vcombine.low %v679_v13, %v683_v14  ;;  %v727_v11 = vld [vmem:[#allocation5 + $0x14c8] sm:$0xff] }
 0x153   :  { %v731_v12 = vld [vmem:[#allocation5 + $0x14e8] sm:$0xff] }
 0x154   :  { %6721 = vmatpush1.bf16.msra.mxu0 %v10765_v18  ;;  %7090 = vmatpush1.bf16.msra.mxu1 %v10767_v20  ;;  %v10824_v18 = vcombine.high %v679_v13, %v683_v14  ;;  %v686_v20 = vld [vmem:[#allocation5 + $0x1380] sm:$0xff] }
 0x155   :  { %6722 = vmatprep.subr.bf16.mxu0 %v10774_v21  ;;  %7091 = vmatprep.subr.bf16.mxu1 %v10776_v22  ;;  %v690_v21 = vld [vmem:[#allocation5 + $0x13a0] sm:$0xff]  ;;  %v687_v22 = vld [vmem:[#allocation5 + $0x1388] sm:$0xff] }
 0x156   :  { %v10830_v27 = vcombine.high %v686_v20, %v690_v21  ;;  %v10829_v63 = vcombine.low %v686_v20, %v690_v21  ;;  %v10831_v35 = vcombine.low %v687_v22, %v691_v24  ;;  %v735_v20 = vld [vmem:[#allocation5 + $0x1508] sm:$0xff] }
 0x157   :  { %v739_v21 = vld [vmem:[#allocation5 + $0x1528] sm:$0xff] }
 0x158   :  { %6723 = vmatpush1.bf16.msra.mxu0 %v10773_v28  ;;  %7092 = vmatpush1.bf16.msra.mxu1 %v10775_v30  ;;  %v10832_v28 = vcombine.high %v687_v22, %v691_v24  ;;  %v694_v30 = vld [vmem:[#allocation5 + $0x13c0] sm:$0xff]  ;;  %v10871_v24 = vcombine.low %v727_v11, %v731_v12 }
 0x159   :  { %6724 = vmatprep.subr.bf16.mxu0 %v10782_v32  ;;  %7093 = vmatprep.subr.bf16.mxu1 %v10784_v59  ;;  %v698_v32 = vld [vmem:[#allocation5 + $0x13e0] sm:$0xff]  ;;  %v695_v59 = vld [vmem:[#allocation5 + $0x13c8] sm:$0xff] }
 0x15a   :  { %v10838_v36 = vcombine.high %v694_v30, %v698_v32  ;;  %v10837_v44 = vcombine.low %v694_v30, %v698_v32  ;;  %v10839_v45 = vcombine.low %v695_v59, %v699_v33  ;;  %v743_v30 = vld [vmem:[#allocation5 + $0x1548] sm:$0xff] }
 0x15b   :  { %v747_v32 = vld [vmem:[#allocation5 + $0x1568] sm:$0xff] }
 0x15c   :  { %6725 = vmatpush1.bf16.msra.mxu0 %v10781_v37  ;;  %7094 = vmatpush1.bf16.msra.mxu1 %v10783_v38  ;;  %v10840_v37 = vcombine.high %v695_v59, %v699_v33  ;;  %v702_v38 = vld [vmem:[#allocation5 + $0x1400] sm:$0xff]  ;;  %v10879_v33 = vcombine.low %v735_v20, %v739_v21 }
 0x15d   :  { %6726 = vmatprep.subr.bf16.mxu0 %v10790_v39  ;;  %7095 = vmatprep.subr.bf16.mxu1 %v10792_v41  ;;  %v706_v39 = vld [vmem:[#allocation5 + $0x1420] sm:$0xff]  ;;  %v703_v41 = vld [vmem:[#allocation5 + $0x1408] sm:$0xff] }
 0x15e   :  { %v10846_v46 = vcombine.high %v702_v38, %v706_v39  ;;  %v10845_v55 = vcombine.low %v702_v38, %v706_v39  ;;  %v10847_v56 = vcombine.low %v703_v41, %v707_v42  ;;  %v751_v38 = vld [vmem:[#allocation5 + $0x1588] sm:$0xff] }
 0x15f   :  { %v755_v39 = vld [vmem:[#allocation5 + $0x15a8] sm:$0xff] }
 0x160   :  { %6727 = vmatpush1.bf16.msra.mxu0 %v10789_v47  ;;  %7096 = vmatpush1.bf16.msra.mxu1 %v10791_v48  ;;  %v10848_v47 = vcombine.high %v703_v41, %v707_v42  ;;  %v710_v48 = vld [vmem:[#allocation5 + $0x1440] sm:$0xff]  ;;  %v10887_v42 = vcombine.low %v743_v30, %v747_v32 }
 0x161   :  { %6728 = vmatprep.subr.bf16.mxu0 %v10798_v49  ;;  %7097 = vmatprep.subr.bf16.mxu1 %v10800_v51  ;;  %v714_v49 = vld [vmem:[#allocation5 + $0x1460] sm:$0xff]  ;;  %v12459_v51 = vrot.slane %v12442_v8, %v12381_v53  ;;  %v719_v8 = vld [vmem:[#allocation5 + $0x1488] sm:$0xff] }
 0x162   :  { %v10853_v3 = vcombine.low %v710_v48, %v714_v49  ;;  %v10863_v14 = vcombine.low %v719_v8, %v723_v2 }
 0x164   :  { %6729 = vmatpush1.bf16.msra.mxu0 %v10797_v57  ;;  %7098 = vmatpush1.bf16.msra.mxu1 %v10799_v58  ;;  %v10854_v57 = vcombine.high %v710_v48, %v714_v49  ;;  %v10856_v58 = vcombine.high %v711_v52, %v715_v54  ;;  %v759_v48 = vld [vmem:[#allocation5 + $0x15c8] sm:$0xff]  ;;  %v10895_v54 = vcombine.low %v751_v38, %v755_v39 }
 0x165   :  { %6730 = vmatprep.subr.bf16.mxu0 %v10806_v60  ;;  %7099 = vmatprep.subr.bf16.mxu1 %v10808_v62  ;;  %v718_v60 = vld [vmem:[#allocation5 + $0x1480] sm:$0xff]  ;;  %v763_v49 = vld [vmem:[#allocation5 + $0x15e8] sm:$0xff] }
 0x166   :  { %v722_v62 = vld [vmem:[#allocation5 + $0x14a0] sm:$0xff] }
 0x167   :  { %v10861_v13 = vcombine.low %v718_v60, %v722_v62 }
 0x168   :  { %6731 = vmatpush1.bf16.msra.mxu0 %v10805_v6  ;;  %7100 = vmatpush1.bf16.msra.mxu1 %v10807_v7  ;;  %v10862_v6 = vcombine.high %v718_v60, %v722_v62  ;;  %v10864_v7 = vcombine.high %v719_v8, %v723_v2  ;;  %v767_v60 = vld [vmem:[#allocation5 + $0x1608] sm:$0xff]  ;;  %v10903_v2 = vcombine.low %v759_v48, %v763_v49 }
 0x169   :  { %6732 = vmatprep.subr.bf16.mxu0 %v10814_v31  ;;  %7101 = vmatprep.subr.bf16.mxu1 %v10816_v10  ;;  %v726_v31 = vld [vmem:[#allocation5 + $0x14c0] sm:$0xff]  ;;  %v771_v62 = vld [vmem:[#allocation5 + $0x1628] sm:$0xff] }
 0x16a   :  { %v730_v10 = vld [vmem:[#allocation5 + $0x14e0] sm:$0xff] }
 0x16b   :  { %v10869_v22 = vcombine.low %v726_v31, %v730_v10 }
 0x16c   :  { %6733 = vmatpush1.bf16.msra.mxu0 %v10813_v15  ;;  %7102 = vmatpush1.bf16.msra.mxu1 %v10815_v16  ;;  %v10870_v15 = vcombine.high %v726_v31, %v730_v10  ;;  %v10872_v16 = vcombine.high %v727_v11, %v731_v12  ;;  %v775_v31 = vld [vmem:[#allocation5 + $0x1648] sm:$0xff]  ;;  %v10911_v12 = vcombine.low %v767_v60, %v771_v62 }
 0x16d   :  { %6734 = vmatprep.subr.bf16.mxu0 %v10822_v17  ;;  %7103 = vmatprep.subr.bf16.mxu1 %v10824_v18  ;;  %v734_v17 = vld [vmem:[#allocation5 + $0x1500] sm:$0xff]  ;;  %v779_v10 = vld [vmem:[#allocation5 + $0x1668] sm:$0xff] }
 0x16e   :  { %v738_v18 = vld [vmem:[#allocation5 + $0x1520] sm:$0xff] }
 0x16f   :  { %v10877_v59 = vcombine.low %v734_v17, %v738_v18 }
 0x170   :  { %6735 = vmatpush1.bf16.msra.mxu0 %v10821_v25  ;;  %7104 = vmatpush1.bf16.msra.mxu1 %v10823_v26  ;;  %v10878_v25 = vcombine.high %v734_v17, %v738_v18  ;;  %v10880_v26 = vcombine.high %v735_v20, %v739_v21  ;;  %v783_v17 = vld [vmem:[#allocation5 + $0x1688] sm:$0xff]  ;;  %v10919_v21 = vcombine.low %v775_v31, %v779_v10 }
 0x171   :  { %6736 = vmatprep.subr.bf16.mxu0 %v10830_v27  ;;  %7105 = vmatprep.subr.bf16.mxu1 %v10832_v28  ;;  %v742_v27 = vld [vmem:[#allocation5 + $0x1540] sm:$0xff]  ;;  %v787_v18 = vld [vmem:[#allocation5 + $0x16a8] sm:$0xff] }
 0x172   :  { %v746_v28 = vld [vmem:[#allocation5 + $0x1560] sm:$0xff] }
 0x173   :  { %v10885_v41 = vcombine.low %v742_v27, %v746_v28 }
 0x174   :  { %6737 = vmatpush1.bf16.msra.mxu0 %v10829_v63  ;;  %7106 = vmatpush1.bf16.msra.mxu1 %v10831_v35  ;;  %v10886_v63 = vcombine.high %v742_v27, %v746_v28  ;;  %v10888_v35 = vcombine.high %v743_v30, %v747_v32  ;;  %v791_v27 = vld [vmem:[#allocation5 + $0x16c8] sm:$0xff]  ;;  %v10927_v32 = vcombine.low %v783_v17, %v787_v18 }
 0x175   :  { %6738 = vmatprep.subr.bf16.mxu0 %v10838_v36  ;;  %7107 = vmatprep.subr.bf16.mxu1 %v10840_v37  ;;  %v750_v36 = vld [vmem:[#allocation5 + $0x1580] sm:$0xff]  ;;  %v795_v28 = vld [vmem:[#allocation5 + $0x16e8] sm:$0xff] }
 0x176   :  { %v754_v37 = vld [vmem:[#allocation5 + $0x15a0] sm:$0xff] }
 0x177   :  { %v10893_v52 = vcombine.low %v750_v36, %v754_v37 }
 0x178   :  { %6739 = vmatpush1.bf16.msra.mxu0 %v10837_v44  ;;  %7108 = vmatpush1.bf16.msra.mxu1 %v10839_v45  ;;  %v10894_v44 = vcombine.high %v750_v36, %v754_v37  ;;  %v10896_v45 = vcombine.high %v751_v38, %v755_v39  ;;  %v799_v36 = vld [vmem:[#allocation5 + $0x1708] sm:$0xff]  ;;  %v10935_v39 = vcombine.low %v791_v27, %v795_v28 }
 0x179   :  { %6749 = vmatprep.subr.bf16.mxu0 %v10846_v46  ;;  %7118 = vmatprep.subr.bf16.mxu1 %v10848_v47  ;;  %v758_v46 = vld [vmem:[#allocation5 + $0x15c0] sm:$0xff]  ;;  %v803_v37 = vld [vmem:[#allocation5 + $0x1728] sm:$0xff] }
 0x17a   :  { %v762_v47 = vld [vmem:[#allocation5 + $0x15e0] sm:$0xff] }
 0x17b   :  { %6741 = vmatmul.mubr.bf16.vlgmr.msra.gmra.mrb[0].mxu0 %v12459_v51  ;;  %7110 = vmatmul.mubr.bf16.vlgmr.msra.gmra.mrb[0].mxu1 %v12459_v51  ;;  %v10901_v8 = vcombine.low %v758_v46, %v762_v47 }
 0x17c   :  { %6750 = vmatpush1.bf16.msra.mxu0 %v10845_v55  ;;  %7119 = vmatpush1.bf16.msra.mxu1 %v10847_v56  ;;  %v10902_v55 = vcombine.high %v758_v46, %v762_v47  ;;  %v10904_v56 = vcombine.high %v759_v48, %v763_v49  ;;  %v807_v46 = vld [vmem:[#allocation5 + $0x1748] sm:$0xff]  ;;  %v10943_v49 = vcombine.low %v799_v36, %v803_v37 }
 0x17d   :  { %6751 = vmatprep.subr.bf16.mxu0 %v10854_v57  ;;  %7120 = vmatprep.subr.bf16.mxu1 %v10856_v58  ;;  %v766_v57 = vld [vmem:[#allocation5 + $0x1600] sm:$0xff]  ;;  %v811_v47 = vld [vmem:[#allocation5 + $0x1768] sm:$0xff] }
 0x17e   :  { %6781 = vmatprep.mubr.bf16.mxu0 %v12463_v0  ;;  %7150 = vmatprep.mubr.bf16.mxu1 %v12463_v0  ;;  %v770_v58 = vld [vmem:[#allocation5 + $0x1620] sm:$0xff] }
 0x17f   :  { %v10909_v11 = vcombine.low %v766_v57, %v770_v58 }
 0x180   :  { %6752 = vmatpush1.bf16.msra.mxu0 %v10853_v3  ;;  %7121 = vmatpush1.bf16.msra.mxu1 %v10855_v4  ;;  %v10910_v3 = vcombine.high %v766_v57, %v770_v58  ;;  %v10912_v4 = vcombine.high %v767_v60, %v771_v62  ;;  %v815_v57 = vld [vmem:[#allocation5 + $0x1788] sm:$0xff]  ;;  %v10951_v62 = vcombine.low %v807_v46, %v811_v47 }
 0x181   :  { %6753 = vmatprep.subr.bf16.mxu0 %v10862_v6  ;;  %7122 = vmatprep.subr.bf16.mxu1 %v10864_v7  ;;  %v774_v6 = vld [vmem:[#allocation5 + $0x1640] sm:$0xff]  ;;  %v819_v58 = vld [vmem:[#allocation5 + $0x17a8] sm:$0xff] }
 0x182   :  { %v778_v7 = vld [vmem:[#allocation5 + $0x1660] sm:$0xff] }
 0x183   :  { %v10917_v20 = vcombine.low %v774_v6, %v778_v7 }
 0x184   :  { %6754 = vmatpush1.bf16.msra.mxu0 %v10861_v13  ;;  %7123 = vmatpush1.bf16.msra.mxu1 %v10863_v14  ;;  %v10918_v13 = vcombine.high %v774_v6, %v778_v7  ;;  %v10920_v14 = vcombine.high %v775_v31, %v779_v10  ;;  %v1204_v6 = vcombine.high %v12438_v1, %v12438_v1  ;;  %v823_v7 = vld [vmem:[#allocation5 + $0x17c8] sm:$0xff] }
 0x185   :  { %6755 = vmatprep.subr.bf16.mxu0 %v10870_v15  ;;  %7124 = vmatprep.subr.bf16.mxu1 %v10872_v16  ;;  %v782_v15 = vld [vmem:[#allocation5 + $0x1680] sm:$0xff]  ;;  %v827_v31 = vld [vmem:[#allocation5 + $0x17e8] sm:$0xff] }
 0x186   :  { %v786_v16 = vld [vmem:[#allocation5 + $0x16a0] sm:$0xff]  ;;  %v10967_v1 = vcombine.low %v823_v7, %v827_v31 }
 0x187   :  { %v10925_v30 = vcombine.low %v782_v15, %v786_v16 }
 0x188   :  { %6756 = vmatpush1.bf16.msra.mxu0 %v10869_v22  ;;  %7125 = vmatpush1.bf16.msra.mxu1 %v10871_v24  ;;  %v10926_v22 = vcombine.high %v782_v15, %v786_v16  ;;  %v10928_v24 = vcombine.high %v783_v17, %v787_v18  ;;  %v834_v15 = vld [vmem:[#allocation5 + $0x1820] sm:$0xff]  ;;  %v12472_v16 = vrot.slane %v1204_v6, %v12381_v53  ;;  %v831_v17 = vld [vmem:[#allocation5 + $0x1808] sm:$0xff] }
 0x189   :  { %6757 = vmatprep.subr.bf16.mxu0 %v10878_v25  ;;  %7126 = vmatprep.subr.bf16.mxu1 %v10880_v26  ;;  %v790_v25 = vld [vmem:[#allocation5 + $0x16c0] sm:$0xff]  ;;  %v835_v18 = vld [vmem:[#allocation5 + $0x1828] sm:$0xff] }
 0x18a   :  { %v794_v26 = vld [vmem:[#allocation5 + $0x16e0] sm:$0xff] }
 0x18b   :  { %v10933_v38 = vcombine.low %v790_v25, %v794_v26  ;;  %v870_v6 = vld [vmem:[#allocation5 + $0x1940] sm:$0xff] }
 0x18c   :  { %6758 = vmatpush1.bf16.msra.mxu0 %v10877_v59  ;;  %7127 = vmatpush1.bf16.msra.mxu1 %v10879_v33  ;;  %v10934_v59 = vcombine.high %v790_v25, %v794_v26  ;;  %v10936_v33 = vcombine.high %v791_v27, %v795_v28  ;;  %v842_v25 = vld [vmem:[#allocation5 + $0x1860] sm:$0xff]  ;;  %v1220_v26 = vcombine.high %v12472_v16, %v12472_v16  ;;  %v839_v28 = vld [vmem:[#allocation5 + $0x1848] sm:$0xff] }
 0x18d   :  { %6759 = vmatprep.subr.bf16.mxu0 %v10886_v63  ;;  %7128 = vmatprep.subr.bf16.mxu1 %v10888_v35  ;;  %v798_v63 = vld [vmem:[#allocation5 + $0x1700] sm:$0xff]  ;;  %v12478_v27 = vcombine.high %v12459_v51, %v12459_v51 }
 0x18e   :  { %v802_v35 = vld [vmem:[#allocation5 + $0x1720] sm:$0xff] }
 0x18f   :  { %v10941_v48 = vcombine.low %v798_v63, %v802_v35 }
 0x190   :  { %6760 = vmatpush1.bf16.msra.mxu0 %v10885_v41  ;;  %7129 = vmatpush1.bf16.msra.mxu1 %v10887_v42  ;;  %v10942_v41 = vcombine.high %v798_v63, %v802_v35  ;;  %v10944_v42 = vcombine.high %v799_v36, %v803_v37  ;;  %v846_v35 = vld [vmem:[#allocation5 + $0x1880] sm:$0xff]  ;;  %v12481_v37 = vrot.slane %v1220_v26, %v12381_v53 }
 0x191   :  { %6761 = vmatprep.subr.bf16.mxu0 %v10894_v44  ;;  %7130 = vmatprep.subr.bf16.mxu1 %v10896_v45  ;;  %v806_v44 = vld [vmem:[#allocation5 + $0x1740] sm:$0xff] }
 0x192   :  { %v810_v45 = vld [vmem:[#allocation5 + $0x1760] sm:$0xff] }
 0x193   :  { %v10949_v60 = vcombine.low %v806_v44, %v810_v45  ;;  %v850_v36 = vld [vmem:[#allocation5 + $0x18a0] sm:$0xff] }
 0x194   :  { %6762 = vmatpush1.bf16.msra.mxu0 %v10893_v52  ;;  %7131 = vmatpush1.bf16.msra.mxu1 %v10895_v54  ;;  %v10950_v52 = vcombine.high %v806_v44, %v810_v45  ;;  %v10952_v54 = vcombine.high %v807_v46, %v811_v47  ;;  %v10990_v44 = vcombine.high %v846_v35, %v850_v36  ;;  %v854_v46 = vld [vmem:[#allocation5 + $0x18c0] sm:$0xff] }
 0x195   :  { %6763 = vmatprep.subr.bf16.mxu0 %v10902_v55  ;;  %7132 = vmatprep.subr.bf16.mxu1 %v10904_v56  ;;  %v814_v55 = vld [vmem:[#allocation5 + $0x1780] sm:$0xff] }
 0x196   :  { %v818_v56 = vld [vmem:[#allocation5 + $0x17a0] sm:$0xff] }
 0x197   :  { %v10957_v10 = vcombine.low %v814_v55, %v818_v56  ;;  %v858_v47 = vld [vmem:[#allocation5 + $0x18e0] sm:$0xff] }
 0x198   :  { %6764 = vmatpush1.bf16.msra.mxu0 %v10901_v8  ;;  %7133 = vmatpush1.bf16.msra.mxu1 %v10903_v2  ;;  %v10958_v8 = vcombine.high %v814_v55, %v818_v56  ;;  %v10960_v2 = vcombine.high %v815_v57, %v819_v58  ;;  %v10998_v55 = vcombine.high %v854_v46, %v858_v47  ;;  %v890_v26 = vld [vmem:[#allocation5 + $0x19e0] sm:$0xff] }
 0x199   :  { %6765 = vmatprep.subr.bf16.mxu0 %v10910_v3  ;;  %7134 = vmatprep.subr.bf16.mxu1 %v10912_v4  ;;  %v822_v3 = vld [vmem:[#allocation5 + $0x17c0] sm:$0xff] }
 0x19a   :  { %v826_v4 = vld [vmem:[#allocation5 + $0x17e0] sm:$0xff] }
 0x19c   :  { %6766 = vmatpush1.bf16.msra.mxu0 %v10909_v11  ;;  %7135 = vmatpush1.bf16.msra.mxu1 %v10911_v12  ;;  %v10959_v11 = vcombine.low %v815_v57, %v819_v58  ;;  %v10966_v12 = vcombine.high %v822_v3, %v826_v4  ;;  %v862_v57 = vld [vmem:[#allocation5 + $0x1900] sm:$0xff] }
 0x19d   :  { %6767 = vmatprep.subr.bf16.mxu0 %v10918_v13  ;;  %7136 = vmatprep.subr.bf16.mxu1 %v10920_v14  ;;  %v10968_v13 = vcombine.high %v823_v7, %v827_v31  ;;  %v830_v14 = vld [vmem:[#allocation5 + $0x1800] sm:$0xff]  ;;  %v871_v31 = vld [vmem:[#allocation5 + $0x1948] sm:$0xff] }
 0x19e   :  { %v866_v58 = vld [vmem:[#allocation5 + $0x1920] sm:$0xff] }
 0x19f   :  { %v874_v7 = vld [vmem:[#allocation5 + $0x1960] sm:$0xff] }
 0x1a0   :  { %6768 = vmatpush1.bf16.msra.mxu0 %v10917_v20  ;;  %7137 = vmatpush1.bf16.msra.mxu1 %v10919_v21  ;;  %v10965_v20 = vcombine.low %v822_v3, %v826_v4  ;;  %v10974_v21 = vcombine.high %v830_v14, %v834_v15  ;;  %v11006_v3 = vcombine.high %v862_v57, %v866_v58 }
 0x1a1   :  { %6769 = vmatprep.subr.bf16.mxu0 %v10926_v22  ;;  %7138 = vmatprep.subr.bf16.mxu1 %v10928_v24  ;;  %v10976_v22 = vcombine.high %v831_v17, %v835_v18  ;;  %v838_v24 = vld [vmem:[#allocation5 + $0x1840] sm:$0xff] }
 0x1a4   :  { %6770 = vmatpush1.bf16.msra.mxu0 %v10925_v30  ;;  %7139 = vmatpush1.bf16.msra.mxu1 %v10927_v32  ;;  %v843_v30 = vld [vmem:[#allocation5 + $0x1868] sm:$0xff]  ;;  %v10973_v32 = vcombine.low %v830_v14, %v834_v15  ;;  %v878_v15 = vld [vmem:[#allocation5 + $0x1980] sm:$0xff] }
 0x1a5   :  { %6771 = vmatprep.subr.bf16.mxu0 %v10934_v59  ;;  %7140 = vmatprep.subr.bf16.mxu1 %v10936_v33  ;;  %v10975_v59 = vcombine.low %v831_v17, %v835_v18  ;;  %v10982_v33 = vcombine.high %v838_v24, %v842_v25  ;;  %v10984_v63 = vcombine.high %v839_v28, %v843_v30  ;;  %v882_v17 = vld [vmem:[#allocation5 + $0x19a0] sm:$0xff]  ;;  %v879_v18 = vld [vmem:[#allocation5 + $0x1988] sm:$0xff] }
 0x1a8   :  { %6772 = vmatpush1.bf16.msra.mxu0 %v10933_v38  ;;  %7141 = vmatpush1.bf16.msra.mxu1 %v10935_v39  ;;  %v847_v38 = vld [vmem:[#allocation5 + $0x1888] sm:$0xff] }
 0x1a9   :  { %6773 = vmatprep.subr.bf16.mxu0 %v10942_v41  ;;  %7142 = vmatprep.subr.bf16.mxu1 %v10944_v42  ;;  %v851_v39 = vld [vmem:[#allocation5 + $0x18a8] sm:$0xff]  ;;  %v10981_v41 = vcombine.low %v838_v24, %v842_v25  ;;  %v10983_v42 = vcombine.low %v839_v28, %v843_v30  ;;  %v886_v25 = vld [vmem:[#allocation5 + $0x19c0] sm:$0xff] }
 0x1aa   :  { %v10992_v45 = vcombine.high %v847_v38, %v851_v39  ;;  %v887_v28 = vld [vmem:[#allocation5 + $0x19c8] sm:$0xff] }
 0x1ab   :  { %v891_v30 = vld [vmem:[#allocation5 + $0x19e8] sm:$0xff] }
 0x1ac   :  { %6774 = vmatpush1.bf16.msra.mxu0 %v10941_v48  ;;  %7143 = vmatpush1.bf16.msra.mxu1 %v10943_v49  ;;  %v855_v48 = vld [vmem:[#allocation5 + $0x18c8] sm:$0xff] }
 0x1ad   :  { %6775 = vmatprep.subr.bf16.mxu0 %v10950_v52  ;;  %7144 = vmatprep.subr.bf16.mxu1 %v10952_v54  ;;  %v859_v49 = vld [vmem:[#allocation5 + $0x18e8] sm:$0xff]  ;;  %v10989_v52 = vcombine.low %v846_v35, %v850_v36  ;;  %v10991_v54 = vcombine.low %v847_v38, %v851_v39  ;;  %v894_v35 = vld [vmem:[#allocation5 + $0x1a00] sm:$0xff] }
 0x1ae   :  { %v11000_v56 = vcombine.high %v855_v48, %v859_v49  ;;  %v898_v36 = vld [vmem:[#allocation5 + $0x1a20] sm:$0xff]  ;;  %v895_v38 = vld [vmem:[#allocation5 + $0x1a08] sm:$0xff] }
 0x1af   :  { %v899_v39 = vld [vmem:[#allocation5 + $0x1a28] sm:$0xff] }
 0x1b0   :  { %6776 = vmatpush1.bf16.msra.mxu0 %v10949_v60  ;;  %7145 = vmatpush1.bf16.msra.mxu1 %v10951_v62  ;;  %v863_v60 = vld [vmem:[#allocation5 + $0x1908] sm:$0xff] }
 0x1b1   :  { %6777 = vmatprep.subr.bf16.mxu0 %v10958_v8  ;;  %7146 = vmatprep.subr.bf16.mxu1 %v10960_v2  ;;  %v867_v62 = vld [vmem:[#allocation5 + $0x1928] sm:$0xff]  ;;  %v10997_v8 = vcombine.low %v854_v46, %v858_v47  ;;  %v10999_v2 = vcombine.low %v855_v48, %v859_v49  ;;  %v902_v46 = vld [vmem:[#allocation5 + $0x1a40] sm:$0xff] }
 0x1b2   :  { %v11008_v4 = vcombine.high %v863_v60, %v867_v62  ;;  %v906_v47 = vld [vmem:[#allocation5 + $0x1a60] sm:$0xff]  ;;  %v903_v48 = vld [vmem:[#allocation5 + $0x1a48] sm:$0xff] }
 0x1b3   :  { %v907_v49 = vld [vmem:[#allocation5 + $0x1a68] sm:$0xff] }
 0x1b4   :  { %6778 = vmatpush1.bf16.msra.mxu0 %v10957_v10  ;;  %7147 = vmatpush1.bf16.msra.mxu1 %v10959_v11  ;;  %v875_v10 = vld [vmem:[#allocation5 + $0x1968] sm:$0xff]  ;;  %v11005_v11 = vcombine.low %v862_v57, %v866_v58  ;;  %v910_v57 = vld [vmem:[#allocation5 + $0x1a80] sm:$0xff] }
 0x1b5   :  { %6779 = vmatprep.subr.bf16.mxu0 %v10966_v12  ;;  %7148 = vmatprep.subr.bf16.mxu1 %v10968_v13  ;;  %v11007_v12 = vcombine.low %v863_v60, %v867_v62  ;;  %v11014_v13 = vcombine.high %v870_v6, %v874_v7  ;;  %v11016_v14 = vcombine.high %v871_v31, %v875_v10  ;;  %v914_v58 = vld [vmem:[#allocation5 + $0x1aa0] sm:$0xff]  ;;  %v911_v60 = vld [vmem:[#allocation5 + $0x1a88] sm:$0xff] }
 0x1b6   :  { %v915_v62 = vld [vmem:[#allocation5 + $0x1aa8] sm:$0xff] }
 0x1b8   :  { %6780 = vmatpush1.bf16.msra.mxu0 %v10965_v20  ;;  %7149 = vmatpush1.bf16.msra.mxu1 %v10967_v1  ;;  %v883_v20 = vld [vmem:[#allocation5 + $0x19a8] sm:$0xff]  ;;  %v11013_v1 = vcombine.low %v870_v6, %v874_v7  ;;  %v918_v6 = vld [vmem:[#allocation5 + $0x1ac0] sm:$0xff] }
 0x1b9   :  { %6790 = vmatprep.subr.bf16.mxu0 %v10974_v21  ;;  %7159 = vmatprep.subr.bf16.mxu1 %v10976_v22  ;;  %v11015_v21 = vcombine.low %v871_v31, %v875_v10  ;;  %v11022_v22 = vcombine.high %v878_v15, %v882_v17  ;;  %v11024_v24 = vcombine.high %v879_v18, %v883_v20  ;;  %v922_v7 = vld [vmem:[#allocation5 + $0x1ae0] sm:$0xff]  ;;  %v919_v31 = vld [vmem:[#allocation5 + $0x1ac8] sm:$0xff] }
 0x1ba   :  { %v923_v10 = vld [vmem:[#allocation5 + $0x1ae8] sm:$0xff] }
 0x1bb   :  { %6782 = vmatmul.mubr.bf16.vlgmr.msra.gmra.mrb[0].mxu0 %v12478_v27  ;;  %7151 = vmatmul.mubr.bf16.vlgmr.msra.gmra.mrb[0].mxu1 %v12478_v27 }
 0x1bc   :  { %6791 = vmatpush1.bf16.msra.mxu0 %v10973_v32  ;;  %7160 = vmatpush1.bf16.msra.mxu1 %v10975_v59  ;;  %v11021_v32 = vcombine.low %v878_v15, %v882_v17  ;;  %v11023_v59 = vcombine.low %v879_v18, %v883_v20  ;;  %v926_v15 = vld [vmem:[#allocation5 + $0x1b00] sm:$0xff]  ;;  %v927_v18 = vld [vmem:[#allocation5 + $0x1b08] sm:$0xff] }
 0x1bd   :  { %6792 = vmatprep.subr.bf16.mxu0 %v10982_v33  ;;  %7161 = vmatprep.subr.bf16.mxu1 %v10984_v63  ;;  %v11030_v33 = vcombine.high %v886_v25, %v890_v26  ;;  %v11032_v63 = vcombine.high %v887_v28, %v891_v30  ;;  %v930_v17 = vld [vmem:[#allocation5 + $0x1b20] sm:$0xff]  ;;  %v931_v20 = vld [vmem:[#allocation5 + $0x1b28] sm:$0xff] }
 0x1be   :  { %6822 = vmatprep.mubr.bf16.mxu0 %v12481_v37  ;;  %7191 = vmatprep.mubr.bf16.mxu1 %v12481_v37 }
 0x1c0   :  { %6793 = vmatpush1.bf16.msra.mxu0 %v10981_v41  ;;  %7162 = vmatpush1.bf16.msra.mxu1 %v10983_v42  ;;  %v11029_v41 = vcombine.low %v886_v25, %v890_v26  ;;  %v11031_v42 = vcombine.low %v887_v28, %v891_v30  ;;  %v934_v25 = vld [vmem:[#allocation5 + $0x1b40] sm:$0xff]  ;;  %v935_v28 = vld [vmem:[#allocation5 + $0x1b48] sm:$0xff] }
 0x1c1   :  { %6794 = vmatprep.subr.bf16.mxu0 %v10990_v44  ;;  %7163 = vmatprep.subr.bf16.mxu1 %v10992_v45  ;;  %v11038_v44 = vcombine.high %v894_v35, %v898_v36  ;;  %v11040_v45 = vcombine.high %v895_v38, %v899_v39  ;;  %v938_v26 = vld [vmem:[#allocation5 + $0x1b60] sm:$0xff]  ;;  %v939_v30 = vld [vmem:[#allocation5 + $0x1b68] sm:$0xff] }
 0x1c4   :  { %6795 = vmatpush1.bf16.msra.mxu0 %v10989_v52  ;;  %7164 = vmatpush1.bf16.msra.mxu1 %v10991_v54  ;;  %v11037_v52 = vcombine.low %v894_v35, %v898_v36  ;;  %v11039_v54 = vcombine.low %v895_v38, %v899_v39  ;;  %v942_v35 = vld [vmem:[#allocation5 + $0x1b80] sm:$0xff]  ;;  %v943_v38 = vld [vmem:[#allocation5 + $0x1b88] sm:$0xff] }
 0x1c5   :  { %6796 = vmatprep.subr.bf16.mxu0 %v10998_v55  ;;  %7165 = vmatprep.subr.bf16.mxu1 %v11000_v56  ;;  %v11046_v55 = vcombine.high %v902_v46, %v906_v47  ;;  %v11048_v56 = vcombine.high %v903_v48, %v907_v49  ;;  %v946_v36 = vld [vmem:[#allocation5 + $0x1ba0] sm:$0xff]  ;;  %v947_v39 = vld [vmem:[#allocation5 + $0x1ba8] sm:$0xff] }
 0x1c8   :  { %6797 = vmatpush1.bf16.msra.mxu0 %v10997_v8  ;;  %7166 = vmatpush1.bf16.msra.mxu1 %v10999_v2  ;;  %v11045_v8 = vcombine.low %v902_v46, %v906_v47  ;;  %v11047_v2 = vcombine.low %v903_v48, %v907_v49  ;;  %v950_v46 = vld [vmem:[#allocation5 + $0x1bc0] sm:$0xff]  ;;  %v951_v48 = vld [vmem:[#allocation5 + $0x1bc8] sm:$0xff] }
 0x1c9   :  { %6798 = vmatprep.subr.bf16.mxu0 %v11006_v3  ;;  %7167 = vmatprep.subr.bf16.mxu1 %v11008_v4  ;;  %v11054_v3 = vcombine.high %v910_v57, %v914_v58  ;;  %v11056_v4 = vcombine.high %v911_v60, %v915_v62  ;;  %v954_v47 = vld [vmem:[#allocation5 + $0x1be0] sm:$0xff]  ;;  %v955_v49 = vld [vmem:[#allocation5 + $0x1be8] sm:$0xff] }
 0x1cc   :  { %6799 = vmatpush1.bf16.msra.mxu0 %v11005_v11  ;;  %7168 = vmatpush1.bf16.msra.mxu1 %v11007_v12  ;;  %v11053_v11 = vcombine.low %v910_v57, %v914_v58  ;;  %v11055_v12 = vcombine.low %v911_v60, %v915_v62  ;;  %v958_v57 = vld [vmem:[#allocation5 + $0x1c00] sm:$0xff]  ;;  %v959_v60 = vld [vmem:[#allocation5 + $0x1c08] sm:$0xff] }
 0x1cd   :  { %6800 = vmatprep.subr.bf16.mxu0 %v11014_v13  ;;  %7169 = vmatprep.subr.bf16.mxu1 %v11016_v14  ;;  %v11062_v13 = vcombine.high %v918_v6, %v922_v7  ;;  %v11064_v14 = vcombine.high %v919_v31, %v923_v10  ;;  %v962_v58 = vld [vmem:[#allocation5 + $0x1c20] sm:$0xff]  ;;  %v963_v62 = vld [vmem:[#allocation5 + $0x1c28] sm:$0xff] }
 0x1d0   :  { %6801 = vmatpush1.bf16.msra.mxu0 %v11013_v1  ;;  %7170 = vmatpush1.bf16.msra.mxu1 %v11015_v21  ;;  %v11061_v1 = vcombine.low %v918_v6, %v922_v7  ;;  %v11063_v21 = vcombine.low %v919_v31, %v923_v10  ;;  %v966_v6 = vld [vmem:[#allocation5 + $0x1c40] sm:$0xff]  ;;  %v12489_v31 = vrot.slane %v12472_v16, %v12381_v53  ;;  %v967_v10 = vld [vmem:[#allocation5 + $0x1c48] sm:$0xff] }
 0x1d1   :  { %6802 = vmatprep.subr.bf16.mxu0 %v11022_v22  ;;  %7171 = vmatprep.subr.bf16.mxu1 %v11024_v24  ;;  %v11070_v22 = vcombine.high %v926_v15, %v930_v17  ;;  %v11072_v24 = vcombine.high %v927_v18, %v931_v20  ;;  %v970_v7 = vld [vmem:[#allocation5 + $0x1c60] sm:$0xff]  ;;  %v975_v16 = vld [vmem:[#allocation5 + $0x1c88] sm:$0xff] }
 0x1d4   :  { %6803 = vmatpush1.bf16.msra.mxu0 %v11021_v32  ;;  %7172 = vmatpush1.bf16.msra.mxu1 %v11023_v59  ;;  %v11069_v32 = vcombine.low %v926_v15, %v930_v17  ;;  %v11071_v59 = vcombine.low %v927_v18, %v931_v20  ;;  %v974_v17 = vld [vmem:[#allocation5 + $0x1c80] sm:$0xff]  ;;  %v12493_v20 = vcombine.high %v12481_v37, %v12481_v37 }
 0x1d5   :  { %6804 = vmatprep.subr.bf16.mxu0 %v11030_v33  ;;  %7173 = vmatprep.subr.bf16.mxu1 %v11032_v63  ;;  %v11078_v33 = vcombine.high %v934_v25, %v938_v26  ;;  %v11080_v63 = vcombine.high %v935_v28, %v939_v30  ;;  %v978_v18 = vld [vmem:[#allocation5 + $0x1ca0] sm:$0xff] }
 0x1d8   :  { %6805 = vmatpush1.bf16.msra.mxu0 %v11029_v41  ;;  %7174 = vmatpush1.bf16.msra.mxu1 %v11031_v42  ;;  %v11077_v41 = vcombine.low %v934_v25, %v938_v26  ;;  %v11079_v42 = vcombine.low %v935_v28, %v939_v30  ;;  %v982_v26 = vld [vmem:[#allocation5 + $0x1cc0] sm:$0xff]  ;;  %v983_v30 = vld [vmem:[#allocation5 + $0x1cc8] sm:$0xff] }
 0x1d9   :  { %6806 = vmatprep.subr.bf16.mxu0 %v11038_v44  ;;  %7175 = vmatprep.subr.bf16.mxu1 %v11040_v45  ;;  %v11086_v44 = vcombine.high %v942_v35, %v946_v36  ;;  %v11088_v45 = vcombine.high %v943_v38, %v947_v39  ;;  %v986_v28 = vld [vmem:[#allocation5 + $0x1ce0] sm:$0xff] }
 0x1dc   :  { %6807 = vmatpush1.bf16.msra.mxu0 %v11037_v52  ;;  %7176 = vmatpush1.bf16.msra.mxu1 %v11039_v54  ;;  %v11085_v52 = vcombine.low %v942_v35, %v946_v36  ;;  %v11087_v54 = vcombine.low %v943_v38, %v947_v39  ;;  %v990_v36 = vld [vmem:[#allocation5 + $0x1d00] sm:$0xff]  ;;  %v991_v39 = vld [vmem:[#allocation5 + $0x1d08] sm:$0xff] }
 0x1dd   :  { %6808 = vmatprep.subr.bf16.mxu0 %v11046_v55  ;;  %7177 = vmatprep.subr.bf16.mxu1 %v11048_v56  ;;  %v11094_v55 = vcombine.high %v950_v46, %v954_v47  ;;  %v11096_v56 = vcombine.high %v951_v48, %v955_v49  ;;  %v994_v38 = vld [vmem:[#allocation5 + $0x1d20] sm:$0xff] }
 0x1e0   :  { %6809 = vmatpush1.bf16.msra.mxu0 %v11045_v8  ;;  %7178 = vmatpush1.bf16.msra.mxu1 %v11047_v2  ;;  %v11093_v8 = vcombine.low %v950_v46, %v954_v47  ;;  %v11095_v2 = vcombine.low %v951_v48, %v955_v49  ;;  %v998_v47 = vld [vmem:[#allocation5 + $0x1d40] sm:$0xff]  ;;  %v999_v49 = vld [vmem:[#allocation5 + $0x1d48] sm:$0xff] }
 0x1e1   :  { %6810 = vmatprep.subr.bf16.mxu0 %v11054_v3  ;;  %7179 = vmatprep.subr.bf16.mxu1 %v11056_v4  ;;  %v11102_v3 = vcombine.high %v958_v57, %v962_v58  ;;  %v11104_v4 = vcombine.high %v959_v60, %v963_v62  ;;  %v1002_v48 = vld [vmem:[#allocation5 + $0x1d60] sm:$0xff] }
 0x1e4   :  { %6811 = vmatpush1.bf16.msra.mxu0 %v11053_v11  ;;  %7180 = vmatpush1.bf16.msra.mxu1 %v11055_v12  ;;  %v971_v11 = vld [vmem:[#allocation5 + $0x1c68] sm:$0xff]  ;;  %v11101_v12 = vcombine.low %v958_v57, %v962_v58  ;;  %v1006_v58 = vld [vmem:[#allocation5 + $0x1d80] sm:$0xff] }
 0x1e5   :  { %6812 = vmatprep.subr.bf16.mxu0 %v11062_v13  ;;  %7181 = vmatprep.subr.bf16.mxu1 %v11064_v14  ;;  %v11103_v13 = vcombine.low %v959_v60, %v963_v62  ;;  %v11110_v14 = vcombine.high %v966_v6, %v970_v7  ;;  %v11112_v15 = vcombine.high %v967_v10, %v971_v11  ;;  %v1010_v60 = vld [vmem:[#allocation5 + $0x1da0] sm:$0xff]  ;;  %v1007_v62 = vld [vmem:[#allocation5 + $0x1d88] sm:$0xff] }
 0x1e8   :  { %6813 = vmatpush1.bf16.msra.mxu0 %v11061_v1  ;;  %7182 = vmatpush1.bf16.msra.mxu1 %v11063_v21  ;;  %v979_v1 = vld [vmem:[#allocation5 + $0x1ca8] sm:$0xff]  ;;  %v11109_v21 = vcombine.low %v966_v6, %v970_v7  ;;  %v1014_v7 = vld [vmem:[#allocation5 + $0x1dc0] sm:$0xff] }
 0x1e9   :  { %6814 = vmatprep.subr.bf16.mxu0 %v11070_v22  ;;  %7183 = vmatprep.subr.bf16.mxu1 %v11072_v24  ;;  %v11111_v22 = vcombine.low %v967_v10, %v971_v11  ;;  %v11118_v24 = vcombine.high %v974_v17, %v978_v18  ;;  %v11120_v25 = vcombine.high %v975_v16, %v979_v1  ;;  %v1018_v10 = vld [vmem:[#allocation5 + $0x1de0] sm:$0xff]  ;;  %v1015_v11 = vld [vmem:[#allocation5 + $0x1dc8] sm:$0xff] }
 0x1ec   :  { %6815 = vmatpush1.bf16.msra.mxu0 %v11069_v32  ;;  %7184 = vmatpush1.bf16.msra.mxu1 %v11071_v59  ;;  %v987_v32 = vld [vmem:[#allocation5 + $0x1ce8] sm:$0xff]  ;;  %v11117_v59 = vcombine.low %v974_v17, %v978_v18  ;;  %v1022_v18 = vld [vmem:[#allocation5 + $0x1e00] sm:$0xff] }
 0x1ed   :  { %6816 = vmatprep.subr.bf16.mxu0 %v11078_v33  ;;  %7185 = vmatprep.subr.bf16.mxu1 %v11080_v63  ;;  %v11119_v33 = vcombine.low %v975_v16, %v979_v1  ;;  %v11126_v63 = vcombine.high %v982_v26, %v986_v28  ;;  %v11128_v35 = vcombine.high %v983_v30, %v987_v32  ;;  %v1026_v16 = vld [vmem:[#allocation5 + $0x1e20] sm:$0xff]  ;;  %v1023_v1 = vld [vmem:[#allocation5 + $0x1e08] sm:$0xff] }
 0x1f0   :  { %6817 = vmatpush1.bf16.msra.mxu0 %v11077_v41  ;;  %7186 = vmatpush1.bf16.msra.mxu1 %v11079_v42  ;;  %v995_v41 = vld [vmem:[#allocation5 + $0x1d28] sm:$0xff]  ;;  %v11125_v42 = vcombine.low %v982_v26, %v986_v28  ;;  %v1030_v28 = vld [vmem:[#allocation5 + $0x1e40] sm:$0xff] }
 0x1f1   :  { %6818 = vmatprep.subr.bf16.mxu0 %v11086_v44  ;;  %7187 = vmatprep.subr.bf16.mxu1 %v11088_v45  ;;  %v11127_v44 = vcombine.low %v983_v30, %v987_v32  ;;  %v11134_v45 = vcombine.high %v990_v36, %v994_v38  ;;  %v11136_v46 = vcombine.high %v991_v39, %v995_v41  ;;  %v1034_v30 = vld [vmem:[#allocation5 + $0x1e60] sm:$0xff]  ;;  %v1031_v32 = vld [vmem:[#allocation5 + $0x1e48] sm:$0xff] }
 0x1f4   :  { %6819 = vmatpush1.bf16.msra.mxu0 %v11085_v52  ;;  %7188 = vmatpush1.bf16.msra.mxu1 %v11087_v54  ;;  %v1003_v52 = vld [vmem:[#allocation5 + $0x1d68] sm:$0xff]  ;;  %v11133_v54 = vcombine.low %v990_v36, %v994_v38  ;;  %v1038_v38 = vld [vmem:[#allocation5 + $0x1e80] sm:$0xff] }
 0x1f5   :  { %6820 = vmatprep.subr.bf16.mxu0 %v11094_v55  ;;  %7189 = vmatprep.subr.bf16.mxu1 %v11096_v56  ;;  %v11135_v55 = vcombine.low %v991_v39, %v995_v41  ;;  %v11142_v56 = vcombine.high %v998_v47, %v1002_v48  ;;  %v11144_v57 = vcombine.high %v999_v49, %v1003_v52  ;;  %v1042_v39 = vld [vmem:[#allocation5 + $0x1ea0] sm:$0xff]  ;;  %v1039_v41 = vld [vmem:[#allocation5 + $0x1e88] sm:$0xff] }
 0x1f8   :  { %6821 = vmatpush1.bf16.msra.mxu0 %v11093_v8  ;;  %7190 = vmatpush1.bf16.msra.mxu1 %v11095_v2  ;;  %v1011_v8 = vld [vmem:[#allocation5 + $0x1da8] sm:$0xff]  ;;  %v11141_v2 = vcombine.low %v998_v47, %v1002_v48  ;;  %v1046_v48 = vld [vmem:[#allocation5 + $0x1ec0] sm:$0xff] }
 0x1f9   :  { %6831 = vmatprep.subr.bf16.mxu0 %v11102_v3  ;;  %7200 = vmatprep.subr.bf16.mxu1 %v11104_v4  ;;  %v11143_v3 = vcombine.low %v999_v49, %v1003_v52  ;;  %v11150_v4 = vcombine.high %v1006_v58, %v1010_v60  ;;  %v11152_v6 = vcombine.high %v1007_v62, %v1011_v8  ;;  %v1050_v49 = vld [vmem:[#allocation5 + $0x1ee0] sm:$0xff]  ;;  %v1047_v52 = vld [vmem:[#allocation5 + $0x1ec8] sm:$0xff] }
 0x1fb   :  { %6823 = vmatmul.mubr.bf16.vlgmr.msra.gmra.mrb[0].mxu0 %v12489_v31  ;;  %7192 = vmatmul.mubr.bf16.vlgmr.msra.gmra.mrb[0].mxu1 %v12489_v31 }
 0x1fc   :  { %6832 = vmatpush1.bf16.msra.mxu0 %v11101_v12  ;;  %7201 = vmatpush1.bf16.msra.mxu1 %v11103_v13  ;;  %v1019_v12 = vld [vmem:[#allocation5 + $0x1de8] sm:$0xff]  ;;  %v11149_v13 = vcombine.low %v1006_v58, %v1010_v60  ;;  %v1054_v60 = vld [vmem:[#allocation5 + $0x1f00] sm:$0xff] }
 0x1fd   :  { %6833 = vmatprep.subr.bf16.mxu0 %v11110_v14  ;;  %7202 = vmatprep.subr.bf16.mxu1 %v11112_v15  ;;  %v11151_v14 = vcombine.low %v1007_v62, %v1011_v8  ;;  %v11158_v15 = vcombine.high %v1014_v7, %v1018_v10  ;;  %v11160_v17 = vcombine.high %v1015_v11, %v1019_v12  ;;  %v1058_v62 = vld [vmem:[#allocation5 + $0x1f20] sm:$0xff]  ;;  %v1055_v8 = vld [vmem:[#allocation5 + $0x1f08] sm:$0xff] }
 0x1fe   :  { %6863 = vmatprep.mubr.bf16.mxu0 %v12493_v20  ;;  %7232 = vmatprep.mubr.bf16.mxu1 %v12493_v20 }
 0x200   :  { %6834 = vmatpush1.bf16.msra.mxu0 %v11109_v21  ;;  %7203 = vmatpush1.bf16.msra.mxu1 %v11111_v22  ;;  %v1027_v21 = vld [vmem:[#allocation5 + $0x1e28] sm:$0xff]  ;;  %v11157_v22 = vcombine.low %v1014_v7, %v1018_v10  ;;  %v1062_v10 = vld [vmem:[#allocation5 + $0x1f40] sm:$0xff] }
 0x201   :  { %6835 = vmatprep.subr.bf16.mxu0 %v11118_v24  ;;  %7204 = vmatprep.subr.bf16.mxu1 %v11120_v25  ;;  %v11159_v24 = vcombine.low %v1015_v11, %v1019_v12  ;;  %v11166_v25 = vcombine.high %v1022_v18, %v1026_v16  ;;  %v11168_v26 = vcombine.high %v1023_v1, %v1027_v21  ;;  %v1066_v11 = vld [vmem:[#allocation5 + $0x1f60] sm:$0xff]  ;;  %v1063_v12 = vld [vmem:[#allocation5 + $0x1f48] sm:$0xff] }
 0x204   :  { %6836 = vmatpush1.bf16.msra.mxu0 %v11117_v59  ;;  %7205 = vmatpush1.bf16.msra.mxu1 %v11119_v33  ;;  %v1035_v59 = vld [vmem:[#allocation5 + $0x1e68] sm:$0xff]  ;;  %v11165_v33 = vcombine.low %v1022_v18, %v1026_v16  ;;  %v1070_v16 = vld [vmem:[#allocation5 + $0x1f80] sm:$0xff] }
 0x205   :  { %6837 = vmatprep.subr.bf16.mxu0 %v11126_v63  ;;  %7206 = vmatprep.subr.bf16.mxu1 %v11128_v35  ;;  %v11167_v63 = vcombine.low %v1023_v1, %v1027_v21  ;;  %v11174_v35 = vcombine.high %v1030_v28, %v1034_v30  ;;  %v11176_v36 = vcombine.high %v1031_v32, %v1035_v59  ;;  %v1074_v1 = vld [vmem:[#allocation5 + $0x1fa0] sm:$0xff]  ;;  %v1071_v21 = vld [vmem:[#allocation5 + $0x1f88] sm:$0xff] }
 0x208   :  { %6838 = vmatpush1.bf16.msra.mxu0 %v11125_v42  ;;  %7207 = vmatpush1.bf16.msra.mxu1 %v11127_v44  ;;  %v1043_v42 = vld [vmem:[#allocation5 + $0x1ea8] sm:$0xff]  ;;  %v11173_v44 = vcombine.low %v1030_v28, %v1034_v30  ;;  %v1078_v30 = vld [vmem:[#allocation5 + $0x1fc0] sm:$0xff] }
 0x209   :  { %6839 = vmatprep.subr.bf16.mxu0 %v11134_v45  ;;  %7208 = vmatprep.subr.bf16.mxu1 %v11136_v46  ;;  %v11175_v45 = vcombine.low %v1031_v32, %v1035_v59  ;;  %v11182_v46 = vcombine.high %v1038_v38, %v1042_v39  ;;  %v11184_v47 = vcombine.high %v1039_v41, %v1043_v42  ;;  %v1082_v32 = vld [vmem:[#allocation5 + $0x1fe0] sm:$0xff]  ;;  %v1079_v59 = vld [vmem:[#allocation5 + $0x1fc8] sm:$0xff] }
 0x20c   :  { %6840 = vmatpush1.bf16.msra.mxu0 %v11133_v54  ;;  %7209 = vmatpush1.bf16.msra.mxu1 %v11135_v55  ;;  %v1051_v54 = vld [vmem:[#allocation5 + $0x1ee8] sm:$0xff]  ;;  %v11181_v55 = vcombine.low %v1038_v38, %v1042_v39  ;;  %v1086_v39 = vld [vmem:[#allocation5 + $0x2000] sm:$0xff] }
 0x20d   :  { %6841 = vmatprep.subr.bf16.mxu0 %v11142_v56  ;;  %7210 = vmatprep.subr.bf16.mxu1 %v11144_v57  ;;  %v11183_v56 = vcombine.low %v1039_v41, %v1043_v42  ;;  %v11190_v57 = vcombine.high %v1046_v48, %v1050_v49  ;;  %v11192_v58 = vcombine.high %v1047_v52, %v1051_v54  ;;  %v1090_v41 = vld [vmem:[#allocation5 + $0x2020] sm:$0xff]  ;;  %v1087_v42 = vld [vmem:[#allocation5 + $0x2008] sm:$0xff] }
 0x210   :  { %6842 = vmatpush1.bf16.msra.mxu0 %v11141_v2  ;;  %7211 = vmatpush1.bf16.msra.mxu1 %v11143_v3  ;;  %v1059_v2 = vld [vmem:[#allocation5 + $0x1f28] sm:$0xff]  ;;  %v11189_v3 = vcombine.low %v1046_v48, %v1050_v49  ;;  %v1094_v49 = vld [vmem:[#allocation5 + $0x2040] sm:$0xff] }
 0x211   :  { %6843 = vmatprep.subr.bf16.mxu0 %v11150_v4  ;;  %7212 = vmatprep.subr.bf16.mxu1 %v11152_v6  ;;  %v11191_v4 = vcombine.low %v1047_v52, %v1051_v54  ;;  %v11198_v6 = vcombine.high %v1054_v60, %v1058_v62  ;;  %v11200_v7 = vcombine.high %v1055_v8, %v1059_v2  ;;  %v1098_v52 = vld [vmem:[#allocation5 + $0x2060] sm:$0xff] }
 0x212   :  { %v12501_v54 = vcombine.high %v12489_v31, %v12489_v31 }
 0x214   :  { %6844 = vmatpush1.bf16.msra.mxu0 %v11149_v13  ;;  %7213 = vmatpush1.bf16.msra.mxu1 %v11151_v14  ;;  %v1067_v13 = vld [vmem:[#allocation5 + $0x1f68] sm:$0xff]  ;;  %v11197_v14 = vcombine.low %v1054_v60, %v1058_v62  ;;  %v11238_v60 = vcombine.high %v1094_v49, %v1098_v52 }
 0x215   :  { %6845 = vmatprep.subr.bf16.mxu0 %v11158_v15  ;;  %7214 = vmatprep.subr.bf16.mxu1 %v11160_v17  ;;  %v11199_v15 = vcombine.low %v1055_v8, %v1059_v2  ;;  %v11206_v17 = vcombine.high %v1062_v10, %v1066_v11  ;;  %v11208_v18 = vcombine.high %v1063_v12, %v1067_v13  ;;  %v1102_v8 = vld [vmem:[#allocation5 + $0x2080] sm:$0xff] }
 0x216   :  { %v1106_v2 = vld [vmem:[#allocation5 + $0x20a0] sm:$0x11] }
 0x218   :  { %6846 = vmatpush1.bf16.msra.mxu0 %v11157_v22  ;;  %7215 = vmatpush1.bf16.msra.mxu1 %v11159_v24  ;;  %v1075_v22 = vld [vmem:[#allocation5 + $0x1fa8] sm:$0xff]  ;;  %v11205_v24 = vcombine.low %v1062_v10, %v1066_v11  ;;  %v11246_v10 = vcombine.high %v1102_v8, %v1106_v2  ;;  %v11245_v11 = vcombine.low %v1102_v8, %v1106_v2  ;;  %v97_v8 = vld [vmem:[#allocation5 + $0x118] sm:$0xff] }
 0x219   :  { %6847 = vmatprep.subr.bf16.mxu0 %v11166_v25  ;;  %7216 = vmatprep.subr.bf16.mxu1 %v11168_v26  ;;  %v11207_v25 = vcombine.low %v1063_v12, %v1067_v13  ;;  %v11214_v26 = vcombine.high %v1070_v16, %v1074_v1  ;;  %v11216_v28 = vcombine.high %v1071_v21, %v1075_v22  ;;  %v101_v2 = vld [vmem:[#allocation5 + $0x138] sm:$0xff] }
 0x21c   :  { %6848 = vmatpush1.bf16.msra.mxu0 %v11165_v33  ;;  %7217 = vmatpush1.bf16.msra.mxu1 %v11167_v63  ;;  %v1083_v33 = vld [vmem:[#allocation5 + $0x1fe8] sm:$0xff]  ;;  %v11213_v63 = vcombine.low %v1070_v16, %v1074_v1  ;;  %v69_v16 = vld [vmem:[#allocation5 + $0x38] sm:$0xff] }
 0x21d   :  { %6849 = vmatprep.subr.bf16.mxu0 %v11174_v35  ;;  %7218 = vmatprep.subr.bf16.mxu1 %v11176_v36  ;;  %v11215_v35 = vcombine.low %v1071_v21, %v1075_v22  ;;  %v11222_v36 = vcombine.high %v1078_v30, %v1082_v32  ;;  %v11224_v38 = vcombine.high %v1079_v59, %v1083_v33  ;;  %v10204_v1 = vld.sshfl [vmem:[#allocation2 + $0x10] sm:$0x1 pattern:$0x75316420]  ;;  %v6521_v21 = vsel %vm6519_vm0, %v11245_v11, 0 }
 0x21e   :  { %v105_v11 = vld [vmem:[#allocation5 + $0x158] sm:$0xff] }
 0x220   :  { %6850 = vmatpush1.bf16.msra.mxu0 %v11173_v44  ;;  %7219 = vmatpush1.bf16.msra.mxu1 %v11175_v45  ;;  %v1091_v44 = vld [vmem:[#allocation5 + $0x2028] sm:$0xff]  ;;  %v11221_v45 = vcombine.low %v1078_v30, %v1082_v32  ;;  %v12512_v30 = vrot.slane %v10204_v1, %v12381_v53  ;;  %v73_v32 = vld [vmem:[#allocation5 + $0x58] sm:$0xff]  ;;  %v116_v1 = vld [vmem:[#allocation5 + $0x1b0] sm:$0xff] }
 0x221   :  { %6851 = vmatprep.subr.bf16.mxu0 %v11182_v46  ;;  %7220 = vmatprep.subr.bf16.mxu1 %v11184_v47  ;;  %v11223_v46 = vcombine.low %v1079_v59, %v1083_v33  ;;  %v11230_v47 = vcombine.high %v1086_v39, %v1090_v41  ;;  %v11232_v48 = vcombine.high %v1087_v42, %v1091_v44  ;;  %v77_v59 = vld [vmem:[#allocation5 + $0x78] sm:$0xff] }
 0x224   :  { %6852 = vmatpush1.bf16.msra.mxu0 %v11181_v55  ;;  %7221 = vmatpush1.bf16.msra.mxu1 %v11183_v56  ;;  %v1095_v55 = vld [vmem:[#allocation5 + $0x2048] sm:$0xff] }
 0x225   :  { %6853 = vmatprep.subr.bf16.mxu0 %v11190_v57  ;;  %7222 = vmatprep.subr.bf16.mxu1 %v11192_v58  ;;  %v1099_v56 = vld [vmem:[#allocation5 + $0x2068] sm:$0xff]  ;;  %v11229_v57 = vcombine.low %v1086_v39, %v1090_v41  ;;  %v11231_v58 = vcombine.low %v1087_v42, %v1091_v44  ;;  %v84_v39 = vld [vmem:[#allocation5 + $0xb0] sm:$0xff]  ;;  %v81_v41 = vld [vmem:[#allocation5 + $0x98] sm:$0xff]  ;;  %v10219_v44 = vcombine.low %v73_v32, %v77_v59 }
 0x226   :  { %v11240_v62 = vcombine.high %v1095_v55, %v1099_v56  ;;  %v85_v42 = vld [vmem:[#allocation5 + $0xb8] sm:$0xff] }
 0x228   :  { %6854 = vmatpush1.bf16.msra.mxu0 %v11189_v3  ;;  %7223 = vmatpush1.bf16.msra.mxu1 %v11191_v4  ;;  %v1103_v3 = vld [vmem:[#allocation5 + $0x2088] sm:$0xff] }
 0x229   :  { %6855 = vmatprep.subr.bf16.mxu0 %v11198_v6  ;;  %7224 = vmatprep.subr.bf16.mxu1 %v11200_v7  ;;  %v1107_v4 = vld [vmem:[#allocation5 + $0x20a8] sm:$0x11]  ;;  %v11237_v6 = vcombine.low %v1094_v49, %v1098_v52  ;;  %v11239_v7 = vcombine.low %v1095_v55, %v1099_v56  ;;  %v89_v49 = vld [vmem:[#allocation5 + $0xd8] sm:$0xff]  ;;  %v10227_v56 = vcombine.low %v81_v41, %v85_v42 }
 0x22a   :  { %v11248_v12 = vcombine.high %v1103_v3, %v1107_v4  ;;  %v11247_v13 = vcombine.low %v1103_v3, %v1107_v4  ;;  %v93_v52 = vld [vmem:[#allocation5 + $0xf8] sm:$0xff] }
 0x22b   :  { %v10235_v4 = vcombine.low %v89_v49, %v93_v52 }
 0x22c   :  { %6856 = vmatpush1.bf16.msra.mxu0 %v11197_v14  ;;  %7225 = vmatpush1.bf16.msra.mxu1 %v11199_v15  ;;  %v12309_v14 = vmov 0   ;;  %v64_v15 = vld [vmem:[#allocation5 + $0x10] sm:$0xff] }
 0x22d   :  { %6857 = vmatprep.subr.bf16.mxu0 %v11206_v17  ;;  %7226 = vmatprep.subr.bf16.mxu1 %v11208_v18  ;;  %v68_v17 = vld [vmem:[#allocation5 + $0x30] sm:$0xff]  ;;  %v65_v18 = vld [vmem:[#allocation5 + $0x18] sm:$0xff] }
 0x22e   :  { %v10210_v22 = vcombine.high %v64_v15, %v68_v17  ;;  %v10209_v33 = vcombine.low %v64_v15, %v68_v17  ;;  %v10243_v15 = vcombine.low %v97_v8, %v101_v2 }
 0x230   :  { %6858 = vmatpush1.bf16.msra.mxu0 %v11205_v24  ;;  %7227 = vmatpush1.bf16.msra.mxu1 %v11207_v25  ;;  %v6527_v24 = vsel %vm6519_vm0, %v11247_v13, 0  ;;  %v10212_v25 = vcombine.high %v65_v18, %v69_v16 }
 0x231   :  { %6859 = vmatprep.subr.bf16.mxu0 %v11214_v26  ;;  %7228 = vmatprep.subr.bf16.mxu1 %v11216_v28  ;;  %v72_v26 = vld [vmem:[#allocation5 + $0x50] sm:$0xff] }
 0x232   :  { %v76_v28 = vld [vmem:[#allocation5 + $0x70] sm:$0xff] }
 0x233   :  { %v10217_v53 = vcombine.low %v72_v26, %v76_v28 }
 0x234   :  { %6860 = vmatpush1.bf16.msra.mxu0 %v11213_v63  ;;  %7229 = vmatpush1.bf16.msra.mxu1 %v11215_v35  ;;  %v10211_v63 = vcombine.low %v65_v18, %v69_v16  ;;  %v10218_v35 = vcombine.high %v72_v26, %v76_v28  ;;  %v112_v16 = vld [vmem:[#allocation5 + $0x190] sm:$0xff] }
 0x235   :  { %6861 = vmatprep.subr.bf16.mxu0 %v11222_v36  ;;  %7230 = vmatprep.subr.bf16.mxu1 %v11224_v38  ;;  %v10220_v36 = vcombine.high %v73_v32, %v77_v59  ;;  %v80_v38 = vld [vmem:[#allocation5 + $0x90] sm:$0xff]  ;;  %v10258_v26 = vcombine.high %v112_v16, %v116_v1 }
 0x236   :  { %v10225_v55 = vcombine.low %v80_v38, %v84_v39  ;;  %v120_v32 = vld [vmem:[#allocation5 + $0x1d0] sm:$0xff] }
 0x237   :  { %v124_v59 = vld [vmem:[#allocation5 + $0x1f0] sm:$0xff] }
 0x238   :  { %6862 = vmatpush1.bf16.msra.mxu0 %v11221_v45  ;;  %7231 = vmatpush1.bf16.msra.mxu1 %v11223_v46  ;;  %v10226_v45 = vcombine.high %v80_v38, %v84_v39  ;;  %v10228_v46 = vcombine.high %v81_v41, %v85_v42  ;;  %v10266_v38 = vcombine.high %v120_v32, %v124_v59  ;;  %v128_v41 = vld [vmem:[#allocation5 + $0x210] sm:$0xff] }
 0x239   :  { %6872 = vmatprep.subr.bf16.mxu0 %v11230_v47  ;;  %7241 = vmatprep.subr.bf16.mxu1 %v11232_v48  ;;  %v88_v47 = vld [vmem:[#allocation5 + $0xd0] sm:$0xff] }
 0x23a   :  { %v92_v48 = vld [vmem:[#allocation5 + $0xf0] sm:$0xff] }
 0x23b   :  { %6864 = vmatmul.mubr.bf16.vlgmr.msra.gmra.mrb[0].mxu0 %v12501_v54  ;;  %7233 = vmatmul.mubr.bf16.vlgmr.msra.gmra.mrb[0].mxu1 %v12501_v54  ;;  %v10233_v3 = vcombine.low %v88_v47, %v92_v48  ;;  %v132_v42 = vld [vmem:[#allocation5 + $0x230] sm:$0xff] }
 0x23c   :  { %6873 = vmatpush1.bf16.msra.mxu0 %v11229_v57  ;;  %7242 = vmatpush1.bf16.msra.mxu1 %v11231_v58  ;;  %v10234_v57 = vcombine.high %v88_v47, %v92_v48  ;;  %v10236_v58 = vcombine.high %v89_v49, %v93_v52  ;;  %v10274_v47 = vcombine.high %v128_v41, %v132_v42  ;;  %v136_v49 = vld [vmem:[#allocation5 + $0x250] sm:$0xff] }
 0x23d   :  { %6874 = vmatprep.subr.bf16.mxu0 %v11238_v60  ;;  %7243 = vmatprep.subr.bf16.mxu1 %v11240_v62  ;;  %v96_v60 = vld [vmem:[#allocation5 + $0x110] sm:$0xff] }
 0x23e   :  { %6904 = vmatprep.mubr.bf16.mxu0 %v12309_v14  ;;  %7273 = vmatprep.mubr.bf16.mxu1 %v12309_v14  ;;  %v100_v62 = vld [vmem:[#allocation5 + $0x130] sm:$0xff] }
 0x23f   :  { %v10241_v13 = vcombine.low %v96_v60, %v100_v62  ;;  %v140_v52 = vld [vmem:[#allocation5 + $0x270] sm:$0xff] }
 0x240   :  { %6875 = vmatpush1.bf16.msra.mxu0 %v11237_v6  ;;  %7244 = vmatpush1.bf16.msra.mxu1 %v11239_v7  ;;  %v10242_v6 = vcombine.high %v96_v60, %v100_v62  ;;  %v104_v7 = vld [vmem:[#allocation5 + $0x150] sm:$0xff]  ;;  %v10282_v60 = vcombine.high %v136_v49, %v140_v52 }
 0x241   :  { %11253 = vmatprep.subr.msk.bf16.mxu0 %vm6519_vm0, %v11246_v10  ;;  %11255 = vmatprep.subr.msk.bf16.mxu1 %vm6519_vm0, %v11248_v12  ;;  %v108_v10 = vld [vmem:[#allocation5 + $0x170] sm:$0xff]  ;;  %v109_v12 = vld [vmem:[#allocation5 + $0x178] sm:$0xff] }
 0x242   :  { %v10250_v17 = vcombine.high %v104_v7, %v108_v10  ;;  %v10252_v18 = vcombine.high %v105_v11, %v109_v12 }
 0x244   :  { %6877 = vmatpush1.bf16.msra.mxu0 %v6521_v21  ;;  %7246 = vmatpush1.bf16.msra.mxu1 %v6527_v24  ;;  %v113_v21 = vld [vmem:[#allocation5 + $0x198] sm:$0xff]  ;;  %v10249_v24 = vcombine.low %v104_v7, %v108_v10 }
 0x245   :  { %7282 = vmatprep.subr.bf16.mxu0 %v10210_v22  ;;  %7651 = vmatprep.subr.bf16.mxu1 %v10212_v25  ;;  %v117_v22 = vld [vmem:[#allocation5 + $0x1b8] sm:$0xff]  ;;  %v10251_v25 = vcombine.low %v105_v11, %v109_v12  ;;  %v152_v11 = vld [vmem:[#allocation5 + $0x2d0] sm:$0xff] }
 0x246   :  { %v10260_v28 = vcombine.high %v113_v21, %v117_v22  ;;  %v156_v12 = vld [vmem:[#allocation5 + $0x2f0] sm:$0xff] }
 0x247   :  { %11254 = vmatmul.mubr.msk.bf16.vlgmr.msra.gmra.mrb[0].mxu0 %vm6515_vm1, %v12512_v30  ;;  %11256 = vmatmul.mubr.msk.bf16.vlgmr.msra.gmra.mrb[0].mxu1 %vm6515_vm1, %v12512_v30 }
 0x248   :  { %7283 = vmatpush1.bf16.msra.mxu0 %v10209_v33  ;;  %7652 = vmatpush1.bf16.msra.mxu1 %v10211_v63  ;;  %v121_v33 = vld [vmem:[#allocation5 + $0x1d8] sm:$0xff] }
 0x249   :  { %7284 = vmatprep.subr.bf16.mxu0 %v10218_v35  ;;  %7653 = vmatprep.subr.bf16.mxu1 %v10220_v36  ;;  %v125_v63 = vld [vmem:[#allocation5 + $0x1f8] sm:$0xff]  ;;  %v10257_v35 = vcombine.low %v112_v16, %v116_v1  ;;  %v10259_v36 = vcombine.low %v113_v21, %v117_v22  ;;  %v10298_v16 = vcombine.high %v152_v11, %v156_v12  ;;  %v160_v21 = vld [vmem:[#allocation5 + $0x310] sm:$0xff] }
 0x24a   :  { %7314 = vmatprep.mubr.bf16.mxu0 %v12392_v9  ;;  %7683 = vmatprep.mubr.bf16.mxu1 %v12392_v9  ;;  %v10244_v9 = vcombine.high %v97_v8, %v101_v2  ;;  %v10268_v39 = vcombine.high %v121_v33, %v125_v63  ;;  %v144_v8 = vld [vmem:[#allocation5 + $0x290] sm:$0xff] }
 0x24b   :  { %v148_v2 = vld [vmem:[#allocation5 + $0x2b0] sm:$0xff] }
 0x24c   :  { %7285 = vmatpush1.bf16.msra.mxu0 %v10217_v53  ;;  %7654 = vmatpush1.bf16.msra.mxu1 %v10219_v44  ;;  %v129_v53 = vld [vmem:[#allocation5 + $0x218] sm:$0xff]  ;;  %v10290_v7 = vcombine.high %v144_v8, %v148_v2  ;;  %v164_v22 = vld [vmem:[#allocation5 + $0x330] sm:$0xff] }
 0x24d   :  { %7286 = vmatprep.subr.bf16.mxu0 %v10226_v45  ;;  %7655 = vmatprep.subr.bf16.mxu1 %v10228_v46  ;;  %v133_v44 = vld [vmem:[#allocation5 + $0x238] sm:$0xff]  ;;  %v10265_v45 = vcombine.low %v120_v32, %v124_v59  ;;  %v10267_v46 = vcombine.low %v121_v33, %v125_v63  ;;  %v10306_v32 = vcombine.high %v160_v21, %v164_v22  ;;  %v168_v33 = vld [vmem:[#allocation5 + $0x350] sm:$0xff] }
 0x24e   :  { %v10276_v48 = vcombine.high %v129_v53, %v133_v44  ;;  %v172_v63 = vld [vmem:[#allocation5 + $0x370] sm:$0xff] }
 0x250   :  { %7287 = vmatpush1.bf16.msra.mxu0 %v10225_v55  ;;  %7656 = vmatpush1.bf16.msra.mxu1 %v10227_v56  ;;  %v137_v55 = vld [vmem:[#allocation5 + $0x258] sm:$0xff] }
 0x251   :  { %7288 = vmatprep.subr.bf16.mxu0 %v10234_v57  ;;  %7657 = vmatprep.subr.bf16.mxu1 %v10236_v58  ;;  %v141_v56 = vld [vmem:[#allocation5 + $0x278] sm:$0xff]  ;;  %v10273_v57 = vcombine.low %v128_v41, %v132_v42  ;;  %v10275_v58 = vcombine.low %v129_v53, %v133_v44  ;;  %v10314_v41 = vcombine.high %v168_v33, %v172_v63  ;;  %v176_v53 = vld [vmem:[#allocation5 + $0x390] sm:$0xff] }
 0x252   :  { %v10284_v62 = vcombine.high %v137_v55, %v141_v56  ;;  %v180_v44 = vld [vmem:[#allocation5 + $0x3b0] sm:$0xff] }
 0x254   :  { %7289 = vmatpush1.bf16.msra.mxu0 %v10233_v3  ;;  %7658 = vmatpush1.bf16.msra.mxu1 %v10235_v4  ;;  %v145_v3 = vld [vmem:[#allocation5 + $0x298] sm:$0xff] }
 0x255   :  { %7290 = vmatprep.subr.bf16.mxu0 %v10242_v6  ;;  %7659 = vmatprep.subr.bf16.mxu1 %v10244_v9  ;;  %v149_v4 = vld [vmem:[#allocation5 + $0x2b8] sm:$0xff]  ;;  %v10281_v6 = vcombine.low %v136_v49, %v140_v52  ;;  %v10283_v9 = vcombine.low %v137_v55, %v141_v56  ;;  %v10322_v49 = vcombine.high %v176_v53, %v180_v44  ;;  %v184_v55 = vld [vmem:[#allocation5 + $0x3d0] sm:$0xff] }
 0x256   :  { %v10292_v10 = vcombine.high %v145_v3, %v149_v4  ;;  %v188_v56 = vld [vmem:[#allocation5 + $0x3f0] sm:$0xff] }
 0x258   :  { %7291 = vmatpush1.bf16.msra.mxu0 %v10241_v13  ;;  %7660 = vmatpush1.bf16.msra.mxu1 %v10243_v15  ;;  %v153_v13 = vld [vmem:[#allocation5 + $0x2d8] sm:$0xff] }
 0x259   :  { %7292 = vmatprep.subr.bf16.mxu0 %v10250_v17  ;;  %7661 = vmatprep.subr.bf16.mxu1 %v10252_v18  ;;  %v157_v15 = vld [vmem:[#allocation5 + $0x2f8] sm:$0xff]  ;;  %v10289_v17 = vcombine.low %v144_v8, %v148_v2  ;;  %v10291_v18 = vcombine.low %v145_v3, %v149_v4  ;;  %v10330_v8 = vcombine.high %v184_v55, %v188_v56  ;;  %v192_v3 = vld [vmem:[#allocation5 + $0x410] sm:$0xff] }
 0x25a   :  { %v10300_v1 = vcombine.high %v153_v13, %v157_v15  ;;  %v196_v4 = vld [vmem:[#allocation5 + $0x430] sm:$0xff] }
 0x25c   :  { %7293 = vmatpush1.bf16.msra.mxu0 %v10249_v24  ;;  %7662 = vmatpush1.bf16.msra.mxu1 %v10251_v25  ;;  %v161_v24 = vld [vmem:[#allocation5 + $0x318] sm:$0xff] }
 0x25d   :  { %7294 = vmatprep.subr.bf16.mxu0 %v10258_v26  ;;  %7663 = vmatprep.subr.bf16.mxu1 %v10260_v28  ;;  %v165_v25 = vld [vmem:[#allocation5 + $0x338] sm:$0xff]  ;;  %v10297_v26 = vcombine.low %v152_v11, %v156_v12  ;;  %v10299_v28 = vcombine.low %v153_v13, %v157_v15  ;;  %v10338_v11 = vcombine.high %v192_v3, %v196_v4  ;;  %v200_v13 = vld [vmem:[#allocation5 + $0x450] sm:$0xff] }
 0x25e   :  { %v10308_v59 = vcombine.high %v161_v24, %v165_v25  ;;  %v204_v15 = vld [vmem:[#allocation5 + $0x470] sm:$0xff] }
 0x260   :  { %7295 = vmatpush1.bf16.msra.mxu0 %v10257_v35  ;;  %7664 = vmatpush1.bf16.msra.mxu1 %v10259_v36  ;;  %v169_v35 = vld [vmem:[#allocation5 + $0x358] sm:$0xff] }
 0x261   :  { %7296 = vmatprep.subr.bf16.mxu0 %v10266_v38  ;;  %7665 = vmatprep.subr.bf16.mxu1 %v10268_v39  ;;  %v173_v36 = vld [vmem:[#allocation5 + $0x378] sm:$0xff]  ;;  %v10305_v38 = vcombine.low %v160_v21, %v164_v22  ;;  %v10307_v39 = vcombine.low %v161_v24, %v165_v25  ;;  %v10346_v21 = vcombine.high %v200_v13, %v204_v15  ;;  %v208_v24 = vld [vmem:[#allocation5 + $0x490] sm:$0xff] }
 0x262   :  { %v10316_v42 = vcombine.high %v169_v35, %v173_v36  ;;  %v212_v25 = vld [vmem:[#allocation5 + $0x4b0] sm:$0xff] }
 0x264   :  { %7297 = vmatpush1.bf16.msra.mxu0 %v10265_v45  ;;  %7666 = vmatpush1.bf16.msra.mxu1 %v10267_v46  ;;  %v177_v45 = vld [vmem:[#allocation5 + $0x398] sm:$0xff] }
 0x265   :  { %7298 = vmatprep.subr.bf16.mxu0 %v10274_v47  ;;  %7667 = vmatprep.subr.bf16.mxu1 %v10276_v48  ;;  %v181_v46 = vld [vmem:[#allocation5 + $0x3b8] sm:$0xff]  ;;  %v10313_v47 = vcombine.low %v168_v33, %v172_v63  ;;  %v10315_v48 = vcombine.low %v169_v35, %v173_v36  ;;  %v10354_v33 = vcombine.high %v208_v24, %v212_v25  ;;  %v216_v35 = vld [vmem:[#allocation5 + $0x4d0] sm:$0xff] }
 0x266   :  { %v10324_v52 = vcombine.high %v177_v45, %v181_v46  ;;  %v220_v36 = vld [vmem:[#allocation5 + $0x4f0] sm:$0xff] }
 0x268   :  { %7299 = vmatpush1.bf16.msra.mxu0 %v10273_v57  ;;  %7668 = vmatpush1.bf16.msra.mxu1 %v10275_v58  ;;  %v185_v57 = vld [vmem:[#allocation5 + $0x3d8] sm:$0xff] }
 0x269   :  { %7300 = vmatprep.subr.bf16.mxu0 %v10282_v60  ;;  %7669 = vmatprep.subr.bf16.mxu1 %v10284_v62  ;;  %v189_v58 = vld [vmem:[#allocation5 + $0x3f8] sm:$0xff]  ;;  %v10321_v60 = vcombine.low %v176_v53, %v180_v44  ;;  %v10323_v62 = vcombine.low %v177_v45, %v181_v46  ;;  %v224_v44 = vld [vmem:[#allocation5 + $0x510] sm:$0xff] }
 0x26a   :  { %v10332_v2 = vcombine.high %v185_v57, %v189_v58  ;;  %v228_v45 = vld [vmem:[#allocation5 + $0x530] sm:$0xff]  ;;  %v225_v46 = vld [vmem:[#allocation5 + $0x518] sm:$0xff] }
 0x26c   :  { %7301 = vmatpush1.bf16.msra.mxu0 %v10281_v6  ;;  %7670 = vmatpush1.bf16.msra.mxu1 %v10283_v9  ;;  %v193_v6 = vld [vmem:[#allocation5 + $0x418] sm:$0xff] }
 0x26d   :  { %7302 = vmatprep.subr.bf16.mxu0 %v10290_v7  ;;  %7671 = vmatprep.subr.bf16.mxu1 %v10292_v10  ;;  %v197_v9 = vld [vmem:[#allocation5 + $0x438] sm:$0xff]  ;;  %v10329_v7 = vcombine.low %v184_v55, %v188_v56  ;;  %v10331_v10 = vcombine.low %v185_v57, %v189_v58  ;;  %v232_v55 = vld [vmem:[#allocation5 + $0x550] sm:$0xff] }
 0x26e   :  { %v10340_v12 = vcombine.high %v193_v6, %v197_v9  ;;  %v236_v56 = vld [vmem:[#allocation5 + $0x570] sm:$0xff]  ;;  %v233_v57 = vld [vmem:[#allocation5 + $0x558] sm:$0xff] }
 0x26f   :  { %v237_v58 = vld [vmem:[#allocation5 + $0x578] sm:$0xff] }
 0x270   :  { %7303 = vmatpush1.bf16.msra.mxu0 %v10289_v17  ;;  %7672 = vmatpush1.bf16.msra.mxu1 %v10291_v18  ;;  %v201_v17 = vld [vmem:[#allocation5 + $0x458] sm:$0xff] }
 0x271   :  { %7304 = vmatprep.subr.bf16.mxu0 %v10298_v16  ;;  %7673 = vmatprep.subr.bf16.mxu1 %v10300_v1  ;;  %v205_v18 = vld [vmem:[#allocation5 + $0x478] sm:$0xff]  ;;  %v10337_v16 = vcombine.low %v192_v3, %v196_v4  ;;  %v10339_v1 = vcombine.low %v193_v6, %v197_v9  ;;  %v240_v3 = vld [vmem:[#allocation5 + $0x590] sm:$0xff] }
 0x272   :  { %v10348_v22 = vcombine.high %v201_v17, %v205_v18  ;;  %v244_v4 = vld [vmem:[#allocation5 + $0x5b0] sm:$0xff]  ;;  %v241_v6 = vld [vmem:[#allocation5 + $0x598] sm:$0xff] }
 0x273   :  { %v245_v9 = vld [vmem:[#allocation5 + $0x5b8] sm:$0xff] }
 0x274   :  { %7305 = vmatpush1.bf16.msra.mxu0 %v10297_v26  ;;  %7674 = vmatpush1.bf16.msra.mxu1 %v10299_v28  ;;  %v209_v26 = vld [vmem:[#allocation5 + $0x498] sm:$0xff] }
 0x275   :  { %7306 = vmatprep.subr.bf16.mxu0 %v10306_v32  ;;  %7675 = vmatprep.subr.bf16.mxu1 %v10308_v59  ;;  %v213_v28 = vld [vmem:[#allocation5 + $0x4b8] sm:$0xff]  ;;  %v10345_v32 = vcombine.low %v200_v13, %v204_v15  ;;  %v10347_v59 = vcombine.low %v201_v17, %v205_v18  ;;  %v248_v13 = vld [vmem:[#allocation5 + $0x5d0] sm:$0xff] }
 0x276   :  { %v10356_v63 = vcombine.high %v209_v26, %v213_v28  ;;  %v252_v15 = vld [vmem:[#allocation5 + $0x5f0] sm:$0xff]  ;;  %v249_v17 = vld [vmem:[#allocation5 + $0x5d8] sm:$0xff] }
 0x277   :  { %v253_v18 = vld [vmem:[#allocation5 + $0x5f8] sm:$0xff] }
 0x278   :  { %7307 = vmatpush1.bf16.msra.mxu0 %v10305_v38  ;;  %7676 = vmatpush1.bf16.msra.mxu1 %v10307_v39  ;;  %v217_v38 = vld [vmem:[#allocation5 + $0x4d8] sm:$0xff] }
 0x279   :  { %7308 = vmatprep.subr.bf16.mxu0 %v10314_v41  ;;  %7677 = vmatprep.subr.bf16.mxu1 %v10316_v42  ;;  %v221_v39 = vld [vmem:[#allocation5 + $0x4f8] sm:$0xff]  ;;  %v10353_v41 = vcombine.low %v208_v24, %v212_v25  ;;  %v10362_v42 = vcombine.high %v216_v35, %v220_v36  ;;  %v256_v24 = vld [vmem:[#allocation5 + $0x610] sm:$0xff] }
 0x27a   :  { %v10364_v53 = vcombine.high %v217_v38, %v221_v39  ;;  %v260_v25 = vld [vmem:[#allocation5 + $0x630] sm:$0xff] }
 0x27c   :  { %7309 = vmatpush1.bf16.msra.mxu0 %v10313_v47  ;;  %7678 = vmatpush1.bf16.msra.mxu1 %v10315_v48  ;;  %v229_v47 = vld [vmem:[#allocation5 + $0x538] sm:$0xff]  ;;  %v10361_v48 = vcombine.low %v216_v35, %v220_v36  ;;  %v264_v35 = vld [vmem:[#allocation5 + $0x650] sm:$0xff] }
 0x27d   :  { %7310 = vmatprep.subr.bf16.mxu0 %v10322_v49  ;;  %7679 = vmatprep.subr.bf16.mxu1 %v10324_v52  ;;  %v10363_v49 = vcombine.low %v217_v38, %v221_v39  ;;  %v10370_v52 = vcombine.high %v224_v44, %v228_v45  ;;  %v268_v36 = vld [vmem:[#allocation5 + $0x670] sm:$0xff]  ;;  %v265_v38 = vld [vmem:[#allocation5 + $0x658] sm:$0xff] }
 0x27e   :  { %v269_v39 = vld [vmem:[#allocation5 + $0x678] sm:$0xff] }
 0x280   :  { %7311 = vmatpush1.bf16.msra.mxu0 %v10321_v60  ;;  %7680 = vmatpush1.bf16.msra.mxu1 %v10323_v62  ;;  %v10369_v60 = vcombine.low %v224_v44, %v228_v45  ;;  %v10371_v62 = vcombine.low %v225_v46, %v229_v47  ;;  %v272_v44 = vld [vmem:[#allocation5 + $0x690] sm:$0xff] }
 0x281   :  { %7312 = vmatprep.subr.bf16.mxu0 %v10330_v8  ;;  %7681 = vmatprep.subr.bf16.mxu1 %v10332_v2  ;;  %v10378_v8 = vcombine.high %v232_v55, %v236_v56  ;;  %v10380_v2 = vcombine.high %v233_v57, %v237_v58  ;;  %v276_v45 = vld [vmem:[#allocation5 + $0x6b0] sm:$0xff] }
 0x284   :  { %7313 = vmatpush1.bf16.msra.mxu0 %v10329_v7  ;;  %7682 = vmatpush1.bf16.msra.mxu1 %v10331_v10  ;;  %v10377_v7 = vcombine.low %v232_v55, %v236_v56  ;;  %v10379_v10 = vcombine.low %v233_v57, %v237_v58  ;;  %v280_v55 = vld [vmem:[#allocation5 + $0x6d0] sm:$0xff]  ;;  %v281_v57 = vld [vmem:[#allocation5 + $0x6d8] sm:$0xff] }
 0x285   :  { %7323 = vmatprep.subr.bf16.mxu0 %v10338_v11  ;;  %7692 = vmatprep.subr.bf16.mxu1 %v10340_v12  ;;  %v10386_v11 = vcombine.high %v240_v3, %v244_v4  ;;  %v10388_v12 = vcombine.high %v241_v6, %v245_v9  ;;  %v284_v56 = vld [vmem:[#allocation5 + $0x6f0] sm:$0xff]  ;;  %v285_v58 = vld [vmem:[#allocation5 + $0x6f8] sm:$0xff] }
 0x287   :  { %7315 = vmatmul.mubr.bf16.vlgmr.msra.gmra.mrb[4].mxu0 %v12398_v23  ;;  %7684 = vmatmul.mubr.bf16.vlgmr.msra.gmra.mrb[4].mxu1 %v12398_v23  ;;  %v10355_v23 = vcombine.low %v209_v26, %v213_v28  ;;  %v257_v26 = vld [vmem:[#allocation5 + $0x618] sm:$0xff] }
 0x288   :  { %7324 = vmatpush1.bf16.msra.mxu0 %v10337_v16  ;;  %7693 = vmatpush1.bf16.msra.mxu1 %v10339_v1  ;;  %v10385_v16 = vcombine.low %v240_v3, %v244_v4  ;;  %v10387_v1 = vcombine.low %v241_v6, %v245_v9  ;;  %v261_v28 = vld [vmem:[#allocation5 + $0x638] sm:$0xff]  ;;  %v288_v3 = vld [vmem:[#allocation5 + $0x710] sm:$0xff] }
 0x289   :  { %7325 = vmatprep.subr.bf16.mxu0 %v10346_v21  ;;  %7694 = vmatprep.subr.bf16.mxu1 %v10348_v22  ;;  %v10394_v21 = vcombine.high %v248_v13, %v252_v15  ;;  %v10396_v22 = vcombine.high %v249_v17, %v253_v18  ;;  %v292_v4 = vld [vmem:[#allocation5 + $0x730] sm:$0xff]  ;;  %v289_v6 = vld [vmem:[#allocation5 + $0x718] sm:$0xff] }
 0x28a   :  { %7355 = vmatprep.mubr.bf16.mxu0 %v12402_v34  ;;  %7724 = vmatprep.mubr.bf16.mxu1 %v12402_v34  ;;  %v10372_v34 = vcombine.high %v225_v46, %v229_v47  ;;  %v273_v46 = vld [vmem:[#allocation5 + $0x698] sm:$0xff] }
 0x28b   :  { %v277_v47 = vld [vmem:[#allocation5 + $0x6b8] sm:$0xff] }
 0x28c   :  { %7326 = vmatpush1.bf16.msra.mxu0 %v10345_v32  ;;  %7695 = vmatpush1.bf16.msra.mxu1 %v10347_v59  ;;  %v10393_v32 = vcombine.low %v248_v13, %v252_v15  ;;  %v10395_v59 = vcombine.low %v249_v17, %v253_v18  ;;  %v293_v9 = vld [vmem:[#allocation5 + $0x738] sm:$0xff]  ;;  %v296_v13 = vld [vmem:[#allocation5 + $0x750] sm:$0xff] }
 0x28d   :  { %7327 = vmatprep.subr.bf16.mxu0 %v10354_v33  ;;  %7696 = vmatprep.subr.bf16.mxu1 %v10356_v63  ;;  %v10402_v33 = vcombine.high %v256_v24, %v260_v25  ;;  %v10404_v63 = vcombine.high %v257_v26, %v261_v28  ;;  %v300_v15 = vld [vmem:[#allocation5 + $0x770] sm:$0xff]  ;;  %v297_v17 = vld [vmem:[#allocation5 + $0x758] sm:$0xff] }
 0x28e   :  { %v301_v18 = vld [vmem:[#allocation5 + $0x778] sm:$0xff] }
 0x290   :  { %7328 = vmatpush1.bf16.msra.mxu0 %v10353_v41  ;;  %7697 = vmatpush1.bf16.msra.mxu1 %v10355_v23  ;;  %v10401_v41 = vcombine.low %v256_v24, %v260_v25  ;;  %v10403_v23 = vcombine.low %v257_v26, %v261_v28  ;;  %v304_v24 = vld [vmem:[#allocation5 + $0x790] sm:$0xff]  ;;  %v305_v26 = vld [vmem:[#allocation5 + $0x798] sm:$0xff] }
 0x291   :  { %7329 = vmatprep.subr.bf16.mxu0 %v10362_v42  ;;  %7698 = vmatprep.subr.bf16.mxu1 %v10364_v53  ;;  %v10410_v42 = vcombine.high %v264_v35, %v268_v36  ;;  %v10412_v53 = vcombine.high %v265_v38, %v269_v39  ;;  %v308_v25 = vld [vmem:[#allocation5 + $0x7b0] sm:$0xff]  ;;  %v309_v28 = vld [vmem:[#allocation5 + $0x7b8] sm:$0xff] }
 0x294   :  { %7330 = vmatpush1.bf16.msra.mxu0 %v10361_v48  ;;  %7699 = vmatpush1.bf16.msra.mxu1 %v10363_v49  ;;  %v10409_v48 = vcombine.low %v264_v35, %v268_v36  ;;  %v10411_v49 = vcombine.low %v265_v38, %v269_v39  ;;  %v312_v35 = vld [vmem:[#allocation5 + $0x7d0] sm:$0xff]  ;;  %v313_v38 = vld [vmem:[#allocation5 + $0x7d8] sm:$0xff] }
 0x295   :  { %7331 = vmatprep.subr.bf16.mxu0 %v10370_v52  ;;  %7700 = vmatprep.subr.bf16.mxu1 %v10372_v34  ;;  %v10418_v52 = vcombine.high %v272_v44, %v276_v45  ;;  %v10420_v34 = vcombine.high %v273_v46, %v277_v47  ;;  %v316_v36 = vld [vmem:[#allocation5 + $0x7f0] sm:$0xff]  ;;  %v317_v39 = vld [vmem:[#allocation5 + $0x7f8] sm:$0xff] }
 0x298   :  { %7332 = vmatpush1.bf16.msra.mxu0 %v10369_v60  ;;  %7701 = vmatpush1.bf16.msra.mxu1 %v10371_v62  ;;  %v10417_v60 = vcombine.low %v272_v44, %v276_v45  ;;  %v10419_v62 = vcombine.low %v273_v46, %v277_v47  ;;  %v320_v44 = vld [vmem:[#allocation5 + $0x810] sm:$0xff]  ;;  %v321_v46 = vld [vmem:[#allocation5 + $0x818] sm:$0xff] }
 0x299   :  { %7333 = vmatprep.subr.bf16.mxu0 %v10378_v8  ;;  %7702 = vmatprep.subr.bf16.mxu1 %v10380_v2  ;;  %v10426_v8 = vcombine.high %v280_v55, %v284_v56  ;;  %v10428_v2 = vcombine.high %v281_v57, %v285_v58  ;;  %v324_v45 = vld [vmem:[#allocation5 + $0x830] sm:$0xff]  ;;  %v325_v47 = vld [vmem:[#allocation5 + $0x838] sm:$0xff] }
 0x29c   :  { %7334 = vmatpush1.bf16.msra.mxu0 %v10377_v7  ;;  %7703 = vmatpush1.bf16.msra.mxu1 %v10379_v10  ;;  %v10425_v7 = vcombine.low %v280_v55, %v284_v56  ;;  %v10427_v10 = vcombine.low %v281_v57, %v285_v58  ;;  %v328_v55 = vld [vmem:[#allocation5 + $0x850] sm:$0xff]  ;;  %v329_v57 = vld [vmem:[#allocation5 + $0x858] sm:$0xff] }
 0x29d   :  { %7335 = vmatprep.subr.bf16.mxu0 %v10386_v11  ;;  %7704 = vmatprep.subr.bf16.mxu1 %v10388_v12  ;;  %v10434_v11 = vcombine.high %v288_v3, %v292_v4  ;;  %v10436_v12 = vcombine.high %v289_v6, %v293_v9  ;;  %v332_v56 = vld [vmem:[#allocation5 + $0x870] sm:$0xff]  ;;  %v333_v58 = vld [vmem:[#allocation5 + $0x878] sm:$0xff] }
 0x2a0   :  { %7336 = vmatpush1.bf16.msra.mxu0 %v10385_v16  ;;  %7705 = vmatpush1.bf16.msra.mxu1 %v10387_v1  ;;  %v10433_v16 = vcombine.low %v288_v3, %v292_v4  ;;  %v10435_v1 = vcombine.low %v289_v6, %v293_v9  ;;  %v336_v3 = vld [vmem:[#allocation5 + $0x890] sm:$0xff]  ;;  %v337_v6 = vld [vmem:[#allocation5 + $0x898] sm:$0xff] }
 0x2a1   :  { %7337 = vmatprep.subr.bf16.mxu0 %v10394_v21  ;;  %7706 = vmatprep.subr.bf16.mxu1 %v10396_v22  ;;  %v10442_v21 = vcombine.high %v296_v13, %v300_v15  ;;  %v10444_v22 = vcombine.high %v297_v17, %v301_v18  ;;  %v340_v4 = vld [vmem:[#allocation5 + $0x8b0] sm:$0xff]  ;;  %v341_v9 = vld [vmem:[#allocation5 + $0x8b8] sm:$0xff] }
 0x2a4   :  { %7338 = vmatpush1.bf16.msra.mxu0 %v10393_v32  ;;  %7707 = vmatpush1.bf16.msra.mxu1 %v10395_v59  ;;  %v10441_v32 = vcombine.low %v296_v13, %v300_v15  ;;  %v10443_v59 = vcombine.low %v297_v17, %v301_v18  ;;  %v344_v13 = vld [vmem:[#allocation5 + $0x8d0] sm:$0xff]  ;;  %v345_v17 = vld [vmem:[#allocation5 + $0x8d8] sm:$0xff] }
 0x2a5   :  { %7339 = vmatprep.subr.bf16.mxu0 %v10402_v33  ;;  %7708 = vmatprep.subr.bf16.mxu1 %v10404_v63  ;;  %v10450_v33 = vcombine.high %v304_v24, %v308_v25  ;;  %v10452_v63 = vcombine.high %v305_v26, %v309_v28  ;;  %v348_v15 = vld [vmem:[#allocation5 + $0x8f0] sm:$0xff]  ;;  %v349_v18 = vld [vmem:[#allocation5 + $0x8f8] sm:$0xff] }
 0x2a8   :  { %7340 = vmatpush1.bf16.msra.mxu0 %v10401_v41  ;;  %7709 = vmatpush1.bf16.msra.mxu1 %v10403_v23  ;;  %v10449_v41 = vcombine.low %v304_v24, %v308_v25  ;;  %v10451_v23 = vcombine.low %v305_v26, %v309_v28  ;;  %v356_v24 = vld [vmem:[#allocation5 + $0x930] sm:$0xff]  ;;  %v353_v25 = vld [vmem:[#allocation5 + $0x918] sm:$0xff]  ;;  %v10489_v28 = vcombine.low %v344_v13, %v348_v15 }
 0x2a9   :  { %7341 = vmatprep.subr.bf16.mxu0 %v10410_v42  ;;  %7710 = vmatprep.subr.bf16.mxu1 %v10412_v53  ;;  %v10458_v42 = vcombine.high %v312_v35, %v316_v36  ;;  %v10460_v53 = vcombine.high %v313_v38, %v317_v39  ;;  %v357_v26 = vld [vmem:[#allocation5 + $0x938] sm:$0xff] }
 0x2ac   :  { %7342 = vmatpush1.bf16.msra.mxu0 %v10409_v48  ;;  %7711 = vmatpush1.bf16.msra.mxu1 %v10411_v49  ;;  %v10457_v48 = vcombine.low %v312_v35, %v316_v36  ;;  %v10459_v49 = vcombine.low %v313_v38, %v317_v39  ;;  %v361_v35 = vld [vmem:[#allocation5 + $0x958] sm:$0xff]  ;;  %v10499_v39 = vcombine.low %v353_v25, %v357_v26 }
 0x2ad   :  { %7343 = vmatprep.subr.bf16.mxu0 %v10418_v52  ;;  %7712 = vmatprep.subr.bf16.mxu1 %v10420_v34  ;;  %v10466_v52 = vcombine.high %v320_v44, %v324_v45  ;;  %v10468_v34 = vcombine.high %v321_v46, %v325_v47  ;;  %v365_v36 = vld [vmem:[#allocation5 + $0x978] sm:$0xff] }
 0x2b0   :  { %7344 = vmatpush1.bf16.msra.mxu0 %v10417_v60  ;;  %7713 = vmatpush1.bf16.msra.mxu1 %v10419_v62  ;;  %v10465_v60 = vcombine.low %v320_v44, %v324_v45  ;;  %v10467_v62 = vcombine.low %v321_v46, %v325_v47  ;;  %v369_v44 = vld [vmem:[#allocation5 + $0x998] sm:$0xff]  ;;  %v10507_v47 = vcombine.low %v361_v35, %v365_v36 }
 0x2b1   :  { %7345 = vmatprep.subr.bf16.mxu0 %v10426_v8  ;;  %7714 = vmatprep.subr.bf16.mxu1 %v10428_v2  ;;  %v10474_v8 = vcombine.high %v328_v55, %v332_v56  ;;  %v10476_v2 = vcombine.high %v329_v57, %v333_v58  ;;  %v373_v45 = vld [vmem:[#allocation5 + $0x9b8] sm:$0xff] }
 0x2b4   :  { %7346 = vmatpush1.bf16.msra.mxu0 %v10425_v7  ;;  %7715 = vmatpush1.bf16.msra.mxu1 %v10427_v10  ;;  %v10473_v7 = vcombine.low %v328_v55, %v332_v56  ;;  %v10475_v10 = vcombine.low %v329_v57, %v333_v58  ;;  %v377_v55 = vld [vmem:[#allocation5 + $0x9d8] sm:$0xff]  ;;  %v10515_v58 = vcombine.low %v369_v44, %v373_v45 }
 0x2b5   :  { %7347 = vmatprep.subr.bf16.mxu0 %v10434_v11  ;;  %7716 = vmatprep.subr.bf16.mxu1 %v10436_v12  ;;  %v10482_v11 = vcombine.high %v336_v3, %v340_v4  ;;  %v10484_v12 = vcombine.high %v337_v6, %v341_v9  ;;  %v381_v56 = vld [vmem:[#allocation5 + $0x9f8] sm:$0xff] }
 0x2b8   :  { %7348 = vmatpush1.bf16.msra.mxu0 %v10433_v16  ;;  %7717 = vmatpush1.bf16.msra.mxu1 %v10435_v1  ;;  %v10481_v16 = vcombine.low %v336_v3, %v340_v4  ;;  %v10490_v1 = vcombine.high %v344_v13, %v348_v15  ;;  %v385_v3 = vld [vmem:[#allocation5 + $0xa18] sm:$0xff] }
 0x2b9   :  { %7349 = vmatprep.subr.bf16.mxu0 %v10442_v21  ;;  %7718 = vmatprep.subr.bf16.mxu1 %v10444_v22  ;;  %v10492_v21 = vcombine.high %v345_v17, %v349_v18  ;;  %v352_v22 = vld [vmem:[#allocation5 + $0x910] sm:$0xff]  ;;  %v389_v4 = vld [vmem:[#allocation5 + $0xa38] sm:$0xff] }
 0x2ba   :  { %v10497_v38 = vcombine.low %v352_v22, %v356_v24  ;;  %v393_v13 = vld [vmem:[#allocation5 + $0xa58] sm:$0xff] }
 0x2bb   :  { %v397_v15 = vld [vmem:[#allocation5 + $0xa78] sm:$0xff] }
 0x2bc   :  { %7350 = vmatpush1.bf16.msra.mxu0 %v10441_v32  ;;  %7719 = vmatpush1.bf16.msra.mxu1 %v10443_v59  ;;  %v10491_v32 = vcombine.low %v345_v17, %v349_v18  ;;  %v10498_v59 = vcombine.high %v352_v22, %v356_v24  ;;  %v10531_v18 = vcombine.low %v385_v3, %v389_v4  ;;  %v401_v22 = vld [vmem:[#allocation5 + $0xa98] sm:$0xff] }
 0x2bd   :  { %7351 = vmatprep.subr.bf16.mxu0 %v10450_v33  ;;  %7720 = vmatprep.subr.bf16.mxu1 %v10452_v63  ;;  %v360_v33 = vld [vmem:[#allocation5 + $0x950] sm:$0xff]  ;;  %v405_v24 = vld [vmem:[#allocation5 + $0xab8] sm:$0xff] }
 0x2be   :  { %v364_v63 = vld [vmem:[#allocation5 + $0x970] sm:$0xff] }
 0x2bf   :  { %v10505_v46 = vcombine.low %v360_v33, %v364_v63 }
 0x2c0   :  { %7352 = vmatpush1.bf16.msra.mxu0 %v10449_v41  ;;  %7721 = vmatpush1.bf16.msra.mxu1 %v10451_v23  ;;  %v10506_v41 = vcombine.high %v360_v33, %v364_v63  ;;  %v10508_v23 = vcombine.high %v361_v35, %v365_v36  ;;  %v409_v33 = vld [vmem:[#allocation5 + $0xad8] sm:$0xff]  ;;  %v10547_v36 = vcombine.low %v401_v22, %v405_v24 }
 0x2c1   :  { %7353 = vmatprep.subr.bf16.mxu0 %v10458_v42  ;;  %7722 = vmatprep.subr.bf16.mxu1 %v10460_v53  ;;  %v368_v42 = vld [vmem:[#allocation5 + $0x990] sm:$0xff]  ;;  %v413_v63 = vld [vmem:[#allocation5 + $0xaf8] sm:$0xff] }
 0x2c2   :  { %v372_v53 = vld [vmem:[#allocation5 + $0x9b0] sm:$0xff] }
 0x2c3   :  { %v10513_v57 = vcombine.low %v368_v42, %v372_v53 }
 0x2c4   :  { %7354 = vmatpush1.bf16.msra.mxu0 %v10457_v48  ;;  %7723 = vmatpush1.bf16.msra.mxu1 %v10459_v49  ;;  %v10514_v48 = vcombine.high %v368_v42, %v372_v53  ;;  %v10516_v49 = vcombine.high %v369_v44, %v373_v45  ;;  %v417_v42 = vld [vmem:[#allocation5 + $0xb18] sm:$0xff]  ;;  %v10555_v45 = vcombine.low %v409_v33, %v413_v63 }
 0x2c5   :  { %7364 = vmatprep.subr.bf16.mxu0 %v10466_v52  ;;  %7733 = vmatprep.subr.bf16.mxu1 %v10468_v34  ;;  %v376_v52 = vld [vmem:[#allocation5 + $0x9d0] sm:$0xff]  ;;  %v421_v53 = vld [vmem:[#allocation5 + $0xb38] sm:$0xff] }
 0x2c6   :  { %v380_v34 = vld [vmem:[#allocation5 + $0x9f0] sm:$0xff] }
 0x2c7   :  { %7356 = vmatmul.mubr.bf16.vlgmr.msra.gmra.mrb[4].mxu0 %v12417_v40  ;;  %7725 = vmatmul.mubr.bf16.vlgmr.msra.gmra.mrb[4].mxu1 %v12417_v40  ;;  %v10483_v40 = vcombine.low %v337_v6, %v341_v9  ;;  %v10521_v6 = vcombine.low %v376_v52, %v380_v34  ;;  %v10523_v9 = vcombine.low %v377_v55, %v381_v56 }
 0x2c8   :  { %7365 = vmatpush1.bf16.msra.mxu0 %v10465_v60  ;;  %7734 = vmatpush1.bf16.msra.mxu1 %v10467_v62  ;;  %v10522_v60 = vcombine.high %v376_v52, %v380_v34  ;;  %v10524_v62 = vcombine.high %v377_v55, %v381_v56  ;;  %v425_v52 = vld [vmem:[#allocation5 + $0xb58] sm:$0xff]  ;;  %v10563_v56 = vcombine.low %v417_v42, %v421_v53 }
 0x2c9   :  { %7366 = vmatprep.subr.bf16.mxu0 %v10474_v8  ;;  %7735 = vmatprep.subr.bf16.mxu1 %v10476_v2  ;;  %v384_v8 = vld [vmem:[#allocation5 + $0xa10] sm:$0xff]  ;;  %v429_v34 = vld [vmem:[#allocation5 + $0xb78] sm:$0xff] }
 0x2ca   :  { %7396 = vmatprep.mubr.bf16.mxu0 %v12420_v50  ;;  %7765 = vmatprep.mubr.bf16.mxu1 %v12420_v50  ;;  %v10500_v50 = vcombine.high %v353_v25, %v357_v26  ;;  %v388_v2 = vld [vmem:[#allocation5 + $0xa30] sm:$0xff]  ;;  %v10539_v26 = vcombine.low %v393_v13, %v397_v15 }
 0x2cb   :  { %v10529_v17 = vcombine.low %v384_v8, %v388_v2 }
 0x2cc   :  { %7367 = vmatpush1.bf16.msra.mxu0 %v10473_v7  ;;  %7736 = vmatpush1.bf16.msra.mxu1 %v10475_v10  ;;  %v10530_v7 = vcombine.high %v384_v8, %v388_v2  ;;  %v10532_v10 = vcombine.high %v385_v3, %v389_v4  ;;  %v433_v8 = vld [vmem:[#allocation5 + $0xb98] sm:$0xff]  ;;  %v10571_v4 = vcombine.low %v425_v52, %v429_v34 }
 0x2cd   :  { %7368 = vmatprep.subr.bf16.mxu0 %v10482_v11  ;;  %7737 = vmatprep.subr.bf16.mxu1 %v10484_v12  ;;  %v392_v11 = vld [vmem:[#allocation5 + $0xa50] sm:$0xff]  ;;  %v437_v2 = vld [vmem:[#allocation5 + $0xbb8] sm:$0xff] }
 0x2ce   :  { %v396_v12 = vld [vmem:[#allocation5 + $0xa70] sm:$0xff] }
 0x2cf   :  { %v10537_v25 = vcombine.low %v392_v11, %v396_v12 }
 0x2d0   :  { %7369 = vmatpush1.bf16.msra.mxu0 %v10481_v16  ;;  %7738 = vmatpush1.bf16.msra.mxu1 %v10483_v40  ;;  %v10538_v16 = vcombine.high %v392_v11, %v396_v12  ;;  %v10540_v40 = vcombine.high %v393_v13, %v397_v15  ;;  %v441_v11 = vld [vmem:[#allocation5 + $0xbd8] sm:$0xff]  ;;  %v10579_v15 = vcombine.low %v433_v8, %v437_v2 }
 0x2d1   :  { %7370 = vmatprep.subr.bf16.mxu0 %v10490_v1  ;;  %7739 = vmatprep.subr.bf16.mxu1 %v10492_v21  ;;  %v400_v1 = vld [vmem:[#allocation5 + $0xa90] sm:$0xff]  ;;  %v445_v12 = vld [vmem:[#allocation5 + $0xbf8] sm:$0xff] }
 0x2d2   :  { %v404_v21 = vld [vmem:[#allocation5 + $0xab0] sm:$0xff] }
 0x2d3   :  { %v10545_v35 = vcombine.low %v400_v1, %v404_v21 }
 0x2d4   :  { %7371 = vmatpush1.bf16.msra.mxu0 %v10489_v28  ;;  %7740 = vmatpush1.bf16.msra.mxu1 %v10491_v32  ;;  %v10546_v28 = vcombine.high %v400_v1, %v404_v21  ;;  %v10548_v32 = vcombine.high %v401_v22, %v405_v24  ;;  %v449_v1 = vld [vmem:[#allocation5 + $0xc18] sm:$0xff]  ;;  %v10587_v24 = vcombine.low %v441_v11, %v445_v12 }
 0x2d5   :  { %7372 = vmatprep.subr.bf16.mxu0 %v10498_v59  ;;  %7741 = vmatprep.subr.bf16.mxu1 %v10500_v50  ;;  %v408_v59 = vld [vmem:[#allocation5 + $0xad0] sm:$0xff]  ;;  %v453_v21 = vld [vmem:[#allocation5 + $0xc38] sm:$0xff] }
 0x2d6   :  { %v412_v50 = vld [vmem:[#allocation5 + $0xaf0] sm:$0xff] }
 0x2d7   :  { %v10553_v44 = vcombine.low %v408_v59, %v412_v50 }
 0x2d8   :  { %7373 = vmatpush1.bf16.msra.mxu0 %v10497_v38  ;;  %7742 = vmatpush1.bf16.msra.mxu1 %v10499_v39  ;;  %v10554_v38 = vcombine.high %v408_v59, %v412_v50  ;;  %v10556_v39 = vcombine.high %v409_v33, %v413_v63  ;;  %v457_v59 = vld [vmem:[#allocation5 + $0xc58] sm:$0xff]  ;;  %v10595_v63 = vcombine.low %v449_v1, %v453_v21 }
 0x2d9   :  { %7374 = vmatprep.subr.bf16.mxu0 %v10506_v41  ;;  %7743 = vmatprep.subr.bf16.mxu1 %v10508_v23  ;;  %v416_v41 = vld [vmem:[#allocation5 + $0xb10] sm:$0xff]  ;;  %v461_v50 = vld [vmem:[#allocation5 + $0xc78] sm:$0xff] }
 0x2da   :  { %v420_v23 = vld [vmem:[#allocation5 + $0xb30] sm:$0xff] }
 0x2db   :  { %v10561_v55 = vcombine.low %v416_v41, %v420_v23 }
 0x2dc   :  { %7375 = vmatpush1.bf16.msra.mxu0 %v10505_v46  ;;  %7744 = vmatpush1.bf16.msra.mxu1 %v10507_v47  ;;  %v10562_v46 = vcombine.high %v416_v41, %v420_v23  ;;  %v10564_v47 = vcombine.high %v417_v42, %v421_v53  ;;  %v465_v41 = vld [vmem:[#allocation5 + $0xc98] sm:$0xff]  ;;  %v10603_v53 = vcombine.low %v457_v59, %v461_v50 }
 0x2dd   :  { %7376 = vmatprep.subr.bf16.mxu0 %v10514_v48  ;;  %7745 = vmatprep.subr.bf16.mxu1 %v10516_v49  ;;  %v424_v48 = vld [vmem:[#allocation5 + $0xb50] sm:$0xff]  ;;  %v469_v23 = vld [vmem:[#allocation5 + $0xcb8] sm:$0xff] }
 0x2de   :  { %v428_v49 = vld [vmem:[#allocation5 + $0xb70] sm:$0xff] }
 0x2df   :  { %v10569_v3 = vcombine.low %v424_v48, %v428_v49 }
 0x2e0   :  { %7377 = vmatpush1.bf16.msra.mxu0 %v10513_v57  ;;  %7746 = vmatpush1.bf16.msra.mxu1 %v10515_v58  ;;  %v10570_v57 = vcombine.high %v424_v48, %v428_v49  ;;  %v10572_v58 = vcombine.high %v425_v52, %v429_v34  ;;  %v473_v48 = vld [vmem:[#allocation5 + $0xcd8] sm:$0xff] }
 0x2e1   :  { %7378 = vmatprep.subr.bf16.mxu0 %v10522_v60  ;;  %7747 = vmatprep.subr.bf16.mxu1 %v10524_v62  ;;  %v432_v60 = vld [vmem:[#allocation5 + $0xb90] sm:$0xff]  ;;  %v477_v49 = vld [vmem:[#allocation5 + $0xcf8] sm:$0xff] }
 0x2e2   :  { %v436_v62 = vld [vmem:[#allocation5 + $0xbb0] sm:$0xff] }
 0x2e3   :  { %v10577_v13 = vcombine.low %v432_v60, %v436_v62 }
 0x2e4   :  { %7379 = vmatpush1.bf16.msra.mxu0 %v10521_v6  ;;  %7748 = vmatpush1.bf16.msra.mxu1 %v10523_v9  ;;  %v10578_v6 = vcombine.high %v432_v60, %v436_v62  ;;  %v10580_v9 = vcombine.high %v433_v8, %v437_v2  ;;  %v485_v60 = vld [vmem:[#allocation5 + $0xd38] sm:$0xff]  ;;  %v10619_v8 = vcombine.low %v473_v48, %v477_v49 }
 0x2e5   :  { %7380 = vmatprep.subr.bf16.mxu0 %v10530_v7  ;;  %7749 = vmatprep.subr.bf16.mxu1 %v10532_v10  ;;  %v440_v7 = vld [vmem:[#allocation5 + $0xbd0] sm:$0xff] }
 0x2e6   :  { %v444_v10 = vld [vmem:[#allocation5 + $0xbf0] sm:$0xff] }
 0x2e7   :  { %v10585_v22 = vcombine.low %v440_v7, %v444_v10 }
 0x2e8   :  { %7381 = vmatpush1.bf16.msra.mxu0 %v10529_v17  ;;  %7750 = vmatpush1.bf16.msra.mxu1 %v10531_v18  ;;  %v10586_v17 = vcombine.high %v440_v7, %v444_v10  ;;  %v10588_v18 = vcombine.high %v441_v11, %v445_v12 }
 0x2e9   :  { %7382 = vmatprep.subr.bf16.mxu0 %v10538_v16  ;;  %7751 = vmatprep.subr.bf16.mxu1 %v10540_v40  ;;  %v448_v16 = vld [vmem:[#allocation5 + $0xc10] sm:$0xff] }
 0x2ea   :  { %v452_v40 = vld [vmem:[#allocation5 + $0xc30] sm:$0xff] }
 0x2eb   :  { %v10593_v33 = vcombine.low %v448_v16, %v452_v40 }
 0x2ec   :  { %7383 = vmatpush1.bf16.msra.mxu0 %v10537_v25  ;;  %7752 = vmatpush1.bf16.msra.mxu1 %v10539_v26  ;;  %v10594_v25 = vcombine.high %v448_v16, %v452_v40  ;;  %v10596_v26 = vcombine.high %v449_v1, %v453_v21 }
 0x2ed   :  { %7384 = vmatprep.subr.bf16.mxu0 %v10546_v28  ;;  %7753 = vmatprep.subr.bf16.mxu1 %v10548_v32  ;;  %v456_v28 = vld [vmem:[#allocation5 + $0xc50] sm:$0xff] }
 0x2ee   :  { %v460_v32 = vld [vmem:[#allocation5 + $0xc70] sm:$0xff] }
 0x2ef   :  { %v10601_v42 = vcombine.low %v456_v28, %v460_v32 }
 0x2f0   :  { %7385 = vmatpush1.bf16.msra.mxu0 %v10545_v35  ;;  %7754 = vmatpush1.bf16.msra.mxu1 %v10547_v36  ;;  %v10602_v35 = vcombine.high %v456_v28, %v460_v32  ;;  %v10604_v36 = vcombine.high %v457_v59, %v461_v50  ;;  %v505_v32 = vld [vmem:[#allocation5 + $0xdd8] sm:$0xff] }
 0x2f1   :  { %7386 = vmatprep.subr.bf16.mxu0 %v10554_v38  ;;  %7755 = vmatprep.subr.bf16.mxu1 %v10556_v39  ;;  %v464_v38 = vld [vmem:[#allocation5 + $0xc90] sm:$0xff]  ;;  %v509_v59 = vld [vmem:[#allocation5 + $0xdf8] sm:$0xff] }
 0x2f2   :  { %v468_v39 = vld [vmem:[#allocation5 + $0xcb0] sm:$0xff] }
 0x2f3   :  { %v10609_v52 = vcombine.low %v464_v38, %v468_v39 }
 0x2f4   :  { %7387 = vmatpush1.bf16.msra.mxu0 %v10553_v44  ;;  %7756 = vmatpush1.bf16.msra.mxu1 %v10555_v45  ;;  %v10610_v44 = vcombine.high %v464_v38, %v468_v39  ;;  %v10612_v45 = vcombine.high %v465_v41, %v469_v23 }
 0x2f5   :  { %7388 = vmatprep.subr.bf16.mxu0 %v10562_v46  ;;  %7757 = vmatprep.subr.bf16.mxu1 %v10564_v47  ;;  %v472_v46 = vld [vmem:[#allocation5 + $0xcd0] sm:$0xff] }
 0x2f6   :  { %v476_v47 = vld [vmem:[#allocation5 + $0xcf0] sm:$0xff] }
 0x2f7   :  { %v10618_v34 = vcombine.high %v472_v46, %v476_v47  ;;  %v10617_v62 = vcombine.low %v472_v46, %v476_v47  ;;  %v10651_v47 = vcombine.low %v505_v32, %v509_v59 }
 0x2f8   :  { %7389 = vmatpush1.bf16.msra.mxu0 %v10561_v55  ;;  %7758 = vmatpush1.bf16.msra.mxu1 %v10563_v56  ;;  %v10620_v55 = vcombine.high %v473_v48, %v477_v49  ;;  %v480_v56 = vld [vmem:[#allocation5 + $0xd10] sm:$0xff] }
 0x2f9   :  { %7390 = vmatprep.subr.bf16.mxu0 %v10570_v57  ;;  %7759 = vmatprep.subr.bf16.mxu1 %v10572_v58  ;;  %v484_v57 = vld [vmem:[#allocation5 + $0xd30] sm:$0xff]  ;;  %v481_v58 = vld [vmem:[#allocation5 + $0xd18] sm:$0xff] }
 0x2fa   :  { %v10626_v2 = vcombine.high %v480_v56, %v484_v57  ;;  %v10625_v7 = vcombine.low %v480_v56, %v484_v57  ;;  %v10627_v10 = vcombine.low %v481_v58, %v485_v60 }
 0x2fc   :  { %7391 = vmatpush1.bf16.msra.mxu0 %v10569_v3  ;;  %7760 = vmatpush1.bf16.msra.mxu1 %v10571_v4  ;;  %v488_v3 = vld [vmem:[#allocation5 + $0xd50] sm:$0xff] }
 0x2fd   :  { %7392 = vmatprep.subr.bf16.mxu0 %v10578_v6  ;;  %7761 = vmatprep.subr.bf16.mxu1 %v10580_v9  ;;  %v492_v4 = vld [vmem:[#allocation5 + $0xd70] sm:$0xff]  ;;  %v489_v6 = vld [vmem:[#allocation5 + $0xd58] sm:$0xff] }
 0x2fe   :  { %v493_v9 = vld [vmem:[#allocation5 + $0xd78] sm:$0xff]  ;;  %v10634_v11 = vcombine.high %v488_v3, %v492_v4  ;;  %v10633_v16 = vcombine.low %v488_v3, %v492_v4 }
 0x2ff   :  { %v10636_v12 = vcombine.high %v489_v6, %v493_v9  ;;  %v10635_v40 = vcombine.low %v489_v6, %v493_v9 }
 0x300   :  { %7393 = vmatpush1.bf16.msra.mxu0 %v10577_v13  ;;  %7762 = vmatpush1.bf16.msra.mxu1 %v10579_v15  ;;  %v496_v13 = vld [vmem:[#allocation5 + $0xd90] sm:$0xff] }
 0x301   :  { %7394 = vmatprep.subr.bf16.mxu0 %v10586_v17  ;;  %7763 = vmatprep.subr.bf16.mxu1 %v10588_v18  ;;  %v500_v15 = vld [vmem:[#allocation5 + $0xdb0] sm:$0xff]  ;;  %v497_v17 = vld [vmem:[#allocation5 + $0xd98] sm:$0xff] }
 0x302   :  { %v501_v18 = vld [vmem:[#allocation5 + $0xdb8] sm:$0xff]  ;;  %v10642_v1 = vcombine.high %v496_v13, %v500_v15 }
 0x303   :  { %v10643_v38 = vcombine.low %v497_v17, %v501_v18 }
 0x304   :  { %7395 = vmatpush1.bf16.msra.mxu0 %v10585_v22  ;;  %7764 = vmatpush1.bf16.msra.mxu1 %v10587_v24  ;;  %v10644_v22 = vcombine.high %v497_v17, %v501_v18  ;;  %v504_v24 = vld [vmem:[#allocation5 + $0xdd0] sm:$0xff] }
 0x305   :  { %7405 = vmatprep.subr.bf16.mxu0 %v10594_v25  ;;  %7774 = vmatprep.subr.bf16.mxu1 %v10596_v26  ;;  %v508_v25 = vld [vmem:[#allocation5 + $0xdf0] sm:$0xff] }
 0x306   :  { %v10650_v39 = vcombine.high %v504_v24, %v508_v25  ;;  %v10649_v46 = vcombine.low %v504_v24, %v508_v25 }
 0x307   :  { %7397 = vmatmul.mubr.bf16.vlgmr.msra.gmra.mrb[4].mxu0 %v12428_v61  ;;  %7766 = vmatmul.mubr.bf16.vlgmr.msra.gmra.mrb[4].mxu1 %v12428_v61  ;;  %v10611_v61 = vcombine.low %v465_v41, %v469_v23  ;;  %v10652_v23 = vcombine.high %v505_v32, %v509_v59 }
 0x308   :  { %7406 = vmatpush1.bf16.msra.mxu0 %v10593_v33  ;;  %7775 = vmatpush1.bf16.msra.mxu1 %v10595_v63  ;;  %v10641_v63 = vcombine.low %v496_v13, %v500_v15 }
 0x309   :  { %7407 = vmatprep.subr.bf16.mxu0 %v10602_v35  ;;  %7776 = vmatprep.subr.bf16.mxu1 %v10604_v36 }
 0x30a   :  { %7437 = vmatprep.mubr.bf16.mxu0 %v12432_v5  ;;  %7806 = vmatprep.mubr.bf16.mxu1 %v12432_v5  ;;  %v10628_v5 = vcombine.high %v481_v58, %v485_v60 }
 0x30c   :  { %7408 = vmatpush1.bf16.msra.mxu0 %v10601_v42  ;;  %7777 = vmatpush1.bf16.msra.mxu1 %v10603_v53  ;;  %v512_v42 = vld [vmem:[#allocation5 + $0xe10] sm:$0xff] }
 0x30d   :  { %7409 = vmatprep.subr.bf16.mxu0 %v10610_v44  ;;  %7778 = vmatprep.subr.bf16.mxu1 %v10612_v45  ;;  %v516_v53 = vld [vmem:[#allocation5 + $0xe30] sm:$0xff]  ;;  %v513_v44 = vld [vmem:[#allocation5 + $0xe18] sm:$0xff] }
 0x30e   :  { %v517_v45 = vld [vmem:[#allocation5 + $0xe38] sm:$0xff]  ;;  %v10658_v48 = vcombine.high %v512_v42, %v516_v53  ;;  %v10657_v56 = vcombine.low %v512_v42, %v516_v53  ;;  %v560_v42 = vld [vmem:[#allocation5 + $0xf90] sm:$0xff] }
 0x30f   :  { %v10660_v49 = vcombine.high %v513_v44, %v517_v45  ;;  %v10659_v57 = vcombine.low %v513_v44, %v517_v45  ;;  %v564_v53 = vld [vmem:[#allocation5 + $0xfb0] sm:$0xff]  ;;  %v561_v44 = vld [vmem:[#allocation5 + $0xf98] sm:$0xff] }
 0x310   :  { %7410 = vmatpush1.bf16.msra.mxu0 %v10609_v52  ;;  %7779 = vmatpush1.bf16.msra.mxu1 %v10611_v61  ;;  %v520_v52 = vld [vmem:[#allocation5 + $0xe50] sm:$0xff]  ;;  %v565_v45 = vld [vmem:[#allocation5 + $0xfb8] sm:$0xff] }
 0x311   :  { %7411 = vmatprep.subr.bf16.mxu0 %v10618_v34  ;;  %7780 = vmatprep.subr.bf16.mxu1 %v10620_v55  ;;  %v524_v61 = vld [vmem:[#allocation5 + $0xe70] sm:$0xff]  ;;  %v521_v34 = vld [vmem:[#allocation5 + $0xe58] sm:$0xff] }
 0x312   :  { %v525_v55 = vld [vmem:[#allocation5 + $0xe78] sm:$0xff]  ;;  %v10666_v58 = vcombine.high %v520_v52, %v524_v61  ;;  %v10665_v3 = vcombine.low %v520_v52, %v524_v61  ;;  %v568_v52 = vld [vmem:[#allocation5 + $0xfd0] sm:$0xff] }
 0x313   :  { %v10668_v60 = vcombine.high %v521_v34, %v525_v55  ;;  %v10667_v4 = vcombine.low %v521_v34, %v525_v55  ;;  %v572_v61 = vld [vmem:[#allocation5 + $0xff0] sm:$0xff]  ;;  %v569_v34 = vld [vmem:[#allocation5 + $0xfd8] sm:$0xff] }
 0x314   :  { %7412 = vmatpush1.bf16.msra.mxu0 %v10617_v62  ;;  %7781 = vmatpush1.bf16.msra.mxu1 %v10619_v8  ;;  %v528_v62 = vld [vmem:[#allocation5 + $0xe90] sm:$0xff]  ;;  %v573_v55 = vld [vmem:[#allocation5 + $0xff8] sm:$0xff] }
 0x315   :  { %7413 = vmatprep.subr.bf16.mxu0 %v10626_v2  ;;  %7782 = vmatprep.subr.bf16.mxu1 %v10628_v5  ;;  %v532_v8 = vld [vmem:[#allocation5 + $0xeb0] sm:$0xff]  ;;  %v529_v2 = vld [vmem:[#allocation5 + $0xe98] sm:$0xff] }
 0x316   :  { %v533_v5 = vld [vmem:[#allocation5 + $0xeb8] sm:$0xff]  ;;  %v10674_v6 = vcombine.high %v528_v62, %v532_v8  ;;  %v10673_v13 = vcombine.low %v528_v62, %v532_v8  ;;  %v576_v62 = vld [vmem:[#allocation5 + $0x1010] sm:$0xff] }
 0x317   :  { %v10676_v9 = vcombine.high %v529_v2, %v533_v5  ;;  %v10675_v15 = vcombine.low %v529_v2, %v533_v5  ;;  %v580_v8 = vld [vmem:[#allocation5 + $0x1030] sm:$0xff]  ;;  %v577_v2 = vld [vmem:[#allocation5 + $0x1018] sm:$0xff] }
 0x318   :  { %7414 = vmatpush1.bf16.msra.mxu0 %v10625_v7  ;;  %7783 = vmatpush1.bf16.msra.mxu1 %v10627_v10  ;;  %v536_v7 = vld [vmem:[#allocation5 + $0xed0] sm:$0xff]  ;;  %v581_v5 = vld [vmem:[#allocation5 + $0x1038] sm:$0xff] }
 0x319   :  { %7415 = vmatprep.subr.bf16.mxu0 %v10634_v11  ;;  %7784 = vmatprep.subr.bf16.mxu1 %v10636_v12  ;;  %v540_v10 = vld [vmem:[#allocation5 + $0xef0] sm:$0xff]  ;;  %v537_v11 = vld [vmem:[#allocation5 + $0xed8] sm:$0xff] }
 0x31a   :  { %v12532_v21 = vpop.f32.mrb[0].mxu0  ;;  %v12534_v26 = vpop.f32.mrb[0].mxu1  ;;  %v541_v12 = vld [vmem:[#allocation5 + $0xef8] sm:$0xff]  ;;  %v10682_v17 = vcombine.high %v536_v7, %v540_v10  ;;  %v10681_v24 = vcombine.low %v536_v7, %v540_v10  ;;  %v584_v7 = vld [vmem:[#allocation5 + $0x1050] sm:$0xff] }
 0x31b   :  { %v12536_v28 = vpop.f32.mrb[1].mxu0  ;;  %v12538_v50 = vpop.f32.mrb[1].mxu1  ;;  %v10684_v18 = vcombine.high %v537_v11, %v541_v12  ;;  %v10683_v25 = vcombine.low %v537_v11, %v541_v12  ;;  %v588_v10 = vld [vmem:[#allocation5 + $0x1070] sm:$0xff]  ;;  %v585_v11 = vld [vmem:[#allocation5 + $0x1058] sm:$0xff] }
 0x31c   :  { %v6910_v33 = vpop.f32.mrb[2].mxu0  ;;  %7416 = vmatpush1.bf16.msra.mxu0 %v10633_v16  ;;  %v7279_v35 = vpop.f32.mrb[2].mxu1  ;;  %7785 = vmatpush1.bf16.msra.mxu1 %v10635_v40  ;;  %v544_v16 = vld [vmem:[#allocation5 + $0xf10] sm:$0xff]  ;;  %v589_v12 = vld [vmem:[#allocation5 + $0x1078] sm:$0xff] }
 0x31d   :  { %v6911_v36 = vpop.f32.mrb[3].mxu0  ;;  %7417 = vmatprep.subr.bf16.mxu0 %v10642_v1  ;;  %v7280_v41 = vpop.f32.mrb[3].mxu1  ;;  %7786 = vmatprep.subr.bf16.mxu1 %v10644_v22  ;;  %v548_v40 = vld [vmem:[#allocation5 + $0xf30] sm:$0xff]  ;;  %v545_v1 = vld [vmem:[#allocation5 + $0xf18] sm:$0xff] }
 0x31e   :  { %v549_v22 = vld [vmem:[#allocation5 + $0xf38] sm:$0xff]  ;;  %v10690_v32 = vcombine.high %v544_v16, %v548_v40  ;;  %v552_v33 = vld [vmem:[#allocation5 + $0xf50] sm:$0xff] }
 0x31f   :  { %v10692_v59 = vcombine.high %v545_v1, %v549_v22  ;;  %v553_v35 = vld [vmem:[#allocation5 + $0xf58] sm:$0xff] }
 0x320   :  { %7418 = vmatpush1.bf16.msra.mxu0 %v10641_v63  ;;  %7787 = vmatpush1.bf16.msra.mxu1 %v10643_v38  ;;  %v556_v63 = vld [vmem:[#allocation5 + $0xf70] sm:$0xff]  ;;  %v557_v36 = vld [vmem:[#allocation5 + $0xf78] sm:$0xff]  ;;  %v10689_v38 = vcombine.low %v544_v16, %v548_v40 }
 0x321   :  { %7419 = vmatprep.subr.bf16.mxu0 %v10650_v39  ;;  %7788 = vmatprep.subr.bf16.mxu1 %v10652_v23  ;;  %v10691_v39 = vcombine.low %v545_v1, %v549_v22  ;;  %v10698_v41 = vcombine.high %v552_v33, %v556_v63  ;;  %v10700_v23 = vcombine.high %v553_v35, %v557_v36  ;;  %v592_v16 = vld [vmem:[#allocation5 + $0x1090] sm:$0xff]  ;;  %v593_v1 = vld [vmem:[#allocation5 + $0x1098] sm:$0xff] }
 0x322   :  { %v596_v40 = vld [vmem:[#allocation5 + $0x10b0] sm:$0xff]  ;;  %v597_v22 = vld [vmem:[#allocation5 + $0x10b8] sm:$0xff] }
 0x324   :  { %7420 = vmatpush1.bf16.msra.mxu0 %v10649_v46  ;;  %7789 = vmatpush1.bf16.msra.mxu1 %v10651_v47  ;;  %v10697_v46 = vcombine.low %v552_v33, %v556_v63  ;;  %v10699_v47 = vcombine.low %v553_v35, %v557_v36  ;;  %v600_v33 = vld [vmem:[#allocation5 + $0x10d0] sm:$0xff]  ;;  %v601_v35 = vld [vmem:[#allocation5 + $0x10d8] sm:$0xff] }
 0x325   :  { %7421 = vmatprep.subr.bf16.mxu0 %v10658_v48  ;;  %7790 = vmatprep.subr.bf16.mxu1 %v10660_v49  ;;  %v10706_v48 = vcombine.high %v560_v42, %v564_v53  ;;  %v10708_v49 = vcombine.high %v561_v44, %v565_v45  ;;  %v604_v63 = vld [vmem:[#allocation5 + $0x10f0] sm:$0xff]  ;;  %v605_v36 = vld [vmem:[#allocation5 + $0x10f8] sm:$0xff] }
 0x328   :  { %7422 = vmatpush1.bf16.msra.mxu0 %v10657_v56  ;;  %7791 = vmatpush1.bf16.msra.mxu1 %v10659_v57  ;;  %v10705_v56 = vcombine.low %v560_v42, %v564_v53  ;;  %v10707_v57 = vcombine.low %v561_v44, %v565_v45  ;;  %v612_v42 = vld [vmem:[#allocation5 + $0x1130] sm:$0xff]  ;;  %v609_v53 = vld [vmem:[#allocation5 + $0x1118] sm:$0xff]  ;;  %v10745_v45 = vcombine.low %v600_v33, %v604_v63 }
 0x329   :  { %7423 = vmatprep.subr.bf16.mxu0 %v10666_v58  ;;  %7792 = vmatprep.subr.bf16.mxu1 %v10668_v60  ;;  %v10714_v58 = vcombine.high %v568_v52, %v572_v61  ;;  %v10716_v60 = vcombine.high %v569_v34, %v573_v55  ;;  %v613_v44 = vld [vmem:[#allocation5 + $0x1138] sm:$0xff] }
 0x32c   :  { %7424 = vmatpush1.bf16.msra.mxu0 %v10665_v3  ;;  %7793 = vmatpush1.bf16.msra.mxu1 %v10667_v4  ;;  %v10713_v3 = vcombine.low %v568_v52, %v572_v61  ;;  %v10715_v4 = vcombine.low %v569_v34, %v573_v55  ;;  %v617_v52 = vld [vmem:[#allocation5 + $0x1158] sm:$0xff]  ;;  %v10755_v55 = vcombine.low %v609_v53, %v613_v44 }
 0x32d   :  { %7425 = vmatprep.subr.bf16.mxu0 %v10674_v6  ;;  %7794 = vmatprep.subr.bf16.mxu1 %v10676_v9  ;;  %v10722_v6 = vcombine.high %v576_v62, %v580_v8  ;;  %v10724_v9 = vcombine.high %v577_v2, %v581_v5  ;;  %v621_v61 = vld [vmem:[#allocation5 + $0x1178] sm:$0xff] }
 0x330   :  { %7426 = vmatpush1.bf16.msra.mxu0 %v10673_v13  ;;  %7795 = vmatpush1.bf16.msra.mxu1 %v10675_v15  ;;  %v10721_v13 = vcombine.low %v576_v62, %v580_v8  ;;  %v10723_v15 = vcombine.low %v577_v2, %v581_v5  ;;  %v625_v62 = vld [vmem:[#allocation5 + $0x1198] sm:$0xff]  ;;  %v10763_v5 = vcombine.low %v617_v52, %v621_v61 }
 0x331   :  { %7427 = vmatprep.subr.bf16.mxu0 %v10682_v17  ;;  %7796 = vmatprep.subr.bf16.mxu1 %v10684_v18  ;;  %v10730_v17 = vcombine.high %v584_v7, %v588_v10  ;;  %v10732_v18 = vcombine.high %v585_v11, %v589_v12  ;;  %v629_v8 = vld [vmem:[#allocation5 + $0x11b8] sm:$0xff] }
 0x334   :  { %7428 = vmatpush1.bf16.msra.mxu0 %v10681_v24  ;;  %7797 = vmatpush1.bf16.msra.mxu1 %v10683_v25  ;;  %v10729_v24 = vcombine.low %v584_v7, %v588_v10  ;;  %v10731_v25 = vcombine.low %v585_v11, %v589_v12  ;;  %v633_v7 = vld [vmem:[#allocation5 + $0x11d8] sm:$0xff]  ;;  %v10771_v12 = vcombine.low %v625_v62, %v629_v8 }
 0x335   :  { %7429 = vmatprep.subr.bf16.mxu0 %v10690_v32  ;;  %7798 = vmatprep.subr.bf16.mxu1 %v10692_v59  ;;  %v10738_v32 = vcombine.high %v592_v16, %v596_v40  ;;  %v10740_v59 = vcombine.high %v593_v1, %v597_v22  ;;  %v637_v10 = vld [vmem:[#allocation5 + $0x11f8] sm:$0xff] }
 0x338   :  { %7430 = vmatpush1.bf16.msra.mxu0 %v10689_v38  ;;  %7799 = vmatpush1.bf16.msra.mxu1 %v10691_v39  ;;  %v10737_v38 = vcombine.low %v592_v16, %v596_v40  ;;  %v10746_v39 = vcombine.high %v600_v33, %v604_v63  ;;  %v641_v16 = vld [vmem:[#allocation5 + $0x1218] sm:$0xff] }
 0x339   :  { %7431 = vmatprep.subr.bf16.mxu0 %v10698_v41  ;;  %7800 = vmatprep.subr.bf16.mxu1 %v10700_v23  ;;  %v10748_v41 = vcombine.high %v601_v35, %v605_v36  ;;  %v608_v23 = vld [vmem:[#allocation5 + $0x1110] sm:$0xff]  ;;  %v645_v40 = vld [vmem:[#allocation5 + $0x1238] sm:$0xff] }
 0x33a   :  { %v10753_v34 = vcombine.low %v608_v23, %v612_v42  ;;  %v649_v33 = vld [vmem:[#allocation5 + $0x1258] sm:$0xff] }
 0x33b   :  { %v653_v63 = vld [vmem:[#allocation5 + $0x1278] sm:$0xff] }
 0x33c   :  { %7432 = vmatpush1.bf16.msra.mxu0 %v10697_v46  ;;  %7801 = vmatpush1.bf16.msra.mxu1 %v10699_v47  ;;  %v10747_v46 = vcombine.low %v601_v35, %v605_v36  ;;  %v10754_v47 = vcombine.high %v608_v23, %v612_v42  ;;  %v10787_v36 = vcombine.low %v641_v16, %v645_v40  ;;  %v657_v23 = vld [vmem:[#allocation5 + $0x1298] sm:$0xff] }
 0x33d   :  { %7433 = vmatprep.subr.bf16.mxu0 %v10706_v48  ;;  %7802 = vmatprep.subr.bf16.mxu1 %v10708_v49  ;;  %v616_v48 = vld [vmem:[#allocation5 + $0x1150] sm:$0xff]  ;;  %v661_v42 = vld [vmem:[#allocation5 + $0x12b8] sm:$0xff] }
 0x33e   :  { %v620_v49 = vld [vmem:[#allocation5 + $0x1170] sm:$0xff] }
 0x33f   :  { %v10761_v2 = vcombine.low %v616_v48, %v620_v49 }
 0x340   :  { %7434 = vmatpush1.bf16.msra.mxu0 %v10705_v56  ;;  %7803 = vmatpush1.bf16.msra.mxu1 %v10707_v57  ;;  %v10762_v56 = vcombine.high %v616_v48, %v620_v49  ;;  %v10764_v57 = vcombine.high %v617_v52, %v621_v61  ;;  %v665_v48 = vld [vmem:[#allocation5 + $0x12d8] sm:$0xff]  ;;  %v10803_v61 = vcombine.low %v657_v23, %v661_v42 }
 0x341   :  { %7435 = vmatprep.subr.bf16.mxu0 %v10714_v58  ;;  %7804 = vmatprep.subr.bf16.mxu1 %v10716_v60  ;;  %v624_v58 = vld [vmem:[#allocation5 + $0x1190] sm:$0xff]  ;;  %v669_v49 = vld [vmem:[#allocation5 + $0x12f8] sm:$0xff] }
 0x342   :  { %v628_v60 = vld [vmem:[#allocation5 + $0x11b0] sm:$0xff] }
 0x343   :  { %v10769_v11 = vcombine.low %v624_v58, %v628_v60 }
 0x344   :  { %7436 = vmatpush1.bf16.msra.mxu0 %v10713_v3  ;;  %7805 = vmatpush1.bf16.msra.mxu1 %v10715_v4  ;;  %v10770_v3 = vcombine.high %v624_v58, %v628_v60  ;;  %v10772_v4 = vcombine.high %v625_v62, %v629_v8  ;;  %v673_v58 = vld [vmem:[#allocation5 + $0x1318] sm:$0xff]  ;;  %v10811_v8 = vcombine.low %v665_v48, %v669_v49 }
 0x345   :  { %7446 = vmatprep.subr.bf16.mxu0 %v10722_v6  ;;  %7815 = vmatprep.subr.bf16.mxu1 %v10724_v9  ;;  %v632_v6 = vld [vmem:[#allocation5 + $0x11d0] sm:$0xff]  ;;  %v677_v60 = vld [vmem:[#allocation5 + $0x1338] sm:$0xff] }
 0x346   :  { %v636_v9 = vld [vmem:[#allocation5 + $0x11f0] sm:$0xff] }
 0x347   :  { %7438 = vmatmul.mubr.bf16.vlgmr.msra.gmra.mrb[4].mxu0 %v12448_v19  ;;  %7807 = vmatmul.mubr.bf16.vlgmr.msra.gmra.mrb[4].mxu1 %v12448_v19  ;;  %v10739_v19 = vcombine.low %v593_v1, %v597_v22  ;;  %v10777_v1 = vcombine.low %v632_v6, %v636_v9  ;;  %v10779_v22 = vcombine.low %v633_v7, %v637_v10 }
 0x348   :  { %7447 = vmatpush1.bf16.msra.mxu0 %v10721_v13  ;;  %7816 = vmatpush1.bf16.msra.mxu1 %v10723_v15  ;;  %v10778_v13 = vcombine.high %v632_v6, %v636_v9  ;;  %v10780_v15 = vcombine.high %v633_v7, %v637_v10  ;;  %v681_v6 = vld [vmem:[#allocation5 + $0x1358] sm:$0xff]  ;;  %v10819_v10 = vcombine.low %v673_v58, %v677_v60 }
 0x349   :  { %7448 = vmatprep.subr.bf16.mxu0 %v10730_v17  ;;  %7817 = vmatprep.subr.bf16.mxu1 %v10732_v18  ;;  %v640_v17 = vld [vmem:[#allocation5 + $0x1210] sm:$0xff]  ;;  %v685_v9 = vld [vmem:[#allocation5 + $0x1378] sm:$0xff] }
 0x34a   :  { %7478 = vmatprep.mubr.bf16.mxu0 %v12451_v29  ;;  %7847 = vmatprep.mubr.bf16.mxu1 %v12451_v29  ;;  %v10756_v29 = vcombine.high %v609_v53, %v613_v44  ;;  %v644_v18 = vld [vmem:[#allocation5 + $0x1230] sm:$0xff]  ;;  %v10795_v44 = vcombine.low %v649_v33, %v653_v63 }
 0x34b   :  { %v10785_v35 = vcombine.low %v640_v17, %v644_v18 }
 0x34c   :  { %7449 = vmatpush1.bf16.msra.mxu0 %v10729_v24  ;;  %7818 = vmatpush1.bf16.msra.mxu1 %v10731_v25  ;;  %v10786_v24 = vcombine.high %v640_v17, %v644_v18  ;;  %v10788_v25 = vcombine.high %v641_v16, %v645_v40  ;;  %v689_v17 = vld [vmem:[#allocation5 + $0x1398] sm:$0xff]  ;;  %v10827_v40 = vcombine.low %v681_v6, %v685_v9 }
 0x34d   :  { %7450 = vmatprep.subr.bf16.mxu0 %v10738_v32  ;;  %7819 = vmatprep.subr.bf16.mxu1 %v10740_v59  ;;  %v648_v32 = vld [vmem:[#allocation5 + $0x1250] sm:$0xff]  ;;  %v693_v18 = vld [vmem:[#allocation5 + $0x13b8] sm:$0xff] }
 0x34e   :  { %v652_v59 = vld [vmem:[#allocation5 + $0x1270] sm:$0xff] }
 0x34f   :  { %v10793_v53 = vcombine.low %v648_v32, %v652_v59 }
 0x350   :  { %7451 = vmatpush1.bf16.msra.mxu0 %v10737_v38  ;;  %7820 = vmatpush1.bf16.msra.mxu1 %v10739_v19  ;;  %v10794_v38 = vcombine.high %v648_v32, %v652_v59  ;;  %v10796_v19 = vcombine.high %v649_v33, %v653_v63  ;;  %v697_v32 = vld [vmem:[#allocation5 + $0x13d8] sm:$0xff]  ;;  %v10835_v63 = vcombine.low %v689_v17, %v693_v18 }
 0x351   :  { %7452 = vmatprep.subr.bf16.mxu0 %v10746_v39  ;;  %7821 = vmatprep.subr.bf16.mxu1 %v10748_v41  ;;  %v656_v39 = vld [vmem:[#allocation5 + $0x1290] sm:$0xff]  ;;  %v701_v59 = vld [vmem:[#allocation5 + $0x13f8] sm:$0xff] }
 0x352   :  { %v660_v41 = vld [vmem:[#allocation5 + $0x12b0] sm:$0xff] }
 0x353   :  { %v10801_v52 = vcombine.low %v656_v39, %v660_v41 }
 0x354   :  { %7453 = vmatpush1.bf16.msra.mxu0 %v10745_v45  ;;  %7822 = vmatpush1.bf16.msra.mxu1 %v10747_v46  ;;  %v10802_v45 = vcombine.high %v656_v39, %v660_v41  ;;  %v10804_v46 = vcombine.high %v657_v23, %v661_v42  ;;  %v705_v39 = vld [vmem:[#allocation5 + $0x1418] sm:$0xff]  ;;  %v10843_v42 = vcombine.low %v697_v32, %v701_v59 }
 0x355   :  { %7454 = vmatprep.subr.bf16.mxu0 %v10754_v47  ;;  %7823 = vmatprep.subr.bf16.mxu1 %v10756_v29  ;;  %v664_v47 = vld [vmem:[#allocation5 + $0x12d0] sm:$0xff]  ;;  %v709_v41 = vld [vmem:[#allocation5 + $0x1438] sm:$0xff] }
 0x356   :  { %v668_v29 = vld [vmem:[#allocation5 + $0x12f0] sm:$0xff] }
 0x357   :  { %v10809_v62 = vcombine.low %v664_v47, %v668_v29 }
 0x358   :  { %7455 = vmatpush1.bf16.msra.mxu0 %v10753_v34  ;;  %7824 = vmatpush1.bf16.msra.mxu1 %v10755_v55  ;;  %v10810_v34 = vcombine.high %v664_v47, %v668_v29  ;;  %v10812_v55 = vcombine.high %v665_v48, %v669_v49  ;;  %v713_v47 = vld [vmem:[#allocation5 + $0x1458] sm:$0xff]  ;;  %v10851_v49 = vcombine.low %v705_v39, %v709_v41 }
 0x359   :  { %7456 = vmatprep.subr.bf16.mxu0 %v10762_v56  ;;  %7825 = vmatprep.subr.bf16.mxu1 %v10764_v57  ;;  %v672_v56 = vld [vmem:[#allocation5 + $0x1310] sm:$0xff]  ;;  %v717_v29 = vld [vmem:[#allocation5 + $0x1478] sm:$0xff] }
 0x35a   :  { %v676_v57 = vld [vmem:[#allocation5 + $0x1330] sm:$0xff] }
 0x35b   :  { %v10817_v7 = vcombine.low %v672_v56, %v676_v57 }
 0x35c   :  { %7457 = vmatpush1.bf16.msra.mxu0 %v10761_v2  ;;  %7826 = vmatpush1.bf16.msra.mxu1 %v10763_v5  ;;  %v10818_v2 = vcombine.high %v672_v56, %v676_v57  ;;  %v10820_v5 = vcombine.high %v673_v58, %v677_v60  ;;  %v721_v56 = vld [vmem:[#allocation5 + $0x1498] sm:$0xff]  ;;  %v10859_v60 = vcombine.low %v713_v47, %v717_v29 }
 0x35d   :  { %7458 = vmatprep.subr.bf16.mxu0 %v10770_v3  ;;  %7827 = vmatprep.subr.bf16.mxu1 %v10772_v4  ;;  %v680_v3 = vld [vmem:[#allocation5 + $0x1350] sm:$0xff]  ;;  %v725_v57 = vld [vmem:[#allocation5 + $0x14b8] sm:$0xff] }
 0x35e   :  { %v684_v4 = vld [vmem:[#allocation5 + $0x1370] sm:$0xff] }
 0x35f   :  { %v10825_v16 = vcombine.low %v680_v3, %v684_v4 }
 0x360   :  { %7459 = vmatpush1.bf16.msra.mxu0 %v10769_v11  ;;  %7828 = vmatpush1.bf16.msra.mxu1 %v10771_v12  ;;  %v10826_v11 = vcombine.high %v680_v3, %v684_v4  ;;  %v10828_v12 = vcombine.high %v681_v6, %v685_v9  ;;  %v729_v3 = vld [vmem:[#allocation5 + $0x14d8] sm:$0xff] }
 0x361   :  { %7460 = vmatprep.subr.bf16.mxu0 %v10778_v13  ;;  %7829 = vmatprep.subr.bf16.mxu1 %v10780_v15  ;;  %v688_v13 = vld [vmem:[#allocation5 + $0x1390] sm:$0xff]  ;;  %v733_v4 = vld [vmem:[#allocation5 + $0x14f8] sm:$0xff] }
 0x362   :  { %v692_v15 = vld [vmem:[#allocation5 + $0x13b0] sm:$0xff] }
 0x363   :  { %v10833_v33 = vcombine.low %v688_v13, %v692_v15 }
 0x364   :  { %7461 = vmatpush1.bf16.msra.mxu0 %v10777_v1  ;;  %7830 = vmatpush1.bf16.msra.mxu1 %v10779_v22  ;;  %v10834_v1 = vcombine.high %v688_v13, %v692_v15  ;;  %v10836_v22 = vcombine.high %v689_v17, %v693_v18  ;;  %v741_v13 = vld [vmem:[#allocation5 + $0x1538] sm:$0xff]  ;;  %v10875_v17 = vcombine.low %v729_v3, %v733_v4 }
 0x365   :  { %7462 = vmatprep.subr.bf16.mxu0 %v10786_v24  ;;  %7831 = vmatprep.subr.bf16.mxu1 %v10788_v25  ;;  %v696_v24 = vld [vmem:[#allocation5 + $0x13d0] sm:$0xff] }
 0x366   :  { %v700_v25 = vld [vmem:[#allocation5 + $0x13f0] sm:$0xff] }
 0x367   :  { %v10841_v23 = vcombine.low %v696_v24, %v700_v25 }
 0x368   :  { %7463 = vmatpush1.bf16.msra.mxu0 %v10785_v35  ;;  %7832 = vmatpush1.bf16.msra.mxu1 %v10787_v36  ;;  %v10842_v35 = vcombine.high %v696_v24, %v700_v25  ;;  %v10844_v36 = vcombine.high %v697_v32, %v701_v59 }
 0x369   :  { %7464 = vmatprep.subr.bf16.mxu0 %v10794_v38  ;;  %7833 = vmatprep.subr.bf16.mxu1 %v10796_v19  ;;  %v704_v38 = vld [vmem:[#allocation5 + $0x1410] sm:$0xff] }
 0x36a   :  { %v708_v19 = vld [vmem:[#allocation5 + $0x1430] sm:$0xff] }
 0x36b   :  { %v10849_v48 = vcombine.low %v704_v38, %v708_v19 }
 0x36c   :  { %7465 = vmatpush1.bf16.msra.mxu0 %v10793_v53  ;;  %7834 = vmatpush1.bf16.msra.mxu1 %v10795_v44  ;;  %v10850_v53 = vcombine.high %v704_v38, %v708_v19  ;;  %v10852_v44 = vcombine.high %v705_v39, %v709_v41 }
 0x36d   :  { %7466 = vmatprep.subr.bf16.mxu0 %v10802_v45  ;;  %7835 = vmatprep.subr.bf16.mxu1 %v10804_v46  ;;  %v712_v45 = vld [vmem:[#allocation5 + $0x1450] sm:$0xff] }
 0x36e   :  { %v716_v46 = vld [vmem:[#allocation5 + $0x1470] sm:$0xff] }
 0x36f   :  { %v10857_v58 = vcombine.low %v712_v45, %v716_v46 }
 0x370   :  { %7467 = vmatpush1.bf16.msra.mxu0 %v10801_v52  ;;  %7836 = vmatpush1.bf16.msra.mxu1 %v10803_v61  ;;  %v10858_v52 = vcombine.high %v712_v45, %v716_v46  ;;  %v10860_v61 = vcombine.high %v713_v47, %v717_v29 }
 0x371   :  { %7468 = vmatprep.subr.bf16.mxu0 %v10810_v34  ;;  %7837 = vmatprep.subr.bf16.mxu1 %v10812_v55  ;;  %v720_v34 = vld [vmem:[#allocation5 + $0x1490] sm:$0xff] }
 0x372   :  { %v724_v55 = vld [vmem:[#allocation5 + $0x14b0] sm:$0xff] }
 0x373   :  { %v10865_v6 = vcombine.low %v720_v34, %v724_v55 }
 0x374   :  { %7469 = vmatpush1.bf16.msra.mxu0 %v10809_v62  ;;  %7838 = vmatpush1.bf16.msra.mxu1 %v10811_v8  ;;  %v10866_v62 = vcombine.high %v720_v34, %v724_v55  ;;  %v10868_v8 = vcombine.high %v721_v56, %v725_v57 }
 0x375   :  { %7470 = vmatprep.subr.bf16.mxu0 %v10818_v2  ;;  %7839 = vmatprep.subr.bf16.mxu1 %v10820_v5  ;;  %v728_v2 = vld [vmem:[#allocation5 + $0x14d0] sm:$0xff] }
 0x376   :  { %v732_v5 = vld [vmem:[#allocation5 + $0x14f0] sm:$0xff] }
 0x377   :  { %v10874_v9 = vcombine.high %v728_v2, %v732_v5  ;;  %v10873_v15 = vcombine.low %v728_v2, %v732_v5 }
 0x378   :  { %7471 = vmatpush1.bf16.msra.mxu0 %v10817_v7  ;;  %7840 = vmatpush1.bf16.msra.mxu1 %v10819_v10  ;;  %v10876_v7 = vcombine.high %v729_v3, %v733_v4  ;;  %v736_v10 = vld [vmem:[#allocation5 + $0x1510] sm:$0xff] }
 0x379   :  { %7472 = vmatprep.subr.bf16.mxu0 %v10826_v11  ;;  %7841 = vmatprep.subr.bf16.mxu1 %v10828_v12  ;;  %v740_v11 = vld [vmem:[#allocation5 + $0x1530] sm:$0xff]  ;;  %v737_v12 = vld [vmem:[#allocation5 + $0x1518] sm:$0xff] }
 0x37a   :  { %v10882_v18 = vcombine.high %v736_v10, %v740_v11  ;;  %v10881_v24 = vcombine.low %v736_v10, %v740_v11  ;;  %v10883_v25 = vcombine.low %v737_v12, %v741_v13 }
 0x37c   :  { %7473 = vmatpush1.bf16.msra.mxu0 %v10825_v16  ;;  %7842 = vmatpush1.bf16.msra.mxu1 %v10827_v40  ;;  %v744_v16 = vld [vmem:[#allocation5 + $0x1550] sm:$0xff] }
 0x37d   :  { %7474 = vmatprep.subr.bf16.mxu0 %v10834_v1  ;;  %7843 = vmatprep.subr.bf16.mxu1 %v10836_v22  ;;  %v748_v40 = vld [vmem:[#allocation5 + $0x1570] sm:$0xff]  ;;  %v745_v1 = vld [vmem:[#allocation5 + $0x1558] sm:$0xff] }
 0x37e   :  { %v749_v22 = vld [vmem:[#allocation5 + $0x1578] sm:$0xff]  ;;  %v10890_v32 = vcombine.high %v744_v16, %v748_v40  ;;  %v10889_v38 = vcombine.low %v744_v16, %v748_v40 }
 0x37f   :  { %v10892_v59 = vcombine.high %v745_v1, %v749_v22  ;;  %v10891_v19 = vcombine.low %v745_v1, %v749_v22 }
 0x380   :  { %7475 = vmatpush1.bf16.msra.mxu0 %v10833_v33  ;;  %7844 = vmatpush1.bf16.msra.mxu1 %v10835_v63  ;;  %v752_v33 = vld [vmem:[#allocation5 + $0x1590] sm:$0xff] }
 0x381   :  { %7476 = vmatprep.subr.bf16.mxu0 %v10842_v35  ;;  %7845 = vmatprep.subr.bf16.mxu1 %v10844_v36  ;;  %v756_v63 = vld [vmem:[#allocation5 + $0x15b0] sm:$0xff]  ;;  %v753_v35 = vld [vmem:[#allocation5 + $0x1598] sm:$0xff] }
 0x382   :  { %v757_v36 = vld [vmem:[#allocation5 + $0x15b8] sm:$0xff]  ;;  %v10898_v39 = vcombine.high %v752_v33, %v756_v63  ;;  %v10897_v45 = vcombine.low %v752_v33, %v756_v63 }
 0x383   :  { %v10900_v41 = vcombine.high %v753_v35, %v757_v36  ;;  %v10899_v46 = vcombine.low %v753_v35, %v757_v36 }
 0x384   :  { %7477 = vmatpush1.bf16.msra.mxu0 %v10841_v23  ;;  %7846 = vmatpush1.bf16.msra.mxu1 %v10843_v42  ;;  %v760_v23 = vld [vmem:[#allocation5 + $0x15d0] sm:$0xff] }
 0x385   :  { %7487 = vmatprep.subr.bf16.mxu0 %v10850_v53  ;;  %7856 = vmatprep.subr.bf16.mxu1 %v10852_v44  ;;  %v764_v42 = vld [vmem:[#allocation5 + $0x15f0] sm:$0xff]  ;;  %v761_v53 = vld [vmem:[#allocation5 + $0x15d8] sm:$0xff] }
 0x386   :  { %v765_v44 = vld [vmem:[#allocation5 + $0x15f8] sm:$0xff]  ;;  %v10906_v47 = vcombine.high %v760_v23, %v764_v42  ;;  %v10905_v34 = vcombine.low %v760_v23, %v764_v42 }
 0x387   :  { %7479 = vmatmul.mubr.bf16.vlgmr.msra.gmra.mrb[4].mxu0 %v12459_v51  ;;  %7848 = vmatmul.mubr.bf16.vlgmr.msra.gmra.mrb[4].mxu1 %v12459_v51  ;;  %v10867_v51 = vcombine.low %v721_v56, %v725_v57  ;;  %v10908_v29 = vcombine.high %v761_v53, %v765_v44  ;;  %v10907_v55 = vcombine.low %v761_v53, %v765_v44 }
 0x388   :  { %7488 = vmatpush1.bf16.msra.mxu0 %v10849_v48  ;;  %7857 = vmatpush1.bf16.msra.mxu1 %v10851_v49  ;;  %v768_v48 = vld [vmem:[#allocation5 + $0x1610] sm:$0xff] }
 0x389   :  { %7489 = vmatprep.subr.bf16.mxu0 %v10858_v52  ;;  %7858 = vmatprep.subr.bf16.mxu1 %v10860_v61  ;;  %v772_v49 = vld [vmem:[#allocation5 + $0x1630] sm:$0xff]  ;;  %v769_v52 = vld [vmem:[#allocation5 + $0x1618] sm:$0xff] }
 0x38a   :  { %7519 = vmatprep.mubr.bf16.mxu0 %v12463_v0  ;;  %7888 = vmatprep.mubr.bf16.mxu1 %v12463_v0  ;;  %v10884_v0 = vcombine.high %v737_v12, %v741_v13  ;;  %v773_v61 = vld [vmem:[#allocation5 + $0x1638] sm:$0xff]  ;;  %v10914_v56 = vcombine.high %v768_v48, %v772_v49  ;;  %v10913_v2 = vcombine.low %v768_v48, %v772_v49 }
 0x38b   :  { %v10916_v57 = vcombine.high %v769_v52, %v773_v61  ;;  %v10915_v5 = vcombine.low %v769_v52, %v773_v61 }
 0x38c   :  { %7490 = vmatpush1.bf16.msra.mxu0 %v10857_v58  ;;  %7859 = vmatpush1.bf16.msra.mxu1 %v10859_v60  ;;  %v776_v58 = vld [vmem:[#allocation5 + $0x1650] sm:$0xff] }
 0x38d   :  { %7491 = vmatprep.subr.bf16.mxu0 %v10866_v62  ;;  %7860 = vmatprep.subr.bf16.mxu1 %v10868_v8  ;;  %v780_v60 = vld [vmem:[#allocation5 + $0x1670] sm:$0xff]  ;;  %v777_v62 = vld [vmem:[#allocation5 + $0x1658] sm:$0xff] }
 0x38e   :  { %v781_v8 = vld [vmem:[#allocation5 + $0x1678] sm:$0xff]  ;;  %v10922_v3 = vcombine.high %v776_v58, %v780_v60  ;;  %v10921_v10 = vcombine.low %v776_v58, %v780_v60 }
 0x38f   :  { %v10924_v4 = vcombine.high %v777_v62, %v781_v8  ;;  %v10923_v11 = vcombine.low %v777_v62, %v781_v8 }
 0x390   :  { %7492 = vmatpush1.bf16.msra.mxu0 %v10865_v6  ;;  %7861 = vmatpush1.bf16.msra.mxu1 %v10867_v51  ;;  %v784_v6 = vld [vmem:[#allocation5 + $0x1690] sm:$0xff] }
 0x391   :  { %7493 = vmatprep.subr.bf16.mxu0 %v10874_v9  ;;  %7862 = vmatprep.subr.bf16.mxu1 %v10876_v7  ;;  %v788_v51 = vld [vmem:[#allocation5 + $0x16b0] sm:$0xff]  ;;  %v785_v9 = vld [vmem:[#allocation5 + $0x1698] sm:$0xff] }
 0x392   :  { %v789_v7 = vld [vmem:[#allocation5 + $0x16b8] sm:$0xff]  ;;  %v10930_v12 = vcombine.high %v784_v6, %v788_v51  ;;  %v10929_v16 = vcombine.low %v784_v6, %v788_v51 }
 0x393   :  { %v10932_v13 = vcombine.high %v785_v9, %v789_v7  ;;  %v10931_v40 = vcombine.low %v785_v9, %v789_v7 }
 0x394   :  { %7494 = vmatpush1.bf16.msra.mxu0 %v10873_v15  ;;  %7863 = vmatpush1.bf16.msra.mxu1 %v10875_v17  ;;  %v792_v15 = vld [vmem:[#allocation5 + $0x16d0] sm:$0xff] }
 0x395   :  { %7495 = vmatprep.subr.bf16.mxu0 %v10882_v18  ;;  %7864 = vmatprep.subr.bf16.mxu1 %v10884_v0  ;;  %v796_v17 = vld [vmem:[#allocation5 + $0x16f0] sm:$0xff]  ;;  %v793_v18 = vld [vmem:[#allocation5 + $0x16d8] sm:$0xff] }
 0x396   :  { %v797_v0 = vld [vmem:[#allocation5 + $0x16f8] sm:$0xff]  ;;  %v10938_v1 = vcombine.high %v792_v15, %v796_v17  ;;  %v10937_v33 = vcombine.low %v792_v15, %v796_v17 }
 0x397   :  { %v10940_v22 = vcombine.high %v793_v18, %v797_v0  ;;  %v10939_v63 = vcombine.low %v793_v18, %v797_v0 }
 0x398   :  { %7496 = vmatpush1.bf16.msra.mxu0 %v10881_v24  ;;  %7865 = vmatpush1.bf16.msra.mxu1 %v10883_v25  ;;  %v800_v24 = vld [vmem:[#allocation5 + $0x1710] sm:$0xff] }
 0x399   :  { %7497 = vmatprep.subr.bf16.mxu0 %v10890_v32  ;;  %7866 = vmatprep.subr.bf16.mxu1 %v10892_v59  ;;  %v804_v25 = vld [vmem:[#allocation5 + $0x1730] sm:$0xff]  ;;  %v801_v32 = vld [vmem:[#allocation5 + $0x1718] sm:$0xff] }
 0x39a   :  { %v805_v59 = vld [vmem:[#allocation5 + $0x1738] sm:$0xff]  ;;  %v10946_v35 = vcombine.high %v800_v24, %v804_v25  ;;  %v10945_v23 = vcombine.low %v800_v24, %v804_v25 }
 0x39b   :  { %v10948_v36 = vcombine.high %v801_v32, %v805_v59  ;;  %v10947_v42 = vcombine.low %v801_v32, %v805_v59 }
 0x39c   :  { %7498 = vmatpush1.bf16.msra.mxu0 %v10889_v38  ;;  %7867 = vmatpush1.bf16.msra.mxu1 %v10891_v19  ;;  %v808_v38 = vld [vmem:[#allocation5 + $0x1750] sm:$0xff] }
 0x39d   :  { %7499 = vmatprep.subr.bf16.mxu0 %v10898_v39  ;;  %7868 = vmatprep.subr.bf16.mxu1 %v10900_v41  ;;  %v812_v19 = vld [vmem:[#allocation5 + $0x1770] sm:$0xff]  ;;  %v809_v39 = vld [vmem:[#allocation5 + $0x1758] sm:$0xff] }
 0x39e   :  { %v813_v41 = vld [vmem:[#allocation5 + $0x1778] sm:$0xff]  ;;  %v10954_v53 = vcombine.high %v808_v38, %v812_v19  ;;  %v10953_v48 = vcombine.low %v808_v38, %v812_v19 }
 0x39f   :  { %v10956_v44 = vcombine.high %v809_v39, %v813_v41  ;;  %v10955_v49 = vcombine.low %v809_v39, %v813_v41  ;;  %v864_v41 = vld [vmem:[#allocation5 + $0x1910] sm:$0xff] }
 0x3a0   :  { %7500 = vmatpush1.bf16.msra.mxu0 %v10897_v45  ;;  %7869 = vmatpush1.bf16.msra.mxu1 %v10899_v46  ;;  %v816_v45 = vld [vmem:[#allocation5 + $0x1790] sm:$0xff] }
 0x3a1   :  { %7501 = vmatprep.subr.bf16.mxu0 %v10906_v47  ;;  %7870 = vmatprep.subr.bf16.mxu1 %v10908_v29  ;;  %v820_v46 = vld [vmem:[#allocation5 + $0x17b0] sm:$0xff]  ;;  %v817_v47 = vld [vmem:[#allocation5 + $0x1798] sm:$0xff] }
 0x3a2   :  { %v821_v29 = vld [vmem:[#allocation5 + $0x17b8] sm:$0xff]  ;;  %v10962_v52 = vcombine.high %v816_v45, %v820_v46  ;;  %v10961_v58 = vcombine.low %v816_v45, %v820_v46 }
 0x3a3   :  { %v10964_v61 = vcombine.high %v817_v47, %v821_v29  ;;  %v10963_v60 = vcombine.low %v817_v47, %v821_v29  ;;  %v872_v47 = vld [vmem:[#allocation5 + $0x1950] sm:$0xff] }
 0x3a4   :  { %7502 = vmatpush1.bf16.msra.mxu0 %v10905_v34  ;;  %7871 = vmatpush1.bf16.msra.mxu1 %v10907_v55  ;;  %v824_v34 = vld [vmem:[#allocation5 + $0x17d0] sm:$0xff] }
 0x3a5   :  { %7503 = vmatprep.subr.bf16.mxu0 %v10914_v56  ;;  %7872 = vmatprep.subr.bf16.mxu1 %v10916_v57  ;;  %v828_v55 = vld [vmem:[#allocation5 + $0x17f0] sm:$0xff]  ;;  %v825_v56 = vld [vmem:[#allocation5 + $0x17d8] sm:$0xff] }
 0x3a6   :  { %v829_v57 = vld [vmem:[#allocation5 + $0x17f8] sm:$0xff]  ;;  %v10970_v62 = vcombine.high %v824_v34, %v828_v55  ;;  %v10969_v6 = vcombine.low %v824_v34, %v828_v55  ;;  %v876_v29 = vld [vmem:[#allocation5 + $0x1970] sm:$0xff] }
 0x3a7   :  { %v10972_v8 = vcombine.high %v825_v56, %v829_v57  ;;  %v10971_v51 = vcombine.low %v825_v56, %v829_v57  ;;  %v11018_v34 = vcombine.high %v872_v47, %v876_v29  ;;  %v880_v56 = vld [vmem:[#allocation5 + $0x1990] sm:$0xff] }
 0x3a8   :  { %7504 = vmatpush1.bf16.msra.mxu0 %v10913_v2  ;;  %7873 = vmatpush1.bf16.msra.mxu1 %v10915_v5  ;;  %v832_v2 = vld [vmem:[#allocation5 + $0x1810] sm:$0xff] }
 0x3a9   :  { %7505 = vmatprep.subr.bf16.mxu0 %v10922_v3  ;;  %7874 = vmatprep.subr.bf16.mxu1 %v10924_v4  ;;  %v836_v5 = vld [vmem:[#allocation5 + $0x1830] sm:$0xff]  ;;  %v833_v3 = vld [vmem:[#allocation5 + $0x1818] sm:$0xff] }
 0x3aa   :  { %v837_v4 = vld [vmem:[#allocation5 + $0x1838] sm:$0xff]  ;;  %v10978_v9 = vcombine.high %v832_v2, %v836_v5  ;;  %v10977_v15 = vcombine.low %v832_v2, %v836_v5  ;;  %v884_v57 = vld [vmem:[#allocation5 + $0x19b0] sm:$0xff] }
 0x3ab   :  { %v10980_v7 = vcombine.high %v833_v3, %v837_v4  ;;  %v10979_v17 = vcombine.low %v833_v3, %v837_v4  ;;  %v11026_v2 = vcombine.high %v880_v56, %v884_v57  ;;  %v888_v3 = vld [vmem:[#allocation5 + $0x19d0] sm:$0xff] }
 0x3ac   :  { %7506 = vmatpush1.bf16.msra.mxu0 %v10921_v10  ;;  %7875 = vmatpush1.bf16.msra.mxu1 %v10923_v11  ;;  %v840_v10 = vld [vmem:[#allocation5 + $0x1850] sm:$0xff] }
 0x3ad   :  { %7507 = vmatprep.subr.bf16.mxu0 %v10930_v12  ;;  %7876 = vmatprep.subr.bf16.mxu1 %v10932_v13  ;;  %v844_v11 = vld [vmem:[#allocation5 + $0x1870] sm:$0xff]  ;;  %v841_v12 = vld [vmem:[#allocation5 + $0x1858] sm:$0xff] }
 0x3ae   :  { %v845_v13 = vld [vmem:[#allocation5 + $0x1878] sm:$0xff]  ;;  %v10986_v18 = vcombine.high %v840_v10, %v844_v11  ;;  %v10985_v24 = vcombine.low %v840_v10, %v844_v11  ;;  %v892_v4 = vld [vmem:[#allocation5 + $0x19f0] sm:$0xff] }
 0x3af   :  { %v10988_v0 = vcombine.high %v841_v12, %v845_v13  ;;  %v10987_v25 = vcombine.low %v841_v12, %v845_v13  ;;  %v11034_v10 = vcombine.high %v888_v3, %v892_v4  ;;  %v896_v12 = vld [vmem:[#allocation5 + $0x1a10] sm:$0xff] }
 0x3b0   :  { %7508 = vmatpush1.bf16.msra.mxu0 %v10929_v16  ;;  %7877 = vmatpush1.bf16.msra.mxu1 %v10931_v40  ;;  %v848_v16 = vld [vmem:[#allocation5 + $0x1890] sm:$0xff] }
 0x3b1   :  { %7509 = vmatprep.subr.bf16.mxu0 %v10938_v1  ;;  %7878 = vmatprep.subr.bf16.mxu1 %v10940_v22  ;;  %v852_v40 = vld [vmem:[#allocation5 + $0x18b0] sm:$0xff]  ;;  %v849_v1 = vld [vmem:[#allocation5 + $0x1898] sm:$0xff] }
 0x3b2   :  { %v853_v22 = vld [vmem:[#allocation5 + $0x18b8] sm:$0xff]  ;;  %v10994_v32 = vcombine.high %v848_v16, %v852_v40  ;;  %v10993_v38 = vcombine.low %v848_v16, %v852_v40  ;;  %v900_v13 = vld [vmem:[#allocation5 + $0x1a30] sm:$0xff] }
 0x3b3   :  { %v10996_v59 = vcombine.high %v849_v1, %v853_v22  ;;  %v11042_v16 = vcombine.high %v896_v12, %v900_v13 }
 0x3b4   :  { %7510 = vmatpush1.bf16.msra.mxu0 %v10937_v33  ;;  %7879 = vmatpush1.bf16.msra.mxu1 %v10939_v63  ;;  %v856_v33 = vld [vmem:[#allocation5 + $0x18d0] sm:$0xff] }
 0x3b5   :  { %7511 = vmatprep.subr.bf16.mxu0 %v10946_v35  ;;  %7880 = vmatprep.subr.bf16.mxu1 %v10948_v36  ;;  %v860_v63 = vld [vmem:[#allocation5 + $0x18f0] sm:$0xff]  ;;  %v857_v35 = vld [vmem:[#allocation5 + $0x18d8] sm:$0xff] }
 0x3b6   :  { %v861_v36 = vld [vmem:[#allocation5 + $0x18f8] sm:$0xff]  ;;  %v11002_v19 = vcombine.high %v856_v33, %v860_v63 }
 0x3b7   :  { %v11004_v39 = vcombine.high %v857_v35, %v861_v36  ;;  %v11003_v45 = vcombine.low %v857_v35, %v861_v36  ;;  %v912_v35 = vld [vmem:[#allocation5 + $0x1a90] sm:$0xff] }
 0x3b8   :  { %7512 = vmatpush1.bf16.msra.mxu0 %v10945_v23  ;;  %7881 = vmatpush1.bf16.msra.mxu1 %v10947_v42  ;;  %v868_v23 = vld [vmem:[#allocation5 + $0x1930] sm:$0xff]  ;;  %v865_v42 = vld [vmem:[#allocation5 + $0x1918] sm:$0xff] }
 0x3b9   :  { %7513 = vmatprep.subr.bf16.mxu0 %v10954_v53  ;;  %7882 = vmatprep.subr.bf16.mxu1 %v10956_v44  ;;  %v869_v53 = vld [vmem:[#allocation5 + $0x1938] sm:$0xff]  ;;  %v11001_v44 = vcombine.low %v856_v33, %v860_v63  ;;  %v11010_v46 = vcombine.high %v864_v41, %v868_v23  ;;  %v916_v36 = vld [vmem:[#allocation5 + $0x1ab0] sm:$0xff] }
 0x3bc   :  { %7514 = vmatpush1.bf16.msra.mxu0 %v10953_v48  ;;  %7883 = vmatpush1.bf16.msra.mxu1 %v10955_v49  ;;  %v873_v48 = vld [vmem:[#allocation5 + $0x1958] sm:$0xff] }
 0x3bd   :  { %7515 = vmatprep.subr.bf16.mxu0 %v10962_v52  ;;  %7884 = vmatprep.subr.bf16.mxu1 %v10964_v61  ;;  %v877_v49 = vld [vmem:[#allocation5 + $0x1978] sm:$0xff]  ;;  %v11009_v52 = vcombine.low %v864_v41, %v868_v23  ;;  %v11011_v61 = vcombine.low %v865_v42, %v869_v53  ;;  %v11058_v41 = vcombine.high %v912_v35, %v916_v36 }
 0x3be   :  { %v11020_v55 = vcombine.high %v873_v48, %v877_v49 }
 0x3c0   :  { %7516 = vmatpush1.bf16.msra.mxu0 %v10961_v58  ;;  %7885 = vmatpush1.bf16.msra.mxu1 %v10963_v60  ;;  %v881_v58 = vld [vmem:[#allocation5 + $0x1998] sm:$0xff] }
 0x3c1   :  { %7517 = vmatprep.subr.bf16.mxu0 %v10970_v62  ;;  %7886 = vmatprep.subr.bf16.mxu1 %v10972_v8  ;;  %v885_v60 = vld [vmem:[#allocation5 + $0x19b8] sm:$0xff]  ;;  %v11017_v62 = vcombine.low %v872_v47, %v876_v29  ;;  %v11019_v8 = vcombine.low %v873_v48, %v877_v49  ;;  %v928_v48 = vld [vmem:[#allocation5 + $0x1b10] sm:$0xff] }
 0x3c2   :  { %v11028_v5 = vcombine.high %v881_v58, %v885_v60  ;;  %v932_v49 = vld [vmem:[#allocation5 + $0x1b30] sm:$0xff] }
 0x3c4   :  { %7518 = vmatpush1.bf16.msra.mxu0 %v10969_v6  ;;  %7887 = vmatpush1.bf16.msra.mxu1 %v10971_v51  ;;  %v889_v6 = vld [vmem:[#allocation5 + $0x19d8] sm:$0xff] }
 0x3c5   :  { %7528 = vmatprep.subr.bf16.mxu0 %v10978_v9  ;;  %7897 = vmatprep.subr.bf16.mxu1 %v10980_v7  ;;  %v893_v51 = vld [vmem:[#allocation5 + $0x19f8] sm:$0xff]  ;;  %v11025_v9 = vcombine.low %v880_v56, %v884_v57  ;;  %v11027_v7 = vcombine.low %v881_v58, %v885_v60  ;;  %v11074_v56 = vcombine.high %v928_v48, %v932_v49  ;;  %v936_v58 = vld [vmem:[#allocation5 + $0x1b50] sm:$0xff] }
 0x3c6   :  { %v11036_v11 = vcombine.high %v889_v6, %v893_v51  ;;  %v940_v60 = vld [vmem:[#allocation5 + $0x1b70] sm:$0xff] }
 0x3c7   :  { %7520 = vmatmul.mubr.bf16.vlgmr.msra.gmra.mrb[4].mxu0 %v12478_v27  ;;  %7889 = vmatmul.mubr.bf16.vlgmr.msra.gmra.mrb[4].mxu1 %v12478_v27  ;;  %v10995_v27 = vcombine.low %v849_v1, %v853_v22  ;;  %v904_v1 = vld [vmem:[#allocation5 + $0x1a50] sm:$0xff] }
 0x3c8   :  { %7529 = vmatpush1.bf16.msra.mxu0 %v10977_v15  ;;  %7898 = vmatpush1.bf16.msra.mxu1 %v10979_v17  ;;  %v897_v15 = vld [vmem:[#allocation5 + $0x1a18] sm:$0xff]  ;;  %v908_v22 = vld [vmem:[#allocation5 + $0x1a70] sm:$0xff] }
 0x3c9   :  { %7530 = vmatprep.subr.bf16.mxu0 %v10986_v18  ;;  %7899 = vmatprep.subr.bf16.mxu1 %v10988_v0  ;;  %v901_v17 = vld [vmem:[#allocation5 + $0x1a38] sm:$0xff]  ;;  %v11033_v18 = vcombine.low %v888_v3, %v892_v4  ;;  %v11035_v0 = vcombine.low %v889_v6, %v893_v51  ;;  %v11050_v33 = vcombine.high %v904_v1, %v908_v22  ;;  %v944_v6 = vld [vmem:[#allocation5 + $0x1b90] sm:$0xff] }
 0x3ca   :  { %7560 = vmatprep.mubr.bf16.mxu0 %v12481_v37  ;;  %7929 = vmatprep.mubr.bf16.mxu1 %v12481_v37  ;;  %v11012_v37 = vcombine.high %v865_v42, %v869_v53  ;;  %v11044_v40 = vcombine.high %v897_v15, %v901_v17  ;;  %v920_v42 = vld [vmem:[#allocation5 + $0x1ad0] sm:$0xff]  ;;  %v11082_v3 = vcombine.high %v936_v58, %v940_v60 }
 0x3cb   :  { %v924_v53 = vld [vmem:[#allocation5 + $0x1af0] sm:$0xff] }
 0x3cc   :  { %7531 = vmatpush1.bf16.msra.mxu0 %v10985_v24  ;;  %7900 = vmatpush1.bf16.msra.mxu1 %v10987_v25  ;;  %v905_v24 = vld [vmem:[#allocation5 + $0x1a58] sm:$0xff]  ;;  %v11066_v47 = vcombine.high %v920_v42, %v924_v53  ;;  %v948_v51 = vld [vmem:[#allocation5 + $0x1bb0] sm:$0xff] }
 0x3cd   :  { %7532 = vmatprep.subr.bf16.mxu0 %v10994_v32  ;;  %7901 = vmatprep.subr.bf16.mxu1 %v10996_v59  ;;  %v909_v25 = vld [vmem:[#allocation5 + $0x1a78] sm:$0xff]  ;;  %v11041_v32 = vcombine.low %v896_v12, %v900_v13  ;;  %v11043_v59 = vcombine.low %v897_v15, %v901_v17  ;;  %v11090_v12 = vcombine.high %v944_v6, %v948_v51  ;;  %v952_v15 = vld [vmem:[#allocation5 + $0x1bd0] sm:$0xff] }
 0x3ce   :  { %v11052_v63 = vcombine.high %v905_v24, %v909_v25  ;;  %v956_v17 = vld [vmem:[#allocation5 + $0x1bf0] sm:$0xff] }
 0x3d0   :  { %7533 = vmatpush1.bf16.msra.mxu0 %v10993_v38  ;;  %7902 = vmatpush1.bf16.msra.mxu1 %v10995_v27  ;;  %v913_v38 = vld [vmem:[#allocation5 + $0x1a98] sm:$0xff] }
 0x3d1   :  { %7534 = vmatprep.subr.bf16.mxu0 %v11002_v19  ;;  %7903 = vmatprep.subr.bf16.mxu1 %v11004_v39  ;;  %v917_v27 = vld [vmem:[#allocation5 + $0x1ab8] sm:$0xff]  ;;  %v11049_v19 = vcombine.low %v904_v1, %v908_v22  ;;  %v11051_v39 = vcombine.low %v905_v24, %v909_v25  ;;  %v11098_v1 = vcombine.high %v952_v15, %v956_v17  ;;  %v960_v24 = vld [vmem:[#allocation5 + $0x1c10] sm:$0xff] }
 0x3d2   :  { %v11060_v23 = vcombine.high %v913_v38, %v917_v27  ;;  %v964_v25 = vld [vmem:[#allocation5 + $0x1c30] sm:$0xff] }
 0x3d4   :  { %7535 = vmatpush1.bf16.msra.mxu0 %v11001_v44  ;;  %7904 = vmatpush1.bf16.msra.mxu1 %v11003_v45  ;;  %v921_v44 = vld [vmem:[#allocation5 + $0x1ad8] sm:$0xff] }
 0x3d5   :  { %7536 = vmatprep.subr.bf16.mxu0 %v11010_v46  ;;  %7905 = vmatprep.subr.bf16.mxu1 %v11012_v37  ;;  %v925_v45 = vld [vmem:[#allocation5 + $0x1af8] sm:$0xff]  ;;  %v11057_v46 = vcombine.low %v912_v35, %v916_v36  ;;  %v11059_v37 = vcombine.low %v913_v38, %v917_v27  ;;  %v11106_v35 = vcombine.high %v960_v24, %v964_v25  ;;  %v968_v38 = vld [vmem:[#allocation5 + $0x1c50] sm:$0xff] }
 0x3d6   :  { %v11068_v29 = vcombine.high %v921_v44, %v925_v45  ;;  %v972_v27 = vld [vmem:[#allocation5 + $0x1c70] sm:$0xff] }
 0x3d8   :  { %7537 = vmatpush1.bf16.msra.mxu0 %v11009_v52  ;;  %7906 = vmatpush1.bf16.msra.mxu1 %v11011_v61  ;;  %v929_v52 = vld [vmem:[#allocation5 + $0x1b18] sm:$0xff] }
 0x3d9   :  { %7538 = vmatprep.subr.bf16.mxu0 %v11018_v34  ;;  %7907 = vmatprep.subr.bf16.mxu1 %v11020_v55  ;;  %v933_v61 = vld [vmem:[#allocation5 + $0x1b38] sm:$0xff]  ;;  %v11065_v34 = vcombine.low %v920_v42, %v924_v53  ;;  %v11067_v55 = vcombine.low %v921_v44, %v925_v45  ;;  %v11114_v42 = vcombine.high %v968_v38, %v972_v27  ;;  %v976_v44 = vld [vmem:[#allocation5 + $0x1c90] sm:$0xff] }
 0x3da   :  { %v11076_v57 = vcombine.high %v929_v52, %v933_v61  ;;  %v980_v45 = vld [vmem:[#allocation5 + $0x1cb0] sm:$0xff] }
 0x3dc   :  { %7539 = vmatpush1.bf16.msra.mxu0 %v11017_v62  ;;  %7908 = vmatpush1.bf16.msra.mxu1 %v11019_v8  ;;  %v937_v62 = vld [vmem:[#allocation5 + $0x1b58] sm:$0xff] }
 0x3dd   :  { %7540 = vmatprep.subr.bf16.mxu0 %v11026_v2  ;;  %7909 = vmatprep.subr.bf16.mxu1 %v11028_v5  ;;  %v941_v8 = vld [vmem:[#allocation5 + $0x1b78] sm:$0xff]  ;;  %v11073_v2 = vcombine.low %v928_v48, %v932_v49  ;;  %v11075_v5 = vcombine.low %v929_v52, %v933_v61  ;;  %v11122_v48 = vcombine.high %v976_v44, %v980_v45  ;;  %v984_v52 = vld [vmem:[#allocation5 + $0x1cd0] sm:$0xff] }
 0x3de   :  { %v11084_v4 = vcombine.high %v937_v62, %v941_v8  ;;  %v988_v61 = vld [vmem:[#allocation5 + $0x1cf0] sm:$0xff] }
 0x3e0   :  { %7541 = vmatpush1.bf16.msra.mxu0 %v11025_v9  ;;  %7910 = vmatpush1.bf16.msra.mxu1 %v11027_v7  ;;  %v945_v9 = vld [vmem:[#allocation5 + $0x1b98] sm:$0xff] }
 0x3e1   :  { %7542 = vmatprep.subr.bf16.mxu0 %v11034_v10  ;;  %7911 = vmatprep.subr.bf16.mxu1 %v11036_v11  ;;  %v949_v7 = vld [vmem:[#allocation5 + $0x1bb8] sm:$0xff]  ;;  %v11081_v10 = vcombine.low %v936_v58, %v940_v60  ;;  %v11083_v11 = vcombine.low %v937_v62, %v941_v8  ;;  %v992_v60 = vld [vmem:[#allocation5 + $0x1d10] sm:$0xff] }
 0x3e2   :  { %v11092_v13 = vcombine.high %v945_v9, %v949_v7  ;;  %v996_v62 = vld [vmem:[#allocation5 + $0x1d30] sm:$0xff]  ;;  %v993_v8 = vld [vmem:[#allocation5 + $0x1d18] sm:$0xff] }
 0x3e4   :  { %7543 = vmatpush1.bf16.msra.mxu0 %v11033_v18  ;;  %7912 = vmatpush1.bf16.msra.mxu1 %v11035_v0  ;;  %v953_v18 = vld [vmem:[#allocation5 + $0x1bd8] sm:$0xff] }
 0x3e5   :  { %7544 = vmatprep.subr.bf16.mxu0 %v11042_v16  ;;  %7913 = vmatprep.subr.bf16.mxu1 %v11044_v40  ;;  %v957_v0 = vld [vmem:[#allocation5 + $0x1bf8] sm:$0xff]  ;;  %v11089_v16 = vcombine.low %v944_v6, %v948_v51  ;;  %v11091_v40 = vcombine.low %v945_v9, %v949_v7  ;;  %v1000_v6 = vld [vmem:[#allocation5 + $0x1d50] sm:$0xff] }
 0x3e6   :  { %v11100_v22 = vcombine.high %v953_v18, %v957_v0  ;;  %v1004_v51 = vld [vmem:[#allocation5 + $0x1d70] sm:$0xff]  ;;  %v1001_v9 = vld [vmem:[#allocation5 + $0x1d58] sm:$0xff] }
 0x3e7   :  { %v1005_v7 = vld [vmem:[#allocation5 + $0x1d78] sm:$0xff] }
 0x3e8   :  { %7545 = vmatpush1.bf16.msra.mxu0 %v11041_v32  ;;  %7914 = vmatpush1.bf16.msra.mxu1 %v11043_v59  ;;  %v961_v32 = vld [vmem:[#allocation5 + $0x1c18] sm:$0xff] }
 0x3e9   :  { %7546 = vmatprep.subr.bf16.mxu0 %v11050_v33  ;;  %7915 = vmatprep.subr.bf16.mxu1 %v11052_v63  ;;  %v965_v59 = vld [vmem:[#allocation5 + $0x1c38] sm:$0xff]  ;;  %v11097_v33 = vcombine.low %v952_v15, %v956_v17  ;;  %v11099_v63 = vcombine.low %v953_v18, %v957_v0  ;;  %v1008_v15 = vld [vmem:[#allocation5 + $0x1d90] sm:$0xff] }
 0x3ea   :  { %v11108_v36 = vcombine.high %v961_v32, %v965_v59  ;;  %v1012_v17 = vld [vmem:[#allocation5 + $0x1db0] sm:$0xff]  ;;  %v1009_v18 = vld [vmem:[#allocation5 + $0x1d98] sm:$0xff] }
 0x3eb   :  { %v1013_v0 = vld [vmem:[#allocation5 + $0x1db8] sm:$0xff] }
 0x3ec   :  { %7547 = vmatpush1.bf16.msra.mxu0 %v11049_v19  ;;  %7916 = vmatpush1.bf16.msra.mxu1 %v11051_v39  ;;  %v969_v19 = vld [vmem:[#allocation5 + $0x1c58] sm:$0xff] }
 0x3ed   :  { %7548 = vmatprep.subr.bf16.mxu0 %v11058_v41  ;;  %7917 = vmatprep.subr.bf16.mxu1 %v11060_v23  ;;  %v973_v39 = vld [vmem:[#allocation5 + $0x1c78] sm:$0xff]  ;;  %v11105_v41 = vcombine.low %v960_v24, %v964_v25  ;;  %v11107_v23 = vcombine.low %v961_v32, %v965_v59  ;;  %v1016_v24 = vld [vmem:[#allocation5 + $0x1dd0] sm:$0xff] }
 0x3ee   :  { %v11116_v53 = vcombine.high %v969_v19, %v973_v39  ;;  %v1020_v25 = vld [vmem:[#allocation5 + $0x1df0] sm:$0xff]  ;;  %v1017_v32 = vld [vmem:[#allocation5 + $0x1dd8] sm:$0xff] }
 0x3ef   :  { %v1021_v59 = vld [vmem:[#allocation5 + $0x1df8] sm:$0xff] }
 0x3f0   :  { %7549 = vmatpush1.bf16.msra.mxu0 %v11057_v46  ;;  %7918 = vmatpush1.bf16.msra.mxu1 %v11059_v37  ;;  %v977_v46 = vld [vmem:[#allocation5 + $0x1c98] sm:$0xff] }
 0x3f1   :  { %7550 = vmatprep.subr.bf16.mxu0 %v11066_v47  ;;  %7919 = vmatprep.subr.bf16.mxu1 %v11068_v29  ;;  %v981_v37 = vld [vmem:[#allocation5 + $0x1cb8] sm:$0xff]  ;;  %v11113_v47 = vcombine.low %v968_v38, %v972_v27  ;;  %v11115_v29 = vcombine.low %v969_v19, %v973_v39  ;;  %v1024_v38 = vld [vmem:[#allocation5 + $0x1e10] sm:$0xff] }
 0x3f2   :  { %v11124_v49 = vcombine.high %v977_v46, %v981_v37  ;;  %v1028_v27 = vld [vmem:[#allocation5 + $0x1e30] sm:$0xff]  ;;  %v1025_v19 = vld [vmem:[#allocation5 + $0x1e18] sm:$0xff] }
 0x3f3   :  { %v1029_v39 = vld [vmem:[#allocation5 + $0x1e38] sm:$0xff] }
 0x3f4   :  { %7551 = vmatpush1.bf16.msra.mxu0 %v11065_v34  ;;  %7920 = vmatpush1.bf16.msra.mxu1 %v11067_v55  ;;  %v985_v34 = vld [vmem:[#allocation5 + $0x1cd8] sm:$0xff] }
 0x3f5   :  { %7552 = vmatprep.subr.bf16.mxu0 %v11074_v56  ;;  %7921 = vmatprep.subr.bf16.mxu1 %v11076_v57  ;;  %v989_v55 = vld [vmem:[#allocation5 + $0x1cf8] sm:$0xff]  ;;  %v11121_v56 = vcombine.low %v976_v44, %v980_v45  ;;  %v11130_v57 = vcombine.high %v984_v52, %v988_v61  ;;  %v1032_v44 = vld [vmem:[#allocation5 + $0x1e50] sm:$0xff] }
 0x3f6   :  { %v11132_v58 = vcombine.high %v985_v34, %v989_v55  ;;  %v1036_v45 = vld [vmem:[#allocation5 + $0x1e70] sm:$0xff] }
 0x3f8   :  { %7553 = vmatpush1.bf16.msra.mxu0 %v11073_v2  ;;  %7922 = vmatpush1.bf16.msra.mxu1 %v11075_v5  ;;  %v997_v2 = vld [vmem:[#allocation5 + $0x1d38] sm:$0xff]  ;;  %v11129_v5 = vcombine.low %v984_v52, %v988_v61  ;;  %v1040_v52 = vld [vmem:[#allocation5 + $0x1e90] sm:$0xff] }
 0x3f9   :  { %7554 = vmatprep.subr.bf16.mxu0 %v11082_v3  ;;  %7923 = vmatprep.subr.bf16.mxu1 %v11084_v4  ;;  %v11131_v3 = vcombine.low %v985_v34, %v989_v55  ;;  %v11138_v4 = vcombine.high %v992_v60, %v996_v62  ;;  %v1044_v61 = vld [vmem:[#allocation5 + $0x1eb0] sm:$0xff]  ;;  %v1041_v34 = vld [vmem:[#allocation5 + $0x1e98] sm:$0xff] }
 0x3fa   :  { %v1045_v55 = vld [vmem:[#allocation5 + $0x1eb8] sm:$0xff] }
 0x3fc   :  { %7555 = vmatpush1.bf16.msra.mxu0 %v11081_v10  ;;  %7924 = vmatpush1.bf16.msra.mxu1 %v11083_v11  ;;  %v11137_v10 = vcombine.low %v992_v60, %v996_v62  ;;  %v11139_v11 = vcombine.low %v993_v8, %v997_v2  ;;  %v1048_v60 = vld [vmem:[#allocation5 + $0x1ed0] sm:$0xff] }
 0x3fd   :  { %7556 = vmatprep.subr.bf16.mxu0 %v11090_v12  ;;  %7925 = vmatprep.subr.bf16.mxu1 %v11092_v13  ;;  %v11146_v12 = vcombine.high %v1000_v6, %v1004_v51  ;;  %v11148_v13 = vcombine.high %v1001_v9, %v1005_v7  ;;  %v1052_v62 = vld [vmem:[#allocation5 + $0x1ef0] sm:$0xff] }
 0x400   :  { %7557 = vmatpush1.bf16.msra.mxu0 %v11089_v16  ;;  %7926 = vmatpush1.bf16.msra.mxu1 %v11091_v40  ;;  %v11145_v16 = vcombine.low %v1000_v6, %v1004_v51  ;;  %v11147_v40 = vcombine.low %v1001_v9, %v1005_v7  ;;  %v11194_v6 = vcombine.high %v1048_v60, %v1052_v62  ;;  %v1056_v9 = vld [vmem:[#allocation5 + $0x1f10] sm:$0xff] }
 0x401   :  { %7558 = vmatprep.subr.bf16.mxu0 %v11098_v1  ;;  %7927 = vmatprep.subr.bf16.mxu1 %v11100_v22  ;;  %v11154_v1 = vcombine.high %v1008_v15, %v1012_v17  ;;  %v11156_v22 = vcombine.high %v1009_v18, %v1013_v0  ;;  %v1060_v7 = vld [vmem:[#allocation5 + $0x1f30] sm:$0xff] }
 0x404   :  { %7559 = vmatpush1.bf16.msra.mxu0 %v11097_v33  ;;  %7928 = vmatpush1.bf16.msra.mxu1 %v11099_v63  ;;  %v11153_v33 = vcombine.low %v1008_v15, %v1012_v17  ;;  %v11155_v63 = vcombine.low %v1009_v18, %v1013_v0  ;;  %v11202_v17 = vcombine.high %v1056_v9, %v1060_v7  ;;  %v1064_v0 = vld [vmem:[#allocation5 + $0x1f50] sm:$0xff] }
 0x405   :  { %7569 = vmatprep.subr.bf16.mxu0 %v11106_v35  ;;  %7938 = vmatprep.subr.bf16.mxu1 %v11108_v36  ;;  %v11162_v35 = vcombine.high %v1016_v24, %v1020_v25  ;;  %v11164_v36 = vcombine.high %v1017_v32, %v1021_v59 }
 0x407   :  { %7561 = vmatmul.mubr.bf16.vlgmr.msra.gmra.mrb[4].mxu0 %v12489_v31  ;;  %7930 = vmatmul.mubr.bf16.vlgmr.msra.gmra.mrb[4].mxu1 %v12489_v31  ;;  %v11123_v31 = vcombine.low %v977_v46, %v981_v37  ;;  %v1033_v46 = vld [vmem:[#allocation5 + $0x1e58] sm:$0xff] }
 0x408   :  { %7570 = vmatpush1.bf16.msra.mxu0 %v11105_v41  ;;  %7939 = vmatpush1.bf16.msra.mxu1 %v11107_v23  ;;  %v11161_v41 = vcombine.low %v1016_v24, %v1020_v25  ;;  %v11163_v23 = vcombine.low %v1017_v32, %v1021_v59  ;;  %v1037_v37 = vld [vmem:[#allocation5 + $0x1e78] sm:$0xff]  ;;  %v11201_v24 = vcombine.low %v1056_v9, %v1060_v7 }
 0x409   :  { %7571 = vmatprep.subr.bf16.mxu0 %v11114_v42  ;;  %7940 = vmatprep.subr.bf16.mxu1 %v11116_v53  ;;  %v11170_v42 = vcombine.high %v1024_v38, %v1028_v27  ;;  %v11172_v53 = vcombine.high %v1025_v19, %v1029_v39  ;;  %v1109_v9 = vld [vmem:[#allocation5 + $0x20b8] sm:$0x11] }
 0x40a   :  { %7601 = vmatprep.mubr.bf16.mxu0 %v12493_v20  ;;  %7970 = vmatprep.mubr.bf16.mxu1 %v12493_v20  ;;  %v11140_v20 = vcombine.high %v993_v8, %v997_v2  ;;  %v1118_v8 = vsub.s32 1, %v12378_v43  ;;  %v1049_v2 = vld [vmem:[#allocation5 + $0x1ed8] sm:$0xff] }
 0x40c   :  { %7572 = vmatpush1.bf16.msra.mxu0 %v11113_v47  ;;  %7941 = vmatpush1.bf16.msra.mxu1 %v11115_v29  ;;  %v11169_v47 = vcombine.low %v1024_v38, %v1028_v27  ;;  %v11171_v29 = vcombine.low %v1025_v19, %v1029_v39  ;;  %v1077_v38 = vld [vmem:[#allocation5 + $0x1fb8] sm:$0xff] }
 0x40d   :  { %7573 = vmatprep.subr.bf16.mxu0 %v11122_v48  ;;  %7942 = vmatprep.subr.bf16.mxu1 %v11124_v49  ;;  %v11178_v48 = vcombine.high %v1032_v44, %v1036_v45  ;;  %v11180_v49 = vcombine.high %v1033_v46, %v1037_v37 }
 0x410   :  { %7574 = vmatpush1.bf16.msra.mxu0 %v11121_v56  ;;  %7943 = vmatpush1.bf16.msra.mxu1 %v11123_v31  ;;  %v11177_v56 = vcombine.low %v1032_v44, %v1036_v45  ;;  %v11179_v31 = vcombine.low %v1033_v46, %v1037_v37  ;;  %v1085_v44 = vld [vmem:[#allocation5 + $0x1ff8] sm:$0xff] }
 0x411   :  { %7575 = vmatprep.subr.bf16.mxu0 %v11130_v57  ;;  %7944 = vmatprep.subr.bf16.mxu1 %v11132_v58  ;;  %v11186_v57 = vcombine.high %v1040_v52, %v1044_v61  ;;  %v11188_v58 = vcombine.high %v1041_v34, %v1045_v55 }
 0x414   :  { %7576 = vmatpush1.bf16.msra.mxu0 %v11129_v5  ;;  %7945 = vmatpush1.bf16.msra.mxu1 %v11131_v3  ;;  %v1053_v5 = vld [vmem:[#allocation5 + $0x1ef8] sm:$0xff] }
 0x415   :  { %7577 = vmatprep.subr.bf16.mxu0 %v11138_v4  ;;  %7946 = vmatprep.subr.bf16.mxu1 %v11140_v20  ;;  %v12557_v3 = vld [vmem:[#allocation7] ss:$4 sm:$0xff]  ;;  %v11185_v4 = vcombine.low %v1040_v52, %v1044_v61  ;;  %v11187_v20 = vcombine.low %v1041_v34, %v1045_v55  ;;  %v11196_v51 = vcombine.high %v1049_v2, %v1053_v5 }
 0x416   :  { %v11195_v15 = vcombine.low %v1049_v2, %v1053_v5  ;;  %v1093_v52 = vld [vmem:[#allocation5 + $0x2038] sm:$0xff] }
 0x418   :  { %7578 = vmatpush1.bf16.msra.mxu0 %v11137_v10  ;;  %7947 = vmatpush1.bf16.msra.mxu1 %v11139_v11  ;;  %v1119_v10 = vrot.slane %v12557_v3, %v1118_v8  ;;  %v1057_v11 = vld [vmem:[#allocation5 + $0x1f18] sm:$0xff] }
 0x419   :  { %7579 = vmatprep.subr.bf16.mxu0 %v11146_v12  ;;  %7948 = vmatprep.subr.bf16.mxu1 %v11148_v13  ;;  %v1061_v12 = vld [vmem:[#allocation5 + $0x1f38] sm:$0xff]  ;;  %v11193_v13 = vcombine.low %v1048_v60, %v1052_v62 }
 0x41a   :  { %v11204_v18 = vcombine.high %v1057_v11, %v1061_v12  ;;  %v11203_v25 = vcombine.low %v1057_v11, %v1061_v12  ;;  %v1101_v60 = vld [vmem:[#allocation5 + $0x2078] sm:$0xff] }
 0x41c   :  { %7580 = vmatpush1.bf16.msra.mxu0 %v11145_v16  ;;  %7949 = vmatpush1.bf16.msra.mxu1 %v11147_v40  ;;  %v1068_v16 = vld [vmem:[#allocation5 + $0x1f70] sm:$0xff]  ;;  %v12563_v40 = vadd.f32 %v12536_v28, %v1119_v10 }
 0x41d   :  { %7581 = vmatprep.subr.bf16.mxu0 %v11154_v1  ;;  %7950 = vmatprep.subr.bf16.mxu1 %v11156_v22  ;;  %v1065_v1 = vld [vmem:[#allocation5 + $0x1f58] sm:$0xff]  ;;  %v11210_v32 = vcombine.high %v1064_v0, %v1068_v16  ;;  %v11209_v27 = vcombine.low %v1064_v0, %v1068_v16  ;;  %v11802_v0 = vld [vmem:[%s13577_s2 + $0x4] ss:$16 sps:$4 sm:$0xff]  }
 0x41e   :  { %v1069_v22 = vld [vmem:[#allocation5 + $0x1f78] sm:$0xff]  ;;  %vm8021_vm2 = vcmp.gt.f32.partialorder %v12563_v40, 0.0 }
 0x41f   :  { %v11212_v59 = vcombine.high %v1065_v1, %v1069_v22  ;;  %v11211_v28 = vcombine.low %v1065_v1, %v1069_v22  ;;  %v11805_v1 = vld [vmem:[%s13577_s2 + $0xc] ss:$16 sps:$4 sm:$0xff]  }
 0x420   :  { %7582 = vmatpush1.bf16.msra.mxu0 %v11153_v33  ;;  %7951 = vmatpush1.bf16.msra.mxu1 %v11155_v63  ;;  %v1072_v33 = vld [vmem:[#allocation5 + $0x1f90] sm:$0xff] }
 0x421   :  { %7583 = vmatprep.subr.bf16.mxu0 %v11162_v35  ;;  %7952 = vmatprep.subr.bf16.mxu1 %v11164_v36  ;;  %v1076_v63 = vld [vmem:[#allocation5 + $0x1fb0] sm:$0xff]  ;;  %v8029_v35 = vmin.f32 %v12563_v40, 0.0  ;;  %v1073_v36 = vld [vmem:[#allocation5 + $0x1f98] sm:$0xff] }
 0x422   :  { %v11218_v19 = vcombine.high %v1072_v33, %v1076_v63  ;;  %v11220_v39 = vcombine.high %v1073_v36, %v1077_v38  ;;  %v11217_v45 = vcombine.low %v1072_v33, %v1076_v63  ;;  %v11219_v46 = vcombine.low %v1073_v36, %v1077_v38  ;;  %v11809_v33 = vld [vmem:[%s13577_s2 + $0x28] ss:$16 sps:$4 sm:$0xff]   ;;  %v11814_v63 = vld [vmem:[%s13577_s2 + $0x44] ss:$16 sps:$4 sm:$0xff]  }
 0x423   :  { %v11815_v36 = vld [vmem:[%s13577_s2 + $0x48] ss:$16 sps:$4 sm:$0xff]   ;;  %v11820_v38 = vld [vmem:[%s13577_s2 + $0x64] ss:$16 sps:$4 sm:$0xff]  }
 0x424   :  { %7584 = vmatpush1.bf16.msra.mxu0 %v11161_v41  ;;  %7953 = vmatpush1.bf16.msra.mxu1 %v11163_v23  ;;  %v1080_v41 = vld [vmem:[#allocation5 + $0x1fd0] sm:$0xff] }
 0x425   :  { %7585 = vmatprep.subr.bf16.mxu0 %v11170_v42  ;;  %7954 = vmatprep.subr.bf16.mxu1 %v11172_v53  ;;  %v1084_v23 = vld [vmem:[#allocation5 + $0x1ff0] sm:$0xff]  ;;  %v8038_v42 = vmul.f32 1.442695, %v8029_v35  ;;  %v1081_v53 = vld [vmem:[#allocation5 + $0x1fd8] sm:$0xff] }
 0x426   :  { %v11226_v37 = vcombine.high %v1080_v41, %v1084_v23  ;;  %v11225_v61 = vcombine.low %v1080_v41, %v1084_v23  ;;  %v11227_v34 = vcombine.low %v1081_v53, %v1085_v44  ;;  %v11812_v35 = vld [vmem:[%s13577_s2 + $0x40] ss:$16 sps:$4 sm:$0xff]   ;;  %v11829_v41 = vld [vmem:[%s13577_s2 + $0x8c] ss:$16 sps:$4 sm:$0xff]  }
 0x427   :  { %12184 = vpow2.f32 %v8038_v42  ;;  %v11824_v23 = vld [vmem:[%s13577_s2 + $0x80] ss:$16 sps:$4 sm:$0xff]   ;;  %v11827_v42 = vld [vmem:[%s13577_s2 + $0x88] ss:$16 sps:$4 sm:$0xff]  }
 0x428   :  { %7586 = vmatpush1.bf16.msra.mxu0 %v11169_v47  ;;  %7955 = vmatpush1.bf16.msra.mxu1 %v11171_v29  ;;  %v11228_v47 = vcombine.high %v1081_v53, %v1085_v44  ;;  %v1088_v29 = vld [vmem:[#allocation5 + $0x2010] sm:$0xff]  ;;  %v11835_v44 = vld [vmem:[%s13577_s2 + $0xac] ss:$16 sps:$4 sm:$0xff]  }
 0x429   :  { %7587 = vmatprep.subr.bf16.mxu0 %v11178_v48  ;;  %7956 = vmatprep.subr.bf16.mxu1 %v11180_v49  ;;  %v1092_v48 = vld [vmem:[#allocation5 + $0x2030] sm:$0xff]  ;;  %v1089_v49 = vld [vmem:[#allocation5 + $0x2018] sm:$0xff] }
 0x42a   :  { %v11234_v55 = vcombine.high %v1088_v29, %v1092_v48  ;;  %v11233_v62 = vcombine.low %v1088_v29, %v1092_v48  ;;  %v11235_v2 = vcombine.low %v1089_v49, %v1093_v52  ;;  %v11832_v53 = vld [vmem:[%s13577_s2 + $0xa4] ss:$16 sps:$4 sm:$0xff]   ;;  %v11836_v29 = vld [vmem:[%s13577_s2 + $0xc0] ss:$16 sps:$4 sm:$0xff]   ;;  %v1114_v48 = vsub.s32 0, %v12378_v43 }
 0x42c   :  { %7588 = vmatpush1.bf16.msra.mxu0 %v11177_v56  ;;  %7957 = vmatpush1.bf16.msra.mxu1 %v11179_v31  ;;  %v11236_v56 = vcombine.high %v1089_v49, %v1093_v52  ;;  %v1096_v31 = vld [vmem:[#allocation5 + $0x2050] sm:$0xff] }
 0x42d   :  { %7589 = vmatprep.subr.bf16.mxu0 %v11186_v57  ;;  %7958 = vmatprep.subr.bf16.mxu1 %v11188_v58  ;;  %v1100_v57 = vld [vmem:[#allocation5 + $0x2070] sm:$0xff]  ;;  %v1097_v58 = vld [vmem:[#allocation5 + $0x2058] sm:$0xff] }
 0x42e   :  { %v11242_v5 = vcombine.high %v1096_v31, %v1100_v57  ;;  %v11241_v7 = vcombine.low %v1096_v31, %v1100_v57  ;;  %v11243_v11 = vcombine.low %v1097_v58, %v1101_v60  ;;  %v11839_v49 = vld [vmem:[%s13577_s2 + $0xc8] ss:$16 sps:$4 sm:$0xff]   ;;  %v11844_v52 = vld [vmem:[%s13577_s2 + $0xe4] ss:$16 sps:$4 sm:$0xff]  }
 0x42f   :  { %v11845_v31 = vld [vmem:[%s13577_s2 + $0xe8] ss:$16 sps:$4 sm:$0xff]   ;;  %v11850_v57 = vld [vmem:[%s13577_s2 + $0x104] ss:$16 sps:$4 sm:$0xff]  }
 0x430   :  { %7590 = vmatpush1.bf16.msra.mxu0 %v11185_v4  ;;  %7959 = vmatpush1.bf16.msra.mxu1 %v11187_v20  ;;  %v11244_v4 = vcombine.high %v1097_v58, %v1101_v60  ;;  %v1104_v20 = vld [vmem:[#allocation5 + $0x2090] sm:$0xff]  ;;  %v11853_v58 = vld [vmem:[%s13577_s2 + $0x10c] ss:$16 sps:$4 sm:$0xff]  }
 0x431   :  { %7591 = vmatprep.subr.bf16.mxu0 %v11194_v6  ;;  %7960 = vmatprep.subr.bf16.mxu1 %v11196_v51  ;;  %v1108_v6 = vld [vmem:[#allocation5 + $0x20b0] sm:$0x11]  ;;  %v1105_v51 = vld [vmem:[#allocation5 + $0x2098] sm:$0xff]  ;;  %v12185_v10 = vpop.eup %12184 }
 0x432   :  { %v11250_v12 = vcombine.high %v1104_v20, %v1108_v6 }
 0x434   :  { %7592 = vmatpush1.bf16.msra.mxu0 %v11193_v13  ;;  %7961 = vmatpush1.bf16.msra.mxu1 %v11195_v15  ;;  %v11249_v13 = vcombine.low %v1104_v20, %v1108_v6  ;;  %v11252_v15 = vcombine.high %v1105_v51, %v1109_v9  ;;  %v11859_v20 = vld [vmem:[%s13577_s2 + $0x12c] ss:$16 sps:$4 sm:$0xff]  }
 0x435   :  { %7593 = vmatprep.subr.bf16.mxu0 %v11202_v17  ;;  %7962 = vmatprep.subr.bf16.mxu1 %v11204_v18  ;;  %v11251_v17 = vcombine.low %v1105_v51, %v1109_v9  ;;  %v11262_v18 = vadd.f32 -1.0, %v12185_v10  ;;  %v11857_v9 = vld [vmem:[%s13577_s2 + $0x128] ss:$16 sps:$4 sm:$0xff]  }
 0x437   :  { %v6539_v16 = vsel %vm6519_vm0, %v11251_v17, 0  ;;  %v8061_v22 = vsel %vm8021_vm2, %v12563_v40, %v11262_v18  ;;  %v11806_v40 = vld [vmem:[%s13577_s2 + $0x20] ss:$16 sps:$4 sm:$0xff]   ;;  %v11871_v17 = vld [vmem:[%s13577_s2 + $0x16c] ss:$16 sps:$4 sm:$0xff]  }
 0x438   :  { %7594 = vmatpush1.bf16.msra.mxu0 %v11201_v24  ;;  %7963 = vmatpush1.bf16.msra.mxu1 %v11203_v25  ;;  %v11803_v24 = vld [vmem:[%s13577_s2 + $0x8] ss:$16 sps:$4 sm:$0xff]   ;;  %v11808_v25 = vld [vmem:[%s13577_s2 + $0x24] ss:$16 sps:$4 sm:$0xff]  }
 0x439   :  { %7595 = vmatprep.subr.bf16.mxu0 %v11210_v32  ;;  %7964 = vmatprep.subr.bf16.mxu1 %v11212_v59  ;;  %v8069_v32 = vpack.c.bf16 %v8061_v22, %v8061_v22  ;;  %v11811_v59 = vld [vmem:[%s13577_s2 + $0x2c] ss:$16 sps:$4 sm:$0xff]   ;;  %v11875_v22 = vld [vmem:[%s13577_s2 + $0x188] ss:$16 sps:$4 sm:$0xff]  }
 0x43c   :  { %7596 = vmatpush1.bf16.msra.mxu0 %v11209_v27  ;;  %7965 = vmatpush1.bf16.msra.mxu1 %v11211_v28  ;;  %v11823_v27 = vld [vmem:[%s13577_s2 + $0x6c] ss:$16 sps:$4 sm:$0xff]   ;;  %v11818_v28 = vld [vmem:[%s13577_s2 + $0x60] ss:$16 sps:$4 sm:$0xff]  }
 0x43d   :  { %7597 = vmatprep.subr.bf16.mxu0 %v11218_v19  ;;  %7966 = vmatprep.subr.bf16.mxu1 %v11220_v39  ;;  %v11821_v19 = vld [vmem:[%s13577_s2 + $0x68] ss:$16 sps:$4 sm:$0xff]   ;;  %v11826_v39 = vld [vmem:[%s13577_s2 + $0x84] ss:$16 sps:$4 sm:$0xff]  }
 0x440   :  { %7598 = vmatpush1.bf16.msra.mxu0 %v11217_v45  ;;  %7967 = vmatpush1.bf16.msra.mxu1 %v11219_v46  ;;  %v11830_v45 = vld [vmem:[%s13577_s2 + $0xa0] ss:$16 sps:$4 sm:$0xff]   ;;  %v11833_v46 = vld [vmem:[%s13577_s2 + $0xa8] ss:$16 sps:$4 sm:$0xff]  }
 0x441   :  { %7599 = vmatprep.subr.bf16.mxu0 %v11226_v37  ;;  %7968 = vmatprep.subr.bf16.mxu1 %v11228_v47  ;;  %v11838_v37 = vld [vmem:[%s13577_s2 + $0xc4] ss:$16 sps:$4 sm:$0xff]   ;;  %v11841_v47 = vld [vmem:[%s13577_s2 + $0xcc] ss:$16 sps:$4 sm:$0xff]  }
 0x444   :  { %7600 = vmatpush1.bf16.msra.mxu0 %v11225_v61  ;;  %7969 = vmatpush1.bf16.msra.mxu1 %v11227_v34  ;;  %v11847_v61 = vld [vmem:[%s13577_s2 + $0xec] ss:$16 sps:$4 sm:$0xff]   ;;  %v1126_v34 = vsub.s32 3, %v12378_v43 }
 0x445   :  { %7610 = vmatprep.subr.bf16.mxu0 %v11234_v55  ;;  %7979 = vmatprep.subr.bf16.mxu1 %v11236_v56  ;;  %v11842_v55 = vld [vmem:[%s13577_s2 + $0xe0] ss:$16 sps:$4 sm:$0xff]   ;;  %v1115_v56 = vrot.slane %v12557_v3, %v1114_v48 }
 0x446   :  { %v1127_v60 = vrot.slane %v12557_v3, %v1126_v34 }
 0x447   :  { %7602 = vmatmul.mubr.bf16.vlgmr.msra.gmra.mrb[4].mxu0 %v12501_v54  ;;  %7971 = vmatmul.mubr.bf16.vlgmr.msra.gmra.mrb[4].mxu1 %v12501_v54  ;;  %v6533_v54 = vsel %vm6519_vm0, %v11249_v13, 0  ;;  %v11863_v13 = vld [vmem:[%s13577_s2 + $0x148] ss:$16 sps:$4 sm:$0xff]  }
 0x448   :  { %7611 = vmatpush1.bf16.msra.mxu0 %v11233_v62  ;;  %7980 = vmatpush1.bf16.msra.mxu1 %v11235_v2  ;;  %v11848_v62 = vld [vmem:[%s13577_s2 + $0x100] ss:$16 sps:$4 sm:$0xff]   ;;  %v12694_v2 = vadd.f32 %v12532_v21, %v1115_v56  ;;  %v12706_v6 = vadd.f32 %v12538_v50, %v1127_v60  ;;  %v11865_v50 = vld [vmem:[%s13577_s2 + $0x14c] ss:$16 sps:$4 sm:$0xff]  }
 0x449   :  { %7612 = vmatprep.subr.bf16.mxu0 %v11242_v5  ;;  %7981 = vmatprep.subr.bf16.mxu1 %v11244_v4  ;;  %v11851_v5 = vld [vmem:[%s13577_s2 + $0x108] ss:$16 sps:$4 sm:$0xff]   ;;  %v11856_v4 = vld [vmem:[%s13577_s2 + $0x124] ss:$16 sps:$4 sm:$0xff]   ;;  %v11854_v21 = vld [vmem:[%s13577_s2 + $0x120] ss:$16 sps:$4 sm:$0xff]  }
 0x44a   :  { %7642 = vmatprep.mubr.bf16.mxu0 %v12309_v14  ;;  %8011 = vmatprep.mubr.bf16.mxu1 %v12309_v14  ;;  %v11800_v14 = vld [vmem:[%s13577_s2] ss:$16 sps:$4 sm:$0xff]   ;;  %v8028_v51 = vmin.f32 %v12694_v2, 0.0  ;;  %v8031_v10 = vmin.f32 %v12706_v6, 0.0  ;;  %vm8020_vm3 = vcmp.gt.f32.partialorder %v12694_v2, 0.0  ;;  %vm8023_vm4 = vcmp.gt.f32.partialorder %v12706_v6, 0.0 }
 0x44b   :  { %v11913_v56 = vld [vmem:[%s13577_s2 + $0x24c] ss:$16 sps:$4 sm:$0xff]  }
 0x44c   :  { %7613 = vmatpush1.bf16.msra.mxu0 %v11241_v7  ;;  %7982 = vmatpush1.bf16.msra.mxu1 %v11243_v11  ;;  %v11862_v7 = vld [vmem:[%s13577_s2 + $0x144] ss:$16 sps:$4 sm:$0xff]   ;;  %v11860_v11 = vld [vmem:[%s13577_s2 + $0x140] ss:$16 sps:$4 sm:$0xff]   ;;  %v8042_v18 = vmul.f32 1.442695, %v8031_v10 }
 0x44d   :  { %11257 = vmatprep.subr.msk.bf16.mxu0 %vm6519_vm0, %v11250_v12  ;;  %11259 = vmatprep.subr.msk.bf16.mxu1 %vm6519_vm0, %v11252_v15  ;;  %v8036_v12 = vmul.f32 1.442695, %v8028_v51  ;;  %v11868_v15 = vld [vmem:[%s13577_s2 + $0x164] ss:$16 sps:$4 sm:$0xff]   ;;  %v11919_v60 = vld [vmem:[%s13577_s2 + $0x26c] ss:$16 sps:$4 sm:$0xff]  }
 0x44e   :  { %v11931_v51 = vld [vmem:[%s13577_s2 + $0x2ac] ss:$16 sps:$4 sm:$0xff]  }
 0x44f   :  { %12186 = vpow2.f32 %v8036_v12  ;;  %v11937_v10 = vld [vmem:[%s13577_s2 + $0x2cc] ss:$16 sps:$4 sm:$0xff]   ;;  %v1122_v12 = vsub.s32 2, %v12378_v43 }
 0x450   :  { %7615 = vmatpush1.bf16.msra.mxu0 %v6533_v54  ;;  %7984 = vmatpush1.bf16.msra.mxu1 %v6539_v16  ;;  %v11866_v54 = vld [vmem:[%s13577_s2 + $0x160] ss:$16 sps:$4 sm:$0xff]   ;;  %v11874_v16 = vld [vmem:[%s13577_s2 + $0x184] ss:$16 sps:$4 sm:$0xff]   ;;  %12188 = vpow2.f32 %v8042_v18 }
 0x451   :  { %9635 = vmatprep.subr.bf16.mxu0 %v11802_v0  ;;  %9799 = vmatprep.subr.bf16.mxu1 %v11805_v1  ;;  %v11869_v0 = vld [vmem:[%s13577_s2 + $0x168] ss:$16 sps:$4 sm:$0xff]   ;;  %v11877_v1 = vld [vmem:[%s13577_s2 + $0x18c] ss:$16 sps:$4 sm:$0xff]   ;;  %v11938_v18 = vld [vmem:[%s13577_s2 + $0x2e0] ss:$16 sps:$4 sm:$0xff]  }
 0x453   :  { %11258 = vmatmul.mubr.msk.bf16.vlgmr.msra.gmra.mrb[4].mxu0 %vm6515_vm1, %v12512_v30  ;;  %11260 = vmatmul.mubr.msk.bf16.vlgmr.msra.gmra.mrb[4].mxu1 %vm6515_vm1, %v12512_v30  ;;  %v11817_v30 = vld [vmem:[%s13577_s2 + $0x4c] ss:$16 sps:$4 sm:$0xff]  }
 0x454   :  { %9636 = vmatpush1.bf16.msra.mxu0 %v11800_v14  ;;  %9667 = vmatprep.mubr.bf16.mxu0 %v8069_v32  ;;  %v11872_v14 = vld [vmem:[%s13577_s2 + $0x180] ss:$16 sps:$4 sm:$0xff]  }
 0x455   :  { %9800 = vmatpush1.bf16.msra.mxu1 %v11803_v24  ;;  %9831 = vmatprep.mubr.bf16.mxu1 %v8069_v32  ;;  %v11880_v24 = vld [vmem:[%s13577_s2 + $0x1a4] ss:$16 sps:$4 sm:$0xff]   ;;  %v11878_v32 = vld [vmem:[%s13577_s2 + $0x1a0] ss:$16 sps:$4 sm:$0xff]  }
 0x456   :  { %9637 = vmatprep.subr.bf16.mxu0 %v11808_v25  ;;  %9801 = vmatprep.subr.bf16.mxu1 %v11811_v59  ;;  %v11883_v25 = vld [vmem:[%s13577_s2 + $0x1ac] ss:$16 sps:$4 sm:$0xff]   ;;  %v11881_v59 = vld [vmem:[%s13577_s2 + $0x1a8] ss:$16 sps:$4 sm:$0xff]  }
 0x458   :  { %9638 = vmatpush1.bf16.msra.mxu0 %v11806_v40  ;;  %v11886_v40 = vld [vmem:[%s13577_s2 + $0x1c4] ss:$16 sps:$4 sm:$0xff]  }
 0x459   :  { %9802 = vmatpush1.bf16.msra.mxu1 %v11809_v33  ;;  %9639 = vmatprep.subr.bf16.mxu0 %v11814_v63  ;;  %v11889_v33 = vld [vmem:[%s13577_s2 + $0x1cc] ss:$16 sps:$4 sm:$0xff]   ;;  %v12187_v63 = vpop.eup %12186 }
 0x45a   :  { %9803 = vmatprep.subr.bf16.mxu1 %v11817_v30  ;;  %v11884_v30 = vld [vmem:[%s13577_s2 + $0x1c0] ss:$16 sps:$4 sm:$0xff]  }
 0x45c   :  { %9640 = vmatpush1.bf16.msra.mxu0 %v11812_v35  ;;  %v12189_v35 = vpop.eup %12188 }
 0x45d   :  { %9804 = vmatpush1.bf16.msra.mxu1 %v11815_v36  ;;  %9641 = vmatprep.subr.bf16.mxu0 %v11820_v38  ;;  %v11887_v36 = vld [vmem:[%s13577_s2 + $0x1c8] ss:$16 sps:$4 sm:$0xff]   ;;  %v11892_v38 = vld [vmem:[%s13577_s2 + $0x1e4] ss:$16 sps:$4 sm:$0xff]  }
 0x45e   :  { %9805 = vmatprep.subr.bf16.mxu1 %v11823_v27  ;;  %v11261_v27 = vadd.f32 -1.0, %v12187_v63  ;;  %v11956_v63 = vld [vmem:[%s13577_s2 + $0x340] ss:$16 sps:$4 sm:$0xff]  }
 0x460   :  { %9642 = vmatpush1.bf16.msra.mxu0 %v11818_v28  ;;  %v11895_v28 = vld [vmem:[%s13577_s2 + $0x1ec] ss:$16 sps:$4 sm:$0xff]  }
 0x461   :  { %9806 = vmatpush1.bf16.msra.mxu1 %v11821_v19  ;;  %9643 = vmatprep.subr.bf16.mxu0 %v11826_v39  ;;  %v11890_v19 = vld [vmem:[%s13577_s2 + $0x1e0] ss:$16 sps:$4 sm:$0xff]   ;;  %v11264_v39 = vadd.f32 -1.0, %v12189_v35  ;;  %v11959_v35 = vld [vmem:[%s13577_s2 + $0x348] ss:$16 sps:$4 sm:$0xff]  }
 0x462   :  { %9807 = vmatprep.subr.bf16.mxu1 %v11829_v41  ;;  %v11893_v41 = vld [vmem:[%s13577_s2 + $0x1e8] ss:$16 sps:$4 sm:$0xff]  }
 0x464   :  { %9644 = vmatpush1.bf16.msra.mxu0 %v11824_v23  ;;  %v11898_v23 = vld [vmem:[%s13577_s2 + $0x204] ss:$16 sps:$4 sm:$0xff]  }
 0x465   :  { %9808 = vmatpush1.bf16.msra.mxu1 %v11827_v42  ;;  %9645 = vmatprep.subr.bf16.mxu0 %v11832_v53  ;;  %v8060_v42 = vsel %vm8020_vm3, %v12694_v2, %v11261_v27  ;;  %v11901_v53 = vld [vmem:[%s13577_s2 + $0x20c] ss:$16 sps:$4 sm:$0xff]   ;;  %v11917_v2 = vld [vmem:[%s13577_s2 + $0x268] ss:$16 sps:$4 sm:$0xff]   ;;  %v11962_v27 = vld [vmem:[%s13577_s2 + $0x360] ss:$16 sps:$4 sm:$0xff]  }
 0x466   :  { %9809 = vmatprep.subr.bf16.mxu1 %v11835_v44  ;;  %v11896_v44 = vld [vmem:[%s13577_s2 + $0x200] ss:$16 sps:$4 sm:$0xff]  }
 0x468   :  { %9646 = vmatpush1.bf16.msra.mxu0 %v11830_v45  ;;  %v8063_v45 = vsel %vm8023_vm4, %v12706_v6, %v11264_v39  ;;  %v11923_v6 = vld [vmem:[%s13577_s2 + $0x288] ss:$16 sps:$4 sm:$0xff]   ;;  %v11973_v39 = vld [vmem:[%s13577_s2 + $0x38c] ss:$16 sps:$4 sm:$0xff]  }
 0x469   :  { %9810 = vmatpush1.bf16.msra.mxu1 %v11833_v46  ;;  %9647 = vmatprep.subr.bf16.mxu0 %v11838_v37  ;;  %v8068_v46 = vpack.c.bf16 %v8060_v42, %v8060_v42  ;;  %v11899_v37 = vld [vmem:[%s13577_s2 + $0x208] ss:$16 sps:$4 sm:$0xff]   ;;  %v11976_v42 = vld [vmem:[%s13577_s2 + $0x3a4] ss:$16 sps:$4 sm:$0xff]  }
 0x46a   :  { %9811 = vmatprep.subr.bf16.mxu1 %v11841_v47  ;;  %v11904_v47 = vld [vmem:[%s13577_s2 + $0x224] ss:$16 sps:$4 sm:$0xff]  }
 0x46c   :  { %9648 = vmatpush1.bf16.msra.mxu0 %v11836_v29  ;;  %v8071_v29 = vpack.c.bf16 %v8063_v45, %v8063_v45  ;;  %v11977_v45 = vld [vmem:[%s13577_s2 + $0x3a8] ss:$16 sps:$4 sm:$0xff]  }
 0x46d   :  { %9812 = vmatpush1.bf16.msra.mxu1 %v11839_v49  ;;  %9649 = vmatprep.subr.bf16.mxu0 %v11844_v52  ;;  %v11907_v49 = vld [vmem:[%s13577_s2 + $0x22c] ss:$16 sps:$4 sm:$0xff]   ;;  %v11902_v52 = vld [vmem:[%s13577_s2 + $0x220] ss:$16 sps:$4 sm:$0xff]  }
 0x46e   :  { %9813 = vmatprep.subr.bf16.mxu1 %v11847_v61  ;;  %v11905_v61 = vld [vmem:[%s13577_s2 + $0x228] ss:$16 sps:$4 sm:$0xff]  }
 0x470   :  { %9650 = vmatpush1.bf16.msra.mxu0 %v11842_v55  ;;  %v11910_v55 = vld [vmem:[%s13577_s2 + $0x244] ss:$16 sps:$4 sm:$0xff]  }
 0x471   :  { %9814 = vmatpush1.bf16.msra.mxu1 %v11845_v31  ;;  %9651 = vmatprep.subr.bf16.mxu0 %v11850_v57  ;;  %v11908_v31 = vld [vmem:[%s13577_s2 + $0x240] ss:$16 sps:$4 sm:$0xff]   ;;  %v11911_v57 = vld [vmem:[%s13577_s2 + $0x248] ss:$16 sps:$4 sm:$0xff]  }
 0x472   :  { %9815 = vmatprep.subr.bf16.mxu1 %v11853_v58  ;;  %v11916_v58 = vld [vmem:[%s13577_s2 + $0x264] ss:$16 sps:$4 sm:$0xff]  }
 0x474   :  { %9652 = vmatpush1.bf16.msra.mxu0 %v11848_v62  ;;  %v11914_v62 = vld [vmem:[%s13577_s2 + $0x260] ss:$16 sps:$4 sm:$0xff]  }
 0x475   :  { %9816 = vmatpush1.bf16.msra.mxu1 %v11851_v5  ;;  %9653 = vmatprep.subr.bf16.mxu0 %v11856_v4  ;;  %v11922_v5 = vld [vmem:[%s13577_s2 + $0x284] ss:$16 sps:$4 sm:$0xff]   ;;  %v11925_v4 = vld [vmem:[%s13577_s2 + $0x28c] ss:$16 sps:$4 sm:$0xff]  }
 0x476   :  { %9817 = vmatprep.subr.bf16.mxu1 %v11859_v20  ;;  %v11920_v20 = vld [vmem:[%s13577_s2 + $0x280] ss:$16 sps:$4 sm:$0xff]  }
 0x478   :  { %9654 = vmatpush1.bf16.msra.mxu0 %v11854_v21  ;;  %v11928_v21 = vld [vmem:[%s13577_s2 + $0x2a4] ss:$16 sps:$4 sm:$0xff]  }
 0x479   :  { %9818 = vmatpush1.bf16.msra.mxu1 %v11857_v9  ;;  %9655 = vmatprep.subr.bf16.mxu0 %v11862_v7  ;;  %v11926_v9 = vld [vmem:[%s13577_s2 + $0x2a0] ss:$16 sps:$4 sm:$0xff]   ;;  %v11929_v7 = vld [vmem:[%s13577_s2 + $0x2a8] ss:$16 sps:$4 sm:$0xff]  }
 0x47a   :  { %9819 = vmatprep.subr.bf16.mxu1 %v11865_v50  ;;  %v11934_v50 = vld [vmem:[%s13577_s2 + $0x2c4] ss:$16 sps:$4 sm:$0xff]  }
 0x47c   :  { %9656 = vmatpush1.bf16.msra.mxu0 %v11860_v11  ;;  %v11932_v11 = vld [vmem:[%s13577_s2 + $0x2c0] ss:$16 sps:$4 sm:$0xff]  }
 0x47d   :  { %9820 = vmatpush1.bf16.msra.mxu1 %v11863_v13  ;;  %9657 = vmatprep.subr.bf16.mxu0 %v11868_v15  ;;  %v11935_v13 = vld [vmem:[%s13577_s2 + $0x2c8] ss:$16 sps:$4 sm:$0xff]   ;;  %v11940_v15 = vld [vmem:[%s13577_s2 + $0x2e4] ss:$16 sps:$4 sm:$0xff]  }
 0x47e   :  { %9821 = vmatprep.subr.bf16.mxu1 %v11871_v17  ;;  %v11943_v17 = vld [vmem:[%s13577_s2 + $0x2ec] ss:$16 sps:$4 sm:$0xff]  }
 0x480   :  { %9658 = vmatpush1.bf16.msra.mxu0 %v11866_v54  ;;  %v1123_v54 = vrot.slane %v12557_v3, %v1122_v12  ;;  %v11944_v3 = vld [vmem:[%s13577_s2 + $0x300] ss:$16 sps:$4 sm:$0xff]  }
 0x481   :  { %9822 = vmatpush1.bf16.msra.mxu1 %v11869_v0  ;;  %9659 = vmatprep.subr.bf16.mxu0 %v11874_v16  ;;  %v11941_v0 = vld [vmem:[%s13577_s2 + $0x2e8] ss:$16 sps:$4 sm:$0xff]   ;;  %v11946_v16 = vld [vmem:[%s13577_s2 + $0x304] ss:$16 sps:$4 sm:$0xff]  }
 0x482   :  { %9823 = vmatprep.subr.bf16.mxu1 %v11877_v1  ;;  %v11949_v1 = vld [vmem:[%s13577_s2 + $0x30c] ss:$16 sps:$4 sm:$0xff]  }
 0x484   :  { %9660 = vmatpush1.bf16.msra.mxu0 %v11872_v14  ;;  %v12902_v14 = vadd.f32 %v12534_v26, %v1123_v54  ;;  %v11950_v26 = vld [vmem:[%s13577_s2 + $0x320] ss:$16 sps:$4 sm:$0xff]  }
 0x485   :  { %9824 = vmatpush1.bf16.msra.mxu1 %v11875_v22  ;;  %9661 = vmatprep.subr.bf16.mxu0 %v11880_v24  ;;  %v11947_v22 = vld [vmem:[%s13577_s2 + $0x308] ss:$16 sps:$4 sm:$0xff]   ;;  %v11952_v24 = vld [vmem:[%s13577_s2 + $0x324] ss:$16 sps:$4 sm:$0xff]   ;;  %v12016_v54 = vld [vmem:[%s13577_s2 + $0x480] ss:$16 sps:$4 sm:$0xff]  }
 0x486   :  { %9825 = vmatprep.subr.bf16.mxu1 %v11883_v25  ;;  %v11955_v25 = vld [vmem:[%s13577_s2 + $0x32c] ss:$16 sps:$4 sm:$0xff]   ;;  %vm8022_vm5 = vcmp.gt.f32.partialorder %v12902_v14, 0.0 }
 0x488   :  { %9662 = vmatpush1.bf16.msra.mxu0 %v11878_v32  ;;  %v8030_v32 = vmin.f32 %v12902_v14, 0.0 }
 0x489   :  { %9826 = vmatpush1.bf16.msra.mxu1 %v11881_v59  ;;  %9663 = vmatprep.subr.bf16.mxu0 %v11886_v40  ;;  %v11953_v59 = vld [vmem:[%s13577_s2 + $0x328] ss:$16 sps:$4 sm:$0xff]   ;;  %v11958_v40 = vld [vmem:[%s13577_s2 + $0x344] ss:$16 sps:$4 sm:$0xff]  }
 0x48a   :  { %9827 = vmatprep.subr.bf16.mxu1 %v11889_v33  ;;  %v11961_v33 = vld [vmem:[%s13577_s2 + $0x34c] ss:$16 sps:$4 sm:$0xff]  }
 0x48c   :  { %9664 = vmatpush1.bf16.msra.mxu0 %v11884_v30  ;;  %v8040_v30 = vmul.f32 1.442695, %v8030_v32  ;;  %v12036_v32 = vld [vmem:[%s13577_s2 + $0x4e4] ss:$16 sps:$4 sm:$0xff]  }
 0x48d   :  { %9828 = vmatpush1.bf16.msra.mxu1 %v11887_v36  ;;  %9665 = vmatprep.subr.bf16.mxu0 %v11892_v38  ;;  %v11964_v36 = vld [vmem:[%s13577_s2 + $0x364] ss:$16 sps:$4 sm:$0xff]   ;;  %v11967_v38 = vld [vmem:[%s13577_s2 + $0x36c] ss:$16 sps:$4 sm:$0xff]  }
 0x48e   :  { %9829 = vmatprep.subr.bf16.mxu1 %v11895_v28  ;;  %12190 = vpow2.f32 %v8040_v30  ;;  %v11965_v28 = vld [vmem:[%s13577_s2 + $0x368] ss:$16 sps:$4 sm:$0xff]   ;;  %v12045_v30 = vld [vmem:[%s13577_s2 + $0x50c] ss:$16 sps:$4 sm:$0xff]  }
 0x490   :  { %9666 = vmatpush1.bf16.msra.mxu0 %v11890_v19  ;;  %v11970_v19 = vld [vmem:[%s13577_s2 + $0x384] ss:$16 sps:$4 sm:$0xff]  }
 0x491   :  { %9830 = vmatpush1.bf16.msra.mxu1 %v11893_v41  ;;  %9676 = vmatprep.subr.bf16.mxu0 %v11898_v23  ;;  %v11968_v41 = vld [vmem:[%s13577_s2 + $0x380] ss:$16 sps:$4 sm:$0xff]   ;;  %v11971_v23 = vld [vmem:[%s13577_s2 + $0x388] ss:$16 sps:$4 sm:$0xff]  }
 0x492   :  { %9840 = vmatprep.subr.bf16.mxu1 %v11901_v53  ;;  %v11979_v53 = vld [vmem:[%s13577_s2 + $0x3ac] ss:$16 sps:$4 sm:$0xff]  }
 0x493   :  { %9668 = vmatmul.mubr.bf16.vlgmr.msra.gmra.mrb[8].mxu0 %v8068_v46 }
 0x494   :  { %9832 = vmatmul.mubr.bf16.vlgmr.msra.gmra.mrb[8].mxu1 %v8068_v46  ;;  %9677 = vmatpush1.bf16.msra.mxu0 %v11896_v44  ;;  %v11974_v44 = vld [vmem:[%s13577_s2 + $0x3a0] ss:$16 sps:$4 sm:$0xff]   ;;  %v11982_v46 = vld [vmem:[%s13577_s2 + $0x3c4] ss:$16 sps:$4 sm:$0xff]  }
 0x495   :  { %9708 = vmatprep.mubr.bf16.mxu0 %v8071_v29  ;;  %9841 = vmatpush1.bf16.msra.mxu1 %v11899_v37  ;;  %v11985_v37 = vld [vmem:[%s13577_s2 + $0x3cc] ss:$16 sps:$4 sm:$0xff]  }
 0x496   :  { %9872 = vmatprep.mubr.bf16.mxu1 %v8071_v29  ;;  %9678 = vmatprep.subr.bf16.mxu0 %v11904_v47  ;;  %v11980_v29 = vld [vmem:[%s13577_s2 + $0x3c0] ss:$16 sps:$4 sm:$0xff]  }
 0x497   :  { %9842 = vmatprep.subr.bf16.mxu1 %v11907_v49  ;;  %v11983_v49 = vld [vmem:[%s13577_s2 + $0x3c8] ss:$16 sps:$4 sm:$0xff]  }
 0x498   :  { %9679 = vmatpush1.bf16.msra.mxu0 %v11902_v52  ;;  %v12191_v47 = vpop.eup %12190  ;;  %v11988_v52 = vld [vmem:[%s13577_s2 + $0x3e4] ss:$16 sps:$4 sm:$0xff]  }
 0x499   :  { %9843 = vmatpush1.bf16.msra.mxu1 %v11905_v61  ;;  %9680 = vmatprep.subr.bf16.mxu0 %v11910_v55  ;;  %v11263_v61 = vadd.f32 -1.0, %v12191_v47  ;;  %v11991_v55 = vld [vmem:[%s13577_s2 + $0x3ec] ss:$16 sps:$4 sm:$0xff]  }
 0x49a   :  { %9844 = vmatprep.subr.bf16.mxu1 %v11913_v56  ;;  %v11986_v56 = vld [vmem:[%s13577_s2 + $0x3e0] ss:$16 sps:$4 sm:$0xff]   ;;  %v12069_v47 = vld [vmem:[%s13577_s2 + $0x58c] ss:$16 sps:$4 sm:$0xff]  }
 0x49c   :  { %9681 = vmatpush1.bf16.msra.mxu0 %v11908_v31  ;;  %v11989_v31 = vld [vmem:[%s13577_s2 + $0x3e8] ss:$16 sps:$4 sm:$0xff]  }
 0x49d   :  { %9845 = vmatpush1.bf16.msra.mxu1 %v11911_v57  ;;  %9682 = vmatprep.subr.bf16.mxu0 %v11916_v58  ;;  %v11994_v57 = vld [vmem:[%s13577_s2 + $0x404] ss:$16 sps:$4 sm:$0xff]   ;;  %v8062_v58 = vsel %vm8022_vm5, %v12902_v14, %v11263_v61  ;;  %v12025_v14 = vld [vmem:[%s13577_s2 + $0x4a8] ss:$16 sps:$4 sm:$0xff]   ;;  %v12075_v61 = vld [vmem:[%s13577_s2 + $0x5ac] ss:$16 sps:$4 sm:$0xff]  }
 0x49e   :  { %9846 = vmatprep.subr.bf16.mxu1 %v11919_v60  ;;  %v11997_v60 = vld [vmem:[%s13577_s2 + $0x40c] ss:$16 sps:$4 sm:$0xff]  }
 0x4a0   :  { %9683 = vmatpush1.bf16.msra.mxu0 %v11914_v62  ;;  %v11992_v62 = vld [vmem:[%s13577_s2 + $0x400] ss:$16 sps:$4 sm:$0xff]  }
 0x4a1   :  { %9847 = vmatpush1.bf16.msra.mxu1 %v11917_v2  ;;  %9684 = vmatprep.subr.bf16.mxu0 %v11922_v5  ;;  %v8070_v2 = vpack.c.bf16 %v8062_v58, %v8062_v58  ;;  %v11995_v5 = vld [vmem:[%s13577_s2 + $0x408] ss:$16 sps:$4 sm:$0xff]   ;;  %v12076_v58 = vld [vmem:[%s13577_s2 + $0x5c0] ss:$16 sps:$4 sm:$0xff]  }
 0x4a2   :  { %9848 = vmatprep.subr.bf16.mxu1 %v11925_v4  ;;  %v12000_v4 = vld [vmem:[%s13577_s2 + $0x424] ss:$16 sps:$4 sm:$0xff]  }
 0x4a4   :  { %9685 = vmatpush1.bf16.msra.mxu0 %v11920_v20  ;;  %v12003_v20 = vld [vmem:[%s13577_s2 + $0x42c] ss:$16 sps:$4 sm:$0xff]  }
 0x4a5   :  { %9849 = vmatpush1.bf16.msra.mxu1 %v11923_v6  ;;  %9686 = vmatprep.subr.bf16.mxu0 %v11928_v21  ;;  %v11998_v6 = vld [vmem:[%s13577_s2 + $0x420] ss:$16 sps:$4 sm:$0xff]   ;;  %v12001_v21 = vld [vmem:[%s13577_s2 + $0x428] ss:$16 sps:$4 sm:$0xff]  }
 0x4a6   :  { %9850 = vmatprep.subr.bf16.mxu1 %v11931_v51  ;;  %v12006_v51 = vld [vmem:[%s13577_s2 + $0x444] ss:$16 sps:$4 sm:$0xff]  }
 0x4a8   :  { %9687 = vmatpush1.bf16.msra.mxu0 %v11926_v9  ;;  %v12009_v9 = vld [vmem:[%s13577_s2 + $0x44c] ss:$16 sps:$4 sm:$0xff]  }
 0x4a9   :  { %9851 = vmatpush1.bf16.msra.mxu1 %v11929_v7  ;;  %9688 = vmatprep.subr.bf16.mxu0 %v11934_v50  ;;  %v12004_v7 = vld [vmem:[%s13577_s2 + $0x440] ss:$16 sps:$4 sm:$0xff]   ;;  %v12007_v50 = vld [vmem:[%s13577_s2 + $0x448] ss:$16 sps:$4 sm:$0xff]  }
 0x4aa   :  { %9852 = vmatprep.subr.bf16.mxu1 %v11937_v10  ;;  %v12012_v10 = vld [vmem:[%s13577_s2 + $0x464] ss:$16 sps:$4 sm:$0xff]  }
 0x4ac   :  { %9689 = vmatpush1.bf16.msra.mxu0 %v11932_v11  ;;  %v12015_v11 = vld [vmem:[%s13577_s2 + $0x46c] ss:$16 sps:$4 sm:$0xff]  }
 0x4ad   :  { %9853 = vmatpush1.bf16.msra.mxu1 %v11935_v13  ;;  %9690 = vmatprep.subr.bf16.mxu0 %v11940_v15  ;;  %v12010_v13 = vld [vmem:[%s13577_s2 + $0x460] ss:$16 sps:$4 sm:$0xff]   ;;  %v12013_v15 = vld [vmem:[%s13577_s2 + $0x468] ss:$16 sps:$4 sm:$0xff]  }
 0x4ae   :  { %9854 = vmatprep.subr.bf16.mxu1 %v11943_v17  ;;  %v12018_v17 = vld [vmem:[%s13577_s2 + $0x484] ss:$16 sps:$4 sm:$0xff]  }
 0x4b0   :  { %9691 = vmatpush1.bf16.msra.mxu0 %v11938_v18  ;;  %v12021_v18 = vld [vmem:[%s13577_s2 + $0x48c] ss:$16 sps:$4 sm:$0xff]  }
 0x4b1   :  { %9855 = vmatpush1.bf16.msra.mxu1 %v11941_v0  ;;  %9692 = vmatprep.subr.bf16.mxu0 %v11946_v16  ;;  %v12019_v0 = vld [vmem:[%s13577_s2 + $0x488] ss:$16 sps:$4 sm:$0xff]   ;;  %v12024_v16 = vld [vmem:[%s13577_s2 + $0x4a4] ss:$16 sps:$4 sm:$0xff]  }
 0x4b2   :  { %9856 = vmatprep.subr.bf16.mxu1 %v11949_v1  ;;  %v12027_v1 = vld [vmem:[%s13577_s2 + $0x4ac] ss:$16 sps:$4 sm:$0xff]  }
 0x4b4   :  { %9693 = vmatpush1.bf16.msra.mxu0 %v11944_v3  ;;  %v12022_v3 = vld [vmem:[%s13577_s2 + $0x4a0] ss:$16 sps:$4 sm:$0xff]  }
 0x4b5   :  { %9857 = vmatpush1.bf16.msra.mxu1 %v11947_v22  ;;  %9694 = vmatprep.subr.bf16.mxu0 %v11952_v24  ;;  %v12030_v22 = vld [vmem:[%s13577_s2 + $0x4c4] ss:$16 sps:$4 sm:$0xff]   ;;  %v12033_v24 = vld [vmem:[%s13577_s2 + $0x4cc] ss:$16 sps:$4 sm:$0xff]  }
 0x4b6   :  { %9858 = vmatprep.subr.bf16.mxu1 %v11955_v25  ;;  %v12028_v25 = vld [vmem:[%s13577_s2 + $0x4c0] ss:$16 sps:$4 sm:$0xff]  }
 0x4b8   :  { %9695 = vmatpush1.bf16.msra.mxu0 %v11950_v26  ;;  %v12031_v26 = vld [vmem:[%s13577_s2 + $0x4c8] ss:$16 sps:$4 sm:$0xff]  }
 0x4b9   :  { %9859 = vmatpush1.bf16.msra.mxu1 %v11953_v59  ;;  %9696 = vmatprep.subr.bf16.mxu0 %v11958_v40  ;;  %v12039_v59 = vld [vmem:[%s13577_s2 + $0x4ec] ss:$16 sps:$4 sm:$0xff]   ;;  %v12034_v40 = vld [vmem:[%s13577_s2 + $0x4e0] ss:$16 sps:$4 sm:$0xff]  }
 0x4ba   :  { %9860 = vmatprep.subr.bf16.mxu1 %v11961_v33  ;;  %v12037_v33 = vld [vmem:[%s13577_s2 + $0x4e8] ss:$16 sps:$4 sm:$0xff]  }
 0x4bc   :  { %9697 = vmatpush1.bf16.msra.mxu0 %v11956_v63  ;;  %v12042_v63 = vld [vmem:[%s13577_s2 + $0x504] ss:$16 sps:$4 sm:$0xff]  }
 0x4bd   :  { %9861 = vmatpush1.bf16.msra.mxu1 %v11959_v35  ;;  %9698 = vmatprep.subr.bf16.mxu0 %v11964_v36  ;;  %v12040_v35 = vld [vmem:[%s13577_s2 + $0x500] ss:$16 sps:$4 sm:$0xff]   ;;  %v12043_v36 = vld [vmem:[%s13577_s2 + $0x508] ss:$16 sps:$4 sm:$0xff]  }
 0x4be   :  { %9862 = vmatprep.subr.bf16.mxu1 %v11967_v38  ;;  %v12048_v38 = vld [vmem:[%s13577_s2 + $0x524] ss:$16 sps:$4 sm:$0xff]  }
 0x4c0   :  { %9699 = vmatpush1.bf16.msra.mxu0 %v11962_v27  ;;  %v12051_v27 = vld [vmem:[%s13577_s2 + $0x52c] ss:$16 sps:$4 sm:$0xff]  }
 0x4c1   :  { %9863 = vmatpush1.bf16.msra.mxu1 %v11965_v28  ;;  %9700 = vmatprep.subr.bf16.mxu0 %v11970_v19  ;;  %v12046_v28 = vld [vmem:[%s13577_s2 + $0x520] ss:$16 sps:$4 sm:$0xff]   ;;  %v12049_v19 = vld [vmem:[%s13577_s2 + $0x528] ss:$16 sps:$4 sm:$0xff]  }
 0x4c2   :  { %9864 = vmatprep.subr.bf16.mxu1 %v11973_v39  ;;  %v12054_v39 = vld [vmem:[%s13577_s2 + $0x544] ss:$16 sps:$4 sm:$0xff]  }
 0x4c4   :  { %9701 = vmatpush1.bf16.msra.mxu0 %v11968_v41  ;;  %v12057_v41 = vld [vmem:[%s13577_s2 + $0x54c] ss:$16 sps:$4 sm:$0xff]  }
 0x4c5   :  { %9865 = vmatpush1.bf16.msra.mxu1 %v11971_v23  ;;  %9702 = vmatprep.subr.bf16.mxu0 %v11976_v42  ;;  %v12052_v23 = vld [vmem:[%s13577_s2 + $0x540] ss:$16 sps:$4 sm:$0xff]   ;;  %v12055_v42 = vld [vmem:[%s13577_s2 + $0x548] ss:$16 sps:$4 sm:$0xff]  }
 0x4c6   :  { %9866 = vmatprep.subr.bf16.mxu1 %v11979_v53  ;;  %v12060_v53 = vld [vmem:[%s13577_s2 + $0x564] ss:$16 sps:$4 sm:$0xff]  }
 0x4c8   :  { %9703 = vmatpush1.bf16.msra.mxu0 %v11974_v44  ;;  %v12063_v44 = vld [vmem:[%s13577_s2 + $0x56c] ss:$16 sps:$4 sm:$0xff]  }
 0x4c9   :  { %9867 = vmatpush1.bf16.msra.mxu1 %v11977_v45  ;;  %9704 = vmatprep.subr.bf16.mxu0 %v11982_v46  ;;  %v12058_v45 = vld [vmem:[%s13577_s2 + $0x560] ss:$16 sps:$4 sm:$0xff]   ;;  %v12061_v46 = vld [vmem:[%s13577_s2 + $0x568] ss:$16 sps:$4 sm:$0xff]  }
 0x4ca   :  { %9868 = vmatprep.subr.bf16.mxu1 %v11985_v37  ;;  %v12066_v37 = vld [vmem:[%s13577_s2 + $0x584] ss:$16 sps:$4 sm:$0xff]  }
 0x4cc   :  { %9705 = vmatpush1.bf16.msra.mxu0 %v11980_v29  ;;  %v12064_v29 = vld [vmem:[%s13577_s2 + $0x580] ss:$16 sps:$4 sm:$0xff]  }
 0x4cd   :  { %9869 = vmatpush1.bf16.msra.mxu1 %v11983_v49  ;;  %9706 = vmatprep.subr.bf16.mxu0 %v11988_v52  ;;  %v12067_v49 = vld [vmem:[%s13577_s2 + $0x588] ss:$16 sps:$4 sm:$0xff]   ;;  %v12072_v52 = vld [vmem:[%s13577_s2 + $0x5a4] ss:$16 sps:$4 sm:$0xff]  }
 0x4ce   :  { %9870 = vmatprep.subr.bf16.mxu1 %v11991_v55  ;;  %v12070_v55 = vld [vmem:[%s13577_s2 + $0x5a0] ss:$16 sps:$4 sm:$0xff]  }
 0x4d0   :  { %9707 = vmatpush1.bf16.msra.mxu0 %v11986_v56  ;;  %v12073_v56 = vld [vmem:[%s13577_s2 + $0x5a8] ss:$16 sps:$4 sm:$0xff]  }
 0x4d1   :  { %9871 = vmatpush1.bf16.msra.mxu1 %v11989_v31  ;;  %9717 = vmatprep.subr.bf16.mxu0 %v11994_v57  ;;  %v12078_v31 = vld [vmem:[%s13577_s2 + $0x5c4] ss:$16 sps:$4 sm:$0xff]   ;;  %v12081_v57 = vld [vmem:[%s13577_s2 + $0x5cc] ss:$16 sps:$4 sm:$0xff]  }
 0x4d2   :  { %9881 = vmatprep.subr.bf16.mxu1 %v11997_v60  ;;  %v12079_v60 = vld [vmem:[%s13577_s2 + $0x5c8] ss:$16 sps:$4 sm:$0xff]  }
 0x4d3   :  { %9709 = vmatmul.mubr.bf16.vlgmr.msra.gmra.mrb[8].mxu0 %v8070_v2 }
 0x4d4   :  { %9873 = vmatmul.mubr.bf16.vlgmr.msra.gmra.mrb[8].mxu1 %v8070_v2  ;;  %9718 = vmatpush1.bf16.msra.mxu0 %v11992_v62  ;;  %v12084_v62 = vld [vmem:[%s13577_s2 + $0x5e4] ss:$16 sps:$4 sm:$0xff]   ;;  %v12087_v2 = vld [vmem:[%s13577_s2 + $0x5ec] ss:$16 sps:$4 sm:$0xff]  }
 0x4d5   :  { %9882 = vmatpush1.bf16.msra.mxu1 %v11995_v5  ;;  %9719 = vmatprep.subr.bf16.mxu0 %v12000_v4  ;;  %v12082_v5 = vld [vmem:[%s13577_s2 + $0x5e0] ss:$16 sps:$4 sm:$0xff]   ;;  %v12085_v4 = vld [vmem:[%s13577_s2 + $0x5e8] ss:$16 sps:$4 sm:$0xff]  }
 0x4d6   :  { %9883 = vmatprep.subr.bf16.mxu1 %v12003_v20  ;;  %v12090_v20 = vld [vmem:[%s13577_s2 + $0x604] ss:$16 sps:$4 sm:$0xff]  }
 0x4d8   :  { %9720 = vmatpush1.bf16.msra.mxu0 %v11998_v6  ;;  %v12093_v6 = vld [vmem:[%s13577_s2 + $0x60c] ss:$16 sps:$4 sm:$0xff]  }
 0x4d9   :  { %9884 = vmatpush1.bf16.msra.mxu1 %v12001_v21  ;;  %9721 = vmatprep.subr.bf16.mxu0 %v12006_v51  ;;  %v1130_v21 = vsub.s32 4, %v12378_v43  ;;  %v1134_v51 = vsub.s32 5, %v12378_v43 }
 0x4da   :  { %9885 = vmatprep.subr.bf16.mxu1 %v12009_v9  ;;  %v1142_v9 = vsub.s32 7, %v12378_v43 }
 0x4dc   :  { %9722 = vmatpush1.bf16.msra.mxu0 %v12004_v7  ;;  %v13195_v7 = vld [vmem:[#allocation7] ss:$4 sm:$0xff] }
 0x4dd   :  { %9886 = vmatpush1.bf16.msra.mxu1 %v12007_v50  ;;  %9723 = vmatprep.subr.bf16.mxu0 %v12012_v10  ;;  %v1131_v50 = vrot.slane %v13195_v7, %v1130_v21  ;;  %v1135_v10 = vrot.slane %v13195_v7, %v1134_v51  ;;  %v12129_v21 = vld [vmem:[%s13577_s2 + $0x6cc] ss:$16 sps:$4 sm:$0xff]   ;;  %v12124_v51 = vld [vmem:[%s13577_s2 + $0x6c0] ss:$16 sps:$4 sm:$0xff]  }
 0x4de   :  { %9887 = vmatprep.subr.bf16.mxu1 %v12015_v11  ;;  %v1143_v11 = vrot.slane %v13195_v7, %v1142_v9  ;;  %v12127_v9 = vld [vmem:[%s13577_s2 + $0x6c8] ss:$16 sps:$4 sm:$0xff]  }
 0x4e0   :  { %9724 = vmatpush1.bf16.msra.mxu0 %v12010_v13 }
 0x4e1   :  { %9888 = vmatpush1.bf16.msra.mxu1 %v12013_v15  ;;  %9725 = vmatprep.subr.bf16.mxu0 %v12018_v17 }
 0x4e2   :  { %9889 = vmatprep.subr.bf16.mxu1 %v12021_v18 }
 0x4e4   :  { %9726 = vmatpush1.bf16.msra.mxu0 %v12016_v54 }
 0x4e5   :  { %9890 = vmatpush1.bf16.msra.mxu1 %v12019_v0  ;;  %9727 = vmatprep.subr.bf16.mxu0 %v12024_v16 }
 0x4e6   :  { %9891 = vmatprep.subr.bf16.mxu1 %v12027_v1 }
 0x4e8   :  { %9728 = vmatpush1.bf16.msra.mxu0 %v12022_v3 }
 0x4e9   :  { %9892 = vmatpush1.bf16.msra.mxu1 %v12025_v14  ;;  %9729 = vmatprep.subr.bf16.mxu0 %v12030_v22 }
 0x4ea   :  { %9893 = vmatprep.subr.bf16.mxu1 %v12033_v24 }
 0x4ec   :  { %9730 = vmatpush1.bf16.msra.mxu0 %v12028_v25 }
 0x4ed   :  { %9894 = vmatpush1.bf16.msra.mxu1 %v12031_v26  ;;  %9731 = vmatprep.subr.bf16.mxu0 %v12036_v32 }
 0x4ee   :  { %9895 = vmatprep.subr.bf16.mxu1 %v12039_v59 }
 0x4f0   :  { %9732 = vmatpush1.bf16.msra.mxu0 %v12034_v40 }
 0x4f1   :  { %9896 = vmatpush1.bf16.msra.mxu1 %v12037_v33  ;;  %9733 = vmatprep.subr.bf16.mxu0 %v12042_v63 }
 0x4f2   :  { %9897 = vmatprep.subr.bf16.mxu1 %v12045_v30 }
 0x4f4   :  { %9734 = vmatpush1.bf16.msra.mxu0 %v12040_v35 }
 0x4f5   :  { %9898 = vmatpush1.bf16.msra.mxu1 %v12043_v36  ;;  %9735 = vmatprep.subr.bf16.mxu0 %v12048_v38 }
 0x4f6   :  { %9899 = vmatprep.subr.bf16.mxu1 %v12051_v27 }
 0x4f8   :  { %9736 = vmatpush1.bf16.msra.mxu0 %v12046_v28 }
 0x4f9   :  { %9900 = vmatpush1.bf16.msra.mxu1 %v12049_v19  ;;  %9737 = vmatprep.subr.bf16.mxu0 %v12054_v39  ;;  %v12088_v39 = vld [vmem:[%s13577_s2 + $0x600] ss:$16 sps:$4 sm:$0xff]  }
 0x4fa   :  { %9901 = vmatprep.subr.bf16.mxu1 %v12057_v41  ;;  %v12091_v41 = vld [vmem:[%s13577_s2 + $0x608] ss:$16 sps:$4 sm:$0xff]  }
 0x4fc   :  { %9738 = vmatpush1.bf16.msra.mxu0 %v12052_v23 }
 0x4fd   :  { %9902 = vmatpush1.bf16.msra.mxu1 %v12055_v42  ;;  %9739 = vmatprep.subr.bf16.mxu0 %v12060_v53  ;;  %v12096_v53 = vld [vmem:[%s13577_s2 + $0x624] ss:$16 sps:$4 sm:$0xff]  }
 0x4fe   :  { %9903 = vmatprep.subr.bf16.mxu1 %v12063_v44  ;;  %v12099_v44 = vld [vmem:[%s13577_s2 + $0x62c] ss:$16 sps:$4 sm:$0xff]  }
 0x500   :  { %9740 = vmatpush1.bf16.msra.mxu0 %v12058_v45 }
 0x501   :  { %9904 = vmatpush1.bf16.msra.mxu1 %v12061_v46  ;;  %9741 = vmatprep.subr.bf16.mxu0 %v12066_v37  ;;  %v12094_v46 = vld [vmem:[%s13577_s2 + $0x620] ss:$16 sps:$4 sm:$0xff]   ;;  %v12097_v37 = vld [vmem:[%s13577_s2 + $0x628] ss:$16 sps:$4 sm:$0xff]  }
 0x502   :  { %9905 = vmatprep.subr.bf16.mxu1 %v12069_v47  ;;  %v12102_v47 = vld [vmem:[%s13577_s2 + $0x644] ss:$16 sps:$4 sm:$0xff]  }
 0x504   :  { %9742 = vmatpush1.bf16.msra.mxu0 %v12064_v29  ;;  %v12105_v29 = vld [vmem:[%s13577_s2 + $0x64c] ss:$16 sps:$4 sm:$0xff]  }
 0x505   :  { %9906 = vmatpush1.bf16.msra.mxu1 %v12067_v49  ;;  %9743 = vmatprep.subr.bf16.mxu0 %v12072_v52  ;;  %v12100_v49 = vld [vmem:[%s13577_s2 + $0x640] ss:$16 sps:$4 sm:$0xff]   ;;  %v12103_v52 = vld [vmem:[%s13577_s2 + $0x648] ss:$16 sps:$4 sm:$0xff]  }
 0x506   :  { %9907 = vmatprep.subr.bf16.mxu1 %v12075_v61  ;;  %v12108_v61 = vld [vmem:[%s13577_s2 + $0x664] ss:$16 sps:$4 sm:$0xff]  }
 0x508   :  { %9744 = vmatpush1.bf16.msra.mxu0 %v12070_v55  ;;  %v12111_v55 = vld [vmem:[%s13577_s2 + $0x66c] ss:$16 sps:$4 sm:$0xff]  }
 0x509   :  { %9908 = vmatpush1.bf16.msra.mxu1 %v12073_v56  ;;  %9745 = vmatprep.subr.bf16.mxu0 %v12078_v31  ;;  %v12106_v56 = vld [vmem:[%s13577_s2 + $0x660] ss:$16 sps:$4 sm:$0xff]   ;;  %v12109_v31 = vld [vmem:[%s13577_s2 + $0x668] ss:$16 sps:$4 sm:$0xff]  }
 0x50a   :  { %9909 = vmatprep.subr.bf16.mxu1 %v12081_v57  ;;  %v12114_v57 = vld [vmem:[%s13577_s2 + $0x684] ss:$16 sps:$4 sm:$0xff]  }
 0x50c   :  { %9746 = vmatpush1.bf16.msra.mxu0 %v12076_v58  ;;  %v12117_v58 = vld [vmem:[%s13577_s2 + $0x68c] ss:$16 sps:$4 sm:$0xff]  }
 0x50d   :  { %9910 = vmatpush1.bf16.msra.mxu1 %v12079_v60  ;;  %9747 = vmatprep.subr.bf16.mxu0 %v12084_v62  ;;  %v12112_v60 = vld [vmem:[%s13577_s2 + $0x680] ss:$16 sps:$4 sm:$0xff]   ;;  %v12115_v62 = vld [vmem:[%s13577_s2 + $0x688] ss:$16 sps:$4 sm:$0xff]  }
 0x50e   :  { %9911 = vmatprep.subr.bf16.mxu1 %v12087_v2  ;;  %v12120_v2 = vld [vmem:[%s13577_s2 + $0x6a4] ss:$16 sps:$4 sm:$0xff]  }
 0x510   :  { %9748 = vmatpush1.bf16.msra.mxu0 %v12082_v5  ;;  %v12123_v5 = vld [vmem:[%s13577_s2 + $0x6ac] ss:$16 sps:$4 sm:$0xff]  }
 0x511   :  { %9912 = vmatpush1.bf16.msra.mxu1 %v12085_v4  ;;  %9758 = vmatprep.subr.bf16.mxu0 %v12090_v20  ;;  %v12118_v4 = vld [vmem:[%s13577_s2 + $0x6a0] ss:$16 sps:$4 sm:$0xff]   ;;  %v12121_v20 = vld [vmem:[%s13577_s2 + $0x6a8] ss:$16 sps:$4 sm:$0xff]  }
 0x512   :  { %9922 = vmatprep.subr.bf16.mxu1 %v12093_v6  ;;  %v12126_v6 = vld [vmem:[%s13577_s2 + $0x6c4] ss:$16 sps:$4 sm:$0xff]  }
 0x526   :  { %v7644_v13 = vpop.f32.mrb[4].mxu0  ;;  %v13200_v17 = vpop.f32.mrb[4].mxu1 }
 0x527   :  { %v11629_v15 = vadd.f32 %v7644_v13, %v1131_v50  ;;  %v7646_v18 = vpop.f32.mrb[5].mxu0  ;;  %v8015_v0 = vpop.f32.mrb[5].mxu1  ;;  %v1138_v50 = vsub.s32 6, %v12378_v43  ;;  %v12130_v13 = vld [vmem:[%s13577_s2 + $0x6e0] ss:$16 sps:$4 sm:$0xff]  }
 0x528   :  { %v11630_v54 = vadd.f32 %v7646_v18, %v1135_v10  ;;  %v7648_v16 = vpop.f32.mrb[6].mxu0  ;;  %v11632_v3 = vadd.f32 %v8015_v0, %v1143_v11  ;;  %v8017_v14 = vpop.f32.mrb[6].mxu1  ;;  %v12132_v10 = vld [vmem:[%s13577_s2 + $0x6e4] ss:$16 sps:$4 sm:$0xff]   ;;  %v12135_v11 = vld [vmem:[%s13577_s2 + $0x6ec] ss:$16 sps:$4 sm:$0xff]  }
 0x529   :  { %v8032_v1 = vmin.f32 %v11629_v15, 0.0  ;;  %v7649_v22 = vpop.f32.mrb[7].mxu0  ;;  %v8018_v25 = vpop.f32.mrb[7].mxu1  ;;  %vm8024_vm6 = vcmp.gt.f32.partialorder %v11629_v15, 0.0  ;;  %v1139_v18 = vrot.slane %v13195_v7, %v1138_v50  ;;  %v12141_v0 = vld [vmem:[%s13577_s2 + $0x70c] ss:$16 sps:$4 sm:$0xff]  }
 0x52a   :  { %v8033_v24 = vmin.f32 %v11630_v54, 0.0  ;;  %v8035_v32 = vmin.f32 %v11632_v3, 0.0  ;;  %vm8025_vm7 = vcmp.gt.f32.partialorder %v11630_v54, 0.0  ;;  %vm8027_vm8 = vcmp.gt.f32.partialorder %v11632_v3, 0.0  ;;  %v12136_v16 = vld [vmem:[%s13577_s2 + $0x700] ss:$16 sps:$4 sm:$0xff]  }
 0x52b   :  { %v8044_v26 = vmul.f32 1.442695, %v8032_v1  ;;  %v12139_v7 = vld [vmem:[%s13577_s2 + $0x708] ss:$16 sps:$4 sm:$0xff]   ;;  %v13307_v1 = vadd.f32 %v13200_v17, %v1139_v18  ;;  %v12147_v14 = vld [vmem:[%s13577_s2 + $0x72c] ss:$16 sps:$4 sm:$0xff]  }
 0x52c   :  { %v8046_v59 = vmul.f32 1.442695, %v8033_v24  ;;  %v8050_v40 = vmul.f32 1.442695, %v8035_v32  ;;  %v12142_v22 = vld [vmem:[%s13577_s2 + $0x720] ss:$16 sps:$4 sm:$0xff]  }
 0x52d   :  { %12192 = vpow2.f32 %v8044_v26  ;;  %v12145_v17 = vld [vmem:[%s13577_s2 + $0x728] ss:$16 sps:$4 sm:$0xff]   ;;  %v8034_v24 = vmin.f32 %v13307_v1, 0.0  ;;  %v12150_v25 = vld [vmem:[%s13577_s2 + $0x744] ss:$16 sps:$4 sm:$0xff]   ;;  %vm8026_vm9 = vcmp.gt.f32.partialorder %v13307_v1, 0.0 }
 0x52e   :  { %12194 = vpow2.f32 %v8046_v59  ;;  %v12153_v26 = vld [vmem:[%s13577_s2 + $0x74c] ss:$16 sps:$4 sm:$0xff]   ;;  %v12148_v32 = vld [vmem:[%s13577_s2 + $0x740] ss:$16 sps:$4 sm:$0xff]   ;;  %v12151_v59 = vld [vmem:[%s13577_s2 + $0x748] ss:$16 sps:$4 sm:$0xff]  }
 0x52f   :  { %12196 = vpow2.f32 %v8050_v40  ;;  %v8048_v40 = vmul.f32 1.442695, %v8034_v24  ;;  %v10026_v24 = vld [vmem:[%s13578_s3 + $0x138] sm:$0xff] }
 0x531   :  { %12198 = vpow2.f32 %v8048_v40  ;;  %v9993_v40 = vld [vmem:[%s13578_s3 + $0x30] sm:$0xff] }
 0x537   :  { %v12193_v33 = vpop.eup %12192 }
 0x538   :  { %v11265_v63 = vadd.f32 -1.0, %v12193_v33  ;;  %v12195_v30 = vpop.eup %12194  ;;  %v12156_v33 = vld [vmem:[%s13577_s2 + $0x764] ss:$16 sps:$4 sm:$0xff]  }
 0x539   :  { %v12197_v35 = vpop.eup %12196  ;;  %v11266_v36 = vadd.f32 -1.0, %v12195_v30  ;;  %v12154_v30 = vld [vmem:[%s13577_s2 + $0x760] ss:$16 sps:$4 sm:$0xff]  }
 0x53a   :  { %v8064_v38 = vsel %vm8024_vm6, %v11629_v15, %v11265_v63  ;;  %v11268_v27 = vadd.f32 -1.0, %v12197_v35  ;;  %v12133_v15 = vld [vmem:[%s13577_s2 + $0x6e8] ss:$16 sps:$4 sm:$0xff]   ;;  %v12159_v63 = vld [vmem:[%s13577_s2 + $0x76c] ss:$16 sps:$4 sm:$0xff]  }
 0x53b   :  { %v8065_v28 = vsel %vm8025_vm7, %v11630_v54, %v11266_v36  ;;  %v8072_v42 = vpack.c.bf16 %v8064_v38, %v8064_v38  ;;  %v12138_v54 = vld [vmem:[%s13577_s2 + $0x704] ss:$16 sps:$4 sm:$0xff]   ;;  %v12157_v35 = vld [vmem:[%s13577_s2 + $0x768] ss:$16 sps:$4 sm:$0xff]   ;;  %v12165_v38 = vld [vmem:[%s13577_s2 + $0x78c] ss:$16 sps:$4 sm:$0xff]  }
 0x53c   :  { %v8073_v19 = vpack.c.bf16 %v8065_v28, %v8065_v28  ;;  %v8067_v23 = vsel %vm8027_vm8, %v11632_v3, %v11268_v27  ;;  %v12144_v3 = vld [vmem:[%s13577_s2 + $0x724] ss:$16 sps:$4 sm:$0xff]   ;;  %v12160_v27 = vld [vmem:[%s13577_s2 + $0x780] ss:$16 sps:$4 sm:$0xff]   ;;  %v12163_v28 = vld [vmem:[%s13577_s2 + $0x788] ss:$16 sps:$4 sm:$0xff]  }
 0x53d   :  { %v8075_v45 = vpack.c.bf16 %v8067_v23, %v8067_v23  ;;  %v12162_v36 = vld [vmem:[%s13577_s2 + $0x784] ss:$16 sps:$4 sm:$0xff]   ;;  %v12169_v23 = vld [vmem:[%s13577_s2 + $0x7a8] ss:$16 sps:$4 sm:$0xff]  }
 0x53e   :  { %9749 = vmatprep.mubr.bf16.mxu0 %v8073_v19  ;;  %9913 = vmatprep.mubr.bf16.mxu1 %v8073_v19  ;;  %v12168_v19 = vld [vmem:[%s13577_s2 + $0x7a4] ss:$16 sps:$4 sm:$0xff]  }
 0x53f   :  { %9750 = vmatmul.mubr.bf16.vlgmr.msra.gmra.mrb[8].mxu0 %v8072_v42  ;;  %9914 = vmatmul.mubr.bf16.vlgmr.msra.gmra.mrb[8].mxu1 %v8072_v42  ;;  %v12174_v42 = vld [vmem:[%s13577_s2 + $0x7c4] ss:$16 sps:$4 sm:$0xff]  }
 0x540   :  { %9759 = vmatpush1.bf16.msra.mxu0 %v12088_v39  ;;  %9923 = vmatpush1.bf16.msra.mxu1 %v12091_v41  ;;  %v12171_v39 = vld [vmem:[%s13577_s2 + $0x7ac] ss:$16 sps:$4 sm:$0xff]   ;;  %v12166_v41 = vld [vmem:[%s13577_s2 + $0x7a0] ss:$16 sps:$4 sm:$0xff]  }
 0x541   :  { %9790 = vmatprep.mubr.bf16.mxu0 %v8075_v45  ;;  %9954 = vmatprep.mubr.bf16.mxu1 %v8075_v45  ;;  %v12172_v45 = vld [vmem:[%s13577_s2 + $0x7c0] ss:$16 sps:$4 sm:$0xff]  }
 0x542   :  { %9760 = vmatprep.subr.bf16.mxu0 %v12096_v53  ;;  %9924 = vmatprep.subr.bf16.mxu1 %v12099_v44  ;;  %v12177_v53 = vld [vmem:[%s13577_s2 + $0x7cc] ss:$16 sps:$4 sm:$0xff]   ;;  %v12199_v44 = vpop.eup %12198 }
 0x544   :  { %9761 = vmatpush1.bf16.msra.mxu0 %v12094_v46  ;;  %9925 = vmatpush1.bf16.msra.mxu1 %v12097_v37  ;;  %v12175_v46 = vld [vmem:[%s13577_s2 + $0x7c8] ss:$16 sps:$4 sm:$0xff]   ;;  %v12180_v37 = vld [vmem:[%s13577_s2 + $0x7e4] ss:$16 sps:$4 sm:$0xff]  }
 0x545   :  { %9762 = vmatprep.subr.bf16.mxu0 %v12102_v47  ;;  %9926 = vmatprep.subr.bf16.mxu1 %v12105_v29  ;;  %v12183_v47 = vld [vmem:[%s13577_s2 + $0x7ec] ss:$16 sps:$4 sm:$0xff]   ;;  %v11267_v29 = vadd.f32 -1.0, %v12199_v44  ;;  %v10013_v44 = vld [vmem:[%s13578_s3 + $0xd0] sm:$0xff] }
 0x548   :  { %9763 = vmatpush1.bf16.msra.mxu0 %v12100_v49  ;;  %9927 = vmatpush1.bf16.msra.mxu1 %v12103_v52  ;;  %v10003_v49 = vld [vmem:[%s13578_s3 + $0x80] sm:$0xff]  ;;  %v10004_v52 = vld [vmem:[%s13578_s3 + $0x88] sm:$0xff] }
 0x549   :  { %9764 = vmatprep.subr.bf16.mxu0 %v12108_v61  ;;  %9928 = vmatprep.subr.bf16.mxu1 %v12111_v55  ;;  %v12178_v61 = vld [vmem:[%s13577_s2 + $0x7e0] ss:$16 sps:$4 sm:$0xff]   ;;  %v12181_v55 = vld [vmem:[%s13577_s2 + $0x7e8] ss:$16 sps:$4 sm:$0xff]  }
 0x54c   :  { %9765 = vmatpush1.bf16.msra.mxu0 %v12106_v56  ;;  %9929 = vmatpush1.bf16.msra.mxu1 %v12109_v31  ;;  %v10019_v56 = vld [vmem:[%s13578_s3 + $0x100] sm:$0xff]  ;;  %v10020_v31 = vld [vmem:[%s13578_s3 + $0x108] sm:$0xff] }
 0x54d   :  { %9766 = vmatprep.subr.bf16.mxu0 %v12114_v57  ;;  %9930 = vmatprep.subr.bf16.mxu1 %v12117_v58  ;;  %v11566_v57 = vpack.c.bf16 %v10004_v52, %v10003_v49  ;;  %v9987_v58 = vld [vmem:[%s13578_s3] sm:$0xff]  ;;  %v10032_v49 = vld [vmem:[%s13578_s3 + $0x168] sm:$0xff] }
 0x550   :  { %9767 = vmatpush1.bf16.msra.mxu0 %v12112_v60  ;;  %9931 = vmatpush1.bf16.msra.mxu1 %v12115_v62  ;;  %v9988_v60 = vld [vmem:[%s13578_s3 + $0x8] sm:$0xff]  ;;  %v8066_v62 = vsel %vm8026_vm9, %v13307_v1, %v11267_v29  ;;  %v10031_v29 = vld [vmem:[%s13578_s3 + $0x160] sm:$0xff] }
 0x551   :  { %9768 = vmatprep.subr.bf16.mxu0 %v12120_v2  ;;  %9932 = vmatprep.subr.bf16.mxu1 %v12123_v5  ;;  %v10005_v2 = vld [vmem:[%s13578_s3 + $0x90] sm:$0xff]  ;;  %v10006_v5 = vld [vmem:[%s13578_s3 + $0x98] sm:$0xff] }
 0x552   :  { %v11570_v50 = vpack.c.bf16 %v10006_v5, %v10005_v2  ;;  %v10017_v5 = vld [vmem:[%s13578_s3 + $0xf0] sm:$0xff] }
 0x554   :  { %9769 = vmatpush1.bf16.msra.mxu0 %v12118_v4  ;;  %9933 = vmatpush1.bf16.msra.mxu1 %v12121_v20  ;;  %v11599_v4 = vpack.c.bf16 %v10020_v31, %v10019_v56  ;;  %v11568_v20 = vpack.c.bf16 %v9988_v60, %v9987_v58  ;;  %v10016_v56 = vld [vmem:[%s13578_s3 + $0xe8] sm:$0xff]  ;;  %v9999_v31 = vld [vmem:[%s13578_s3 + $0x60] sm:$0xff]  ;;  %v10033_v60 = vld [vmem:[%s13578_s3 + $0x170] sm:$0xff] }
 0x555   :  { %9770 = vmatprep.subr.bf16.mxu0 %v12126_v6  ;;  %9934 = vmatprep.subr.bf16.mxu1 %v12129_v21  ;;  %v10021_v6 = vld [vmem:[%s13578_s3 + $0x110] sm:$0xff]  ;;  %v8074_v21 = vpack.c.bf16 %v8066_v62, %v8066_v62  ;;  %v10000_v58 = vld [vmem:[%s13578_s3 + $0x68] sm:$0xff]  ;;  %v10034_v62 = vld [vmem:[%s13578_s3 + $0x178] sm:$0xff] }
 0x556   :  { %v11592_v2 = vpack.c.bf16 %v10000_v58, %v9999_v31 }
 0x558   :  { %9771 = vmatpush1.bf16.msra.mxu0 %v12124_v51  ;;  %9935 = vmatpush1.bf16.msra.mxu1 %v12127_v9  ;;  %v12310_v51 = vmov 0.0|0.0   ;;  %v10022_v9 = vld [vmem:[%s13578_s3 + $0x118] sm:$0xff] }
 0x559   :  { %9772 = vmatprep.subr.bf16.mxu0 %v12132_v10  ;;  %9936 = vmatprep.subr.bf16.mxu1 %v12135_v11  ;;  %v9989_v10 = vld [vmem:[%s13578_s3 + $0x10] sm:$0xff]  ;;  %v9990_v11 = vld [vmem:[%s13578_s3 + $0x18] sm:$0xff]  ;;  %v11602_v18 = vpack.c.bf16 %v10022_v9, %v10021_v6 }
 0x55a   :  { %v10002_v9 = vld [vmem:[%s13578_s3 + $0x78] sm:$0xff] }
 0x55c   :  { %9773 = vmatpush1.bf16.msra.mxu0 %v12130_v13  ;;  %9937 = vmatpush1.bf16.msra.mxu1 %v12133_v15  ;;  %v10007_v13 = vld [vmem:[%s13578_s3 + $0xa0] sm:$0xff]  ;;  %v10008_v15 = vld [vmem:[%s13578_s3 + $0xa8] sm:$0xff] }
 0x55d   :  { %9774 = vmatprep.subr.bf16.mxu0 %v12138_v54  ;;  %9938 = vmatprep.subr.bf16.mxu1 %v12141_v0  ;;  %v11572_v54 = vpack.c.bf16 %v9990_v11, %v9989_v10  ;;  %v10023_v0 = vld [vmem:[%s13578_s3 + $0x120] sm:$0xff]  ;;  %v10036_v10 = vld [vmem:[%s13578_s3 + $0x188] sm:$0xff] }
 0x560   :  { %9775 = vmatpush1.bf16.msra.mxu0 %v12136_v16  ;;  %9939 = vmatpush1.bf16.msra.mxu1 %v12139_v7  ;;  %v10024_v16 = vld [vmem:[%s13578_s3 + $0x128] sm:$0xff]  ;;  %v11574_v7 = vpack.c.bf16 %v10008_v15, %v10007_v13  ;;  %v8333_v15 = vld [vmem:[#allocation7 + $0x1] ss:$4 sm:$0xf] }
 0x561   :  { %9776 = vmatprep.subr.bf16.mxu0 %v12144_v3  ;;  %9940 = vmatprep.subr.bf16.mxu1 %v12147_v14  ;;  %v11605_v1 = vpack.c.bf16 %v10024_v16, %v10023_v0  ;;  %v9991_v3 = vld [vmem:[%s13578_s3 + $0x20] sm:$0xff]  ;;  %v9992_v14 = vld [vmem:[%s13578_s3 + $0x28] sm:$0xff]  ;;  %v8342_v0 = vrot.slane %v8333_v15, %v1118_v8  ;;  %v8350_v16 = vrot.slane %v8333_v15, %v1126_v34 }
 0x564   :  { %9777 = vmatpush1.bf16.msra.mxu0 %v12142_v22  ;;  %9941 = vmatpush1.bf16.msra.mxu1 %v12145_v17  ;;  %v10025_v22 = vld [vmem:[%s13578_s3 + $0x130] sm:$0xff]  ;;  %v11576_v17 = vpack.c.bf16 %v9992_v14, %v9991_v3 }
 0x565   :  { %9778 = vmatprep.subr.bf16.mxu0 %v12150_v25  ;;  %9942 = vmatprep.subr.bf16.mxu1 %v12153_v26  ;;  %v11608_v25 = vpack.c.bf16 %v10026_v24, %v10025_v22  ;;  %v10009_v26 = vld [vmem:[%s13578_s3 + $0xb0] sm:$0xff] }
 0x568   :  { %9779 = vmatpush1.bf16.msra.mxu0 %v12148_v32  ;;  %9943 = vmatpush1.bf16.msra.mxu1 %v12151_v59  ;;  %v10010_v32 = vld [vmem:[%s13578_s3 + $0xb8] sm:$0xff] }
 0x569   :  { %9780 = vmatprep.subr.bf16.mxu0 %v12156_v33  ;;  %9944 = vmatprep.subr.bf16.mxu1 %v12159_v63  ;;  %v11578_v59 = vpack.c.bf16 %v10010_v32, %v10009_v26  ;;  %v9994_v33 = vld [vmem:[%s13578_s3 + $0x38] sm:$0xff]  ;;  %v10027_v63 = vld [vmem:[%s13578_s3 + $0x140] sm:$0xff] }
 0x56c   :  { %9781 = vmatpush1.bf16.msra.mxu0 %v12154_v30  ;;  %9945 = vmatpush1.bf16.msra.mxu1 %v12157_v35  ;;  %v11580_v30 = vpack.c.bf16 %v9994_v33, %v9993_v40  ;;  %v10028_v35 = vld [vmem:[%s13578_s3 + $0x148] sm:$0xff] }
 0x56d   :  { %9782 = vmatprep.subr.bf16.mxu0 %v12162_v36  ;;  %9946 = vmatprep.subr.bf16.mxu1 %v12165_v38  ;;  %v11611_v36 = vpack.c.bf16 %v10028_v35, %v10027_v63  ;;  %v10011_v38 = vld [vmem:[%s13578_s3 + $0xc0] sm:$0xff] }
 0x570   :  { %9783 = vmatpush1.bf16.msra.mxu0 %v12160_v27  ;;  %9947 = vmatpush1.bf16.msra.mxu1 %v12163_v28  ;;  %v10012_v27 = vld [vmem:[%s13578_s3 + $0xc8] sm:$0xff] }
 0x571   :  { %9784 = vmatprep.subr.bf16.mxu0 %v12168_v19  ;;  %9948 = vmatprep.subr.bf16.mxu1 %v12171_v39  ;;  %v11582_v28 = vpack.c.bf16 %v10012_v27, %v10011_v38  ;;  %v9995_v19 = vld [vmem:[%s13578_s3 + $0x40] sm:$0xff]  ;;  %v9996_v39 = vld [vmem:[%s13578_s3 + $0x48] sm:$0xff] }
 0x574   :  { %9785 = vmatpush1.bf16.msra.mxu0 %v12166_v41  ;;  %9949 = vmatpush1.bf16.msra.mxu1 %v12169_v23  ;;  %v10029_v41 = vld [vmem:[%s13578_s3 + $0x150] sm:$0xff]  ;;  %v11584_v23 = vpack.c.bf16 %v9996_v39, %v9995_v19 }
 0x575   :  { %9786 = vmatprep.subr.bf16.mxu0 %v12174_v42  ;;  %9950 = vmatprep.subr.bf16.mxu1 %v12177_v53  ;;  %v10030_v42 = vld [vmem:[%s13578_s3 + $0x158] sm:$0xff] }
 0x576   :  { %v11614_v53 = vpack.c.bf16 %v10030_v42, %v10029_v41 }
 0x578   :  { %9787 = vmatpush1.bf16.msra.mxu0 %v12172_v45  ;;  %9951 = vmatpush1.bf16.msra.mxu1 %v12175_v46  ;;  %v10014_v45 = vld [vmem:[%s13578_s3 + $0xd8] sm:$0xff]  ;;  %v9997_v46 = vld [vmem:[%s13578_s3 + $0x50] sm:$0xff] }
 0x579   :  { %9788 = vmatprep.subr.bf16.mxu0 %v12180_v37  ;;  %9952 = vmatprep.subr.bf16.mxu1 %v12183_v47  ;;  %v11586_v37 = vpack.c.bf16 %v10014_v45, %v10013_v44  ;;  %v9998_v47 = vld [vmem:[%s13578_s3 + $0x58] sm:$0xff] }
 0x57a   :  { %v11588_v52 = vpack.c.bf16 %v9998_v47, %v9997_v46  ;;  %v11529_v46 = vld [vmem:[#allocation7 + $0x2] ss:$0 sm:$0xff] }
 0x57c   :  { %9789 = vmatpush1.bf16.msra.mxu0 %v12178_v61  ;;  %9953 = vmatpush1.bf16.msra.mxu1 %v12181_v55  ;;  %v11617_v61 = vpack.c.bf16 %v10032_v49, %v10031_v29  ;;  %v10015_v55 = vld [vmem:[%s13578_s3 + $0xe0] sm:$0xff] }
 0x57d   :  { %11598 = vmatprep.subr.bf16.mxu1 %v12310_v51  ;;  %11567 = vmatprep.subr.bf16.mxu0 %v11566_v57  ;;  %v11590_v57 = vpack.c.bf16 %v10016_v56, %v10015_v55 }
 0x57f   :  { %9791 = vmatmul.mubr.bf16.vlgmr.msra.gmra.mrb[8].mxu0 %v8074_v21  ;;  %9955 = vmatmul.mubr.bf16.vlgmr.msra.gmra.mrb[8].mxu1 %v8074_v21  ;;  %v10001_v21 = vld [vmem:[%s13578_s3 + $0x70] sm:$0xff] }
 0x580   :  { %11600 = vmatpush1.bf16.msra.mxu1 %v11599_v4  ;;  %11569 = vmatpush3.bf16.msra.mxu0 %v11568_v20  ;;  %v10018_v4 = vld [vmem:[%s13578_s3 + $0xf8] sm:$0xff]  ;;  %v11620_v20 = vpack.c.bf16 %v10034_v62, %v10033_v60  ;;  %v11596_v11 = vpack.c.bf16 %v10002_v9, %v10001_v21 }
 0x581   :  { %11601 = vmatprep.subr.bf16.mxu1 %v12310_v51  ;;  %11571 = vmatprep.subr.bf16.mxu0 %v11570_v50  ;;  %v11594_v6 = vpack.c.bf16 %v10018_v4, %v10017_v5  ;;  %v10035_v50 = vld [vmem:[%s13578_s3 + $0x180] sm:$0xff]  ;;  %s12311_s3 = smov [#allocation8]  }
 0x582   :  { %v11623_v13 = vpack.c.bf16 %v10036_v10, %v10035_v50  ;;  %s10194_s23 = sshll.u32 %s12311_s3, 4  ;;  %s10195_s23 = int_to_ptr.vmem [resolvable:$true] %s10194_s23 }
 0x583   :  { %s12275_s24 = scalar_lea.vmem %s10195_s23, 32  ;;  %p12280_p11 = scmp.lt.s32.totalorder %s10195_s23, %s10195_s23 }
 0x584   :  { %11603 = vmatpush1.bf16.msra.mxu1 %v11602_v18  ;;  %11573 = vmatpush3.bf16.msra.mxu0 %v11572_v54  ;;  %v8338_v18 = vrot.slane %v8333_v15, %v1114_v48  ;;  %v8346_v54 = vrot.slane %v8333_v15, %v1122_v12  ;;  %p12276_p10 = scmp.ne.s32.totalorder %s10195_s23, %s12275_s24  ;;  %p12281_p12 = scmp.lt.s32.totalorder %s12275_s24, %s12275_s24 }
 0x585   :  { %11604 = vmatprep.subr.bf16.mxu1 %v12310_v51  ;;  %11575 = vmatprep.subr.bf16.mxu0 %v11574_v7 }
 0x586   :  { %p12282_p13 = por %p12281_p12, %p12280_p11 }
 0x588   :  { %11606 = vmatpush1.bf16.msra.mxu1 %v11605_v1  ;;  %11577 = vmatpush3.bf16.msra.mxu0 %v11576_v17  ;;  %p12283_p0 = pnand %p12282_p13, %p12276_p10 }
 0x589   :  { %11607 = vmatprep.subr.bf16.mxu1 %v12310_v51  ;;  %11579 = vmatprep.subr.bf16.mxu0 %v11578_v59 }
 0x58c   :  { %11609 = vmatpush1.bf16.msra.mxu1 %v11608_v25  ;;  %11581 = vmatpush3.bf16.msra.mxu0 %v11580_v30 }
 0x58d   :  { %11610 = vmatprep.subr.bf16.mxu1 %v12310_v51  ;;  %11583 = vmatprep.subr.bf16.mxu0 %v11582_v28 }
 0x590   :  { %11612 = vmatpush1.bf16.msra.mxu1 %v11611_v36  ;;  %11585 = vmatpush3.bf16.msra.mxu0 %v11584_v23 }
 0x591   :  { %11613 = vmatprep.subr.bf16.mxu1 %v12310_v51  ;;  %11587 = vmatprep.subr.bf16.mxu0 %v11586_v37 }
 0x594   :  { %11615 = vmatpush1.bf16.msra.mxu1 %v11614_v53  ;;  %11589 = vmatpush3.bf16.msra.mxu0 %v11588_v52 }
 0x595   :  { %11616 = vmatprep.subr.bf16.mxu1 %v12310_v51  ;;  %11591 = vmatprep.subr.bf16.mxu0 %v11590_v57 }
 0x598   :  { %11618 = vmatpush1.bf16.msra.mxu1 %v11617_v61  ;;  %11593 = vmatpush3.bf16.msra.mxu0 %v11592_v2 }
 0x599   :  { %11619 = vmatprep.subr.bf16.mxu1 %v12310_v51  ;;  %11595 = vmatprep.subr.bf16.mxu0 %v11594_v6 }
 0x59c   :  { %11621 = vmatpush1.bf16.msra.mxu1 %v11620_v20  ;;  %11597 = vmatpush3.bf16.msra.mxu0 %v11596_v11 }
 0x59d   :  { %11622 = vmatprep.subr.bf16.mxu1 %v12310_v51 }
 0x5a0   :  { %11624 = vmatpush1.bf16.msra.mxu1 %v11623_v13 }
 0x652   :  { %v9792_v7 = vpop.f32.mrb[8].mxu0  ;;  %v9956_v1 = vpop.f32.mrb[8].mxu1 }
 0x653   :  { %v11633_v3 = vadd.f32 %v9792_v7, %v8338_v18  ;;  %v11635_v14 = vadd.f32 %v9956_v1, %v8346_v54  ;;  %v9794_v51 = vpop.f32.mrb[9].mxu0  ;;  %v9958_v22 = vpop.f32.mrb[9].mxu1 }
 0x654   :  { %v11634_v17 = vadd.f32 %v9794_v51, %v8342_v0  ;;  %v11636_v24 = vadd.f32 %v9958_v22, %v8350_v16  ;;  %v9796_v25 = vpop.f32.mrb[10].mxu0  ;;  %v9960_v26 = vpop.f32.mrb[10].mxu1 }
 0x655   :  { %v9967_v48 = vmin.f32 %v11633_v3, 0.0  ;;  %v9969_v32 = vmin.f32 %v11635_v14, 0.0  ;;  %v9797_v59 = vpop.f32.mrb[11].mxu0  ;;  %v9961_v12 = vpop.f32.mrb[11].mxu1  ;;  %vm9963_vm12 = vcmp.gt.f32.partialorder %v11633_v3, 0.0  ;;  %vm9965_vm14 = vcmp.gt.f32.partialorder %v11635_v14, 0.0 }
 0x656   :  { %v9968_v40 = vmin.f32 %v11634_v17, 0.0  ;;  %v9970_v33 = vmin.f32 %v11636_v24, 0.0  ;;  %vm9964_vm10 = vcmp.gt.f32.partialorder %v11634_v17, 0.0  ;;  %vm9966_vm13 = vcmp.gt.f32.partialorder %v11636_v24, 0.0 }
 0x657   :  { %v9971_v8 = vmul.f32 1.442695, %v9967_v48  ;;  %v9975_v63 = vmul.f32 1.442695, %v9969_v32 }
 0x658   :  { %v9973_v43 = vmul.f32 1.442695, %v9968_v40  ;;  %v9977_v34 = vmul.f32 1.442695, %v9970_v33 }
 0x659   :  { %12200 = vpow2.f32 %v9971_v8 }
 0x65a   :  { %12202 = vpow2.f32 %v9975_v63 }
 0x65b   :  { %12204 = vpow2.f32 %v9973_v43 }
 0x65c   :  { %12206 = vpow2.f32 %v9977_v34 }
 0x663   :  { %v12201_v30 = vpop.eup %12200 }
 0x664   :  { %v12203_v35 = vpop.eup %12202  ;;  %v11525_v38 = vadd.f32 -1.0, %v12201_v30 }
 0x665   :  { %v12205_v36 = vpop.eup %12204  ;;  %v11527_v19 = vadd.f32 -1.0, %v12203_v35 }
 0x666   :  { %v12207_v27 = vpop.eup %12206  ;;  %v11526_v28 = vadd.f32 -1.0, %v12205_v36  ;;  %v9983_v42 = vsel %vm9963_vm12, %v11633_v3, %v11525_v38 }
 0x667   :  { %v11528_v39 = vadd.f32 -1.0, %v12207_v27  ;;  %v9985_v53 = vsel %vm9965_vm14, %v11635_v14, %v11527_v19 }
 0x668   :  { %v9984_v41 = vsel %vm9964_vm10, %v11634_v17, %v11526_v28 }
 0x669   :  { %10110 = vmatprep.mubr.f32.mxu0 %v9984_v41  ;;  %v9986_v23 = vsel %vm9966_vm13, %v11636_v24, %v11528_v39 }
 0x66a   :  { %11530 = vmatprep.mubr.msk.f32.mxu1 %vm10042_vm11, %v9986_v23  ;;  %10111 = vmatmul.mubr.f32.vlgmr.msra.gmra.mrb[12].mxu0 %v9983_v42 }
 0x66b   :  { %10181 = vmatmul.mubr.f32.vlgmr.msra.gmra.mrb[12].mxu1 %v9985_v53 }
 0x73d   :  { %v11563_v44 = vpop.f32.mrb[12].mxu0 }
 0x73e   :  { %v10182_v45 = vpop.f32.mrb[12].mxu1  ;;  %v11564_v37 = vpop.f32.mrb[13].mxu0 }
 0x73f   :  { %v11565_v47 = vadd.f32 %v11564_v37, %v11563_v44  ;;  %v10184_v29 = vpop.f32.mrb[13].mxu1 }
 0x741   :  { %v10113_v49 = vadd.f32 %v11565_v47, %v11529_v46 }
 0x743   :  { %v10183_v52 = vadd.f32 %v10182_v45, %v10113_v49 }
 0x745   :  { %10187 = vst.msk [vmem:[#allocation8] sm:$0x3] %vm10186_vm15, %v10183_v52 }
 0x746   :  { %12286 = shalt.err (!%p12283_p0)
}
 0x747   :  { %s12287_s27 = scalar_lea.hbm %s13580_s5, 32 }
 0x748   :  { %p12288_p1 = scmp.ne.s32.totalorder %s13580_s5, %s12287_s27  ;;  %p12291_p2 = scmp.lt.u32.totalorder %s12287_s27, %s13580_s5 }
 0x74a   :  { %p12293_p3 = pnand %p12291_p2, %p12288_p1 }
 0x74c   :  { %12296 = shalt.err (!%p12293_p3)
}
 0x74d   :  { %10197 = dma.vmem_to_hbm [thread:$0]  %s10195_s23, 32, %s13580_s5, [#allocation4]  }
 0x74e   :  { %12301 = dma.done.wait [#allocation4], 32  }
 0x74f   :  { %12302 = vsyncadd [#allocation4], 4294967264 }
 0x750   :  { %10201 = vsyncpa [#allocation3], 1 }
 0x751   :  { %10202 = vsyncpa [#allocation6], 1 }
 0x752   :  { %10203 = vsyncpa [#allocation4], 1 }

</bundles_post_ra>
